<compile_context>
chip_gen: v5e
topology: v5e:2x2
jax: 0.10.0
libtpu: 0.0.40
codegen_flags: <defaults>
</compile_context>

<pallas_src>
import numpy as np

import jax
import jax.numpy as jnp
from jax.experimental import pallas as pl
from jax.experimental.pallas import tpu as pltpu


NUM_BLOCKS = 2          # num_blocks in RFA_Attention
NUM_UNITS = 4           # residual units inside each RFA_NoTail block
N_FEATURES = 8          # n_features (channels); W * C = 16 * 8 = 128 lanes
CA_REDUCTION = 2        # channel-attention bottleneck reduction


# ----------------------------------------------------------------------------
# Fused Pallas kernel: the whole RFA_Attention forward for TB images.
# Activations live as a lane-dense (TB*H, W*C) f32 slab for the entire body.
# ----------------------------------------------------------------------------
def _rfa_fused_kernel(x_ref, mtop_ref, mbot_ref, pool_ref,
                      Bc_ref, bc_ref, Df_ref, bf_ref,
                      w1_ref, b1_ref, w2_ref, b2_ref, o_ref):
    TBH, WC = x_ref.shape
    num_blocks = bf_ref.shape[0]
    num_units = Df_ref.shape[0] // num_blocks

    x = x_ref[...]                 # (TB*H, W*C)
    mtop = mtop_ref[...]           # 0.0 on each image's top row, else 1.0
    mbot = mbot_ref[...]           # 0.0 on each image's bottom row, else 1.0
    pool = pool_ref[...]           # (TB*H, TB*H) per-image row-sum replicator

    def conv3x3(a, idx, relu):
        # ONE (TBH, WC) x (WC, 3*WC) MXU matmul per conv: the dx taps and the
        # channel mixing are folded into the band columns; the three dy taps
        # come out as three 128-lane groups.  dy = -1/+1 become XLU sublane
        # rolls of the products; per-image zero padding at the top/bottom rows
        # is the precomputed mask multiply.  Single f32 accumulator chain.
        p = jnp.dot(a, Bc_ref[idx], preferred_element_type=jnp.float32)
        acc = p[:, WC:2 * WC]                                        # tap on x[h]
        acc = acc + pltpu.roll(p[:, :WC], shift=1, axis=0) * mtop    # tap on x[h-1]
        acc = acc + pltpu.roll(p[:, 2 * WC:], shift=TBH - 1, axis=0) * mbot  # x[h+1]
        acc = acc + bc_ref[idx]                                      # bias (1, WC)
        if relu:
            acc = jnp.maximum(acc, 0.0)
        return acc

    cur = x
    for blk in range(num_blocks):
        inp = cur
        fused = jnp.zeros((TBH, WC), jnp.float32)
        for u in range(num_units):
            ui = blk * num_units + u
            r = conv3x3(inp, 2 * ui + 0, relu=True)
            r = conv3x3(r, 2 * ui + 1, relu=False)
            # concat + 1x1 fuse conv folded into a per-unit block-diag matmul
            fused = fused + jnp.dot(r, Df_ref[ui],
                                    preferred_element_type=jnp.float32)
            inp = inp + r                               # local residual add
        res = cur + fused + bf_ref[blk]                 # RFA_NoTail output

        # --- fused squeeze-excitation channel attention (per image) ---
        # `pool` replicates each image's column-sum to all of its rows; the
        # 1/(H*W) mean and the gate broadcast across W lane groups are folded
        # into caW1 / caW2 at prepare time (caT eliminated).
        pooled = jnp.dot(pool, res, preferred_element_type=jnp.float32)
        h1 = jnp.maximum(
            jnp.dot(pooled, w1_ref[blk], preferred_element_type=jnp.float32)
            + b1_ref[blk], 0.0)
        gate = jax.nn.sigmoid(
            jnp.dot(h1, w2_ref[blk], preferred_element_type=jnp.float32)
            + b2_ref[blk])
        cur = cur + res * gate                          # x += attention(res)

    o_ref[...] = cur


# ----------------------------------------------------------------------------
# One-time parameter repacking into lane-dense matrices.
# ----------------------------------------------------------------------------
def prepare_params(params, H, W):
    num_blocks = len(params)
    num_units = len(params[0]["units"])
    C = params[0]["units"][0]["w1"].shape[2]
    Cr = params[0]["ca"]["w1"].shape[1]
    WC = W * C

    # dx tap selection: sel[dx, wi, wo] = 1 iff input column wi feeds output
    # column wo through tap dx (zero padding handled by exclusion).
    sel = np.zeros((3, W, W), np.float32)
    for dx in range(3):
        for wo in range(W):
            wi = wo + dx - 1
            if 0 <= wi < W:
                sel[dx, wi, wo] = 1.0
    sel = jnp.asarray(sel)
    eye_w = jnp.eye(W, dtype=jnp.float32)

    def band_packed(w):
        # (3, 3, Cin, Cout) -> (W*Cin, 3*W*Cout): three dy-tap band matrices
        # packed along the output-column axis [dy=0 | dy=1 | dy=2].
        b = jnp.einsum("xiw,yxcd->yicwd", sel, w)
        b = b.reshape(3, W * w.shape[2], W * w.shape[3])
        return jnp.concatenate([b[0], b[1], b[2]], axis=1)

    Bc, bc, Df, bf = [], [], [], []
    caW1, cab1, caW2, cab2 = [], [], [], []
    for blk in params:
        for u in blk["units"]:
            Bc.append(band_packed(u["w1"]))
            Bc.append(band_packed(u["w2"]))
            bc.append(jnp.tile(u["b1"], W)[None, :])
            bc.append(jnp.tile(u["b2"], W)[None, :])
        wf = blk["wf"][0, 0]                            # (num_units*C, C)
        for uu in range(num_units):
            Df.append(jnp.kron(eye_w, wf[uu * C:(uu + 1) * C, :]))
        bf.append(jnp.tile(blk["bf"], W)[None, :])
        ca = blk["ca"]
        w1_full = jnp.tile(ca["w1"], (W, 1)) / float(H * W)   # fold mean-pool
        caW1.append(jnp.pad(w1_full, ((0, 0), (0, WC - Cr))))
        cab1.append(jnp.pad(ca["b1"], (0, WC - Cr))[None, :])
        # caT folded in: tile w2/b2 columns across the W lane groups (sigmoid
        # is elementwise, so tiling the pre-activation is identical).  Rows
        # >= Cr are zero, and h1's padded lanes are 0 anyway.
        caW2.append(jnp.pad(jnp.tile(ca["w2"], (1, W)), ((0, WC - Cr), (0, 0))))
        cab2.append(jnp.tile(ca["b2"], W)[None, :])

    return {
        "Bc": jnp.stack(Bc, axis=0),      # (nb*nu*2, WC, 3*WC)
        "bc": jnp.stack(bc, axis=0),      # (nb*nu*2, 1, WC)
        "Df": jnp.stack(Df, axis=0),      # (nb*nu, WC, WC)
        "bf": jnp.stack(bf, axis=0),      # (nb, 1, WC)
        "caW1": jnp.stack(caW1, axis=0),  # (nb, WC, WC)
        "cab1": jnp.stack(cab1, axis=0),  # (nb, 1, WC)
        "caW2": jnp.stack(caW2, axis=0),  # (nb, WC, WC)
        "cab2": jnp.stack(cab2, axis=0),  # (nb, 1, WC)
    }


def _pick_tile_batch(n, want=4):
    """Largest TB <= want dividing n, keeping >= 2 grid steps (v7x: 2 TCs)."""
    best = 1
    for tb in range(1, n + 1):
        if tb > want:
            break
        if n % tb:
            continue
        if n >= 2 and n // tb < 2:
            continue
        best = tb
    return best


# ----------------------------------------------------------------------------
# Public forward (NCHW in / NCHW out) wrapping one pallas_call.
# ----------------------------------------------------------------------------
def rfa_attention_forward(x_nchw, prepared, tile_batch=4):
    N, C, H, W = x_nchw.shape
    WC = W * C
    TB = _pick_tile_batch(N, tile_batch)
    TBH = TB * H

    # NCHW -> lane-dense (N*H, W*C) slab.
    # TODO(synk): callers producing NHWC directly would skip this transpose.
    x_ld = jnp.transpose(x_nchw, (0, 2, 3, 1)).reshape(N * H, WC)

    # Host-precomputed constants (no per-step iota/compare in the kernel):
    r = np.arange(TBH)
    mtop = jnp.asarray(np.tile(((r % H) != 0).astype(np.float32)[:, None],
                               (1, WC)))
    mbot = jnp.asarray(np.tile(((r % H) != H - 1).astype(np.float32)[:, None],
                               (1, WC)))
    poolB = jnp.asarray(((r[:, None] // H) == (r[None, :] // H))
                        .astype(np.float32))

    out_ld = pl.pallas_call(
        _rfa_fused_kernel,
        out_shape=jax.ShapeDtypeStruct((N * H, WC), jnp.float32),
        grid=(N // TB,),
        in_specs=[
            pl.BlockSpec((TBH, WC), lambda n: (n, 0)),          # x (grid-varying)
            pl.BlockSpec((TBH, WC), lambda n: (0, 0)),          # top-row mask
            pl.BlockSpec((TBH, WC), lambda n: (0, 0)),          # bottom-row mask
            pl.BlockSpec((TBH, TBH), lambda n: (0, 0)),         # per-image pool
            pl.BlockSpec(prepared["Bc"].shape, lambda n: (0, 0, 0)),
            pl.BlockSpec(prepared["bc"].shape, lambda n: (0, 0, 0)),
            pl.BlockSpec(prepared["Df"].shape, lambda n: (0, 0, 0)),
            pl.BlockSpec(prepared["bf"].shape, lambda n: (0, 0, 0)),
            pl.BlockSpec(prepared["caW1"].shape, lambda n: (0, 0, 0)),
            pl.BlockSpec(prepared["cab1"].shape, lambda n: (0, 0, 0)),
            pl.BlockSpec(prepared["caW2"].shape, lambda n: (0, 0, 0)),
            pl.BlockSpec(prepared["cab2"].shape, lambda n: (0, 0, 0)),
        ],
        out_specs=pl.BlockSpec((TBH, WC), lambda n: (n, 0)),
        compiler_params=pltpu.CompilerParams(
            dimension_semantics=("parallel",)),   # batch axis across v7x's 2 TCs
    )(x_ld, mtop, mbot, poolB,
      prepared["Bc"], prepared["bc"], prepared["Df"], prepared["bf"],
      prepared["caW1"], prepared["cab1"], prepared["caW2"], prepared["cab2"])

    return out_ld.reshape(N, H, W, C).transpose(0, 3, 1, 2)


# ----------------------------------------------------------------------------
# Parameter init (PyTorch-style shapes) and a pure-JAX reference.
# ----------------------------------------------------------------------------
def init_params(key, n_features=N_FEATURES, num_blocks=NUM_BLOCKS,
                num_units=NUM_UNITS, reduction=CA_REDUCTION):
    C = n_features
    Cr = max(C // reduction, 1)
    params = []
    for _ in range(num_blocks):
        blk = {"units": []}
        for _ in range(num_units):
            key, k1, k2, k3, k4 = jax.random.split(key, 5)
            blk["units"].append({
                "w1": 0.05 * jax.random.normal(k1, (3, 3, C, C), jnp.float32),
                "b1": 0.05 * jax.random.normal(k2, (C,), jnp.float32),
                "w2": 0.05 * jax.random.normal(k3, (3, 3, C, C), jnp.float32),
                "b2": 0.05 * jax.random.normal(k4, (C,), jnp.float32),
            })
        key, kf, kfb, ka1, kb1, ka2, kb2 = jax.random.split(key, 7)
        blk["wf"] = 0.05 * jax.random.normal(
            kf, (1, 1, num_units * C, C), jnp.float32)
        blk["bf"] = 0.05 * jax.random.normal(kfb, (C,), jnp.float32)
        blk["ca"] = {
            "w1": 0.05 * jax.random.normal(ka1, (C, Cr), jnp.float32),
            "b1": 0.05 * jax.random.normal(kb1, (Cr,), jnp.float32),
            "w2": 0.05 * jax.random.normal(ka2, (Cr, C), jnp.float32),
            "b2": 0.05 * jax.random.normal(kb2, (C,), jnp.float32),
        }
        params.append(blk)
    return params


def _conv3x3_ref(x, w, b):
    H, W = x.shape[1], x.shape[2]
    xp = jnp.pad(x, ((0, 0), (1, 1), (1, 1), (0, 0)))
    acc = jnp.zeros(x.shape[:3] + (w.shape[3],), jnp.float32)
    for dy in range(3):
        for dx in range(3):
            acc = acc + jnp.einsum(
                "nhwc,cd->nhwd", xp[:, dy:dy + H, dx:dx + W, :], w[dy, dx],
                precision=jax.lax.Precision.HIGHEST)
    return acc + b


def rfa_attention_reference(x_nchw, params):
    x = jnp.transpose(x_nchw, (0, 2, 3, 1)).astype(jnp.float32)
    for blk in params:
        inp = x
        residuals = []
        for u in blk["units"]:
            r = jnp.maximum(_conv3x3_ref(inp, u["w1"], u["b1"]), 0.0)
            r = _conv3x3_ref(r, u["w2"], u["b2"])
            residuals.append(r)
            inp = inp + r
        agg = jnp.concatenate(residuals, axis=-1)
        fused = jnp.einsum("nhwc,cd->nhwd", agg, blk["wf"][0, 0],
                           precision=jax.lax.Precision.HIGHEST) + blk["bf"]
        res = x + fused
        pooled = jnp.mean(res, axis=(1, 2))
        h = jnp.maximum(pooled @ blk["ca"]["w1"] + blk["ca"]["b1"], 0.0)
        s = jax.nn.sigmoid(h @ blk["ca"]["w2"] + blk["ca"]["b2"])
        res = res * s[:, None, None, :]
        x = x + res
    return jnp.transpose(x, (0, 3, 1, 2))


# ----------------------------------------------------------------------------
if __name__ == "__main__":
    key = jax.random.PRNGKey(0)
    key, kx, kp = jax.random.split(key, 3)

    N, C, H, W = 8, N_FEATURES, 16, 16          # TB=4 -> grid of 2 steps
    x = jax.random.normal(kx, (N, C, H, W), jnp.float32)

    params = init_params(kp)
    prepared = prepare_params(params, H, W)     # one-time lane-dense repack

    fwd = jax.jit(rfa_attention_forward)
    out = fwd(x, prepared)
    jax.block_until_ready(out)

    assert out.shape == (N, C, H, W), out.shape
    assert bool(jnp.all(jnp.isfinite(out)))

    ref = rfa_attention_reference(x, params)
    err = float(jnp.max(jnp.abs(out - ref)))
    assert err < 2e-2, f"mismatch vs reference: max abs err {err}"
    print("KERNEL_OK")
</pallas_src>

<mosaic_0001>
module attributes {stable_mosaic.version = 11 : i64} {
  func.func @_rfa_fused_kernel(%arg0: i32, %arg1: memref<64x128xf32, #tpu.memory_space<vmem>>, %arg2: memref<64x128xf32, #tpu.memory_space<vmem>>, %arg3: memref<64x128xf32, #tpu.memory_space<vmem>>, %arg4: memref<64x64xf32, #tpu.memory_space<vmem>>, %arg5: memref<16x128x384xf32, #tpu.memory_space<vmem>>, %arg6: memref<16x1x128xf32, #tpu.memory_space<vmem>>, %arg7: memref<8x128x128xf32, #tpu.memory_space<vmem>>, %arg8: memref<2x1x128xf32, #tpu.memory_space<vmem>>, %arg9: memref<2x128x128xf32, #tpu.memory_space<vmem>>, %arg10: memref<2x1x128xf32, #tpu.memory_space<vmem>>, %arg11: memref<2x128x128xf32, #tpu.memory_space<vmem>>, %arg12: memref<2x1x128xf32, #tpu.memory_space<vmem>>, %arg13: memref<64x128xf32, #tpu.memory_space<vmem>>) attributes {dimension_semantics = [#tpu.dimension_semantics<parallel>], iteration_bounds = array<i64: 2>, scalar_prefetch = 0 : i64, scratch_operands = 0 : i64, tpu.core_type = #tpu.core_type<tc>, window_params = [{transform_indices = @transform_0, window_bounds = array<i64: 64, 128>}, {pipeline_mode = #tpu.pipeline_mode<synchronous>, transform_indices = @transform_1, window_bounds = array<i64: 64, 128>}, {pipeline_mode = #tpu.pipeline_mode<synchronous>, transform_indices = @transform_2, window_bounds = array<i64: 64, 128>}, {pipeline_mode = #tpu.pipeline_mode<synchronous>, transform_indices = @transform_3, window_bounds = array<i64: 64, 64>}, {pipeline_mode = #tpu.pipeline_mode<synchronous>, transform_indices = @transform_4, window_bounds = array<i64: 16, 128, 384>}, {pipeline_mode = #tpu.pipeline_mode<synchronous>, transform_indices = @transform_5, window_bounds = array<i64: 16, 1, 128>}, {pipeline_mode = #tpu.pipeline_mode<synchronous>, transform_indices = @transform_6, window_bounds = array<i64: 8, 128, 128>}, {pipeline_mode = #tpu.pipeline_mode<synchronous>, transform_indices = @transform_7, window_bounds = array<i64: 2, 1, 128>}, {pipeline_mode = #tpu.pipeline_mode<synchronous>, transform_indices = @transform_8, window_bounds = array<i64: 2, 128, 128>}, {pipeline_mode = #tpu.pipeline_mode<synchronous>, transform_indices = @transform_9, window_bounds = array<i64: 2, 1, 128>}, {pipeline_mode = #tpu.pipeline_mode<synchronous>, transform_indices = @transform_10, window_bounds = array<i64: 2, 128, 128>}, {pipeline_mode = #tpu.pipeline_mode<synchronous>, transform_indices = @transform_11, window_bounds = array<i64: 2, 1, 128>}, {transform_indices = @transform_12, window_bounds = array<i64: 64, 128>}]} {
    %c0 = arith.constant 0 : index
    %c0_0 = arith.constant 0 : index
    %0 = vector.load %arg1[%c0, %c0_0] : memref<64x128xf32, #tpu.memory_space<vmem>>, vector<64x128xf32>
    %c0_1 = arith.constant 0 : index
    %c0_2 = arith.constant 0 : index
    %1 = vector.load %arg2[%c0_1, %c0_2] : memref<64x128xf32, #tpu.memory_space<vmem>>, vector<64x128xf32>
    %c0_3 = arith.constant 0 : index
    %c0_4 = arith.constant 0 : index
    %2 = vector.load %arg3[%c0_3, %c0_4] : memref<64x128xf32, #tpu.memory_space<vmem>>, vector<64x128xf32>
    %c0_5 = arith.constant 0 : index
    %c0_6 = arith.constant 0 : index
    %3 = vector.load %arg4[%c0_5, %c0_6] : memref<64x64xf32, #tpu.memory_space<vmem>>, vector<64x64xf32>
    %cst = arith.constant 0.000000e+00 : f32
    %4 = vector.broadcast %cst : f32 to vector<64x128xf32>
    %c0_7 = arith.constant 0 : index
    %c0_8 = arith.constant 0 : index
    %c0_9 = arith.constant 0 : index
    %5 = vector.load %arg5[%c0_7, %c0_8, %c0_9] : memref<16x128x384xf32, #tpu.memory_space<vmem>>, vector<1x128x384xf32>
    %6 = vector.shape_cast %5 : vector<1x128x384xf32> to vector<128x384xf32>
    %cst_10 = arith.constant dense<0.000000e+00> : vector<64x384xf32>
    %7 = tpu.matmul %0, %6, %cst_10 {dimension_numbers = #tpu.dot_dimension_numbers<[1], [0], [0], [1], [0, 0, 1, 1], [], []>} : vector<64x128xf32>, vector<128x384xf32>, vector<64x384xf32> -> vector<64x384xf32>
    %8 = vector.extract_strided_slice %7 {offsets = [0, 128], sizes = [64, 128], strides = [1, 1]} : vector<64x384xf32> to vector<64x128xf32>
    %9 = vector.extract_strided_slice %7 {offsets = [0, 0], sizes = [64, 128], strides = [1, 1]} : vector<64x384xf32> to vector<64x128xf32>
    %c1_i32 = arith.constant 1 : i32
    %10 = tpu.dynamic_rotate %9 by %c1_i32 dim 0 : vector<64x128xf32>, i32 -> vector<64x128xf32>
    %11 = arith.mulf %10, %1 : vector<64x128xf32>
    %12 = arith.addf %8, %11 : vector<64x128xf32>
    %13 = vector.extract_strided_slice %7 {offsets = [0, 256], sizes = [64, 128], strides = [1, 1]} : vector<64x384xf32> to vector<64x128xf32>
    %c63_i32 = arith.constant 63 : i32
    %14 = tpu.dynamic_rotate %13 by %c63_i32 dim 0 : vector<64x128xf32>, i32 -> vector<64x128xf32>
    %15 = arith.mulf %14, %2 : vector<64x128xf32>
    %16 = arith.addf %12, %15 : vector<64x128xf32>
    %c0_11 = arith.constant 0 : index
    %c0_12 = arith.constant 0 : index
    %c0_13 = arith.constant 0 : index
    %17 = vector.load %arg6[%c0_11, %c0_12, %c0_13] : memref<16x1x128xf32, #tpu.memory_space<vmem>>, vector<1x1x128xf32>
    %18 = vector.shape_cast %17 : vector<1x1x128xf32> to vector<1x128xf32>
    %19 = vector.broadcast %18 : vector<1x128xf32> to vector<64x128xf32>
    %20 = arith.addf %16, %19 : vector<64x128xf32>
    %cst_14 = arith.constant 0.000000e+00 : f32
    %21 = vector.broadcast %cst_14 : f32 to vector<64x128xf32>
    %22 = arith.maximumf %20, %21 : vector<64x128xf32>
    %c1 = arith.constant 1 : index
    %c0_15 = arith.constant 0 : index
    %c0_16 = arith.constant 0 : index
    %23 = vector.load %arg5[%c1, %c0_15, %c0_16] : memref<16x128x384xf32, #tpu.memory_space<vmem>>, vector<1x128x384xf32>
    %24 = vector.shape_cast %23 : vector<1x128x384xf32> to vector<128x384xf32>
    %cst_17 = arith.constant dense<0.000000e+00> : vector<64x384xf32>
    %25 = tpu.matmul %22, %24, %cst_17 {dimension_numbers = #tpu.dot_dimension_numbers<[1], [0], [0], [1], [0, 0, 1, 1], [], []>} : vector<64x128xf32>, vector<128x384xf32>, vector<64x384xf32> -> vector<64x384xf32>
    %26 = vector.extract_strided_slice %25 {offsets = [0, 128], sizes = [64, 128], strides = [1, 1]} : vector<64x384xf32> to vector<64x128xf32>
    %27 = vector.extract_strided_slice %25 {offsets = [0, 0], sizes = [64, 128], strides = [1, 1]} : vector<64x384xf32> to vector<64x128xf32>
    %c1_i32_18 = arith.constant 1 : i32
    %28 = tpu.dynamic_rotate %27 by %c1_i32_18 dim 0 : vector<64x128xf32>, i32 -> vector<64x128xf32>
    %29 = arith.mulf %28, %1 : vector<64x128xf32>
    %30 = arith.addf %26, %29 : vector<64x128xf32>
    %31 = vector.extract_strided_slice %25 {offsets = [0, 256], sizes = [64, 128], strides = [1, 1]} : vector<64x384xf32> to vector<64x128xf32>
    %c63_i32_19 = arith.constant 63 : i32
    %32 = tpu.dynamic_rotate %31 by %c63_i32_19 dim 0 : vector<64x128xf32>, i32 -> vector<64x128xf32>
    %33 = arith.mulf %32, %2 : vector<64x128xf32>
    %34 = arith.addf %30, %33 : vector<64x128xf32>
    %c1_20 = arith.constant 1 : index
    %c0_21 = arith.constant 0 : index
    %c0_22 = arith.constant 0 : index
    %35 = vector.load %arg6[%c1_20, %c0_21, %c0_22] : memref<16x1x128xf32, #tpu.memory_space<vmem>>, vector<1x1x128xf32>
    %36 = vector.shape_cast %35 : vector<1x1x128xf32> to vector<1x128xf32>
    %37 = vector.broadcast %36 : vector<1x128xf32> to vector<64x128xf32>
    %38 = arith.addf %34, %37 : vector<64x128xf32>
    %c0_23 = arith.constant 0 : index
    %c0_24 = arith.constant 0 : index
    %c0_25 = arith.constant 0 : index
    %39 = vector.load %arg7[%c0_23, %c0_24, %c0_25] : memref<8x128x128xf32, #tpu.memory_space<vmem>>, vector<1x128x128xf32>
    %40 = vector.shape_cast %39 : vector<1x128x128xf32> to vector<128x128xf32>
    %cst_26 = arith.constant dense<0.000000e+00> : vector<64x128xf32>
    %41 = tpu.matmul %38, %40, %cst_26 {dimension_numbers = #tpu.dot_dimension_numbers<[1], [0], [0], [1], [0, 0, 1, 1], [], []>} : vector<64x128xf32>, vector<128x128xf32>, vector<64x128xf32> -> vector<64x128xf32>
    %42 = arith.addf %4, %41 : vector<64x128xf32>
    %43 = arith.addf %0, %38 : vector<64x128xf32>
    %c2 = arith.constant 2 : index
    %c0_27 = arith.constant 0 : index
    %c0_28 = arith.constant 0 : index
    %44 = vector.load %arg5[%c2, %c0_27, %c0_28] : memref<16x128x384xf32, #tpu.memory_space<vmem>>, vector<1x128x384xf32>
    %45 = vector.shape_cast %44 : vector<1x128x384xf32> to vector<128x384xf32>
    %cst_29 = arith.constant dense<0.000000e+00> : vector<64x384xf32>
    %46 = tpu.matmul %43, %45, %cst_29 {dimension_numbers = #tpu.dot_dimension_numbers<[1], [0], [0], [1], [0, 0, 1, 1], [], []>} : vector<64x128xf32>, vector<128x384xf32>, vector<64x384xf32> -> vector<64x384xf32>
    %47 = vector.extract_strided_slice %46 {offsets = [0, 128], sizes = [64, 128], strides = [1, 1]} : vector<64x384xf32> to vector<64x128xf32>
    %48 = vector.extract_strided_slice %46 {offsets = [0, 0], sizes = [64, 128], strides = [1, 1]} : vector<64x384xf32> to vector<64x128xf32>
    %c1_i32_30 = arith.constant 1 : i32
    %49 = tpu.dynamic_rotate %48 by %c1_i32_30 dim 0 : vector<64x128xf32>, i32 -> vector<64x128xf32>
    %50 = arith.mulf %49, %1 : vector<64x128xf32>
    %51 = arith.addf %47, %50 : vector<64x128xf32>
    %52 = vector.extract_strided_slice %46 {offsets = [0, 256], sizes = [64, 128], strides = [1, 1]} : vector<64x384xf32> to vector<64x128xf32>
    %c63_i32_31 = arith.constant 63 : i32
    %53 = tpu.dynamic_rotate %52 by %c63_i32_31 dim 0 : vector<64x128xf32>, i32 -> vector<64x128xf32>
    %54 = arith.mulf %53, %2 : vector<64x128xf32>
    %55 = arith.addf %51, %54 : vector<64x128xf32>
    %c2_32 = arith.constant 2 : index
    %c0_33 = arith.constant 0 : index
    %c0_34 = arith.constant 0 : index
    %56 = vector.load %arg6[%c2_32, %c0_33, %c0_34] : memref<16x1x128xf32, #tpu.memory_space<vmem>>, vector<1x1x128xf32>
    %57 = vector.shape_cast %56 : vector<1x1x128xf32> to vector<1x128xf32>
    %58 = vector.broadcast %57 : vector<1x128xf32> to vector<64x128xf32>
    %59 = arith.addf %55, %58 : vector<64x128xf32>
    %cst_35 = arith.constant 0.000000e+00 : f32
    %60 = vector.broadcast %cst_35 : f32 to vector<64x128xf32>
    %61 = arith.maximumf %59, %60 : vector<64x128xf32>
    %c3 = arith.constant 3 : index
    %c0_36 = arith.constant 0 : index
    %c0_37 = arith.constant 0 : index
    %62 = vector.load %arg5[%c3, %c0_36, %c0_37] : memref<16x128x384xf32, #tpu.memory_space<vmem>>, vector<1x128x384xf32>
    %63 = vector.shape_cast %62 : vector<1x128x384xf32> to vector<128x384xf32>
    %cst_38 = arith.constant dense<0.000000e+00> : vector<64x384xf32>
    %64 = tpu.matmul %61, %63, %cst_38 {dimension_numbers = #tpu.dot_dimension_numbers<[1], [0], [0], [1], [0, 0, 1, 1], [], []>} : vector<64x128xf32>, vector<128x384xf32>, vector<64x384xf32> -> vector<64x384xf32>
    %65 = vector.extract_strided_slice %64 {offsets = [0, 128], sizes = [64, 128], strides = [1, 1]} : vector<64x384xf32> to vector<64x128xf32>
    %66 = vector.extract_strided_slice %64 {offsets = [0, 0], sizes = [64, 128], strides = [1, 1]} : vector<64x384xf32> to vector<64x128xf32>
    %c1_i32_39 = arith.constant 1 : i32
    %67 = tpu.dynamic_rotate %66 by %c1_i32_39 dim 0 : vector<64x128xf32>, i32 -> vector<64x128xf32>
    %68 = arith.mulf %67, %1 : vector<64x128xf32>
    %69 = arith.addf %65, %68 : vector<64x128xf32>
    %70 = vector.extract_strided_slice %64 {offsets = [0, 256], sizes = [64, 128], strides = [1, 1]} : vector<64x384xf32> to vector<64x128xf32>
    %c63_i32_40 = arith.constant 63 : i32
    %71 = tpu.dynamic_rotate %70 by %c63_i32_40 dim 0 : vector<64x128xf32>, i32 -> vector<64x128xf32>
    %72 = arith.mulf %71, %2 : vector<64x128xf32>
    %73 = arith.addf %69, %72 : vector<64x128xf32>
    %c3_41 = arith.constant 3 : index
    %c0_42 = arith.constant 0 : index
    %c0_43 = arith.constant 0 : index
    %74 = vector.load %arg6[%c3_41, %c0_42, %c0_43] : memref<16x1x128xf32, #tpu.memory_space<vmem>>, vector<1x1x128xf32>
    %75 = vector.shape_cast %74 : vector<1x1x128xf32> to vector<1x128xf32>
    %76 = vector.broadcast %75 : vector<1x128xf32> to vector<64x128xf32>
    %77 = arith.addf %73, %76 : vector<64x128xf32>
    %c1_44 = arith.constant 1 : index
    %c0_45 = arith.constant 0 : index
    %c0_46 = arith.constant 0 : index
    %78 = vector.load %arg7[%c1_44, %c0_45, %c0_46] : memref<8x128x128xf32, #tpu.memory_space<vmem>>, vector<1x128x128xf32>
    %79 = vector.shape_cast %78 : vector<1x128x128xf32> to vector<128x128xf32>
    %cst_47 = arith.constant dense<0.000000e+00> : vector<64x128xf32>
    %80 = tpu.matmul %77, %79, %cst_47 {dimension_numbers = #tpu.dot_dimension_numbers<[1], [0], [0], [1], [0, 0, 1, 1], [], []>} : vector<64x128xf32>, vector<128x128xf32>, vector<64x128xf32> -> vector<64x128xf32>
    %81 = arith.addf %42, %80 : vector<64x128xf32>
    %82 = arith.addf %43, %77 : vector<64x128xf32>
    %c4 = arith.constant 4 : index
    %c0_48 = arith.constant 0 : index
    %c0_49 = arith.constant 0 : index
    %83 = vector.load %arg5[%c4, %c0_48, %c0_49] : memref<16x128x384xf32, #tpu.memory_space<vmem>>, vector<1x128x384xf32>
    %84 = vector.shape_cast %83 : vector<1x128x384xf32> to vector<128x384xf32>
    %cst_50 = arith.constant dense<0.000000e+00> : vector<64x384xf32>
    %85 = tpu.matmul %82, %84, %cst_50 {dimension_numbers = #tpu.dot_dimension_numbers<[1], [0], [0], [1], [0, 0, 1, 1], [], []>} : vector<64x128xf32>, vector<128x384xf32>, vector<64x384xf32> -> vector<64x384xf32>
    %86 = vector.extract_strided_slice %85 {offsets = [0, 128], sizes = [64, 128], strides = [1, 1]} : vector<64x384xf32> to vector<64x128xf32>
    %87 = vector.extract_strided_slice %85 {offsets = [0, 0], sizes = [64, 128], strides = [1, 1]} : vector<64x384xf32> to vector<64x128xf32>
    %c1_i32_51 = arith.constant 1 : i32
    %88 = tpu.dynamic_rotate %87 by %c1_i32_51 dim 0 : vector<64x128xf32>, i32 -> vector<64x128xf32>
    %89 = arith.mulf %88, %1 : vector<64x128xf32>
    %90 = arith.addf %86, %89 : vector<64x128xf32>
    %91 = vector.extract_strided_slice %85 {offsets = [0, 256], sizes = [64, 128], strides = [1, 1]} : vector<64x384xf32> to vector<64x128xf32>
    %c63_i32_52 = arith.constant 63 : i32
    %92 = tpu.dynamic_rotate %91 by %c63_i32_52 dim 0 : vector<64x128xf32>, i32 -> vector<64x128xf32>
    %93 = arith.mulf %92, %2 : vector<64x128xf32>
    %94 = arith.addf %90, %93 : vector<64x128xf32>
    %c4_53 = arith.constant 4 : index
    %c0_54 = arith.constant 0 : index
    %c0_55 = arith.constant 0 : index
    %95 = vector.load %arg6[%c4_53, %c0_54, %c0_55] : memref<16x1x128xf32, #tpu.memory_space<vmem>>, vector<1x1x128xf32>
    %96 = vector.shape_cast %95 : vector<1x1x128xf32> to vector<1x128xf32>
    %97 = vector.broadcast %96 : vector<1x128xf32> to vector<64x128xf32>
    %98 = arith.addf %94, %97 : vector<64x128xf32>
    %cst_56 = arith.constant 0.000000e+00 : f32
    %99 = vector.broadcast %cst_56 : f32 to vector<64x128xf32>
    %100 = arith.maximumf %98, %99 : vector<64x128xf32>
    %c5 = arith.constant 5 : index
    %c0_57 = arith.constant 0 : index
    %c0_58 = arith.constant 0 : index
    %101 = vector.load %arg5[%c5, %c0_57, %c0_58] : memref<16x128x384xf32, #tpu.memory_space<vmem>>, vector<1x128x384xf32>
    %102 = vector.shape_cast %101 : vector<1x128x384xf32> to vector<128x384xf32>
    %cst_59 = arith.constant dense<0.000000e+00> : vector<64x384xf32>
    %103 = tpu.matmul %100, %102, %cst_59 {dimension_numbers = #tpu.dot_dimension_numbers<[1], [0], [0], [1], [0, 0, 1, 1], [], []>} : vector<64x128xf32>, vector<128x384xf32>, vector<64x384xf32> -> vector<64x384xf32>
    %104 = vector.extract_strided_slice %103 {offsets = [0, 128], sizes = [64, 128], strides = [1, 1]} : vector<64x384xf32> to vector<64x128xf32>
    %105 = vector.extract_strided_slice %103 {offsets = [0, 0], sizes = [64, 128], strides = [1, 1]} : vector<64x384xf32> to vector<64x128xf32>
    %c1_i32_60 = arith.constant 1 : i32
    %106 = tpu.dynamic_rotate %105 by %c1_i32_60 dim 0 : vector<64x128xf32>, i32 -> vector<64x128xf32>
    %107 = arith.mulf %106, %1 : vector<64x128xf32>
    %108 = arith.addf %104, %107 : vector<64x128xf32>
    %109 = vector.extract_strided_slice %103 {offsets = [0, 256], sizes = [64, 128], strides = [1, 1]} : vector<64x384xf32> to vector<64x128xf32>
    %c63_i32_61 = arith.constant 63 : i32
    %110 = tpu.dynamic_rotate %109 by %c63_i32_61 dim 0 : vector<64x128xf32>, i32 -> vector<64x128xf32>
    %111 = arith.mulf %110, %2 : vector<64x128xf32>
    %112 = arith.addf %108, %111 : vector<64x128xf32>
    %c5_62 = arith.constant 5 : index
    %c0_63 = arith.constant 0 : index
    %c0_64 = arith.constant 0 : index
    %113 = vector.load %arg6[%c5_62, %c0_63, %c0_64] : memref<16x1x128xf32, #tpu.memory_space<vmem>>, vector<1x1x128xf32>
    %114 = vector.shape_cast %113 : vector<1x1x128xf32> to vector<1x128xf32>
    %115 = vector.broadcast %114 : vector<1x128xf32> to vector<64x128xf32>
    %116 = arith.addf %112, %115 : vector<64x128xf32>
    %c2_65 = arith.constant 2 : index
    %c0_66 = arith.constant 0 : index
    %c0_67 = arith.constant 0 : index
    %117 = vector.load %arg7[%c2_65, %c0_66, %c0_67] : memref<8x128x128xf32, #tpu.memory_space<vmem>>, vector<1x128x128xf32>
    %118 = vector.shape_cast %117 : vector<1x128x128xf32> to vector<128x128xf32>
    %cst_68 = arith.constant dense<0.000000e+00> : vector<64x128xf32>
    %119 = tpu.matmul %116, %118, %cst_68 {dimension_numbers = #tpu.dot_dimension_numbers<[1], [0], [0], [1], [0, 0, 1, 1], [], []>} : vector<64x128xf32>, vector<128x128xf32>, vector<64x128xf32> -> vector<64x128xf32>
    %120 = arith.addf %81, %119 : vector<64x128xf32>
    %121 = arith.addf %82, %116 : vector<64x128xf32>
    %c6 = arith.constant 6 : index
    %c0_69 = arith.constant 0 : index
    %c0_70 = arith.constant 0 : index
    %122 = vector.load %arg5[%c6, %c0_69, %c0_70] : memref<16x128x384xf32, #tpu.memory_space<vmem>>, vector<1x128x384xf32>
    %123 = vector.shape_cast %122 : vector<1x128x384xf32> to vector<128x384xf32>
    %cst_71 = arith.constant dense<0.000000e+00> : vector<64x384xf32>
    %124 = tpu.matmul %121, %123, %cst_71 {dimension_numbers = #tpu.dot_dimension_numbers<[1], [0], [0], [1], [0, 0, 1, 1], [], []>} : vector<64x128xf32>, vector<128x384xf32>, vector<64x384xf32> -> vector<64x384xf32>
    %125 = vector.extract_strided_slice %124 {offsets = [0, 128], sizes = [64, 128], strides = [1, 1]} : vector<64x384xf32> to vector<64x128xf32>
    %126 = vector.extract_strided_slice %124 {offsets = [0, 0], sizes = [64, 128], strides = [1, 1]} : vector<64x384xf32> to vector<64x128xf32>
    %c1_i32_72 = arith.constant 1 : i32
    %127 = tpu.dynamic_rotate %126 by %c1_i32_72 dim 0 : vector<64x128xf32>, i32 -> vector<64x128xf32>
    %128 = arith.mulf %127, %1 : vector<64x128xf32>
    %129 = arith.addf %125, %128 : vector<64x128xf32>
    %130 = vector.extract_strided_slice %124 {offsets = [0, 256], sizes = [64, 128], strides = [1, 1]} : vector<64x384xf32> to vector<64x128xf32>
    %c63_i32_73 = arith.constant 63 : i32
    %131 = tpu.dynamic_rotate %130 by %c63_i32_73 dim 0 : vector<64x128xf32>, i32 -> vector<64x128xf32>
    %132 = arith.mulf %131, %2 : vector<64x128xf32>
    %133 = arith.addf %129, %132 : vector<64x128xf32>
    %c6_74 = arith.constant 6 : index
    %c0_75 = arith.constant 0 : index
    %c0_76 = arith.constant 0 : index
    %134 = vector.load %arg6[%c6_74, %c0_75, %c0_76] : memref<16x1x128xf32, #tpu.memory_space<vmem>>, vector<1x1x128xf32>
    %135 = vector.shape_cast %134 : vector<1x1x128xf32> to vector<1x128xf32>
    %136 = vector.broadcast %135 : vector<1x128xf32> to vector<64x128xf32>
    %137 = arith.addf %133, %136 : vector<64x128xf32>
    %cst_77 = arith.constant 0.000000e+00 : f32
    %138 = vector.broadcast %cst_77 : f32 to vector<64x128xf32>
    %139 = arith.maximumf %137, %138 : vector<64x128xf32>
    %c7 = arith.constant 7 : index
    %c0_78 = arith.constant 0 : index
    %c0_79 = arith.constant 0 : index
    %140 = vector.load %arg5[%c7, %c0_78, %c0_79] : memref<16x128x384xf32, #tpu.memory_space<vmem>>, vector<1x128x384xf32>
    %141 = vector.shape_cast %140 : vector<1x128x384xf32> to vector<128x384xf32>
    %cst_80 = arith.constant dense<0.000000e+00> : vector<64x384xf32>
    %142 = tpu.matmul %139, %141, %cst_80 {dimension_numbers = #tpu.dot_dimension_numbers<[1], [0], [0], [1], [0, 0, 1, 1], [], []>} : vector<64x128xf32>, vector<128x384xf32>, vector<64x384xf32> -> vector<64x384xf32>
    %143 = vector.extract_strided_slice %142 {offsets = [0, 128], sizes = [64, 128], strides = [1, 1]} : vector<64x384xf32> to vector<64x128xf32>
    %144 = vector.extract_strided_slice %142 {offsets = [0, 0], sizes = [64, 128], strides = [1, 1]} : vector<64x384xf32> to vector<64x128xf32>
    %c1_i32_81 = arith.constant 1 : i32
    %145 = tpu.dynamic_rotate %144 by %c1_i32_81 dim 0 : vector<64x128xf32>, i32 -> vector<64x128xf32>
    %146 = arith.mulf %145, %1 : vector<64x128xf32>
    %147 = arith.addf %143, %146 : vector<64x128xf32>
    %148 = vector.extract_strided_slice %142 {offsets = [0, 256], sizes = [64, 128], strides = [1, 1]} : vector<64x384xf32> to vector<64x128xf32>
    %c63_i32_82 = arith.constant 63 : i32
    %149 = tpu.dynamic_rotate %148 by %c63_i32_82 dim 0 : vector<64x128xf32>, i32 -> vector<64x128xf32>
    %150 = arith.mulf %149, %2 : vector<64x128xf32>
    %151 = arith.addf %147, %150 : vector<64x128xf32>
    %c7_83 = arith.constant 7 : index
    %c0_84 = arith.constant 0 : index
    %c0_85 = arith.constant 0 : index
    %152 = vector.load %arg6[%c7_83, %c0_84, %c0_85] : memref<16x1x128xf32, #tpu.memory_space<vmem>>, vector<1x1x128xf32>
    %153 = vector.shape_cast %152 : vector<1x1x128xf32> to vector<1x128xf32>
    %154 = vector.broadcast %153 : vector<1x128xf32> to vector<64x128xf32>
    %155 = arith.addf %151, %154 : vector<64x128xf32>
    %c3_86 = arith.constant 3 : index
    %c0_87 = arith.constant 0 : index
    %c0_88 = arith.constant 0 : index
    %156 = vector.load %arg7[%c3_86, %c0_87, %c0_88] : memref<8x128x128xf32, #tpu.memory_space<vmem>>, vector<1x128x128xf32>
    %157 = vector.shape_cast %156 : vector<1x128x128xf32> to vector<128x128xf32>
    %cst_89 = arith.constant dense<0.000000e+00> : vector<64x128xf32>
    %158 = tpu.matmul %155, %157, %cst_89 {dimension_numbers = #tpu.dot_dimension_numbers<[1], [0], [0], [1], [0, 0, 1, 1], [], []>} : vector<64x128xf32>, vector<128x128xf32>, vector<64x128xf32> -> vector<64x128xf32>
    %159 = arith.addf %120, %158 : vector<64x128xf32>
    %160 = arith.addf %0, %159 : vector<64x128xf32>
    %c0_90 = arith.constant 0 : index
    %c0_91 = arith.constant 0 : index
    %c0_92 = arith.constant 0 : index
    %161 = vector.load %arg8[%c0_90, %c0_91, %c0_92] : memref<2x1x128xf32, #tpu.memory_space<vmem>>, vector<1x1x128xf32>
    %162 = vector.shape_cast %161 : vector<1x1x128xf32> to vector<1x128xf32>
    %163 = vector.broadcast %162 : vector<1x128xf32> to vector<64x128xf32>
    %164 = arith.addf %160, %163 : vector<64x128xf32>
    %cst_93 = arith.constant dense<0.000000e+00> : vector<64x128xf32>
    %165 = tpu.matmul %3, %164, %cst_93 {dimension_numbers = #tpu.dot_dimension_numbers<[1], [0], [0], [1], [0, 0, 1, 1], [], []>} : vector<64x64xf32>, vector<64x128xf32>, vector<64x128xf32> -> vector<64x128xf32>
    %c0_94 = arith.constant 0 : index
    %c0_95 = arith.constant 0 : index
    %c0_96 = arith.constant 0 : index
    %166 = vector.load %arg9[%c0_94, %c0_95, %c0_96] : memref<2x128x128xf32, #tpu.memory_space<vmem>>, vector<1x128x128xf32>
    %167 = vector.shape_cast %166 : vector<1x128x128xf32> to vector<128x128xf32>
    %cst_97 = arith.constant dense<0.000000e+00> : vector<64x128xf32>
    %168 = tpu.matmul %165, %167, %cst_97 {dimension_numbers = #tpu.dot_dimension_numbers<[1], [0], [0], [1], [0, 0, 1, 1], [], []>} : vector<64x128xf32>, vector<128x128xf32>, vector<64x128xf32> -> vector<64x128xf32>
    %c0_98 = arith.constant 0 : index
    %c0_99 = arith.constant 0 : index
    %c0_100 = arith.constant 0 : index
    %169 = vector.load %arg10[%c0_98, %c0_99, %c0_100] : memref<2x1x128xf32, #tpu.memory_space<vmem>>, vector<1x1x128xf32>
    %170 = vector.shape_cast %169 : vector<1x1x128xf32> to vector<1x128xf32>
    %171 = vector.broadcast %170 : vector<1x128xf32> to vector<64x128xf32>
    %172 = arith.addf %168, %171 : vector<64x128xf32>
    %cst_101 = arith.constant 0.000000e+00 : f32
    %173 = vector.broadcast %cst_101 : f32 to vector<64x128xf32>
    %174 = arith.maximumf %172, %173 : vector<64x128xf32>
    %c0_102 = arith.constant 0 : index
    %c0_103 = arith.constant 0 : index
    %c0_104 = arith.constant 0 : index
    %175 = vector.load %arg11[%c0_102, %c0_103, %c0_104] : memref<2x128x128xf32, #tpu.memory_space<vmem>>, vector<1x128x128xf32>
    %176 = vector.shape_cast %175 : vector<1x128x128xf32> to vector<128x128xf32>
    %cst_105 = arith.constant dense<0.000000e+00> : vector<64x128xf32>
    %177 = tpu.matmul %174, %176, %cst_105 {dimension_numbers = #tpu.dot_dimension_numbers<[1], [0], [0], [1], [0, 0, 1, 1], [], []>} : vector<64x128xf32>, vector<128x128xf32>, vector<64x128xf32> -> vector<64x128xf32>
    %c0_106 = arith.constant 0 : index
    %c0_107 = arith.constant 0 : index
    %c0_108 = arith.constant 0 : index
    %178 = vector.load %arg12[%c0_106, %c0_107, %c0_108] : memref<2x1x128xf32, #tpu.memory_space<vmem>>, vector<1x1x128xf32>
    %179 = vector.shape_cast %178 : vector<1x1x128xf32> to vector<1x128xf32>
    %180 = vector.broadcast %179 : vector<1x128xf32> to vector<64x128xf32>
    %181 = arith.addf %177, %180 : vector<64x128xf32>
    %182 = arith.negf %181 : vector<64x128xf32>
    %183 = math.exp %182 : vector<64x128xf32>
    %cst_109 = arith.constant 1.000000e+00 : f32
    %184 = vector.broadcast %cst_109 : f32 to vector<64x128xf32>
    %185 = arith.addf %184, %183 : vector<64x128xf32>
    %186 = arith.divf %184, %185 : vector<64x128xf32>
    %187 = arith.mulf %164, %186 : vector<64x128xf32>
    %188 = arith.addf %0, %187 : vector<64x128xf32>
    %cst_110 = arith.constant 0.000000e+00 : f32
    %189 = vector.broadcast %cst_110 : f32 to vector<64x128xf32>
    %c8 = arith.constant 8 : index
    %c0_111 = arith.constant 0 : index
    %c0_112 = arith.constant 0 : index
    %190 = vector.load %arg5[%c8, %c0_111, %c0_112] : memref<16x128x384xf32, #tpu.memory_space<vmem>>, vector<1x128x384xf32>
    %191 = vector.shape_cast %190 : vector<1x128x384xf32> to vector<128x384xf32>
    %cst_113 = arith.constant dense<0.000000e+00> : vector<64x384xf32>
    %192 = tpu.matmul %188, %191, %cst_113 {dimension_numbers = #tpu.dot_dimension_numbers<[1], [0], [0], [1], [0, 0, 1, 1], [], []>} : vector<64x128xf32>, vector<128x384xf32>, vector<64x384xf32> -> vector<64x384xf32>
    %193 = vector.extract_strided_slice %192 {offsets = [0, 128], sizes = [64, 128], strides = [1, 1]} : vector<64x384xf32> to vector<64x128xf32>
    %194 = vector.extract_strided_slice %192 {offsets = [0, 0], sizes = [64, 128], strides = [1, 1]} : vector<64x384xf32> to vector<64x128xf32>
    %c1_i32_114 = arith.constant 1 : i32
    %195 = tpu.dynamic_rotate %194 by %c1_i32_114 dim 0 : vector<64x128xf32>, i32 -> vector<64x128xf32>
    %196 = arith.mulf %195, %1 : vector<64x128xf32>
    %197 = arith.addf %193, %196 : vector<64x128xf32>
    %198 = vector.extract_strided_slice %192 {offsets = [0, 256], sizes = [64, 128], strides = [1, 1]} : vector<64x384xf32> to vector<64x128xf32>
    %c63_i32_115 = arith.constant 63 : i32
    %199 = tpu.dynamic_rotate %198 by %c63_i32_115 dim 0 : vector<64x128xf32>, i32 -> vector<64x128xf32>
    %200 = arith.mulf %199, %2 : vector<64x128xf32>
    %201 = arith.addf %197, %200 : vector<64x128xf32>
    %c8_116 = arith.constant 8 : index
    %c0_117 = arith.constant 0 : index
    %c0_118 = arith.constant 0 : index
    %202 = vector.load %arg6[%c8_116, %c0_117, %c0_118] : memref<16x1x128xf32, #tpu.memory_space<vmem>>, vector<1x1x128xf32>
    %203 = vector.shape_cast %202 : vector<1x1x128xf32> to vector<1x128xf32>
    %204 = vector.broadcast %203 : vector<1x128xf32> to vector<64x128xf32>
    %205 = arith.addf %201, %204 : vector<64x128xf32>
    %cst_119 = arith.constant 0.000000e+00 : f32
    %206 = vector.broadcast %cst_119 : f32 to vector<64x128xf32>
    %207 = arith.maximumf %205, %206 : vector<64x128xf32>
    %c9 = arith.constant 9 : index
    %c0_120 = arith.constant 0 : index
    %c0_121 = arith.constant 0 : index
    %208 = vector.load %arg5[%c9, %c0_120, %c0_121] : memref<16x128x384xf32, #tpu.memory_space<vmem>>, vector<1x128x384xf32>
    %209 = vector.shape_cast %208 : vector<1x128x384xf32> to vector<128x384xf32>
    %cst_122 = arith.constant dense<0.000000e+00> : vector<64x384xf32>
    %210 = tpu.matmul %207, %209, %cst_122 {dimension_numbers = #tpu.dot_dimension_numbers<[1], [0], [0], [1], [0, 0, 1, 1], [], []>} : vector<64x128xf32>, vector<128x384xf32>, vector<64x384xf32> -> vector<64x384xf32>
    %211 = vector.extract_strided_slice %210 {offsets = [0, 128], sizes = [64, 128], strides = [1, 1]} : vector<64x384xf32> to vector<64x128xf32>
    %212 = vector.extract_strided_slice %210 {offsets = [0, 0], sizes = [64, 128], strides = [1, 1]} : vector<64x384xf32> to vector<64x128xf32>
    %c1_i32_123 = arith.constant 1 : i32
    %213 = tpu.dynamic_rotate %212 by %c1_i32_123 dim 0 : vector<64x128xf32>, i32 -> vector<64x128xf32>
    %214 = arith.mulf %213, %1 : vector<64x128xf32>
    %215 = arith.addf %211, %214 : vector<64x128xf32>
    %216 = vector.extract_strided_slice %210 {offsets = [0, 256], sizes = [64, 128], strides = [1, 1]} : vector<64x384xf32> to vector<64x128xf32>
    %c63_i32_124 = arith.constant 63 : i32
    %217 = tpu.dynamic_rotate %216 by %c63_i32_124 dim 0 : vector<64x128xf32>, i32 -> vector<64x128xf32>
    %218 = arith.mulf %217, %2 : vector<64x128xf32>
    %219 = arith.addf %215, %218 : vector<64x128xf32>
    %c9_125 = arith.constant 9 : index
    %c0_126 = arith.constant 0 : index
    %c0_127 = arith.constant 0 : index
    %220 = vector.load %arg6[%c9_125, %c0_126, %c0_127] : memref<16x1x128xf32, #tpu.memory_space<vmem>>, vector<1x1x128xf32>
    %221 = vector.shape_cast %220 : vector<1x1x128xf32> to vector<1x128xf32>
    %222 = vector.broadcast %221 : vector<1x128xf32> to vector<64x128xf32>
    %223 = arith.addf %219, %222 : vector<64x128xf32>
    %c4_128 = arith.constant 4 : index
    %c0_129 = arith.constant 0 : index
    %c0_130 = arith.constant 0 : index
    %224 = vector.load %arg7[%c4_128, %c0_129, %c0_130] : memref<8x128x128xf32, #tpu.memory_space<vmem>>, vector<1x128x128xf32>
    %225 = vector.shape_cast %224 : vector<1x128x128xf32> to vector<128x128xf32>
    %cst_131 = arith.constant dense<0.000000e+00> : vector<64x128xf32>
    %226 = tpu.matmul %223, %225, %cst_131 {dimension_numbers = #tpu.dot_dimension_numbers<[1], [0], [0], [1], [0, 0, 1, 1], [], []>} : vector<64x128xf32>, vector<128x128xf32>, vector<64x128xf32> -> vector<64x128xf32>
    %227 = arith.addf %189, %226 : vector<64x128xf32>
    %228 = arith.addf %188, %223 : vector<64x128xf32>
    %c10 = arith.constant 10 : index
    %c0_132 = arith.constant 0 : index
    %c0_133 = arith.constant 0 : index
    %229 = vector.load %arg5[%c10, %c0_132, %c0_133] : memref<16x128x384xf32, #tpu.memory_space<vmem>>, vector<1x128x384xf32>
    %230 = vector.shape_cast %229 : vector<1x128x384xf32> to vector<128x384xf32>
    %cst_134 = arith.constant dense<0.000000e+00> : vector<64x384xf32>
    %231 = tpu.matmul %228, %230, %cst_134 {dimension_numbers = #tpu.dot_dimension_numbers<[1], [0], [0], [1], [0, 0, 1, 1], [], []>} : vector<64x128xf32>, vector<128x384xf32>, vector<64x384xf32> -> vector<64x384xf32>
    %232 = vector.extract_strided_slice %231 {offsets = [0, 128], sizes = [64, 128], strides = [1, 1]} : vector<64x384xf32> to vector<64x128xf32>
    %233 = vector.extract_strided_slice %231 {offsets = [0, 0], sizes = [64, 128], strides = [1, 1]} : vector<64x384xf32> to vector<64x128xf32>
    %c1_i32_135 = arith.constant 1 : i32
    %234 = tpu.dynamic_rotate %233 by %c1_i32_135 dim 0 : vector<64x128xf32>, i32 -> vector<64x128xf32>
    %235 = arith.mulf %234, %1 : vector<64x128xf32>
    %236 = arith.addf %232, %235 : vector<64x128xf32>
    %237 = vector.extract_strided_slice %231 {offsets = [0, 256], sizes = [64, 128], strides = [1, 1]} : vector<64x384xf32> to vector<64x128xf32>
    %c63_i32_136 = arith.constant 63 : i32
    %238 = tpu.dynamic_rotate %237 by %c63_i32_136 dim 0 : vector<64x128xf32>, i32 -> vector<64x128xf32>
    %239 = arith.mulf %238, %2 : vector<64x128xf32>
    %240 = arith.addf %236, %239 : vector<64x128xf32>
    %c10_137 = arith.constant 10 : index
    %c0_138 = arith.constant 0 : index
    %c0_139 = arith.constant 0 : index
    %241 = vector.load %arg6[%c10_137, %c0_138, %c0_139] : memref<16x1x128xf32, #tpu.memory_space<vmem>>, vector<1x1x128xf32>
    %242 = vector.shape_cast %241 : vector<1x1x128xf32> to vector<1x128xf32>
    %243 = vector.broadcast %242 : vector<1x128xf32> to vector<64x128xf32>
    %244 = arith.addf %240, %243 : vector<64x128xf32>
    %cst_140 = arith.constant 0.000000e+00 : f32
    %245 = vector.broadcast %cst_140 : f32 to vector<64x128xf32>
    %246 = arith.maximumf %244, %245 : vector<64x128xf32>
    %c11 = arith.constant 11 : index
    %c0_141 = arith.constant 0 : index
    %c0_142 = arith.constant 0 : index
    %247 = vector.load %arg5[%c11, %c0_141, %c0_142] : memref<16x128x384xf32, #tpu.memory_space<vmem>>, vector<1x128x384xf32>
    %248 = vector.shape_cast %247 : vector<1x128x384xf32> to vector<128x384xf32>
    %cst_143 = arith.constant dense<0.000000e+00> : vector<64x384xf32>
    %249 = tpu.matmul %246, %248, %cst_143 {dimension_numbers = #tpu.dot_dimension_numbers<[1], [0], [0], [1], [0, 0, 1, 1], [], []>} : vector<64x128xf32>, vector<128x384xf32>, vector<64x384xf32> -> vector<64x384xf32>
    %250 = vector.extract_strided_slice %249 {offsets = [0, 128], sizes = [64, 128], strides = [1, 1]} : vector<64x384xf32> to vector<64x128xf32>
    %251 = vector.extract_strided_slice %249 {offsets = [0, 0], sizes = [64, 128], strides = [1, 1]} : vector<64x384xf32> to vector<64x128xf32>
    %c1_i32_144 = arith.constant 1 : i32
    %252 = tpu.dynamic_rotate %251 by %c1_i32_144 dim 0 : vector<64x128xf32>, i32 -> vector<64x128xf32>
    %253 = arith.mulf %252, %1 : vector<64x128xf32>
    %254 = arith.addf %250, %253 : vector<64x128xf32>
    %255 = vector.extract_strided_slice %249 {offsets = [0, 256], sizes = [64, 128], strides = [1, 1]} : vector<64x384xf32> to vector<64x128xf32>
    %c63_i32_145 = arith.constant 63 : i32
    %256 = tpu.dynamic_rotate %255 by %c63_i32_145 dim 0 : vector<64x128xf32>, i32 -> vector<64x128xf32>
    %257 = arith.mulf %256, %2 : vector<64x128xf32>
    %258 = arith.addf %254, %257 : vector<64x128xf32>
    %c11_146 = arith.constant 11 : index
    %c0_147 = arith.constant 0 : index
    %c0_148 = arith.constant 0 : index
    %259 = vector.load %arg6[%c11_146, %c0_147, %c0_148] : memref<16x1x128xf32, #tpu.memory_space<vmem>>, vector<1x1x128xf32>
    %260 = vector.shape_cast %259 : vector<1x1x128xf32> to vector<1x128xf32>
    %261 = vector.broadcast %260 : vector<1x128xf32> to vector<64x128xf32>
    %262 = arith.addf %258, %261 : vector<64x128xf32>
    %c5_149 = arith.constant 5 : index
    %c0_150 = arith.constant 0 : index
    %c0_151 = arith.constant 0 : index
    %263 = vector.load %arg7[%c5_149, %c0_150, %c0_151] : memref<8x128x128xf32, #tpu.memory_space<vmem>>, vector<1x128x128xf32>
    %264 = vector.shape_cast %263 : vector<1x128x128xf32> to vector<128x128xf32>
    %cst_152 = arith.constant dense<0.000000e+00> : vector<64x128xf32>
    %265 = tpu.matmul %262, %264, %cst_152 {dimension_numbers = #tpu.dot_dimension_numbers<[1], [0], [0], [1], [0, 0, 1, 1], [], []>} : vector<64x128xf32>, vector<128x128xf32>, vector<64x128xf32> -> vector<64x128xf32>
    %266 = arith.addf %227, %265 : vector<64x128xf32>
    %267 = arith.addf %228, %262 : vector<64x128xf32>
    %c12 = arith.constant 12 : index
    %c0_153 = arith.constant 0 : index
    %c0_154 = arith.constant 0 : index
    %268 = vector.load %arg5[%c12, %c0_153, %c0_154] : memref<16x128x384xf32, #tpu.memory_space<vmem>>, vector<1x128x384xf32>
    %269 = vector.shape_cast %268 : vector<1x128x384xf32> to vector<128x384xf32>
    %cst_155 = arith.constant dense<0.000000e+00> : vector<64x384xf32>
    %270 = tpu.matmul %267, %269, %cst_155 {dimension_numbers = #tpu.dot_dimension_numbers<[1], [0], [0], [1], [0, 0, 1, 1], [], []>} : vector<64x128xf32>, vector<128x384xf32>, vector<64x384xf32> -> vector<64x384xf32>
    %271 = vector.extract_strided_slice %270 {offsets = [0, 128], sizes = [64, 128], strides = [1, 1]} : vector<64x384xf32> to vector<64x128xf32>
    %272 = vector.extract_strided_slice %270 {offsets = [0, 0], sizes = [64, 128], strides = [1, 1]} : vector<64x384xf32> to vector<64x128xf32>
    %c1_i32_156 = arith.constant 1 : i32
    %273 = tpu.dynamic_rotate %272 by %c1_i32_156 dim 0 : vector<64x128xf32>, i32 -> vector<64x128xf32>
    %274 = arith.mulf %273, %1 : vector<64x128xf32>
    %275 = arith.addf %271, %274 : vector<64x128xf32>
    %276 = vector.extract_strided_slice %270 {offsets = [0, 256], sizes = [64, 128], strides = [1, 1]} : vector<64x384xf32> to vector<64x128xf32>
    %c63_i32_157 = arith.constant 63 : i32
    %277 = tpu.dynamic_rotate %276 by %c63_i32_157 dim 0 : vector<64x128xf32>, i32 -> vector<64x128xf32>
    %278 = arith.mulf %277, %2 : vector<64x128xf32>
    %279 = arith.addf %275, %278 : vector<64x128xf32>
    %c12_158 = arith.constant 12 : index
    %c0_159 = arith.constant 0 : index
    %c0_160 = arith.constant 0 : index
    %280 = vector.load %arg6[%c12_158, %c0_159, %c0_160] : memref<16x1x128xf32, #tpu.memory_space<vmem>>, vector<1x1x128xf32>
    %281 = vector.shape_cast %280 : vector<1x1x128xf32> to vector<1x128xf32>
    %282 = vector.broadcast %281 : vector<1x128xf32> to vector<64x128xf32>
    %283 = arith.addf %279, %282 : vector<64x128xf32>
    %cst_161 = arith.constant 0.000000e+00 : f32
    %284 = vector.broadcast %cst_161 : f32 to vector<64x128xf32>
    %285 = arith.maximumf %283, %284 : vector<64x128xf32>
    %c13 = arith.constant 13 : index
    %c0_162 = arith.constant 0 : index
    %c0_163 = arith.constant 0 : index
    %286 = vector.load %arg5[%c13, %c0_162, %c0_163] : memref<16x128x384xf32, #tpu.memory_space<vmem>>, vector<1x128x384xf32>
    %287 = vector.shape_cast %286 : vector<1x128x384xf32> to vector<128x384xf32>
    %cst_164 = arith.constant dense<0.000000e+00> : vector<64x384xf32>
    %288 = tpu.matmul %285, %287, %cst_164 {dimension_numbers = #tpu.dot_dimension_numbers<[1], [0], [0], [1], [0, 0, 1, 1], [], []>} : vector<64x128xf32>, vector<128x384xf32>, vector<64x384xf32> -> vector<64x384xf32>
    %289 = vector.extract_strided_slice %288 {offsets = [0, 128], sizes = [64, 128], strides = [1, 1]} : vector<64x384xf32> to vector<64x128xf32>
    %290 = vector.extract_strided_slice %288 {offsets = [0, 0], sizes = [64, 128], strides = [1, 1]} : vector<64x384xf32> to vector<64x128xf32>
    %c1_i32_165 = arith.constant 1 : i32
    %291 = tpu.dynamic_rotate %290 by %c1_i32_165 dim 0 : vector<64x128xf32>, i32 -> vector<64x128xf32>
    %292 = arith.mulf %291, %1 : vector<64x128xf32>
    %293 = arith.addf %289, %292 : vector<64x128xf32>
    %294 = vector.extract_strided_slice %288 {offsets = [0, 256], sizes = [64, 128], strides = [1, 1]} : vector<64x384xf32> to vector<64x128xf32>
    %c63_i32_166 = arith.constant 63 : i32
    %295 = tpu.dynamic_rotate %294 by %c63_i32_166 dim 0 : vector<64x128xf32>, i32 -> vector<64x128xf32>
    %296 = arith.mulf %295, %2 : vector<64x128xf32>
    %297 = arith.addf %293, %296 : vector<64x128xf32>
    %c13_167 = arith.constant 13 : index
    %c0_168 = arith.constant 0 : index
    %c0_169 = arith.constant 0 : index
    %298 = vector.load %arg6[%c13_167, %c0_168, %c0_169] : memref<16x1x128xf32, #tpu.memory_space<vmem>>, vector<1x1x128xf32>
    %299 = vector.shape_cast %298 : vector<1x1x128xf32> to vector<1x128xf32>
    %300 = vector.broadcast %299 : vector<1x128xf32> to vector<64x128xf32>
    %301 = arith.addf %297, %300 : vector<64x128xf32>
    %c6_170 = arith.constant 6 : index
    %c0_171 = arith.constant 0 : index
    %c0_172 = arith.constant 0 : index
    %302 = vector.load %arg7[%c6_170, %c0_171, %c0_172] : memref<8x128x128xf32, #tpu.memory_space<vmem>>, vector<1x128x128xf32>
    %303 = vector.shape_cast %302 : vector<1x128x128xf32> to vector<128x128xf32>
    %cst_173 = arith.constant dense<0.000000e+00> : vector<64x128xf32>
    %304 = tpu.matmul %301, %303, %cst_173 {dimension_numbers = #tpu.dot_dimension_numbers<[1], [0], [0], [1], [0, 0, 1, 1], [], []>} : vector<64x128xf32>, vector<128x128xf32>, vector<64x128xf32> -> vector<64x128xf32>
    %305 = arith.addf %266, %304 : vector<64x128xf32>
    %306 = arith.addf %267, %301 : vector<64x128xf32>
    %c14 = arith.constant 14 : index
    %c0_174 = arith.constant 0 : index
    %c0_175 = arith.constant 0 : index
    %307 = vector.load %arg5[%c14, %c0_174, %c0_175] : memref<16x128x384xf32, #tpu.memory_space<vmem>>, vector<1x128x384xf32>
    %308 = vector.shape_cast %307 : vector<1x128x384xf32> to vector<128x384xf32>
    %cst_176 = arith.constant dense<0.000000e+00> : vector<64x384xf32>
    %309 = tpu.matmul %306, %308, %cst_176 {dimension_numbers = #tpu.dot_dimension_numbers<[1], [0], [0], [1], [0, 0, 1, 1], [], []>} : vector<64x128xf32>, vector<128x384xf32>, vector<64x384xf32> -> vector<64x384xf32>
    %310 = vector.extract_strided_slice %309 {offsets = [0, 128], sizes = [64, 128], strides = [1, 1]} : vector<64x384xf32> to vector<64x128xf32>
    %311 = vector.extract_strided_slice %309 {offsets = [0, 0], sizes = [64, 128], strides = [1, 1]} : vector<64x384xf32> to vector<64x128xf32>
    %c1_i32_177 = arith.constant 1 : i32
    %312 = tpu.dynamic_rotate %311 by %c1_i32_177 dim 0 : vector<64x128xf32>, i32 -> vector<64x128xf32>
    %313 = arith.mulf %312, %1 : vector<64x128xf32>
    %314 = arith.addf %310, %313 : vector<64x128xf32>
    %315 = vector.extract_strided_slice %309 {offsets = [0, 256], sizes = [64, 128], strides = [1, 1]} : vector<64x384xf32> to vector<64x128xf32>
    %c63_i32_178 = arith.constant 63 : i32
    %316 = tpu.dynamic_rotate %315 by %c63_i32_178 dim 0 : vector<64x128xf32>, i32 -> vector<64x128xf32>
    %317 = arith.mulf %316, %2 : vector<64x128xf32>
    %318 = arith.addf %314, %317 : vector<64x128xf32>
    %c14_179 = arith.constant 14 : index
    %c0_180 = arith.constant 0 : index
    %c0_181 = arith.constant 0 : index
    %319 = vector.load %arg6[%c14_179, %c0_180, %c0_181] : memref<16x1x128xf32, #tpu.memory_space<vmem>>, vector<1x1x128xf32>
    %320 = vector.shape_cast %319 : vector<1x1x128xf32> to vector<1x128xf32>
    %321 = vector.broadcast %320 : vector<1x128xf32> to vector<64x128xf32>
    %322 = arith.addf %318, %321 : vector<64x128xf32>
    %cst_182 = arith.constant 0.000000e+00 : f32
    %323 = vector.broadcast %cst_182 : f32 to vector<64x128xf32>
    %324 = arith.maximumf %322, %323 : vector<64x128xf32>
    %c15 = arith.constant 15 : index
    %c0_183 = arith.constant 0 : index
    %c0_184 = arith.constant 0 : index
    %325 = vector.load %arg5[%c15, %c0_183, %c0_184] : memref<16x128x384xf32, #tpu.memory_space<vmem>>, vector<1x128x384xf32>
    %326 = vector.shape_cast %325 : vector<1x128x384xf32> to vector<128x384xf32>
    %cst_185 = arith.constant dense<0.000000e+00> : vector<64x384xf32>
    %327 = tpu.matmul %324, %326, %cst_185 {dimension_numbers = #tpu.dot_dimension_numbers<[1], [0], [0], [1], [0, 0, 1, 1], [], []>} : vector<64x128xf32>, vector<128x384xf32>, vector<64x384xf32> -> vector<64x384xf32>
    %328 = vector.extract_strided_slice %327 {offsets = [0, 128], sizes = [64, 128], strides = [1, 1]} : vector<64x384xf32> to vector<64x128xf32>
    %329 = vector.extract_strided_slice %327 {offsets = [0, 0], sizes = [64, 128], strides = [1, 1]} : vector<64x384xf32> to vector<64x128xf32>
    %c1_i32_186 = arith.constant 1 : i32
    %330 = tpu.dynamic_rotate %329 by %c1_i32_186 dim 0 : vector<64x128xf32>, i32 -> vector<64x128xf32>
    %331 = arith.mulf %330, %1 : vector<64x128xf32>
    %332 = arith.addf %328, %331 : vector<64x128xf32>
    %333 = vector.extract_strided_slice %327 {offsets = [0, 256], sizes = [64, 128], strides = [1, 1]} : vector<64x384xf32> to vector<64x128xf32>
    %c63_i32_187 = arith.constant 63 : i32
    %334 = tpu.dynamic_rotate %333 by %c63_i32_187 dim 0 : vector<64x128xf32>, i32 -> vector<64x128xf32>
    %335 = arith.mulf %334, %2 : vector<64x128xf32>
    %336 = arith.addf %332, %335 : vector<64x128xf32>
    %c15_188 = arith.constant 15 : index
    %c0_189 = arith.constant 0 : index
    %c0_190 = arith.constant 0 : index
    %337 = vector.load %arg6[%c15_188, %c0_189, %c0_190] : memref<16x1x128xf32, #tpu.memory_space<vmem>>, vector<1x1x128xf32>
    %338 = vector.shape_cast %337 : vector<1x1x128xf32> to vector<1x128xf32>
    %339 = vector.broadcast %338 : vector<1x128xf32> to vector<64x128xf32>
    %340 = arith.addf %336, %339 : vector<64x128xf32>
    %c7_191 = arith.constant 7 : index
    %c0_192 = arith.constant 0 : index
    %c0_193 = arith.constant 0 : index
    %341 = vector.load %arg7[%c7_191, %c0_192, %c0_193] : memref<8x128x128xf32, #tpu.memory_space<vmem>>, vector<1x128x128xf32>
    %342 = vector.shape_cast %341 : vector<1x128x128xf32> to vector<128x128xf32>
    %cst_194 = arith.constant dense<0.000000e+00> : vector<64x128xf32>
    %343 = tpu.matmul %340, %342, %cst_194 {dimension_numbers = #tpu.dot_dimension_numbers<[1], [0], [0], [1], [0, 0, 1, 1], [], []>} : vector<64x128xf32>, vector<128x128xf32>, vector<64x128xf32> -> vector<64x128xf32>
    %344 = arith.addf %305, %343 : vector<64x128xf32>
    %345 = arith.addf %188, %344 : vector<64x128xf32>
    %c1_195 = arith.constant 1 : index
    %c0_196 = arith.constant 0 : index
    %c0_197 = arith.constant 0 : index
    %346 = vector.load %arg8[%c1_195, %c0_196, %c0_197] : memref<2x1x128xf32, #tpu.memory_space<vmem>>, vector<1x1x128xf32>
    %347 = vector.shape_cast %346 : vector<1x1x128xf32> to vector<1x128xf32>
    %348 = vector.broadcast %347 : vector<1x128xf32> to vector<64x128xf32>
    %349 = arith.addf %345, %348 : vector<64x128xf32>
    %cst_198 = arith.constant dense<0.000000e+00> : vector<64x128xf32>
    %350 = tpu.matmul %3, %349, %cst_198 {dimension_numbers = #tpu.dot_dimension_numbers<[1], [0], [0], [1], [0, 0, 1, 1], [], []>} : vector<64x64xf32>, vector<64x128xf32>, vector<64x128xf32> -> vector<64x128xf32>
    %c1_199 = arith.constant 1 : index
    %c0_200 = arith.constant 0 : index
    %c0_201 = arith.constant 0 : index
    %351 = vector.load %arg9[%c1_199, %c0_200, %c0_201] : memref<2x128x128xf32, #tpu.memory_space<vmem>>, vector<1x128x128xf32>
    %352 = vector.shape_cast %351 : vector<1x128x128xf32> to vector<128x128xf32>
    %cst_202 = arith.constant dense<0.000000e+00> : vector<64x128xf32>
    %353 = tpu.matmul %350, %352, %cst_202 {dimension_numbers = #tpu.dot_dimension_numbers<[1], [0], [0], [1], [0, 0, 1, 1], [], []>} : vector<64x128xf32>, vector<128x128xf32>, vector<64x128xf32> -> vector<64x128xf32>
    %c1_203 = arith.constant 1 : index
    %c0_204 = arith.constant 0 : index
    %c0_205 = arith.constant 0 : index
    %354 = vector.load %arg10[%c1_203, %c0_204, %c0_205] : memref<2x1x128xf32, #tpu.memory_space<vmem>>, vector<1x1x128xf32>
    %355 = vector.shape_cast %354 : vector<1x1x128xf32> to vector<1x128xf32>
    %356 = vector.broadcast %355 : vector<1x128xf32> to vector<64x128xf32>
    %357 = arith.addf %353, %356 : vector<64x128xf32>
    %cst_206 = arith.constant 0.000000e+00 : f32
    %358 = vector.broadcast %cst_206 : f32 to vector<64x128xf32>
    %359 = arith.maximumf %357, %358 : vector<64x128xf32>
    %c1_207 = arith.constant 1 : index
    %c0_208 = arith.constant 0 : index
    %c0_209 = arith.constant 0 : index
    %360 = vector.load %arg11[%c1_207, %c0_208, %c0_209] : memref<2x128x128xf32, #tpu.memory_space<vmem>>, vector<1x128x128xf32>
    %361 = vector.shape_cast %360 : vector<1x128x128xf32> to vector<128x128xf32>
    %cst_210 = arith.constant dense<0.000000e+00> : vector<64x128xf32>
    %362 = tpu.matmul %359, %361, %cst_210 {dimension_numbers = #tpu.dot_dimension_numbers<[1], [0], [0], [1], [0, 0, 1, 1], [], []>} : vector<64x128xf32>, vector<128x128xf32>, vector<64x128xf32> -> vector<64x128xf32>
    %c1_211 = arith.constant 1 : index
    %c0_212 = arith.constant 0 : index
    %c0_213 = arith.constant 0 : index
    %363 = vector.load %arg12[%c1_211, %c0_212, %c0_213] : memref<2x1x128xf32, #tpu.memory_space<vmem>>, vector<1x1x128xf32>
    %364 = vector.shape_cast %363 : vector<1x1x128xf32> to vector<1x128xf32>
    %365 = vector.broadcast %364 : vector<1x128xf32> to vector<64x128xf32>
    %366 = arith.addf %362, %365 : vector<64x128xf32>
    %367 = arith.negf %366 : vector<64x128xf32>
    %368 = math.exp %367 : vector<64x128xf32>
    %cst_214 = arith.constant 1.000000e+00 : f32
    %369 = vector.broadcast %cst_214 : f32 to vector<64x128xf32>
    %370 = arith.addf %369, %368 : vector<64x128xf32>
    %371 = arith.divf %369, %370 : vector<64x128xf32>
    %372 = arith.mulf %349, %371 : vector<64x128xf32>
    %373 = arith.addf %188, %372 : vector<64x128xf32>
    %c0_215 = arith.constant 0 : index
    %c0_216 = arith.constant 0 : index
    %374 = vector.load %arg13[%c0_215, %c0_216] : memref<64x128xf32, #tpu.memory_space<vmem>>, vector<64x128xf32>
    tpu.vector_store %arg13[%c0_215, %c0_216], %373 {strides = array<i32>} : memref<64x128xf32, #tpu.memory_space<vmem>>, vector<64x128xf32>,
    return
  }
  func.func @transform_0(%arg0: i32) -> (i32, i32) {
    %c0_i32 = arith.constant 0 : i32
    %c0_i32_0 = arith.constant 0 : i32
    return %arg0, %c0_i32 : i32, i32
  }
  func.func @transform_1(%arg0: i32) -> (i32, i32) {
    %c0_i32 = arith.constant 0 : i32
    %c0_i32_0 = arith.constant 0 : i32
    %c0_i32_1 = arith.constant 0 : i32
    return %c0_i32, %c0_i32_0 : i32, i32
  }
  func.func @transform_2(%arg0: i32) -> (i32, i32) {
    %c0_i32 = arith.constant 0 : i32
    %c0_i32_0 = arith.constant 0 : i32
    %c0_i32_1 = arith.constant 0 : i32
    return %c0_i32, %c0_i32_0 : i32, i32
  }
  func.func @transform_3(%arg0: i32) -> (i32, i32) {
    %c0_i32 = arith.constant 0 : i32
    %c0_i32_0 = arith.constant 0 : i32
    %c0_i32_1 = arith.constant 0 : i32
    return %c0_i32, %c0_i32_0 : i32, i32
  }
  func.func @transform_4(%arg0: i32) -> (i32, i32, i32) {
    %c0_i32 = arith.constant 0 : i32
    %c0_i32_0 = arith.constant 0 : i32
    %c0_i32_1 = arith.constant 0 : i32
    %c0_i32_2 = arith.constant 0 : i32
    return %c0_i32, %c0_i32_0, %c0_i32_1 : i32, i32, i32
  }
  func.func @transform_5(%arg0: i32) -> (i32, i32, i32) {
    %c0_i32 = arith.constant 0 : i32
    %c0_i32_0 = arith.constant 0 : i32
    %c0_i32_1 = arith.constant 0 : i32
    %c0_i32_2 = arith.constant 0 : i32
    return %c0_i32, %c0_i32_0, %c0_i32_1 : i32, i32, i32
  }
  func.func @transform_6(%arg0: i32) -> (i32, i32, i32) {
    %c0_i32 = arith.constant 0 : i32
    %c0_i32_0 = arith.constant 0 : i32
    %c0_i32_1 = arith.constant 0 : i32
    %c0_i32_2 = arith.constant 0 : i32
    return %c0_i32, %c0_i32_0, %c0_i32_1 : i32, i32, i32
  }
  func.func @transform_7(%arg0: i32) -> (i32, i32, i32) {
    %c0_i32 = arith.constant 0 : i32
    %c0_i32_0 = arith.constant 0 : i32
    %c0_i32_1 = arith.constant 0 : i32
    %c0_i32_2 = arith.constant 0 : i32
    return %c0_i32, %c0_i32_0, %c0_i32_1 : i32, i32, i32
  }
  func.func @transform_8(%arg0: i32) -> (i32, i32, i32) {
    %c0_i32 = arith.constant 0 : i32
    %c0_i32_0 = arith.constant 0 : i32
    %c0_i32_1 = arith.constant 0 : i32
    %c0_i32_2 = arith.constant 0 : i32
    return %c0_i32, %c0_i32_0, %c0_i32_1 : i32, i32, i32
  }
  func.func @transform_9(%arg0: i32) -> (i32, i32, i32) {
    %c0_i32 = arith.constant 0 : i32
    %c0_i32_0 = arith.constant 0 : i32
    %c0_i32_1 = arith.constant 0 : i32
    %c0_i32_2 = arith.constant 0 : i32
    return %c0_i32, %c0_i32_0, %c0_i32_1 : i32, i32, i32
  }
  func.func @transform_10(%arg0: i32) -> (i32, i32, i32) {
    %c0_i32 = arith.constant 0 : i32
    %c0_i32_0 = arith.constant 0 : i32
    %c0_i32_1 = arith.constant 0 : i32
    %c0_i32_2 = arith.constant 0 : i32
    return %c0_i32, %c0_i32_0, %c0_i32_1 : i32, i32, i32
  }
  func.func @transform_11(%arg0: i32) -> (i32, i32, i32) {
    %c0_i32 = arith.constant 0 : i32
    %c0_i32_0 = arith.constant 0 : i32
    %c0_i32_1 = arith.constant 0 : i32
    %c0_i32_2 = arith.constant 0 : i32
    return %c0_i32, %c0_i32_0, %c0_i32_1 : i32, i32, i32
  }
  func.func @transform_12(%arg0: i32) -> (i32, i32) {
    %c0_i32 = arith.constant 0 : i32
    %c0_i32_0 = arith.constant 0 : i32
    return %arg0, %c0_i32 : i32, i32
  }
}

</mosaic_0001>

<bundles_post_ra>
// kernel: rfa_attention_forward.1
= control target key start
LH: loop header
LB: loop body
LE: loop exit
PB: predicated region body
PF: predicated region fallthrough
CT: control target
= control target key end

     0   :  { %s9478_s0 = inlined_call_operand.vmem [shape: f32[128,128], index: 0, kind: input, shape index: {}]   ;;  %s9479_s1 = inlined_call_operand.hbm [shape: f32[64,128], index: 1, kind: input, shape index: {}]   ;;  %s9480_s2 = inlined_call_operand.hbm [shape: f32[64,128], index: 2, kind: input, shape index: {}]   ;;  %s9481_s3 = inlined_call_operand.hbm [shape: f32[64,64], index: 3, kind: input, shape index: {}]   ;;  %s9482_s4 = inlined_call_operand.hbm [shape: f32[16,128,384], index: 4, kind: input, shape index: {}]   ;;  %s9483_s5 = inlined_call_operand.hbm [shape: f32[16,1,128], index: 5, kind: input, shape index: {}]   ;;  %s9484_s6 = inlined_call_operand.hbm [shape: f32[8,128,128], index: 6, kind: input, shape index: {}]   ;;  %s9485_s7 = inlined_call_operand.hbm [shape: f32[2,1,128], index: 7, kind: input, shape index: {}]   ;;  %s9486_s8 = inlined_call_operand.hbm [shape: f32[2,128,128], index: 8, kind: input, shape index: {}]   ;;  %s9487_s9 = inlined_call_operand.hbm [shape: f32[2,1,128], index: 9, kind: input, shape index: {}]   ;;  %s9488_s10 = inlined_call_operand.hbm [shape: f32[2,128,128], index: 10, kind: input, shape index: {}]   ;;  %s9489_s11 = inlined_call_operand.hbm [shape: f32[2,1,128], index: 11, kind: input, shape index: {}]   ;;  %s9490_s12 = inlined_call_operand.vmem [shape: f32[128,128], index: 12, kind: output, shape index: {}]  }
   0x1   :  { %9513 = sst [smem:[#allocation39_spill]] %s9480_s2 }
   0x2   :  { %9514 = sst [smem:[#allocation40_spill]] %s9482_s4 }
   0x3   :  { %17 = vsyncpa [#allocation3], 0 }
   0x4   :  { %18 = vsyncpa [#allocation5], 0 }
   0x5   :  { %19 = vsyncpa [#allocation8], 0 }
   0x6   :  { %20 = vsyncpa [#allocation11], 0 }
   0x7   :  { %21 = vsyncpa [#allocation14], 0 }
   0x8   :  { %22 = vsyncpa [#allocation17], 0  ;;  %s6991_s21 = smov 0  }
   0x9 LB: > { %s9491_s22 = sadd.s32 4294967295, %s6907_s21   ;;  %p6145_p0 = scmp.ge.s32.totalorder %s6907_s21, 1  ;;  %s6907_s21 = sphi %s6991_s21, %s28_s21  }
   0xa   : > { %p316_p1 = scmp.lt.s32.totalorder %s6907_s21, 3  ;;  %p7001_p2 = scmp.eq.s32.totalorder %s9491_s22, 0 }
   0xb   : > { %s9516_s2 = sld [smem:[#allocation39_spill]]  ;;  %s6909_s13 = smov [#allocation4]  }
   0xc   : > { %p7008_p3 = pnand %p6145_p0, %p316_p1  ;;  %s9518_s4 = sld [smem:[#allocation40_spill]] }
   0xd   : > { %s343_s14 = sshll.u32 %s6909_s13, 4  ;;  %s6910_s16 = smov [#allocation7]   ;;  %s344_s14 = int_to_ptr.vmem [resolvable:$true] %s343_s14 }
   0xe   : > { %p6284_p4 = pneg %p7008_p3  ;;  %s371_s17 = sshll.u32 %s6910_s16, 4  ;;  %s372_s17 = int_to_ptr.vmem [resolvable:$true] %s371_s17 }
   0xf   : > { %s6911_s18 = smov 128   ;;  %s6912_s19 = smov 8  }
  0x10   : > { %p7019_p5 = pnand %p7001_p2, %p6284_p4  ;;  %s397_s25 = sshll.u32 %s9484_s6, 4  ;;  %s398_s25 = int_to_ptr.hbm [resolvable:$true] %s397_s25 }
  0x11   : > { %s341_s26 = sshll.u32 %s9516_s2, 4  ;;  %s6913_s28 = smov 384   ;;  %s342_s26 = int_to_ptr.hbm [resolvable:$true] %s341_s26 }
  0x12   : > { %s369_s30 = sshll.u32 %s9518_s4, 4  ;;  %s6914_s29 = smov 24   ;;  %s370_s30 = int_to_ptr.hbm [resolvable:$true] %s369_s30 }
  0x13   : > { %6290 = dma.hbm_to_vmem [thread:$0]  (!%p7019_p5), %s342_s26, 1024, %s344_s14, [#allocation5], %s6911_s18, %s6911_s18, %s6912_s19  }
  0x14   : > { %6296 = dma.hbm_to_vmem [thread:$0]  (!%p7019_p5), %s370_s30, 98304, %s372_s17, [#allocation8], %s6913_s28, %s6913_s28, %s6914_s29  }
  0x15   : > { %s6915_s13 = smov [#allocation10]   ;;  %s425_s4 = sshll.u32 %s9486_s8, 4  ;;  %s426_s4 = int_to_ptr.hbm [resolvable:$true] %s425_s4 }
  0x16   : > { %s399_s16 = sshll.u32 %s6915_s13, 4  ;;  %s453_s20 = sshll.u32 %s9488_s10, 4  ;;  %s400_s16 = int_to_ptr.vmem [resolvable:$true] %s399_s16  ;;  %s454_s20 = int_to_ptr.hbm [resolvable:$true] %s453_s20 }
  0x17   : > { %6302 = dma.hbm_to_vmem [thread:$0]  (!%p7019_p5), %s398_s25, 16384, %s400_s16, [#allocation11], %s6911_s18, %s6911_s18, %s6912_s19  }
  0x18   : > { %s6916_s30 = smov [#allocation13]   ;;  %s6917_s2 = smov [#allocation16]  }
  0x19   : > { %s427_s17 = sshll.u32 %s6916_s30, 4  ;;  %s455_s22 = sshll.u32 %s6917_s2, 4  ;;  %s428_s17 = int_to_ptr.vmem [resolvable:$true] %s427_s17  ;;  %s456_s22 = int_to_ptr.vmem [resolvable:$true] %s455_s22 }
  0x1a   : > { %6308 = dma.hbm_to_vmem [thread:$0]  (!%p7019_p5), %s426_s4, 4096, %s428_s17, [#allocation14], %s6911_s18, %s6911_s18, %s6912_s19  }
  0x1b   : > { %s327_s25 = sshll.u32 %s9479_s1, 4  ;;  %s355_s16 = sshll.u32 %s9481_s3, 4  ;;  %s328_s25 = int_to_ptr.hbm [resolvable:$true] %s327_s25  ;;  %s356_s16 = int_to_ptr.hbm [resolvable:$true] %s355_s16 }
  0x1c   : > { %6314 = dma.hbm_to_vmem [thread:$0]  (!%p7019_p5), %s454_s20, 4096, %s456_s22, [#allocation17], %s6911_s18, %s6911_s18, %s6912_s19  }
  0x1d   : > { %s6918_s26 = smov [#allocation2]   ;;  %s6919_s14 = smov [#allocation6]  }
  0x1e   : > { %s329_s4 = sshll.u32 %s6918_s26, 4  ;;  %s357_s30 = sshll.u32 %s6919_s14, 4  ;;  %s330_s4 = int_to_ptr.vmem [resolvable:$true] %s329_s4  ;;  %s358_s30 = int_to_ptr.vmem [resolvable:$true] %s357_s30 }
  0x1f   : > { %6287 = dma.hbm_to_vmem [thread:$0]  (!%p7019_p5), %s328_s25, 1024, %s330_s4, [#allocation3], %s6911_s18, %s6911_s18, %s6912_s19  }
  0x20   : > { %s383_s20 = sshll.u32 %s9483_s5, 4  ;;  %s6920_s22 = smov [#allocation9]   ;;  %s384_s20 = int_to_ptr.hbm [resolvable:$true] %s383_s20 }
  0x21   : > { %6293 = dma.hbm_to_vmem [thread:$0]  (!%p7019_p5), %s356_s16, 1024, %s358_s30, [#allocation5], %s6911_s18, %s6911_s18, %s6912_s19  }
  0x22   : > { %s385_s24 = sshll.u32 %s6920_s22, 4  ;;  %s411_s25 = sshll.u32 %s9485_s7, 4  ;;  %s386_s24 = int_to_ptr.vmem [resolvable:$true] %s385_s24  ;;  %s412_s25 = int_to_ptr.hbm [resolvable:$true] %s411_s25 }
  0x23   : > { %s6921_s13 = smov 16   ;;  %s6922_s26 = smov 1  }
  0x24   : > { %6299 = dma.hbm_to_vmem [thread:$0]  (!%p7019_p5), %s384_s20, 256, %s386_s24, [#allocation8], %s6921_s13, %s6921_s13, %s6922_s26  }
  0x25   : > { %s6923_s4 = smov [#allocation12]   ;;  %s439_s18 = sshll.u32 %s9487_s9, 4  ;;  %s440_s18 = int_to_ptr.hbm [resolvable:$true] %s439_s18 }
  0x26   : > { %s413_s14 = sshll.u32 %s6923_s4, 4  ;;  %s467_s30 = sshll.u32 %s9489_s11, 4  ;;  %s414_s14 = int_to_ptr.vmem [resolvable:$true] %s413_s14  ;;  %s468_s30 = int_to_ptr.hbm [resolvable:$true] %s467_s30 }
  0x27   : > { %6305 = dma.hbm_to_vmem [thread:$0]  (!%p7019_p5), %s412_s25, 32, %s414_s14, [#allocation11], %s6921_s13, %s6921_s13, %s6922_s26  }
  0x28   : > { %s6924_s22 = smov [#allocation15]   ;;  %s6925_s20 = smov [#allocation18]  }
  0x29   : > { %s441_s28 = sshll.u32 %s6924_s22, 4  ;;  %s469_s24 = sshll.u32 %s6925_s20, 4  ;;  %s442_s28 = int_to_ptr.vmem [resolvable:$true] %s441_s28  ;;  %s470_s24 = int_to_ptr.vmem [resolvable:$true] %s469_s24 }
  0x2a   : > { %6311 = dma.hbm_to_vmem [thread:$0]  (!%p7019_p5), %s440_s18, 32, %s442_s28, [#allocation14], %s6921_s13, %s6921_s13, %s6922_s26  }
  0x2b   : > { %6317 = dma.hbm_to_vmem [thread:$0]  (!%p7019_p5), %s468_s30, 32, %s470_s24, [#allocation17], %s6921_s13, %s6921_s13, %s6922_s26  }
  0x2c   : > { %494 = sbr.rel (%p7008_p3) target bundleno = 4575 (0x11df), region = 68 }
  0x31   : > { %6882 = dma.done.wait (%p7001_p2), [#allocation3], 1024  }
  0x32   : > { %6884 = vsyncadd (%p7001_p2), [#allocation3], 4294966272 }
  0x33   : > { %6886 = dma.done.wait (%p7001_p2), [#allocation5], 2048  }
  0x34   : > { %6888 = vsyncadd (%p7001_p2), [#allocation5], 4294965248 }
  0x35   : > { %6890 = dma.done.wait (%p7001_p2), [#allocation8], 98560  }
  0x36   : > { %6892 = vsyncadd (%p7001_p2), [#allocation8], 4294868736 }
  0x37   : > { %6894 = dma.done.wait (%p7001_p2), [#allocation11], 16416  }
  0x38   : > { %6896 = vsyncadd (%p7001_p2), [#allocation11], 4294950880 }
  0x39   : > { %6898 = dma.done.wait (%p7001_p2), [#allocation14], 4128  }
  0x3a   : > { %6900 = vsyncadd (%p7001_p2), [#allocation14], 4294963168 }
  0x3b   : > { %6902 = dma.done.wait (%p7001_p2), [#allocation17], 4128  }
  0x3c   : > { %6904 = vsyncadd (%p7001_p2), [#allocation17], 4294963168  ;;  %v676_v0 = vld [vmem:[#allocation7 + $0x168] sm:$0xff]  ;;  %v673_v1 = vld [vmem:[#allocation7 + $0x150] sm:$0xff]  ;;  %s9520_s23 = sadd.s32 4294967295, %s6907_s21   ;;  %vm2948_vm2 = vcmask 523264  }
  0x3d   : > { %679 = vmatpush.msra.mxu0 %v676_v0  ;;  %6208 = vmatpush.msra.mxu2 %v676_v0  ;;  %v677_v2 = vld [vmem:[#allocation7 + $0x170] sm:$0xff]  ;;  %v674_v3 = vld [vmem:[#allocation7 + $0x158] sm:$0xff]  ;;  %v671_v5 = vld [vmem:[#allocation7 + $0x140] sm:$0xff]  ;;  %s6170_s27 = sshll.u32 %s9520_s23, 3 }
  0x3e   : > { %v670_v4 = vld [vmem:[#allocation7 + $0x138] sm:$0xff]  ;;  %6224 = vmatpush.msra.mxu3 %v677_v2  ;;  %720 = vmatpush.msra.mxu1 %v677_v2  ;;  %v667_v6 = vld [vmem:[#allocation7 + $0x120] sm:$0xff]  ;;  %v668_v7 = vld [vmem:[#allocation7 + $0x128] sm:$0xff]  ;;  %p588_p6 = scmp.lt.s32.totalorder %s6170_s27, 15 }
  0x3f   : > { %680 = vmatpush.msra.mxu0 %v673_v1  ;;  %6209 = vmatpush.msra.mxu2 %v673_v1  ;;  %v664_v8 = vld [vmem:[#allocation7 + $0x108] sm:$0xff]  ;;  %v665_v9 = vld [vmem:[#allocation7 + $0x110] sm:$0xff]  ;;  %v662_v11 = vld [vmem:[#allocation7 + $0xf8] sm:$0xff] }
  0x40   : > { %6225 = vmatpush.msra.mxu3 %v674_v3  ;;  %721 = vmatpush.msra.mxu1 %v674_v3  ;;  %v661_v10 = vld [vmem:[#allocation7 + $0xf0] sm:$0xff]  ;;  %v658_v12 = vld [vmem:[#allocation7 + $0xd8] sm:$0xff]  ;;  %v659_v13 = vld [vmem:[#allocation7 + $0xe0] sm:$0xff]  ;;  %s9565_s27 = smov (!%p588_p6, %s6170_s27), 15 }
  0x41   : > { %681 = vmatpush.msra.mxu0 %v670_v4  ;;  %6210 = vmatpush.msra.mxu2 %v670_v4  ;;  %v655_v14 = vld [vmem:[#allocation7 + $0xc0] sm:$0xff]  ;;  %v656_v15 = vld [vmem:[#allocation7 + $0xc8] sm:$0xff]  ;;  %v649_v17 = vld [vmem:[#allocation7 + $0x90] sm:$0xff]  ;;  %s6171_s15 = sshll.u32 %s9565_s27, 3 }
  0x42   : > { %6226 = vmatpush.msra.mxu3 %v671_v5  ;;  %722 = vmatpush.msra.mxu1 %v671_v5  ;;  %v652_v16 = vld [vmem:[#allocation7 + $0xa8] sm:$0xff]  ;;  %v653_v18 = vld [vmem:[#allocation7 + $0xb0] sm:$0xff]  ;;  %v646_v19 = vld [vmem:[#allocation7 + $0x78] sm:$0xff]  ;;  %s7126_s13 = scalar_lea.vmem %s9478_s0, %s6171_s15  ;;  %s9446_s14 = scalar_lea.vmem %s9490_s12, %s6171_s15 }
  0x43   : > { %682 = vmatpush.msra.mxu0 %v667_v6  ;;  %6211 = vmatpush.msra.mxu2 %v667_v6  ;;  %v650_v20 = vld [vmem:[#allocation7 + $0x98] sm:$0xff]  ;;  %v643_v21 = vld [vmem:[#allocation7 + $0x60] sm:$0xff]  ;;  %v640_v23 = vld [vmem:[#allocation7 + $0x48] sm:$0xff] }
  0x44   : > { %6227 = vmatpush.msra.mxu3 %v668_v7  ;;  %723 = vmatpush.msra.mxu1 %v668_v7  ;;  %v647_v22 = vld [vmem:[#allocation7 + $0x80] sm:$0xff]  ;;  %v644_v24 = vld [vmem:[#allocation7 + $0x68] sm:$0xff]  ;;  %v641_v25 = vld [vmem:[#allocation7 + $0x50] sm:$0xff] }
  0x45   : > { %683 = vmatpush.msra.mxu0 %v664_v8  ;;  %6212 = vmatpush.msra.mxu2 %v664_v8  ;;  %v637_v26 = vld [vmem:[#allocation7 + $0x30] sm:$0xff]  ;;  %v638_v27 = vld [vmem:[#allocation7 + $0x38] sm:$0xff]  ;;  %v635_v29 = vld [vmem:[#allocation7 + $0x20] sm:$0xff] }
  0x46   : > { %6228 = vmatpush.msra.mxu3 %v665_v9  ;;  %724 = vmatpush.msra.mxu1 %v665_v9  ;;  %v634_v28 = vld [vmem:[#allocation7 + $0x18] sm:$0xff]  ;;  %v631_v30 = vld [vmem:[#allocation7] sm:$0xff]  ;;  %v632_v34 = vld [vmem:[#allocation7 + $0x8] sm:$0xff] }
  0x47   : > { %684 = vmatpush.msra.mxu0 %v661_v10  ;;  %6213 = vmatpush.msra.mxu2 %v661_v10  ;;  %v7129_v31 = vld [vmem:[%s7126_s13] sm:$0xff]  ;;  %v678_v33 = vld [vmem:[#allocation7 + $0x178] sm:$0xff]  ;;  %v672_v36 = vld [vmem:[#allocation7 + $0x148] sm:$0xff] }
  0x48   : > { %6229 = vmatpush.msra.mxu3 %v662_v11  ;;  %725 = vmatpush.msra.mxu1 %v662_v11  ;;  %v7132_v32 = vld [vmem:[%s7126_s13 + $0x20] sm:$0xff]  ;;  %v669_v37 = vld [vmem:[#allocation7 + $0x130] sm:$0xff]  ;;  %v7139_v38 = vld [vmem:[%s7126_s13 + $0x8] sm:$0xff] }
  0x49   : > { %685 = vmatpush.msra.mxu0 %v658_v12  ;;  %6214 = vmatpush.msra.mxu2 %v658_v12  ;;  %v675_v35 = vld [vmem:[#allocation7 + $0x160] sm:$0xff]  ;;  %v7142_v39 = vld [vmem:[%s7126_s13 + $0x28] sm:$0xff]  ;;  %v666_v40 = vld [vmem:[#allocation7 + $0x118] sm:$0xff] }
  0x4a   : > { %6230 = vmatpush.msra.mxu3 %v659_v13  ;;  %726 = vmatpush.msra.mxu1 %v659_v13  ;;  %v663_v41 = vld [vmem:[#allocation7 + $0x100] sm:$0xff]  ;;  %v660_v42 = vld [vmem:[#allocation7 + $0xe8] sm:$0xff]  ;;  %v657_v43 = vld [vmem:[#allocation7 + $0xd0] sm:$0xff] }
  0x4b   : > { %686 = vmatpush.msra.mxu0 %v655_v14  ;;  %6215 = vmatpush.msra.mxu2 %v655_v14  ;;  %v7149_v44 = vld [vmem:[%s7126_s13 + $0x10] sm:$0xff]  ;;  %v654_v46 = vld [vmem:[#allocation7 + $0xb8] sm:$0xff]  ;;  %v651_v47 = vld [vmem:[#allocation7 + $0xa0] sm:$0xff] }
  0x4c   : > { %6231 = vmatpush.msra.mxu3 %v656_v15  ;;  %727 = vmatpush.msra.mxu1 %v656_v15  ;;  %v7152_v45 = vld [vmem:[%s7126_s13 + $0x30] sm:$0xff]  ;;  %v648_v48 = vld [vmem:[#allocation7 + $0x88] sm:$0xff]  ;;  %v7159_v50 = vld [vmem:[%s7126_s13 + $0x18] sm:$0xff] }
  0x4d   : > { %687 = vmatpush.msra.mxu0 %v652_v16  ;;  %6216 = vmatpush.msra.mxu2 %v652_v16  ;;  %v645_v49 = vld [vmem:[#allocation7 + $0x70] sm:$0xff]  ;;  %v7162_v51 = vld [vmem:[%s7126_s13 + $0x38] sm:$0xff]  ;;  %v639_v53 = vld [vmem:[#allocation7 + $0x40] sm:$0xff] }
  0x4e   : > { %6232 = vmatpush.msra.mxu3 %v653_v18  ;;  %728 = vmatpush.msra.mxu1 %v653_v18  ;;  %v642_v52 = vld [vmem:[#allocation7 + $0x58] sm:$0xff]  ;;  %v636_v54 = vld [vmem:[#allocation7 + $0x28] sm:$0xff]  ;;  %v633_v55 = vld [vmem:[#allocation7 + $0x10] sm:$0xff] }
  0x4f   : > { %688 = vmatpush.msra.mxu0 %v649_v17  ;;  %6217 = vmatpush.msra.mxu2 %v649_v17  ;;  %v936_v56 = vld [vmem:[#allocation7 + $0x2e8] sm:$0xff]  ;;  %v937_v57 = vld [vmem:[#allocation7 + $0x2f0] sm:$0xff]  ;;  %v938_v58 = vld [vmem:[#allocation7 + $0x2f8] sm:$0xff] }
  0x50   : > { %6233 = vmatpush.msra.mxu3 %v650_v20  ;;  %729 = vmatpush.msra.mxu1 %v650_v20  ;;  %v933_v59 = vld [vmem:[#allocation7 + $0x2d0] sm:$0xff]  ;;  %v934_v60 = vld [vmem:[#allocation7 + $0x2d8] sm:$0xff]  ;;  %v935_v61 = vld [vmem:[#allocation7 + $0x2e0] sm:$0xff] }
  0x51   : > { %689 = vmatpush.msra.mxu0 %v646_v19  ;;  %6218 = vmatpush.msra.mxu2 %v646_v19  ;;  %v930_v62 = vld [vmem:[#allocation7 + $0x2b8] sm:$0xff]  ;;  %v931_v63 = vld [vmem:[#allocation7 + $0x2c0] sm:$0xff]  ;;  %v932_v0 = vld [vmem:[#allocation7 + $0x2c8] sm:$0xff] }
  0x52   : > { %6234 = vmatpush.msra.mxu3 %v647_v22  ;;  %730 = vmatpush.msra.mxu1 %v647_v22  ;;  %v927_v1 = vld [vmem:[#allocation7 + $0x2a0] sm:$0xff]  ;;  %v928_v2 = vld [vmem:[#allocation7 + $0x2a8] sm:$0xff]  ;;  %v929_v3 = vld [vmem:[#allocation7 + $0x2b0] sm:$0xff] }
  0x53   : > { %690 = vmatpush.msra.mxu0 %v643_v21  ;;  %6219 = vmatpush.msra.mxu2 %v643_v21  ;;  %v924_v4 = vld [vmem:[#allocation7 + $0x288] sm:$0xff]  ;;  %v925_v5 = vld [vmem:[#allocation7 + $0x290] sm:$0xff]  ;;  %v926_v6 = vld [vmem:[#allocation7 + $0x298] sm:$0xff] }
  0x54   : > { %6235 = vmatpush.msra.mxu3 %v644_v24  ;;  %731 = vmatpush.msra.mxu1 %v644_v24  ;;  %v921_v7 = vld [vmem:[#allocation7 + $0x270] sm:$0xff]  ;;  %v922_v8 = vld [vmem:[#allocation7 + $0x278] sm:$0xff]  ;;  %v923_v9 = vld [vmem:[#allocation7 + $0x280] sm:$0xff] }
  0x55   : > { %691 = vmatpush.msra.mxu0 %v640_v23  ;;  %6220 = vmatpush.msra.mxu2 %v640_v23  ;;  %v918_v11 = vld [vmem:[#allocation7 + $0x258] sm:$0xff]  ;;  %v919_v12 = vld [vmem:[#allocation7 + $0x260] sm:$0xff]  ;;  %v920_v13 = vld [vmem:[#allocation7 + $0x268] sm:$0xff] }
  0x56   : > { %6236 = vmatpush.msra.mxu3 %v641_v25  ;;  %732 = vmatpush.msra.mxu1 %v641_v25  ;;  %v915_v14 = vld [vmem:[#allocation7 + $0x240] sm:$0xff]  ;;  %v916_v15 = vld [vmem:[#allocation7 + $0x248] sm:$0xff]  ;;  %v917_v16 = vld [vmem:[#allocation7 + $0x250] sm:$0xff] }
  0x57   : > { %692 = vmatpush.msra.mxu0 %v637_v26  ;;  %6221 = vmatpush.msra.mxu2 %v637_v26  ;;  %v912_v17 = vld [vmem:[#allocation7 + $0x228] sm:$0xff]  ;;  %v913_v18 = vld [vmem:[#allocation7 + $0x230] sm:$0xff]  ;;  %v914_v19 = vld [vmem:[#allocation7 + $0x238] sm:$0xff] }
  0x58   : > { %6237 = vmatpush.msra.mxu3 %v638_v27  ;;  %733 = vmatpush.msra.mxu1 %v638_v27  ;;  %v909_v20 = vld [vmem:[#allocation7 + $0x210] sm:$0xff]  ;;  %v910_v21 = vld [vmem:[#allocation7 + $0x218] sm:$0xff]  ;;  %v911_v22 = vld [vmem:[#allocation7 + $0x220] sm:$0xff] }
  0x59   : > { %693 = vmatpush.msra.mxu0 %v634_v28  ;;  %6222 = vmatpush.msra.mxu2 %v634_v28  ;;  %v906_v24 = vld [vmem:[#allocation7 + $0x1f8] sm:$0xff]  ;;  %v907_v25 = vld [vmem:[#allocation7 + $0x200] sm:$0xff]  ;;  %v908_v26 = vld [vmem:[#allocation7 + $0x208] sm:$0xff] }
  0x5a   : > { %6238 = vmatpush.msra.mxu3 %v635_v29  ;;  %734 = vmatpush.msra.mxu1 %v635_v29  ;;  %v903_v27 = vld [vmem:[#allocation7 + $0x1e0] sm:$0xff]  ;;  %v904_v28 = vld [vmem:[#allocation7 + $0x1e8] sm:$0xff]  ;;  %v905_v29 = vld [vmem:[#allocation7 + $0x1f0] sm:$0xff] }
  0x5b   : > { %694 = vmatpush.msra.mxu0 %v631_v30  ;;  %6223 = vmatpush.msra.mxu2 %v631_v30  ;;  %v900_v30 = vld [vmem:[#allocation7 + $0x1c8] sm:$0xff] }
  0x5c   : > { %695 = vmatmul.f32.vlgmr.msra.gmra.mxu0 %v7129_v31  ;;  %707 = vmatmul.f32.vlgmr.msra.gmra.mxu2 %v7132_v32 }
  0x5d   : > { %761 = vmatpush.msrb.mxu2 %v678_v33  ;;  %6239 = vmatpush.msra.mxu3 %v632_v34  ;;  %v901_v33 = vld [vmem:[#allocation7 + $0x1d0] sm:$0xff] }
  0x5e   : > { %748 = vmatmul.f32.vlgmr.msra.gmra.mxu3 %v7132_v32  ;;  %735 = vmatpush.msra.mxu1 %v632_v34  ;;  %v902_v34 = vld [vmem:[#allocation7 + $0x1d8] sm:$0xff] }
  0x5f   : > { %762 = vmatpush.msrb.mxu2 %v675_v35  ;;  %736 = vmatmul.f32.vlgmr.msra.gmra.mxu1 %v7129_v31  ;;  %v897_v35 = vld [vmem:[#allocation7 + $0x1b0] sm:$0xff] }
  0x60   : > { %939 = vmatpush.msrb.mxu3 %v936_v56  ;;  %980 = vmatpush.msrb.mxu0 %v937_v57 }
  0x61   : > { %763 = vmatpush.msrb.mxu2 %v672_v36  ;;  %1021 = vmatpush.msrb.mxu1 %v938_v58  ;;  %v898_v36 = vld [vmem:[#allocation7 + $0x1b8] sm:$0xff] }
  0x62   : > { %940 = vmatpush.msrb.mxu3 %v933_v59  ;;  %981 = vmatpush.msrb.mxu0 %v934_v60  ;;  %v7190_v59 = vld [vmem:[#allocation2] sm:$0xff] }
  0x63   : > { %764 = vmatpush.msrb.mxu2 %v669_v37  ;;  %1022 = vmatpush.msrb.mxu1 %v935_v61  ;;  %v899_v37 = vld [vmem:[#allocation7 + $0x1c0] sm:$0xff] }
  0x64   : > { %698 = vmatmul.f32.gmra.mxu0 %v7139_v38  ;;  %710 = vmatmul.f32.gmra.mxu2 %v7142_v39 }
  0x65   : > { %765 = vmatpush.msrb.mxu2 %v666_v40  ;;  %941 = vmatpush.msrb.mxu3 %v930_v62 }
  0x66   : > { %751 = vmatmul.f32.gmra.mxu3 %v7142_v39  ;;  %982 = vmatpush.msrb.mxu0 %v931_v63 }
  0x67   : > { %766 = vmatpush.msrb.mxu2 %v663_v41  ;;  %739 = vmatmul.f32.gmra.mxu1 %v7139_v38  ;;  %v894_v41 = vld [vmem:[#allocation7 + $0x198] sm:$0xff] }
  0x68   : > { %1023 = vmatpush.msrb.mxu1 %v932_v0  ;;  %942 = vmatpush.msrb.mxu3 %v927_v1 }
  0x69   : > { %767 = vmatpush.msrb.mxu2 %v660_v42  ;;  %983 = vmatpush.msrb.mxu0 %v928_v2  ;;  %v895_v42 = vld [vmem:[#allocation7 + $0x1a0] sm:$0xff] }
  0x6a   : > { %1024 = vmatpush.msrb.mxu1 %v929_v3  ;;  %943 = vmatpush.msrb.mxu3 %v924_v4  ;;  %v7199_v2 = vld [vmem:[#allocation4] sm:$0xff] }
  0x6b   : > { %768 = vmatpush.msrb.mxu2 %v657_v43  ;;  %984 = vmatpush.msrb.mxu0 %v925_v5  ;;  %v896_v43 = vld [vmem:[#allocation7 + $0x1a8] sm:$0xff] }
  0x6c   : > { %701 = vmatmul.f32.gmra.mxu0 %v7149_v44  ;;  %713 = vmatmul.f32.gmra.mxu2 %v7152_v45 }
  0x6d   : > { %769 = vmatpush.msrb.mxu2 %v654_v46  ;;  %1025 = vmatpush.msrb.mxu1 %v926_v6  ;;  %v891_v46 = vld [vmem:[#allocation7 + $0x180] sm:$0xff] }
  0x6e   : > { %754 = vmatmul.f32.gmra.mxu3 %v7152_v45  ;;  %985 = vmatpush.msrb.mxu0 %v922_v8  ;;  %v7208_v8 = vld [vmem:[#allocation2 + $0x8] sm:$0xff] }
  0x6f   : > { %770 = vmatpush.msrb.mxu2 %v651_v47  ;;  %742 = vmatmul.f32.gmra.mxu1 %v7149_v44  ;;  %v892_v47 = vld [vmem:[#allocation7 + $0x188] sm:$0xff] }
  0x70   : > { %944 = vmatpush.msrb.mxu3 %v921_v7  ;;  %1026 = vmatpush.msrb.mxu1 %v923_v9  ;;  %v7206_v7 = vld [vmem:[#allocation9] ss:$0 sm:$0xff] }
  0x71   : > { %771 = vmatpush.msrb.mxu2 %v648_v48  ;;  %986 = vmatpush.msrb.mxu0 %v919_v12  ;;  %v893_v48 = vld [vmem:[#allocation7 + $0x190] sm:$0xff] }
  0x72   : > { %945 = vmatpush.msrb.mxu3 %v918_v11  ;;  %1027 = vmatpush.msrb.mxu1 %v920_v13 }
  0x73   : > { %772 = vmatpush.msrb.mxu2 %v645_v49  ;;  %987 = vmatpush.msrb.mxu0 %v916_v15 }
  0x74   : > { %704 = vmatmul.f32.gmra.mxu0 %v7159_v50  ;;  %716 = vmatmul.f32.gmra.mxu2 %v7162_v51 }
  0x75   : > { %773 = vmatpush.msrb.mxu2 %v642_v52  ;;  %946 = vmatpush.msrb.mxu3 %v915_v14 }
  0x76   : > { %757 = vmatmul.f32.gmra.mxu3 %v7162_v51  ;;  %1028 = vmatpush.msrb.mxu1 %v917_v16 }
  0x77   : > { %774 = vmatpush.msrb.mxu2 %v639_v53  ;;  %745 = vmatmul.f32.gmra.mxu1 %v7159_v50  ;;  %v810_v53 = vlaneseq }
  0x78   : > { %947 = vmatpush.msrb.mxu3 %v912_v17  ;;  %988 = vmatpush.msrb.mxu0 %v913_v18  ;;  %v7214_v18 = vld [vmem:[#allocation4 + $0x8] sm:$0xff] }
  0x79   : > { %775 = vmatpush.msrb.mxu2 %v636_v54  ;;  %1029 = vmatpush.msrb.mxu1 %v914_v19  ;;  %v7184_v54 = vshrl.u32 %v810_v53, 7 }
  0x7a   : > { %948 = vmatpush.msrb.mxu3 %v909_v20  ;;  %989 = vmatpush.msrb.mxu0 %v910_v21 }
  0x7b   : > { %776 = vmatpush.msrb.mxu2 %v633_v55  ;;  %1030 = vmatpush.msrb.mxu1 %v911_v22  ;;  %vm812_vm0 = vcmp.lt.s32.totalorder %v7184_v54, 1  ;;  %vm845_vm1 = vcmp.lt.s32.totalorder %v7184_v54, 7 }
  0x7c   : > { %777 = vmatmul.f32.vlgmr.msrb.gmra.mxu2 %v7129_v31  ;;  %949 = vmatpush.msrb.mxu3 %v906_v24 }
  0x7d   : > { %990 = vmatpush.msrb.mxu0 %v907_v25  ;;  %1031 = vmatpush.msrb.mxu1 %v908_v26  ;;  %v7219_v25 = vld [vmem:[#allocation2 + $0x10] sm:$0xff] }
  0x7e   : > { %950 = vmatpush.msrb.mxu3 %v903_v27 }
  0x7f   : > { %991 = vmatpush.msrb.mxu0 %v904_v28  ;;  %1032 = vmatpush.msrb.mxu1 %v905_v29 }
  0x80   : > { %951 = vmatpush.msrb.mxu3 %v900_v30 }
  0x81   : > { %992 = vmatpush.msrb.mxu0 %v901_v33  ;;  %1033 = vmatpush.msrb.mxu1 %v902_v34 }
  0x82   : > { %952 = vmatpush.msrb.mxu3 %v897_v35  ;;  %v7225_v35 = vld [vmem:[#allocation4 + $0x10] sm:$0xff] }
  0x83   : > { %993 = vmatpush.msrb.mxu0 %v898_v36  ;;  %1034 = vmatpush.msrb.mxu1 %v899_v37 }
  0x84   : > { %780 = vmatmul.f32.gmra.mxu2 %v7139_v38  ;;  %953 = vmatpush.msrb.mxu3 %v894_v41 }
  0x85   : > { %994 = vmatpush.msrb.mxu0 %v895_v42  ;;  %1035 = vmatpush.msrb.mxu1 %v896_v43 }
  0x86   : > { %954 = vmatpush.msrb.mxu3 %v891_v46 }
  0x87   : > { %995 = vmatpush.msrb.mxu0 %v892_v47  ;;  %1036 = vmatpush.msrb.mxu1 %v893_v48  ;;  %v7230_v47 = vld [vmem:[#allocation2 + $0x18] sm:$0xff] }
  0x8c   : > { %783 = vmatmul.f32.gmra.mxu2 %v7149_v44 }
  0x94   : > { %786 = vmatmul.f32.gmra.mxu2 %v7159_v50 }
  0x9c   : > { %789 = vmatmul.f32.gmra.mxu2 %v7132_v32 }
  0xa4   : > { %792 = vmatmul.f32.gmra.mxu2 %v7142_v39 }
  0xac   : > { %795 = vmatmul.f32.gmra.mxu2 %v7152_v45 }
  0xb4   : > { %798 = vmatmul.f32.gmra.mxu2 %v7162_v51 }
  0xd9   : > { %v696_v52 = vpop.f32.mrf.mxu0 }
  0xda   : > { %v802_v56 = vrot.slane %v696_v52, 7 }
  0xdc   : > { %v737_v60 = vpop.f32.mrf.mxu1 }
  0xdf   : > { %v7176_v10 = vpop.f32.mrf.mxu2 }
  0xe1   : > { %v699_v58 = vpop.f32.mrf.mxu0  ;;  %v749_v53 = vpop.f32.mrf.mxu3 }
  0xe2   : > { %v803_v0 = vrot.slane %v699_v58, 7 }
  0xe4   : > { %v740_v9 = vpop.f32.mrf.mxu1  ;;  %v819_v11 = vsel %vm812_vm0, %v802_v56, %v803_v0 }
  0xe5   : > { %v822_v14 = vmul.f32 %v819_v11, %v7208_v8 }
  0xe7   : > { %v7178_v23 = vpop.f32.mrf.mxu2  ;;  %v830_v22 = vadd.f32 %v822_v14, %v740_v9  ;;  %v7242_v9 = vld [vmem:[#allocation2 + $0x20] sm:$0xff] }
  0xe9   : > { %v702_v12 = vpop.f32.mrf.mxu0 }
  0xea   : > { %v804_v17 = vrot.slane %v702_v12, 7 }
  0xec   : > { %v818_v26 = vsel %vm812_vm0, %v803_v0, %v804_v17  ;;  %v743_v28 = vpop.f32.mrf.mxu1 }
  0xed   : > { %v823_v30 = vmul.f32 %v818_v26, %v7219_v25  ;;  %v7254_v26 = vld [vmem:[#allocation2 + $0x28] sm:$0xff] }
  0xef   : > { %v7180_v40 = vpop.f32.mrf.mxu2  ;;  %v831_v43 = vadd.f32 %v823_v30, %v743_v28 }
  0xf1   : > { %v705_v29 = vpop.f32.mrf.mxu0 }
  0xf2   : > { %v805_v41 = vrot.slane %v705_v29, 7 }
  0xf4   : > { %v817_v48 = vsel %vm812_vm0, %v804_v17, %v805_v41  ;;  %v7249_v17 = vld [vmem:[#allocation4 + $0x20] sm:$0xff] }
  0xf7   : > { %v7182_v49 = vpop.f32.mrf.mxu2 }
  0xf8   : > { %v809_v57 = vrot.slane %v7182_v49, 7 }
  0xfa   : > { %v820_v61 = vsel %vm812_vm0, %v809_v57, %v802_v56  ;;  %v824_v56 = vmul.f32 %v817_v48, %v7230_v47  ;;  %v7266_v48 = vld [vmem:[#allocation2 + $0x30] sm:$0xff] }
  0xfb   : > { %v821_v62 = vmul.f32 %v820_v61, %v7190_v59  ;;  %v746_v61 = vpop.f32.mrf.mxu1 }
  0xfd   : > { %v829_v5 = vadd.f32 %v821_v62, %v737_v60  ;;  %v7236_v62 = vld [vmem:[#allocation4 + $0x18] sm:$0xff] }
  0xff   : > { %v7186_v55 = vpop.f32.mrf.mxu2 }
 0x100   : > { %v837_v1 = vrot.slane %v7186_v55, 1 }
 0x107   : > { %v781_v63 = vpop.f32.mrf.mxu2 }
 0x108   : > { %v838_v3 = vrot.slane %v781_v63, 1 }
 0x10a   : > { %v852_v4 = vsel %vm845_vm1, %v837_v1, %v838_v3 }
 0x10b   : > { %v854_v6 = vmul.f32 %v852_v4, %v7199_v2 }
 0x10d   : > { %v862_v13 = vadd.f32 %v854_v6, %v829_v5  ;;  %v832_v5 = vadd.f32 %v824_v56, %v746_v61 }
 0x10f   : > { %v784_v15 = vpop.f32.mrf.mxu2  ;;  %v874_v16 = vadd.f32 %v7206_v7, %v862_v13 }
 0x110   : > { %v839_v19 = vrot.slane %v784_v15, 1  ;;  %v807_v15 = vrot.slane %v7178_v23, 7 }
 0x111   : > { %v882_v20 = vmax.f32 %v874_v16, 0.0  ;;  %v752_v16 = vpop.f32.mrf.mxu3 }
 0x112   : > { %v851_v21 = vsel %vm845_vm1, %v838_v3, %v839_v19  ;;  %v806_v3 = vrot.slane %v7176_v10, 7 }
 0x113   : > { %v855_v24 = vmul.f32 %v851_v21, %v7214_v18  ;;  %955 = vmatmul.f32.vlgmr.msrb.gmra.mxu3 %v882_v20  ;;  %996 = vmatmul.f32.vlgmr.msrb.gmra.mxu0 %v882_v20 }
 0x114   : > { %1037 = vmatmul.f32.vlgmr.msrb.gmra.mxu1 %v882_v20  ;;  %v816_v11 = vsel %vm812_vm0, %v805_v41, %v806_v3 }
 0x115   : > { %v863_v27 = vadd.f32 %v855_v24, %v830_v22  ;;  %v825_v13 = vmul.f32 %v816_v11, %v7242_v9 }
 0x117   : > { %v787_v33 = vpop.f32.mrf.mxu2  ;;  %v875_v34 = vadd.f32 %v7206_v7, %v863_v27  ;;  %v833_v24 = vadd.f32 %v825_v13, %v749_v53  ;;  %v815_v27 = vsel %vm812_vm0, %v806_v3, %v807_v15 }
 0x118   : > { %v840_v36 = vrot.slane %v787_v33, 1  ;;  %v826_v28 = vmul.f32 %v815_v27, %v7254_v26  ;;  %v808_v33 = vrot.slane %v7180_v40, 7 }
 0x119   : > { %v883_v37 = vmax.f32 %v875_v34, 0.0  ;;  %v7261_v34 = vld [vmem:[#allocation4 + $0x28] sm:$0xff]  ;;  %v755_v41 = vpop.f32.mrf.mxu3 }
 0x11a   : > { %v850_v42 = vsel %vm845_vm1, %v839_v19, %v840_v36  ;;  %v813_v61 = vsel %vm812_vm0, %v808_v33, %v809_v57 }
 0x11b   : > { %v856_v46 = vmul.f32 %v850_v42, %v7225_v35  ;;  %958 = vmatmul.f32.gmra.mxu3 %v883_v37  ;;  %999 = vmatmul.f32.gmra.mxu0 %v883_v37 }
 0x11c   : > { %1040 = vmatmul.f32.gmra.mxu1 %v883_v37 }
 0x11d   : > { %v864_v52 = vadd.f32 %v856_v46, %v831_v43  ;;  %v834_v43 = vadd.f32 %v826_v28, %v752_v16  ;;  %v1207_v28 = vld [vmem:[#allocation7 + $0x458] sm:$0xff] }
 0x11f   : > { %v790_v58 = vpop.f32.mrf.mxu2  ;;  %v876_v60 = vadd.f32 %v7206_v7, %v864_v52  ;;  %v814_v52 = vsel %vm812_vm0, %v807_v15, %v808_v33  ;;  %v1205_v33 = vld [vmem:[#allocation7 + $0x448] sm:$0xff] }
 0x120   : > { %v841_v63 = vrot.slane %v790_v58, 1  ;;  %v827_v53 = vmul.f32 %v814_v52, %v7266_v48 }
 0x121   : > { %v884_v0 = vmax.f32 %v876_v60, 0.0  ;;  %v7272_v60 = vld [vmem:[#allocation2 + $0x38] sm:$0xff]  ;;  %v758_v57 = vpop.f32.mrf.mxu3 }
 0x122   : > { %v849_v4 = vsel %vm845_vm1, %v840_v36, %v841_v63  ;;  %v835_v11 = vadd.f32 %v827_v53, %v755_v41  ;;  %v828_v49 = vmul.f32 %v813_v61, %v7272_v60  ;;  %v1202_v41 = vld [vmem:[#allocation7 + $0x430] sm:$0xff]  ;;  %v1195_v53 = vld [vmem:[#allocation7 + $0x3f8] sm:$0xff]  ;;  %v1192_v61 = vld [vmem:[#allocation7 + $0x3e0] sm:$0xff] }
 0x123   : > { %v857_v6 = vmul.f32 %v849_v4, %v7236_v62  ;;  %961 = vmatmul.f32.gmra.mxu3 %v884_v0  ;;  %1002 = vmatmul.f32.gmra.mxu0 %v884_v0  ;;  %v7280_v4 = vld [vmem:[#allocation4 + $0x38] sm:$0xff] }
 0x124   : > { %1043 = vmatmul.f32.gmra.mxu1 %v884_v0 }
 0x125   : > { %v865_v12 = vadd.f32 %v857_v6, %v832_v5 }
 0x127   : > { %v793_v14 = vpop.f32.mrf.mxu2  ;;  %v877_v10 = vadd.f32 %v7206_v7, %v865_v12 }
 0x128   : > { %v842_v19 = vrot.slane %v793_v14, 1 }
 0x129   : > { %v885_v20 = vmax.f32 %v877_v10, 0.0  ;;  %v836_v10 = vadd.f32 %v828_v49, %v758_v57  ;;  %v1186_v49 = vld [vmem:[#allocation7 + $0x3b0] sm:$0xff] }
 0x12a   : > { %v848_v21 = vsel %vm845_vm1, %v841_v63, %v842_v19  ;;  %v7278_v63 = vld [vmem:[#allocation4 + $0x30] sm:$0xff] }
 0x12b   : > { %v858_v22 = vmul.f32 %v848_v21, %v7249_v17  ;;  %964 = vmatmul.f32.gmra.mxu3 %v885_v20  ;;  %1005 = vmatmul.f32.gmra.mxu0 %v885_v20  ;;  %v1209_v21 = vld [vmem:[#allocation7 + $0x468] sm:$0xff] }
 0x12c   : > { %1046 = vmatmul.f32.gmra.mxu1 %v885_v20  ;;  %1212 = vmatpush.msra.mxu2 %v1209_v21  ;;  %v1177_v21 = vld [vmem:[#allocation7 + $0x368] sm:$0xff] }
 0x12d   : > { %v866_v23 = vadd.f32 %v858_v22, %v833_v24  ;;  %v1210_v22 = vld [vmem:[#allocation7 + $0x470] sm:$0xff]  ;;  %v1211_v24 = vld [vmem:[#allocation7 + $0x478] sm:$0xff] }
 0x12e   : > { %1253 = vmatpush.msra.mxu3 %v1210_v22  ;;  %1294 = vmatpush.msra.mxu0 %v1211_v24  ;;  %v1178_v22 = vld [vmem:[#allocation7 + $0x370] sm:$0xff]  ;;  %v1173_v24 = vld [vmem:[#allocation7 + $0x348] sm:$0xff] }
 0x12f   : > { %v796_v29 = vpop.f32.mrf.mxu2  ;;  %v878_v30 = vadd.f32 %v7206_v7, %v866_v23  ;;  %v1206_v23 = vld [vmem:[#allocation7 + $0x450] sm:$0xff] }
 0x130   : > { %v843_v36 = vrot.slane %v796_v29, 1  ;;  %v1208_v29 = vld [vmem:[#allocation7 + $0x460] sm:$0xff]  ;;  %1213 = vmatpush.msra.mxu2 %v1206_v23  ;;  %1254 = vmatpush.msra.mxu3 %v1207_v28  ;;  %v1174_v23 = vld [vmem:[#allocation7 + $0x350] sm:$0xff]  ;;  %v1175_v28 = vld [vmem:[#allocation7 + $0x358] sm:$0xff] }
 0x131   : > { %v886_v37 = vmax.f32 %v878_v30, 0.0  ;;  %1295 = vmatpush.msra.mxu0 %v1208_v29  ;;  %v1204_v30 = vld [vmem:[#allocation7 + $0x440] sm:$0xff] }
 0x132   : > { %v847_v42 = vsel %vm845_vm1, %v842_v19, %v843_v36  ;;  %1255 = vmatpush.msra.mxu3 %v1204_v30  ;;  %v1171_v30 = vld [vmem:[#allocation7 + $0x338] sm:$0xff] }
 0x133   : > { %v859_v46 = vmul.f32 %v847_v42, %v7261_v34  ;;  %967 = vmatmul.f32.gmra.mxu3 %v886_v37  ;;  %1008 = vmatmul.f32.gmra.mxu0 %v886_v37  ;;  %v1197_v42 = vld [vmem:[#allocation7 + $0x408] sm:$0xff] }
 0x134   : > { %1049 = vmatmul.f32.gmra.mxu1 %v886_v37  ;;  %1296 = vmatpush.msra.mxu0 %v1205_v33  ;;  %v1201_v37 = vld [vmem:[#allocation7 + $0x428] sm:$0xff]  ;;  %v1172_v33 = vld [vmem:[#allocation7 + $0x340] sm:$0xff] }
 0x135   : > { %v867_v40 = vadd.f32 %v859_v46, %v834_v43  ;;  %1256 = vmatpush.msra.mxu3 %v1201_v37  ;;  %v1198_v43 = vld [vmem:[#allocation7 + $0x410] sm:$0xff]  ;;  %v1199_v46 = vld [vmem:[#allocation7 + $0x418] sm:$0xff]  ;;  %v1168_v37 = vld [vmem:[#allocation7 + $0x320] sm:$0xff] }
 0x136   : > { %1297 = vmatpush.msra.mxu0 %v1202_v41 }
 0x137   : > { %v799_v56 = vpop.f32.mrf.mxu2  ;;  %v879_v58 = vadd.f32 %v7206_v7, %v867_v40  ;;  %1257 = vmatpush.msra.mxu3 %v1198_v43  ;;  %v1194_v40 = vld [vmem:[#allocation7 + $0x3f0] sm:$0xff]  ;;  %v1164_v43 = vld [vmem:[#allocation7 + $0x300] sm:$0xff] }
 0x138   : > { %v844_v0 = vrot.slane %v799_v56, 1  ;;  %1298 = vmatpush.msra.mxu0 %v1199_v46  ;;  %v1196_v56 = vld [vmem:[#allocation7 + $0x400] sm:$0xff]  ;;  %v1165_v46 = vld [vmem:[#allocation7 + $0x308] sm:$0xff] }
 0x139   : > { %v887_v3 = vmax.f32 %v879_v58, 0.0  ;;  %1258 = vmatpush.msra.mxu3 %v1195_v53  ;;  %v1191_v58 = vld [vmem:[#allocation7 + $0x3d8] sm:$0xff] }
 0x13a   : > { %v846_v5 = vsel %vm845_vm1, %v843_v36, %v844_v0  ;;  %v853_v6 = vsel %vm845_vm1, %v844_v0, %v837_v1  ;;  %v1200_v36 = vld [vmem:[#allocation7 + $0x420] sm:$0xff]  ;;  %1299 = vmatpush.msra.mxu0 %v1196_v56  ;;  %v1193_v0 = vld [vmem:[#allocation7 + $0x3e8] sm:$0xff] }
 0x13b   : > { %v860_v12 = vmul.f32 %v846_v5, %v7278_v63  ;;  %970 = vmatmul.f32.gmra.mxu3 %v887_v3  ;;  %1011 = vmatmul.f32.gmra.mxu0 %v887_v3  ;;  %v861_v13 = vmul.f32 %v853_v6, %v7280_v4  ;;  %v1189_v5 = vld [vmem:[#allocation7 + $0x3c8] sm:$0xff]  ;;  %v1190_v6 = vld [vmem:[#allocation7 + $0x3d0] sm:$0xff] }
 0x13c   : > { %1052 = vmatmul.f32.gmra.mxu1 %v887_v3  ;;  %1259 = vmatpush.msra.mxu3 %v1192_v61  ;;  %v1188_v3 = vld [vmem:[#allocation7 + $0x3c0] sm:$0xff] }
 0x13d   : > { %v868_v14 = vadd.f32 %v860_v12, %v835_v11  ;;  %v869_v55 = vadd.f32 %v861_v13, %v836_v10  ;;  %1300 = vmatpush.msra.mxu0 %v1193_v0  ;;  %v1185_v11 = vld [vmem:[#allocation7 + $0x3a8] sm:$0xff]  ;;  %v1187_v12 = vld [vmem:[#allocation7 + $0x3b8] sm:$0xff] }
 0x13e   : > { %1260 = vmatpush.msra.mxu3 %v1189_v5  ;;  %v1183_v10 = vld [vmem:[#allocation7 + $0x398] sm:$0xff] }
 0x13f   : > { %v880_v15 = vadd.f32 %v7206_v7, %v868_v14  ;;  %v881_v1 = vadd.f32 %v7206_v7, %v869_v55  ;;  %v1203_v7 = vld [vmem:[#allocation7 + $0x438] sm:$0xff]  ;;  %1301 = vmatpush.msra.mxu0 %v1190_v6  ;;  %v1182_v14 = vld [vmem:[#allocation7 + $0x390] sm:$0xff]  ;;  %v1180_v55 = vld [vmem:[#allocation7 + $0x380] sm:$0xff] }
 0x140   : > { %1214 = vmatpush.msra.mxu2 %v1203_v7  ;;  %1261 = vmatpush.msra.mxu3 %v1186_v49  ;;  %v1170_v7 = vld [vmem:[#allocation7 + $0x330] sm:$0xff] }
 0x141   : > { %v888_v16 = vmax.f32 %v880_v15, 0.0  ;;  %v889_v19 = vmax.f32 %v881_v1, 0.0  ;;  %1302 = vmatpush.msra.mxu0 %v1187_v12  ;;  %v1184_v15 = vld [vmem:[#allocation7 + $0x3a0] sm:$0xff]  ;;  %v1181_v1 = vld [vmem:[#allocation7 + $0x388] sm:$0xff] }
 0x142   : > { %1215 = vmatpush.msra.mxu2 %v1200_v36  ;;  %1262 = vmatpush.msra.mxu3 %v1183_v10  ;;  %v1167_v36 = vld [vmem:[#allocation7 + $0x318] sm:$0xff] }
 0x143   : > { %973 = vmatmul.f32.gmra.mxu3 %v888_v16  ;;  %1014 = vmatmul.f32.gmra.mxu0 %v888_v16 }
 0x144   : > { %1055 = vmatmul.f32.gmra.mxu1 %v888_v16  ;;  %1216 = vmatpush.msra.mxu2 %v1197_v42  ;;  %v1179_v16 = vld [vmem:[#allocation7 + $0x378] sm:$0xff]  ;;  %v1169_v42 = vld [vmem:[#allocation7 + $0x328] sm:$0xff] }
 0x145   : > { %1303 = vmatpush.msra.mxu0 %v1184_v15  ;;  %1263 = vmatpush.msra.mxu3 %v1180_v55 }
 0x146   : > { %1217 = vmatpush.msra.mxu2 %v1194_v40  ;;  %v1166_v40 = vld [vmem:[#allocation7 + $0x310] sm:$0xff] }
 0x147   : > { %1304 = vmatpush.msra.mxu0 %v1181_v1  ;;  %1264 = vmatpush.msra.mxu3 %v1177_v21 }
 0x148   : > { %1218 = vmatpush.msra.mxu2 %v1191_v58 }
 0x149   : > { %1305 = vmatpush.msra.mxu0 %v1178_v22  ;;  %1265 = vmatpush.msra.mxu3 %v1174_v23 }
 0x14a   : > { %1219 = vmatpush.msra.mxu2 %v1188_v3 }
 0x14b   : > { %976 = vmatmul.f32.gmra.mxu3 %v889_v19  ;;  %1017 = vmatmul.f32.gmra.mxu0 %v889_v19 }
 0x14c   : > { %1058 = vmatmul.f32.gmra.mxu1 %v889_v19  ;;  %1220 = vmatpush.msra.mxu2 %v1185_v11  ;;  %v1176_v19 = vld [vmem:[#allocation7 + $0x360] sm:$0xff] }
 0x14d   : > { %1306 = vmatpush.msra.mxu0 %v1175_v28  ;;  %1266 = vmatpush.msra.mxu3 %v1171_v30 }
 0x14e   : > { %1221 = vmatpush.msra.mxu2 %v1182_v14 }
 0x14f   : > { %1307 = vmatpush.msra.mxu0 %v1172_v33  ;;  %1267 = vmatpush.msra.mxu3 %v1168_v37  ;;  %v7332_v33 = vld [vmem:[#allocation9 + $0x1] ss:$0 sm:$0xff] }
 0x150   : > { %1222 = vmatpush.msra.mxu2 %v1179_v16 }
 0x151   : > { %1308 = vmatpush.msra.mxu0 %v1169_v42  ;;  %1268 = vmatpush.msra.mxu3 %v1165_v46 }
 0x152   : > { %1223 = vmatpush.msra.mxu2 %v1176_v19 }
 0x153   : > { %1309 = vmatpush.msra.mxu0 %v1166_v40 }
 0x154   : > { %1224 = vmatpush.msra.mxu2 %v1173_v24 }
 0x156   : > { %1225 = vmatpush.msra.mxu2 %v1170_v7 }
 0x158   : > { %1226 = vmatpush.msra.mxu2 %v1167_v36 }
 0x15a   : > { %1227 = vmatpush.msra.mxu2 %v1164_v43 }
 0x190   : > { %v997_v56 = vpop.f32.mrf.mxu0 }
 0x191   : > { %v7299_v57 = vpop.f32.mrf.mxu1 }
 0x192   : > { %v1094_v12 = vrot.slane %v7299_v57, 1 }
 0x196   : > { %v7293_v20 = vpop.f32.mrf.mxu3 }
 0x197   : > { %v1062_v6 = vrot.slane %v7293_v20, 7 }
 0x198   : > { %v1000_v0 = vpop.f32.mrf.mxu0 }
 0x199   : > { %v1041_v41 = vpop.f32.mrf.mxu1 }
 0x19a   : > { %v1095_v11 = vrot.slane %v1041_v41, 1 }
 0x19c   : > { %v1108_v16 = vsel %vm845_vm1, %v1094_v12, %v1095_v11 }
 0x19d   : > { %v1110_v22 = vmul.f32 %v1108_v16, %v7199_v2 }
 0x19e   : > { %v7295_v27 = vpop.f32.mrf.mxu3 }
 0x19f   : > { %v1063_v3 = vrot.slane %v7295_v27, 7 }
 0x1a0   : > { %v1003_v1 = vpop.f32.mrf.mxu0 }
 0x1a1   : > { %v1044_v58 = vpop.f32.mrf.mxu1  ;;  %v1076_v14 = vsel %vm812_vm0, %v1062_v6, %v1063_v3 }
 0x1a2   : > { %v1096_v10 = vrot.slane %v1044_v58, 1  ;;  %v1079_v27 = vmul.f32 %v1076_v14, %v7208_v8 }
 0x1a4   : > { %v1107_v19 = vsel %vm845_vm1, %v1095_v11, %v1096_v10  ;;  %v1087_v23 = vadd.f32 %v1079_v27, %v1000_v0 }
 0x1a5   : > { %v1111_v28 = vmul.f32 %v1107_v19, %v7214_v18 }
 0x1a6   : > { %v7297_v52 = vpop.f32.mrf.mxu3 }
 0x1a7   : > { %v1064_v21 = vrot.slane %v7297_v52, 7  ;;  %v1119_v42 = vadd.f32 %v1111_v28, %v1087_v23 }
 0x1a9   : > { %v1047_v5 = vpop.f32.mrf.mxu1  ;;  %v1075_v36 = vsel %vm812_vm0, %v1063_v3, %v1064_v21  ;;  %v7352_v3 = vadd.f32 %v7332_v33, %v1119_v42 }
 0x1aa   : > { %v1097_v37 = vrot.slane %v1047_v5, 1  ;;  %v1080_v52 = vmul.f32 %v1075_v36, %v7219_v25 }
 0x1ab   : > { %v7359_v14 = vadd.f32 %v7352_v3, %v7139_v38 }
 0x1ac   : > { %v1106_v46 = vsel %vm845_vm1, %v1096_v10, %v1097_v37  ;;  %v1088_v58 = vadd.f32 %v1080_v52, %v1003_v1 }
 0x1ad   : > { %v1112_v0 = vmul.f32 %v1106_v46, %v7225_v35 }
 0x1ae   : > { %v7301_v13 = vpop.f32.mrf.mxu3 }
 0x1af   : > { %v1065_v40 = vrot.slane %v7301_v13, 7  ;;  %v1120_v11 = vadd.f32 %v1112_v0, %v1088_v58 }
 0x1b1   : > { %v1050_v7 = vpop.f32.mrf.mxu1 }
 0x1b2   : > { %v1098_v5 = vrot.slane %v1050_v7, 1 }
 0x1b4   : > { %v1105_v10 = vsel %vm845_vm1, %v1097_v37, %v1098_v5 }
 0x1b5   : > { %v1113_v27 = vmul.f32 %v1105_v10, %v7236_v62 }
 0x1b6   : > { %v7303_v29 = vpop.f32.mrf.mxu3 }
 0x1b7   : > { %v1066_v16 = vrot.slane %v7303_v29, 7 }
 0x1b9   : > { %v1073_v38 = vsel %vm812_vm0, %v1065_v40, %v1066_v16 }
 0x1ba   : > { %v1082_v29 = vmul.f32 %v1073_v38, %v7242_v9 }
 0x1be   : > { %v7305_v53 = vpop.f32.mrf.mxu3 }
 0x1bf   : > { %v1067_v28 = vrot.slane %v7305_v53, 7 }
 0x1c6   : > { %v7307_v61 = vpop.f32.mrf.mxu3 }
 0x1ce   : > { %v7311_v49 = vpop.f32.mrf.mxu3 }
 0x1cf   : > { %v1069_v15 = vrot.slane %v7311_v49, 7 }
 0x1d1   : > { %v1077_v20 = vsel %vm812_vm0, %v1069_v15, %v1062_v6  ;;  %v1053_v6 = vpop.f32.mrf.mxu1 }
 0x1d2   : > { %v1078_v55 = vmul.f32 %v1077_v20, %v7190_v59  ;;  %v1099_v19 = vrot.slane %v1053_v6, 1 }
 0x1d4   : > { %v1086_v24 = vadd.f32 %v1078_v55, %v997_v56  ;;  %v1006_v56 = vpop.f32.mrf.mxu0  ;;  %v7369_v55 = vadd.f32 %v7332_v33, %v1120_v11  ;;  %v1104_v23 = vsel %vm845_vm1, %v1098_v5, %v1099_v19 }
 0x1d6   : > { %v1118_v30 = vadd.f32 %v1110_v22, %v1086_v24  ;;  %v7376_v24 = vadd.f32 %v7369_v55, %v7149_v44  ;;  %v1072_v44 = vsel %vm812_vm0, %v1066_v16, %v1067_v28 }
 0x1d7   : > { %v1083_v53 = vmul.f32 %v1072_v44, %v7254_v26  ;;  %v1468_v44 = vld [vmem:[#allocation7 + $0x5f8] sm:$0xff] }
 0x1d8   : > { %v7337_v41 = vadd.f32 %v7332_v33, %v1118_v30  ;;  %v1114_v30 = vmul.f32 %v1104_v23, %v7249_v17  ;;  %1551 = vmatpush.msrb.mxu3 %v1468_v44  ;;  %v1440_v44 = vld [vmem:[#allocation7 + $0x518] sm:$0xff] }
 0x1d9   : > { %v1056_v22 = vpop.f32.mrf.mxu1 }
 0x1da   : > { %v7342_v43 = vadd.f32 %v7337_v41, %v7129_v31  ;;  %v1074_v31 = vsel %vm812_vm0, %v1064_v21, %v1065_v40  ;;  %v1100_v37 = vrot.slane %v1056_v22, 1 }
 0x1db   : > { %v1081_v13 = vmul.f32 %v1074_v31, %v7230_v47 }
 0x1dc   : > { %1228 = vmatmul.f32.vlgmr.msra.gmra.mxu2 %v7342_v43  ;;  %1269 = vmatmul.f32.vlgmr.msra.gmra.mxu3 %v7342_v43  ;;  %v1009_v1 = vpop.f32.mrf.mxu0  ;;  %v1103_v40 = vsel %vm845_vm1, %v1099_v19, %v1100_v37 }
 0x1dd   : > { %1310 = vmatmul.f32.vlgmr.msra.gmra.mxu0 %v7342_v43  ;;  %v1089_v20 = vadd.f32 %v1081_v13, %v1006_v56  ;;  %v1090_v7 = vadd.f32 %v1082_v29, %v1009_v1  ;;  %v1068_v56 = vrot.slane %v7307_v61, 7  ;;  %v1115_v31 = vmul.f32 %v1103_v40, %v7261_v34  ;;  %v1462_v40 = vld [vmem:[#allocation7 + $0x5c8] sm:$0xff] }
 0x1df   : > { %v1121_v21 = vadd.f32 %v1113_v27, %v1089_v20  ;;  %v1122_v52 = vadd.f32 %v1114_v30, %v1090_v7  ;;  %v1466_v7 = vld [vmem:[#allocation7 + $0x5e8] sm:$0xff]  ;;  %v1467_v30 = vld [vmem:[#allocation7 + $0x5f0] sm:$0xff] }
 0x1e0   : > { %1469 = vmatpush.msra.mxu1 %v1466_v7  ;;  %1510 = vmatpush.msrb.mxu2 %v1467_v30  ;;  %v1439_v30 = vld [vmem:[#allocation7 + $0x510] sm:$0xff] }
 0x1e1   : > { %v7386_v36 = vadd.f32 %v7332_v33, %v1121_v21  ;;  %v1059_v58 = vpop.f32.mrf.mxu1  ;;  %v7403_v5 = vadd.f32 %v7332_v33, %v1122_v52  ;;  %v1460_v52 = vld [vmem:[#allocation7 + $0x5b8] sm:$0xff] }
 0x1e2   : > { %v1101_v6 = vrot.slane %v1059_v58, 1  ;;  %v1458_v58 = vld [vmem:[#allocation7 + $0x5a8] sm:$0xff] }
 0x1e3   : > { %v7393_v46 = vadd.f32 %v7386_v36, %v7159_v50  ;;  %v1071_v50 = vsel %vm812_vm0, %v1067_v28, %v1068_v56  ;;  %v7410_v13 = vadd.f32 %v7403_v5, %v7132_v32  ;;  %v1070_v32 = vsel %vm812_vm0, %v1068_v56, %v1069_v15  ;;  %v1457_v56 = vld [vmem:[#allocation7 + $0x5a0] sm:$0xff] }
 0x1e4   : > { %1231 = vmatmul.f32.gmra.mxu2 %v7359_v14  ;;  %1272 = vmatmul.f32.gmra.mxu3 %v7359_v14  ;;  %v1012_v42 = vpop.f32.mrf.mxu0  ;;  %v1084_v61 = vmul.f32 %v1071_v50, %v7266_v48  ;;  %v1102_v16 = vsel %vm845_vm1, %v1100_v37, %v1101_v6  ;;  %v1085_v19 = vmul.f32 %v1070_v32, %v7272_v60  ;;  %v1455_v50 = vld [vmem:[#allocation7 + $0x590] sm:$0xff]  ;;  %v1450_v32 = vld [vmem:[#allocation7 + $0x568] sm:$0xff] }
 0x1e5   : > { %1313 = vmatmul.f32.gmra.mxu0 %v7359_v14  ;;  %v1091_v0 = vadd.f32 %v1083_v53, %v1012_v42  ;;  %v1116_v27 = vmul.f32 %v1102_v16, %v7278_v63  ;;  %v1109_v49 = vsel %vm845_vm1, %v1101_v6, %v1094_v12  ;;  %v1464_v42 = vld [vmem:[#allocation7 + $0x5d8] sm:$0xff]  ;;  %v1461_v53 = vld [vmem:[#allocation7 + $0x5c0] sm:$0xff] }
 0x1e6   : > { %v1117_v23 = vmul.f32 %v1109_v49, %v7280_v4  ;;  %1511 = vmatpush.msrb.mxu2 %v1464_v42  ;;  %v1456_v6 = vld [vmem:[#allocation7 + $0x598] sm:$0xff]  ;;  %v1453_v16 = vld [vmem:[#allocation7 + $0x580] sm:$0xff]  ;;  %v1442_v49 = vld [vmem:[#allocation7 + $0x528] sm:$0xff] }
 0x1e7   : > { %v1123_v11 = vadd.f32 %v1115_v31, %v1091_v0  ;;  %v1459_v0 = vld [vmem:[#allocation7 + $0x5b0] sm:$0xff]  ;;  %v1454_v31 = vld [vmem:[#allocation7 + $0x588] sm:$0xff]  ;;  %v1436_v42 = vld [vmem:[#allocation7 + $0x4f8] sm:$0xff] }
 0x1e8   : > { %1512 = vmatpush.msrb.mxu2 %v1461_v53  ;;  %v1433_v53 = vld [vmem:[#allocation7 + $0x4e0] sm:$0xff] }
 0x1e9   : > { %v7419_v1 = vadd.f32 %v7332_v33, %v1123_v11 }
 0x1ea   : > { %1513 = vmatpush.msrb.mxu2 %v1458_v58  ;;  %v1430_v58 = vld [vmem:[#allocation7 + $0x4c8] sm:$0xff] }
 0x1eb   : > { %v7428_v21 = vadd.f32 %v7419_v1, %v7142_v39 }
 0x1ec   : > { %1234 = vmatmul.f32.gmra.mxu2 %v7376_v24  ;;  %1275 = vmatmul.f32.gmra.mxu3 %v7376_v24  ;;  %v1015_v10 = vpop.f32.mrf.mxu0 }
 0x1ed   : > { %1316 = vmatmul.f32.gmra.mxu0 %v7376_v24  ;;  %v1092_v20 = vadd.f32 %v1084_v61, %v1015_v10  ;;  %1514 = vmatpush.msrb.mxu2 %v1455_v50  ;;  %v1451_v61 = vld [vmem:[#allocation7 + $0x570] sm:$0xff]  ;;  %v1452_v10 = vld [vmem:[#allocation7 + $0x578] sm:$0xff] }
 0x1ef   : > { %v1124_v38 = vadd.f32 %v1116_v27, %v1092_v20  ;;  %1515 = vmatpush.msrb.mxu2 %v1452_v10  ;;  %v1448_v20 = vld [vmem:[#allocation7 + $0x558] sm:$0xff]  ;;  %v1449_v27 = vld [vmem:[#allocation7 + $0x560] sm:$0xff] }
 0x1f0   : > { %v1429_v10 = vld [vmem:[#allocation7 + $0x4c0] sm:$0xff] }
 0x1f1   : > { %v7438_v22 = vadd.f32 %v7332_v33, %v1124_v38  ;;  %1516 = vmatpush.msrb.mxu2 %v1449_v27  ;;  %v1445_v38 = vld [vmem:[#allocation7 + $0x540] sm:$0xff] }
 0x1f3   : > { %v7443_v28 = vadd.f32 %v7438_v22, %v7152_v45 }
 0x1f4   : > { %1237 = vmatmul.f32.gmra.mxu2 %v7393_v46  ;;  %1278 = vmatmul.f32.gmra.mxu3 %v7393_v46  ;;  %v1018_v29 = vpop.f32.mrf.mxu0 }
 0x1f5   : > { %1319 = vmatmul.f32.gmra.mxu0 %v7393_v46  ;;  %v1093_v15 = vadd.f32 %v1085_v19, %v1018_v29  ;;  %v1446_v19 = vld [vmem:[#allocation7 + $0x548] sm:$0xff]  ;;  %v1447_v29 = vld [vmem:[#allocation7 + $0x550] sm:$0xff] }
 0x1f6   : > { %1517 = vmatpush.msrb.mxu2 %v1446_v19  ;;  %v1422_v19 = vld [vmem:[#allocation7 + $0x488] sm:$0xff] }
 0x1f7   : > { %v1125_v39 = vadd.f32 %v1117_v23, %v1093_v15  ;;  %v1443_v15 = vld [vmem:[#allocation7 + $0x530] sm:$0xff]  ;;  %v1444_v23 = vld [vmem:[#allocation7 + $0x538] sm:$0xff] }
 0x1f8   : > { %1518 = vmatpush.msrb.mxu2 %v1443_v15 }
 0x1f9   : > { %v7449_v57 = vadd.f32 %v7332_v33, %v1125_v39  ;;  %v1463_v33 = vld [vmem:[#allocation7 + $0x5d0] sm:$0xff] }
 0x1fa   : > { %1470 = vmatpush.msra.mxu1 %v1463_v33  ;;  %v1441_v33 = vld [vmem:[#allocation7 + $0x520] sm:$0xff]  ;;  %1519 = vmatpush.msrb.mxu2 %v1440_v44 }
 0x1fb   : > { %v7453_v12 = vadd.f32 %v7449_v57, %v7162_v51  ;;  %v1465_v51 = vld [vmem:[#allocation7 + $0x5e0] sm:$0xff] }
 0x1fc   : > { %1240 = vmatmul.f32.gmra.mxu2 %v7410_v13  ;;  %1281 = vmatmul.f32.gmra.mxu3 %v7410_v13 }
 0x1fd   : > { %1322 = vmatmul.f32.gmra.mxu0 %v7410_v13  ;;  %1552 = vmatpush.msrb.mxu3 %v1465_v51  ;;  %v1437_v51 = vld [vmem:[#allocation7 + $0x500] sm:$0xff] }
 0x1fe   : > { %1471 = vmatpush.msra.mxu1 %v1460_v52  ;;  %v1438_v52 = vld [vmem:[#allocation7 + $0x508] sm:$0xff]  ;;  %1520 = vmatpush.msrb.mxu2 %v1437_v51 }
 0x1ff   : > { %1553 = vmatpush.msrb.mxu3 %v1462_v40  ;;  %v1434_v40 = vld [vmem:[#allocation7 + $0x4e8] sm:$0xff] }
 0x200   : > { %1472 = vmatpush.msra.mxu1 %v1457_v56  ;;  %v1435_v56 = vld [vmem:[#allocation7 + $0x4f0] sm:$0xff]  ;;  %1521 = vmatpush.msrb.mxu2 %v1434_v40 }
 0x201   : > { %1554 = vmatpush.msrb.mxu3 %v1459_v0  ;;  %v1431_v0 = vld [vmem:[#allocation7 + $0x4d0] sm:$0xff] }
 0x202   : > { %1473 = vmatpush.msra.mxu1 %v1454_v31  ;;  %v1432_v31 = vld [vmem:[#allocation7 + $0x4d8] sm:$0xff]  ;;  %1522 = vmatpush.msrb.mxu2 %v1431_v0 }
 0x203   : > { %1555 = vmatpush.msrb.mxu3 %v1456_v6  ;;  %v1427_v6 = vld [vmem:[#allocation7 + $0x4b0] sm:$0xff] }
 0x204   : > { %1243 = vmatmul.f32.gmra.mxu2 %v7428_v21  ;;  %1284 = vmatmul.f32.gmra.mxu3 %v7428_v21 }
 0x205   : > { %1325 = vmatmul.f32.gmra.mxu0 %v7428_v21  ;;  %1474 = vmatpush.msra.mxu1 %v1451_v61  ;;  %v1428_v61 = vld [vmem:[#allocation7 + $0x4b8] sm:$0xff] }
 0x206   : > { %1556 = vmatpush.msrb.mxu3 %v1453_v16  ;;  %v1424_v16 = vld [vmem:[#allocation7 + $0x498] sm:$0xff]  ;;  %1523 = vmatpush.msrb.mxu2 %v1428_v61 }
 0x207   : > { %1475 = vmatpush.msra.mxu1 %v1448_v20  ;;  %v1425_v20 = vld [vmem:[#allocation7 + $0x4a0] sm:$0xff] }
 0x208   : > { %1557 = vmatpush.msrb.mxu3 %v1450_v32  ;;  %v1426_v32 = vld [vmem:[#allocation7 + $0x4a8] sm:$0xff]  ;;  %1524 = vmatpush.msrb.mxu2 %v1425_v20 }
 0x209   : > { %1476 = vmatpush.msra.mxu1 %v1445_v38  ;;  %v1421_v38 = vld [vmem:[#allocation7 + $0x480] sm:$0xff] }
 0x20a   : > { %1558 = vmatpush.msrb.mxu3 %v1447_v29  ;;  %v1423_v29 = vld [vmem:[#allocation7 + $0x490] sm:$0xff]  ;;  %1525 = vmatpush.msrb.mxu2 %v1422_v19 }
 0x20b   : > { %1477 = vmatpush.msra.mxu1 %v1442_v49 }
 0x20c   : > { %1246 = vmatmul.f32.gmra.mxu2 %v7443_v28  ;;  %1287 = vmatmul.f32.gmra.mxu3 %v7443_v28 }
 0x20d   : > { %1328 = vmatmul.f32.gmra.mxu0 %v7443_v28  ;;  %1559 = vmatpush.msrb.mxu3 %v1444_v23 }
 0x20e   : > { %1478 = vmatpush.msra.mxu1 %v1439_v30 }
 0x20f   : > { %1560 = vmatpush.msrb.mxu3 %v1441_v33 }
 0x210   : > { %1479 = vmatpush.msra.mxu1 %v1436_v42 }
 0x211   : > { %1561 = vmatpush.msrb.mxu3 %v1438_v52 }
 0x212   : > { %1480 = vmatpush.msra.mxu1 %v1433_v53 }
 0x213   : > { %1562 = vmatpush.msrb.mxu3 %v1435_v56 }
 0x214   : > { %1249 = vmatmul.f32.gmra.mxu2 %v7453_v12  ;;  %1290 = vmatmul.f32.gmra.mxu3 %v7453_v12 }
 0x215   : > { %1331 = vmatmul.f32.gmra.mxu0 %v7453_v12  ;;  %1481 = vmatpush.msra.mxu1 %v1430_v58 }
 0x216   : > { %1563 = vmatpush.msrb.mxu3 %v1432_v31 }
 0x217   : > { %1482 = vmatpush.msra.mxu1 %v1427_v6 }
 0x218   : > { %1564 = vmatpush.msrb.mxu3 %v1429_v10 }
 0x219   : > { %1483 = vmatpush.msra.mxu1 %v1424_v16 }
 0x21a   : > { %1565 = vmatpush.msrb.mxu3 %v1426_v32 }
 0x21b   : > { %1484 = vmatpush.msra.mxu1 %v1421_v38 }
 0x21c   : > { %1566 = vmatpush.msrb.mxu3 %v1423_v29 }
 0x25a   : > { %v7464_v39 = vpop.f32.mrf.mxu0 }
 0x25b   : > { %v1367_v40 = vrot.slane %v7464_v39, 1  ;;  %v1685_v39 = vld [vmem:[#allocation10 + $0xf8] sm:$0xff] }
 0x25c   : > { %1686 = vmatpush.msrb.mxu0 %v1685_v39 }
 0x25f   : > { %v7458_v45 = vpop.f32.mrf.mxu2  ;;  %v1270_v15 = vpop.f32.mrf.mxu3 }
 0x260   : > { %v1335_v51 = vrot.slane %v7458_v45, 7 }
 0x262   : > { %v1314_v27 = vpop.f32.mrf.mxu0 }
 0x263   : > { %v1368_v52 = vrot.slane %v1314_v27, 1 }
 0x265   : > { %v1381_v31 = vsel %vm845_vm1, %v1367_v40, %v1368_v52 }
 0x266   : > { %v1383_v20 = vmul.f32 %v1381_v31, %v7199_v2  ;;  %v1153_v31 = vld [vmem:[#allocation10 + $0x70] sm:$0xff] }
 0x267   : > { %v7460_v37 = vpop.f32.mrf.mxu2  ;;  %v1273_v44 = vpop.f32.mrf.mxu3 }
 0x268   : > { %v1336_v33 = vrot.slane %v7460_v37, 7 }
 0x26a   : > { %v1317_v23 = vpop.f32.mrf.mxu0  ;;  %v1349_v56 = vsel %vm812_vm0, %v1335_v51, %v1336_v33 }
 0x26b   : > { %v1369_v58 = vrot.slane %v1317_v23, 1  ;;  %v1352_v37 = vmul.f32 %v1349_v56, %v7208_v8  ;;  %v7497_v23 = vld [vmem:[#allocation9 + $0x2] ss:$0 sm:$0xff] }
 0x26d   : > { %v1380_v61 = vsel %vm845_vm1, %v1368_v52, %v1369_v58  ;;  %v1360_v32 = vadd.f32 %v1352_v37, %v1273_v44  ;;  %v1154_v44 = vld [vmem:[#allocation10 + $0x78] sm:$0xff] }
 0x26e   : > { %v1384_v38 = vmul.f32 %v1380_v61, %v7214_v18  ;;  %1727 = vmatpush.msrb.mxu1 %v1154_v44 }
 0x26f   : > { %v7462_v11 = vpop.f32.mrf.mxu2  ;;  %v1276_v16 = vpop.f32.mrf.mxu3 }
 0x270   : > { %v1337_v10 = vrot.slane %v7462_v11, 7  ;;  %v1392_v56 = vadd.f32 %v1384_v38, %v1360_v32  ;;  %1728 = vmatpush.msrb.mxu1 %v1153_v31 }
 0x272   : > { %v1320_v42 = vpop.f32.mrf.mxu0  ;;  %v1348_v8 = vsel %vm812_vm0, %v1336_v33, %v1337_v10 }
 0x273   : > { %v1353_v52 = vmul.f32 %v1348_v8, %v7219_v25 }
 0x277   : > { %v7466_v7 = vpop.f32.mrf.mxu2  ;;  %v1279_v18 = vpop.f32.mrf.mxu3 }
 0x27a   : > { %v1323_v19 = vpop.f32.mrf.mxu0 }
 0x27b   : > { %v1371_v37 = vrot.slane %v1323_v19, 1 }
 0x27f   : > { %v7468_v50 = vpop.f32.mrf.mxu2 }
 0x287   : > { %v7470_v49 = vpop.f32.mrf.mxu2 }
 0x28f   : > { %v7472_v30 = vpop.f32.mrf.mxu2 }
 0x297   : > { %v7476_v53 = vpop.f32.mrf.mxu2 }
 0x298   : > { %v1342_v0 = vrot.slane %v7476_v53, 7 }
 0x29a   : > { %v1350_v45 = vsel %vm812_vm0, %v1342_v0, %v1335_v51 }
 0x29b   : > { %v1351_v6 = vmul.f32 %v1350_v45, %v7190_v59  ;;  %v1370_v59 = vrot.slane %v1320_v42, 1  ;;  %v1361_v45 = vadd.f32 %v1353_v52, %v1276_v16  ;;  %v1405_v42 = vadd.f32 %v7497_v23, %v1392_v56 }
 0x29d   : > { %v1359_v27 = vadd.f32 %v1351_v6, %v1270_v15  ;;  %v1379_v2 = vsel %vm845_vm1, %v1369_v58, %v1370_v59  ;;  %v1338_v15 = vrot.slane %v7466_v7, 7  ;;  %v1152_v6 = vld [vmem:[#allocation10 + $0x68] sm:$0xff]  ;;  %v1326_v58 = vpop.f32.mrf.mxu0  ;;  %v1413_v61 = vmax.f32 %v1405_v42, 0.0 }
 0x29e   : > { %v1385_v33 = vmul.f32 %v1379_v2, %v7225_v35  ;;  %1729 = vmatpush.msrb.mxu1 %v1152_v6  ;;  %v1378_v16 = vsel %vm845_vm1, %v1370_v59, %v1371_v37  ;;  %v1339_v35 = vrot.slane %v7468_v50, 7  ;;  %v1148_v59 = vld [vmem:[#allocation10 + $0x48] sm:$0xff]  ;;  %v1147_v2 = vld [vmem:[#allocation10 + $0x40] sm:$0xff] }
 0x29f   : > { %v1391_v29 = vadd.f32 %v1383_v20, %v1359_v27  ;;  %v1347_v25 = vsel %vm812_vm0, %v1337_v10, %v1338_v15  ;;  %v1151_v27 = vld [vmem:[#allocation10 + $0x60] sm:$0xff]  ;;  %v1150_v10 = vld [vmem:[#allocation10 + $0x58] sm:$0xff]  ;;  %v1386_v38 = vmul.f32 %v1378_v16, %v7236_v62 }
 0x2a0   : > { %v1354_v7 = vmul.f32 %v1347_v25, %v7230_v47  ;;  %v1393_v20 = vadd.f32 %v1385_v33, %v1361_v45  ;;  %1730 = vmatpush.msrb.mxu1 %v1151_v27  ;;  %v1149_v47 = vld [vmem:[#allocation10 + $0x50] sm:$0xff]  ;;  %v1346_v8 = vsel %vm812_vm0, %v1338_v15, %v1339_v35  ;;  %v1146_v15 = vld [vmem:[#allocation10 + $0x38] sm:$0xff]  ;;  %v1144_v25 = vld [vmem:[#allocation10 + $0x28] sm:$0xff] }
 0x2a1   : > { %v1404_v51 = vadd.f32 %v7497_v23, %v1391_v29  ;;  %v1282_v29 = vpop.f32.mrf.mxu3  ;;  %v1355_v50 = vmul.f32 %v1346_v8, %v7242_v9  ;;  %v1145_v45 = vld [vmem:[#allocation10 + $0x30] sm:$0xff]  ;;  %v1142_v27 = vld [vmem:[#allocation10 + $0x18] sm:$0xff]  ;;  %v1139_v8 = vld [vmem:[#allocation10] sm:$0xff] }
 0x2a2   : > { %v1362_v32 = vadd.f32 %v1354_v7, %v1279_v18  ;;  %v1406_v19 = vadd.f32 %v7497_v23, %v1393_v20  ;;  %1731 = vmatpush.msrb.mxu1 %v1150_v10  ;;  %v1340_v18 = vrot.slane %v7470_v49, 7  ;;  %v1143_v7 = vld [vmem:[#allocation10 + $0x20] sm:$0xff]  ;;  %v1141_v10 = vld [vmem:[#allocation10 + $0x10] sm:$0xff] }
 0x2a3   : > { %v1412_v11 = vmax.f32 %v1404_v51, 0.0  ;;  %v1372_v51 = vrot.slane %v1326_v58, 1  ;;  %v1363_v44 = vadd.f32 %v1355_v50, %v1282_v29 }
 0x2a4   : > { %1732 = vmatpush.msrb.mxu1 %v1149_v47  ;;  %v1394_v56 = vadd.f32 %v1386_v38, %v1362_v32  ;;  %v1345_v33 = vsel %vm812_vm0, %v1339_v35, %v1340_v18 }
 0x2a5   : > { %1485 = vmatmul.f32.vlgmr.msra.gmra.mxu1 %v1412_v11  ;;  %1526 = vmatmul.f32.vlgmr.msrb.gmra.mxu2 %v1412_v11  ;;  %v1329_v52 = vpop.f32.mrf.mxu0  ;;  %v1377_v62 = vsel %vm845_vm1, %v1371_v37, %v1372_v51  ;;  %v1356_v49 = vmul.f32 %v1345_v33, %v7254_v26  ;;  %v1814_v33 = vld [vmem:[#allocation7 + $0x728] sm:$0xff] }
 0x2a6   : > { %1567 = vmatmul.f32.vlgmr.msrb.gmra.mxu3 %v1412_v11  ;;  %v1414_v11 = vmax.f32 %v1406_v19, 0.0  ;;  %1733 = vmatpush.msrb.mxu1 %v1148_v59  ;;  %v1387_v31 = vmul.f32 %v1377_v62, %v7249_v17  ;;  %v1407_v9 = vadd.f32 %v7497_v23, %v1394_v56  ;;  %v1373_v42 = vrot.slane %v1329_v52, 1  ;;  %v1140_v19 = vld [vmem:[#allocation10 + $0x8] sm:$0xff] }
 0x2a7   : > { %v1341_v17 = vrot.slane %v7472_v30, 7 }
 0x2a8   : > { %1734 = vmatpush.msrb.mxu1 %v1147_v2  ;;  %v1415_v6 = vmax.f32 %v1407_v9, 0.0  ;;  %v1395_v58 = vadd.f32 %v1387_v31, %v1363_v44  ;;  %v1681_v9 = vld [vmem:[#allocation10 + $0xd8] sm:$0xff] }
 0x2a9   : > { %v1285_v37 = vpop.f32.mrf.mxu3  ;;  %v1344_v32 = vsel %vm812_vm0, %v1340_v18, %v1341_v17 }
 0x2aa   : > { %1735 = vmatpush.msrb.mxu1 %v1146_v15  ;;  %v1364_v16 = vadd.f32 %v1356_v49, %v1285_v37  ;;  %v1408_v26 = vadd.f32 %v7497_v23, %v1395_v58  ;;  %v1357_v30 = vmul.f32 %v1344_v32, %v7266_v48  ;;  %v1343_v48 = vsel %vm812_vm0, %v1341_v17, %v1342_v0  ;;  %v1811_v37 = vld [vmem:[#allocation7 + $0x710] sm:$0xff]  ;;  %v1804_v17 = vld [vmem:[#allocation7 + $0x6d8] sm:$0xff] }
 0x2ab   : > { %v1807_v58 = vld [vmem:[#allocation7 + $0x6f0] sm:$0xff] }
 0x2ac   : > { %1736 = vmatpush.msrb.mxu1 %v1145_v45  ;;  %v1416_v47 = vmax.f32 %v1408_v26, 0.0  ;;  %v1813_v45 = vld [vmem:[#allocation7 + $0x720] sm:$0xff]  ;;  %v1799_v32 = vld [vmem:[#allocation7 + $0x6b0] sm:$0xff] }
 0x2ad   : > { %1488 = vmatmul.f32.gmra.mxu1 %v1413_v61  ;;  %1529 = vmatmul.f32.gmra.mxu2 %v1413_v61  ;;  %v1332_v20 = vpop.f32.mrf.mxu0  ;;  %v1676_v26 = vld [vmem:[#allocation10 + $0xb0] sm:$0xff] }
 0x2ae   : > { %1570 = vmatmul.f32.gmra.mxu3 %v1413_v61  ;;  %v1376_v61 = vsel %vm845_vm1, %v1372_v51, %v1373_v42  ;;  %1737 = vmatpush.msrb.mxu1 %v1144_v25  ;;  %v1374_v38 = vrot.slane %v1332_v20, 1  ;;  %v1810_v25 = vld [vmem:[#allocation7 + $0x708] sm:$0xff]  ;;  %v1805_v20 = vld [vmem:[#allocation7 + $0x6e0] sm:$0xff] }
 0x2af   : > { %v1388_v35 = vmul.f32 %v1376_v61, %v7261_v34  ;;  %v1678_v61 = vld [vmem:[#allocation10 + $0xc0] sm:$0xff] }
 0x2b0   : > { %1738 = vmatpush.msrb.mxu1 %v1143_v7  ;;  %v1375_v59 = vsel %vm845_vm1, %v1373_v42, %v1374_v38  ;;  %v1382_v62 = vsel %vm845_vm1, %v1374_v38, %v1367_v40  ;;  %v1684_v40 = vld [vmem:[#allocation10 + $0xf0] sm:$0xff]  ;;  %v1808_v7 = vld [vmem:[#allocation7 + $0x6f8] sm:$0xff] }
 0x2b1   : > { %v1396_v29 = vadd.f32 %v1388_v35, %v1364_v16  ;;  %v1288_v51 = vpop.f32.mrf.mxu3  ;;  %v1389_v50 = vmul.f32 %v1375_v59, %v7278_v63  ;;  %v1390_v53 = vmul.f32 %v1382_v62, %v7280_v4  ;;  %1687 = vmatpush.msrb.mxu0 %v1684_v40  ;;  %v1680_v42 = vld [vmem:[#allocation10 + $0xd0] sm:$0xff]  ;;  %v1802_v35 = vld [vmem:[#allocation7 + $0x6c8] sm:$0xff]  ;;  %v1671_v62 = vld [vmem:[#allocation10 + $0x88] sm:$0xff] }
 0x2b2   : > { %1739 = vmatpush.msrb.mxu1 %v1142_v27  ;;  %v1365_v34 = vadd.f32 %v1357_v30, %v1288_v51  ;;  %v1677_v27 = vld [vmem:[#allocation10 + $0xb8] sm:$0xff]  ;;  %v1801_v16 = vld [vmem:[#allocation7 + $0x6c0] sm:$0xff]  ;;  %v1675_v30 = vld [vmem:[#allocation10 + $0xa8] sm:$0xff] }
 0x2b3   : > { %v1409_v52 = vadd.f32 %v7497_v23, %v1396_v29  ;;  %v1796_v29 = vld [vmem:[#allocation7 + $0x698] sm:$0xff]  ;;  %v1793_v59 = vld [vmem:[#allocation7 + $0x680] sm:$0xff] }
 0x2b4   : > { %1740 = vmatpush.msrb.mxu1 %v1141_v10  ;;  %v1397_v2 = vadd.f32 %v1389_v50, %v1365_v34  ;;  %v1798_v10 = vld [vmem:[#allocation7 + $0x6a8] sm:$0xff]  ;;  %v1792_v51 = vld [vmem:[#allocation7 + $0x678] sm:$0xff]  ;;  %v1789_v50 = vld [vmem:[#allocation7 + $0x660] sm:$0xff] }
 0x2b5   : > { %1491 = vmatmul.f32.gmra.mxu1 %v1414_v11  ;;  %1532 = vmatmul.f32.gmra.mxu2 %v1414_v11  ;;  %v1417_v56 = vmax.f32 %v1409_v52, 0.0  ;;  %v1673_v34 = vld [vmem:[#allocation10 + $0x98] sm:$0xff] }
 0x2b6   : > { %1573 = vmatmul.f32.gmra.mxu3 %v1414_v11  ;;  %1741 = vmatpush.msrb.mxu1 %v1140_v19  ;;  %v1358_v11 = vmul.f32 %v1343_v48, %v7272_v60  ;;  %v1410_v15 = vadd.f32 %v7497_v23, %v1397_v2  ;;  %v1790_v52 = vld [vmem:[#allocation7 + $0x668] sm:$0xff]  ;;  %v1672_v48 = vld [vmem:[#allocation10 + $0x90] sm:$0xff] }
 0x2b8   : > { %1742 = vmatpush.msrb.mxu1 %v1139_v8  ;;  %v1418_v0 = vmax.f32 %v1410_v15, 0.0  ;;  %v1674_v8 = vld [vmem:[#allocation10 + $0xa0] sm:$0xff] }
 0x2b9   : > { %v1291_v18 = vpop.f32.mrf.mxu3 }
 0x2ba   : > { %v1366_v63 = vadd.f32 %v1358_v11, %v1291_v18  ;;  %v1786_v11 = vld [vmem:[#allocation7 + $0x648] sm:$0xff]  ;;  %v1783_v18 = vld [vmem:[#allocation7 + $0x630] sm:$0xff] }
 0x2bc   : > { %v1398_v44 = vadd.f32 %v1390_v53, %v1366_v63  ;;  %v1784_v63 = vld [vmem:[#allocation7 + $0x638] sm:$0xff]  ;;  %v1670_v53 = vld [vmem:[#allocation10 + $0x80] sm:$0xff] }
 0x2bd   : > { %1494 = vmatmul.f32.gmra.mxu1 %v1415_v6  ;;  %1535 = vmatmul.f32.gmra.mxu2 %v1415_v6 }
 0x2be   : > { %1576 = vmatmul.f32.gmra.mxu3 %v1415_v6  ;;  %v1411_v60 = vadd.f32 %v7497_v23, %v1398_v44  ;;  %v1823_v23 = vld [vmem:[#allocation7 + $0x770] sm:$0xff]  ;;  %v1679_v6 = vld [vmem:[#allocation10 + $0xc8] sm:$0xff] }
 0x2bf   : > { %1866 = vmatpush.msra.mxu3 %v1823_v23  ;;  %v1780_v44 = vld [vmem:[#allocation7 + $0x618] sm:$0xff] }
 0x2c0   : > { %v1419_v31 = vmax.f32 %v1411_v60, 0.0  ;;  %v1777_v60 = vld [vmem:[#allocation7 + $0x600] sm:$0xff] }
 0x2c5   : > { %1497 = vmatmul.f32.gmra.mxu1 %v1416_v47  ;;  %1538 = vmatmul.f32.gmra.mxu2 %v1416_v47 }
 0x2c6   : > { %1579 = vmatmul.f32.gmra.mxu3 %v1416_v47  ;;  %v1795_v47 = vld [vmem:[#allocation7 + $0x690] sm:$0xff] }
 0x2cd   : > { %1500 = vmatmul.f32.gmra.mxu1 %v1417_v56  ;;  %1541 = vmatmul.f32.gmra.mxu2 %v1417_v56 }
 0x2ce   : > { %1582 = vmatmul.f32.gmra.mxu3 %v1417_v56  ;;  %v1787_v56 = vld [vmem:[#allocation7 + $0x650] sm:$0xff] }
 0x2d5   : > { %1503 = vmatmul.f32.gmra.mxu1 %v1418_v0  ;;  %1544 = vmatmul.f32.gmra.mxu2 %v1418_v0 }
 0x2d6   : > { %1585 = vmatmul.f32.gmra.mxu3 %v1418_v0  ;;  %v1781_v0 = vld [vmem:[#allocation7 + $0x620] sm:$0xff] }
 0x2dd   : > { %1506 = vmatmul.f32.gmra.mxu1 %v1419_v31  ;;  %1547 = vmatmul.f32.gmra.mxu2 %v1419_v31 }
 0x2de   : > { %1588 = vmatmul.f32.gmra.mxu3 %v1419_v31  ;;  %v1778_v31 = vld [vmem:[#allocation7 + $0x608] sm:$0xff] }
 0x2e5   : > { %1743 = vmatmul.f32.vlgmr.msrb.gmra.mxu1 %v7337_v41  ;;  %v1822_v41 = vld [vmem:[#allocation7 + $0x768] sm:$0xff] }
 0x2e6   : > { %1825 = vmatpush.msra.mxu2 %v1822_v41 }
 0x2ed   : > { %1746 = vmatmul.f32.gmra.mxu1 %v7352_v3 }
 0x2f5   : > { %1749 = vmatmul.f32.gmra.mxu1 %v7369_v55  ;;  %v1683_v55 = vld [vmem:[#allocation10 + $0xe8] sm:$0xff] }
 0x2f6   : > { %1688 = vmatpush.msrb.mxu0 %v1683_v55 }
 0x2fd   : > { %1752 = vmatmul.f32.gmra.mxu1 %v7386_v36  ;;  %v1819_v36 = vld [vmem:[#allocation7 + $0x750] sm:$0xff] }
 0x2fe   : > { %1826 = vmatpush.msra.mxu2 %v1819_v36 }
 0x305   : > { %1755 = vmatmul.f32.gmra.mxu1 %v7403_v5  ;;  %v1820_v5 = vld [vmem:[#allocation7 + $0x758] sm:$0xff] }
 0x306   : > { %1867 = vmatpush.msra.mxu3 %v1820_v5 }
 0x30d   : > { %1758 = vmatmul.f32.gmra.mxu1 %v7419_v1  ;;  %v1682_v1 = vld [vmem:[#allocation10 + $0xe0] sm:$0xff] }
 0x30e   : > { %1689 = vmatpush.msrb.mxu0 %v1682_v1 }
 0x310   : > { %1690 = vmatpush.msrb.mxu0 %v1681_v9 }
 0x312   : > { %1691 = vmatpush.msrb.mxu0 %v1680_v42 }
 0x314   : > { %1692 = vmatpush.msrb.mxu0 %v1679_v6 }
 0x315   : > { %1761 = vmatmul.f32.gmra.mxu1 %v7438_v22  ;;  %v1816_v22 = vld [vmem:[#allocation7 + $0x738] sm:$0xff] }
 0x316   : > { %1827 = vmatpush.msra.mxu2 %v1816_v22  ;;  %1693 = vmatpush.msrb.mxu0 %v1678_v61 }
 0x318   : > { %1828 = vmatpush.msra.mxu2 %v1813_v45  ;;  %1694 = vmatpush.msrb.mxu0 %v1677_v27 }
 0x31a   : > { %1829 = vmatpush.msra.mxu2 %v1810_v25  ;;  %1695 = vmatpush.msrb.mxu0 %v1676_v26 }
 0x31c   : > { %1830 = vmatpush.msra.mxu2 %v1807_v58  ;;  %1696 = vmatpush.msrb.mxu0 %v1675_v30 }
 0x31d   : > { %1764 = vmatmul.f32.gmra.mxu1 %v7449_v57  ;;  %v1817_v57 = vld [vmem:[#allocation7 + $0x740] sm:$0xff] }
 0x31e   : > { %1868 = vmatpush.msra.mxu3 %v1817_v57  ;;  %1831 = vmatpush.msra.mxu2 %v1804_v17  ;;  %v7599_v17 = vld [vmem:[#allocation4] sm:$0xff] }
 0x31f   : > { %1697 = vmatpush.msrb.mxu0 %v1674_v8 }
 0x320   : > { %1869 = vmatpush.msra.mxu3 %v1814_v33  ;;  %1832 = vmatpush.msra.mxu2 %v1801_v16 }
 0x321   : > { %1698 = vmatpush.msrb.mxu0 %v1673_v34  ;;  %v1824_v34 = vld [vmem:[#allocation7 + $0x778] sm:$0xff] }
 0x322   : > { %v7559_v4 = vpop.f32.mrf.mxu1  ;;  %1870 = vmatpush.msra.mxu3 %v1811_v37  ;;  %1833 = vmatpush.msra.mxu2 %v1798_v10  ;;  %v7591_v37 = vld [vmem:[#allocation2] sm:$0xff] }
 0x323   : > { %1699 = vmatpush.msrb.mxu0 %v1672_v48  ;;  %v1592_v57 = vrot.slane %v7559_v4, 7  ;;  %v7605_v10 = vld [vmem:[#allocation9 + $0x3] ss:$0 sm:$0xff] }
 0x324   : > { %1871 = vmatpush.msra.mxu3 %v1808_v7  ;;  %1834 = vmatpush.msra.mxu2 %v1795_v47  ;;  %v7596_v7 = vld [vmem:[#allocation2 + $0x8] sm:$0xff] }
 0x325   : > { %1700 = vmatpush.msrb.mxu0 %v1671_v62 }
 0x326   : > { %1872 = vmatpush.msra.mxu3 %v1805_v20  ;;  %1835 = vmatpush.msra.mxu2 %v1792_v51 }
 0x327   : > { %1701 = vmatpush.msrb.mxu0 %v1670_v53  ;;  %v1815_v53 = vld [vmem:[#allocation7 + $0x730] sm:$0xff] }
 0x328   : > { %1873 = vmatpush.msra.mxu3 %v1802_v35  ;;  %1836 = vmatpush.msra.mxu2 %v1789_v50  ;;  %v1527_v40 = vpop.f32.mrf.mxu2 }
 0x329   : > { %v7565_v38 = vpop.f32.mrf.mxu3  ;;  %1907 = vmatpush.msra.mxu0 %v1824_v34  ;;  %v1791_v34 = vld [vmem:[#allocation7 + $0x670] sm:$0xff] }
 0x32a   : > { %v7561_v3 = vpop.f32.mrf.mxu1  ;;  %1874 = vmatpush.msra.mxu3 %v1799_v32  ;;  %1837 = vmatpush.msra.mxu2 %v1786_v11  ;;  %v1624_v9 = vrot.slane %v7565_v38, 1  ;;  %v7607_v32 = vld [vmem:[#allocation4 + $0x8] sm:$0xff]  ;;  %v1821_v11 = vld [vmem:[#allocation7 + $0x760] sm:$0xff] }
 0x32b   : > { %v1593_v5 = vrot.slane %v7561_v3, 7  ;;  %1908 = vmatpush.msra.mxu0 %v1821_v11 }
 0x32c   : > { %1875 = vmatpush.msra.mxu3 %v1796_v29  ;;  %1838 = vmatpush.msra.mxu2 %v1783_v18  ;;  %v7625_v18 = vld [vmem:[#allocation4 + $0x10] sm:$0xff] }
 0x32d   : > { %v1606_v42 = vsel %vm812_vm0, %v1592_v57, %v1593_v5 }
 0x32e   : > { %1876 = vmatpush.msra.mxu3 %v1793_v59  ;;  %1839 = vmatpush.msra.mxu2 %v1780_v44  ;;  %v1609_v61 = vmul.f32 %v7596_v7, %v1606_v42 }
 0x330   : > { %1877 = vmatpush.msra.mxu3 %v1790_v52  ;;  %1840 = vmatpush.msra.mxu2 %v1777_v60  ;;  %v1530_v55 = vpop.f32.mrf.mxu2  ;;  %v7618_v52 = vld [vmem:[#allocation2 + $0x10] sm:$0xff] }
 0x331   : > { %v1571_v15 = vpop.f32.mrf.mxu3  ;;  %v1617_v29 = vadd.f32 %v1609_v61, %v1530_v55 }
 0x332   : > { %v7563_v49 = vpop.f32.mrf.mxu1  ;;  %1878 = vmatpush.msra.mxu3 %v1787_v56  ;;  %v1625_v1 = vrot.slane %v1571_v15, 1  ;;  %v1818_v15 = vld [vmem:[#allocation7 + $0x748] sm:$0xff] }
 0x333   : > { %v1594_v16 = vrot.slane %v7563_v49, 7  ;;  %1909 = vmatpush.msra.mxu0 %v1818_v15  ;;  %v7670_v15 = vld [vmem:[#allocation2 + $0x28] sm:$0xff] }
 0x334   : > { %1879 = vmatpush.msra.mxu3 %v1784_v63  ;;  %v1638_v25 = vsel %vm845_vm1, %v1624_v9, %v1625_v1 }
 0x335   : > { %v1640_v20 = vmul.f32 %v7599_v17, %v1638_v25  ;;  %v1605_v51 = vsel %vm812_vm0, %v1593_v5, %v1594_v16  ;;  %1910 = vmatpush.msra.mxu0 %v1815_v53  ;;  %v1806_v25 = vld [vmem:[#allocation7 + $0x6e8] sm:$0xff] }
 0x336   : > { %1880 = vmatpush.msra.mxu3 %v1781_v0  ;;  %v1610_v48 = vmul.f32 %v7618_v52, %v1605_v51 }
 0x338   : > { %1881 = vmatpush.msra.mxu3 %v1778_v31  ;;  %v1533_v6 = vpop.f32.mrf.mxu2 }
 0x339   : > { %v1574_v41 = vpop.f32.mrf.mxu3  ;;  %v1618_v0 = vadd.f32 %v1610_v48, %v1533_v6 }
 0x33a   : > { %v7567_v19 = vpop.f32.mrf.mxu1  ;;  %v1626_v45 = vrot.slane %v1574_v41, 1  ;;  %v1812_v41 = vld [vmem:[#allocation7 + $0x718] sm:$0xff] }
 0x33b   : > { %v1595_v56 = vrot.slane %v7567_v19, 7  ;;  %1911 = vmatpush.msra.mxu0 %v1812_v41 }
 0x33c   : > { %v1637_v58 = vsel %vm845_vm1, %v1625_v1, %v1626_v45  ;;  %v1809_v1 = vld [vmem:[#allocation7 + $0x700] sm:$0xff] }
 0x33d   : > { %v1641_v30 = vmul.f32 %v7607_v32, %v1637_v58  ;;  %v1604_v31 = vsel %vm812_vm0, %v1594_v16, %v1595_v56  ;;  %1912 = vmatpush.msra.mxu0 %v1809_v1  ;;  %v1800_v16 = vld [vmem:[#allocation7 + $0x6b8] sm:$0xff] }
 0x33f   : > { %v1649_v49 = vadd.f32 %v1641_v30, %v1617_v29  ;;  %1913 = vmatpush.msra.mxu0 %v1806_v25 }
 0x340   : > { %v1536_v62 = vpop.f32.mrf.mxu2 }
 0x341   : > { %v1577_v36 = vpop.f32.mrf.mxu3 }
 0x342   : > { %v7569_v2 = vpop.f32.mrf.mxu1  ;;  %v1627_v47 = vrot.slane %v1577_v36, 1  ;;  %v7636_v36 = vld [vmem:[#allocation2 + $0x18] sm:$0xff] }
 0x343   : > { %v1611_v5 = vmul.f32 %v7636_v36, %v1604_v31  ;;  %v7676_v31 = vld [vmem:[#allocation4 + $0x28] sm:$0xff] }
 0x344   : > { %v1636_v50 = vsel %vm845_vm1, %v1626_v45, %v1627_v47  ;;  %v7643_v45 = vld [vmem:[#allocation4 + $0x18] sm:$0xff] }
 0x345   : > { %v1642_v63 = vmul.f32 %v7625_v18, %v1636_v50  ;;  %v1619_v58 = vadd.f32 %v1611_v5, %v1536_v62 }
 0x349   : > { %v7603_v35 = vpop.f32.mrf.mxu3 }
 0x34a   : > { %v7571_v39 = vpop.f32.mrf.mxu1  ;;  %v1628_v44 = vrot.slane %v7603_v35, 1 }
 0x34b   : > { %v1597_v29 = vrot.slane %v7571_v39, 7 }
 0x34c   : > { %v1635_v55 = vsel %vm845_vm1, %v1627_v47, %v1628_v44  ;;  %v1797_v47 = vld [vmem:[#allocation7 + $0x6a0] sm:$0xff] }
 0x34d   : > { %v1643_v42 = vmul.f32 %v7643_v45, %v1635_v55  ;;  %v1779_v55 = vld [vmem:[#allocation7 + $0x610] sm:$0xff] }
 0x351   : > { %v1583_v60 = vpop.f32.mrf.mxu3 }
 0x352   : > { %v7573_v23 = vpop.f32.mrf.mxu1  ;;  %v1629_v6 = vrot.slane %v1583_v60, 1  ;;  %v1782_v60 = vld [vmem:[#allocation7 + $0x628] sm:$0xff] }
 0x354   : > { %v1634_v35 = vsel %vm845_vm1, %v1628_v44, %v1629_v6 }
 0x35a   : > { %v7576_v22 = vpop.f32.mrf.mxu1 }
 0x35b   : > { %v1599_v33 = vrot.slane %v7576_v22, 7 }
 0x35d   : > { %v1607_v3 = vsel %vm812_vm0, %v1599_v33, %v1592_v57  ;;  %v1596_v57 = vrot.slane %v7569_v2, 7 }
 0x35e   : > { %v1608_v4 = vmul.f32 %v7591_v37, %v1607_v3  ;;  %v1803_v3 = vld [vmem:[#allocation7 + $0x6d0] sm:$0xff] }
 0x35f   : > { %v1603_v61 = vsel %vm812_vm0, %v1595_v56, %v1596_v57  ;;  %1914 = vmatpush.msra.mxu0 %v1803_v3  ;;  %v1602_v56 = vsel %vm812_vm0, %v1596_v57, %v1597_v29  ;;  %v7687_v3 = vld [vmem:[#allocation2 + $0x30] sm:$0xff] }
 0x360   : > { %v1616_v27 = vadd.f32 %v1608_v4, %v1527_v40  ;;  %v1650_v40 = vadd.f32 %v1642_v63, %v1618_v0  ;;  %v1539_v4 = vpop.f32.mrf.mxu2  ;;  %v1613_v53 = vmul.f32 %v7670_v15, %v1602_v56  ;;  %v1785_v0 = vld [vmem:[#allocation7 + $0x640] sm:$0xff]  ;;  %v2081_v56 = vld [vmem:[#allocation7 + $0x8f8] sm:$0xff] }
 0x361   : > { %1915 = vmatpush.msra.mxu0 %v1800_v16  ;;  %2164 = vmatpush.msrb.mxu3 %v2081_v56  ;;  %v2049_v56 = vld [vmem:[#allocation7 + $0x7f8] sm:$0xff] }
 0x362   : > { %v1648_v26 = vadd.f32 %v1640_v20, %v1616_v27  ;;  %v1586_v20 = vpop.f32.mrf.mxu3  ;;  %v1651_v27 = vadd.f32 %v1643_v42, %v1619_v58 }
 0x363   : > { %1916 = vmatpush.msra.mxu0 %v1797_v47  ;;  %v1630_v50 = vrot.slane %v1586_v20, 1 }
 0x364   : > { %v1661_v8 = vadd.f32 %v7605_v10, %v1648_v26  ;;  %v7653_v26 = vld [vmem:[#allocation2 + $0x20] sm:$0xff]  ;;  %v1664_v51 = vadd.f32 %v7605_v10, %v1651_v27 }
 0x365   : > { %v1612_v30 = vmul.f32 %v7653_v26, %v1603_v61  ;;  %v1633_v63 = vsel %vm845_vm1, %v1629_v6, %v1630_v50  ;;  %v7692_v6 = vld [vmem:[#allocation4 + $0x30] sm:$0xff] }
 0x366   : > { %1702 = vmatmul.f32.vlgmr.msrb.gmra.mxu0 %v1661_v8  ;;  %v7614_v59 = vadd.f32 %v1661_v8, %v7342_v43  ;;  %v1662_v43 = vadd.f32 %v7605_v10, %v1649_v49  ;;  %v1794_v49 = vld [vmem:[#allocation7 + $0x688] sm:$0xff]  ;;  %v7666_v39 = vadd.f32 %v1664_v51, %v7393_v46  ;;  %v1598_v46 = vrot.slane %v7573_v23, 7 }
 0x367   : > { %1917 = vmatpush.msra.mxu0 %v1794_v49  ;;  %v1620_v48 = vadd.f32 %v1612_v30, %v1539_v4  ;;  %v7707_v30 = vld [vmem:[#allocation2 + $0x38] sm:$0xff] }
 0x368   : > { %1841 = vmatmul.f32.vlgmr.msra.gmra.mxu2 %v7614_v59  ;;  %1882 = vmatmul.f32.vlgmr.msra.gmra.mxu3 %v7614_v59  ;;  %v7632_v19 = vadd.f32 %v1662_v43, %v7359_v14  ;;  %v1663_v14 = vadd.f32 %v7605_v10, %v1650_v40  ;;  %v1542_v11 = vpop.f32.mrf.mxu2  ;;  %v1645_v40 = vmul.f32 %v7676_v31, %v1633_v63  ;;  %v2078_v63 = vld [vmem:[#allocation7 + $0x8e0] sm:$0xff] }
 0x369   : > { %1918 = vmatpush.msra.mxu0 %v1791_v34  ;;  %v1621_v1 = vadd.f32 %v1613_v53, %v1542_v11  ;;  %v1601_v57 = vsel %vm812_vm0, %v1597_v29, %v1598_v46  ;;  %v1600_v20 = vsel %vm812_vm0, %v1598_v46, %v1599_v33  ;;  %v7712_v33 = vld [vmem:[#allocation4 + $0x38] sm:$0xff]  ;;  %v2080_v11 = vld [vmem:[#allocation7 + $0x8f0] sm:$0xff]  ;;  %2165 = vmatpush.msrb.mxu3 %v2078_v63  ;;  %v2075_v46 = vld [vmem:[#allocation7 + $0x8c8] sm:$0xff] }
 0x36a   : > { %v7649_v2 = vadd.f32 %v1663_v14, %v7376_v24  ;;  %v7659_v24 = vld [vmem:[#allocation4 + $0x20] sm:$0xff]  ;;  %v1589_v44 = vpop.f32.mrf.mxu3  ;;  %v1614_v4 = vmul.f32 %v7687_v3, %v1601_v57  ;;  %v1615_v47 = vmul.f32 %v7707_v30, %v1600_v20  ;;  %2123 = vmatpush.msrb.mxu2 %v2080_v11  ;;  %v2069_v57 = vld [vmem:[#allocation7 + $0x898] sm:$0xff]  ;;  %v2063_v20 = vld [vmem:[#allocation7 + $0x868] sm:$0xff] }
 0x36b   : > { %v1644_v8 = vmul.f32 %v7659_v24, %v1634_v35  ;;  %v1631_v5 = vrot.slane %v1589_v44, 1  ;;  %v1653_v23 = vadd.f32 %v1645_v40, %v1621_v1  ;;  %2166 = vmatpush.msrb.mxu3 %v2075_v46  ;;  %v2070_v40 = vld [vmem:[#allocation7 + $0x8a0] sm:$0xff]  ;;  %v2068_v1 = vld [vmem:[#allocation7 + $0x890] sm:$0xff]  ;;  %v2043_v46 = vld [vmem:[#allocation7 + $0x7c8] sm:$0xff] }
 0x36c   : > { %v2046_v63 = vld [vmem:[#allocation7 + $0x7e0] sm:$0xff] }
 0x36d   : > { %v1652_v62 = vadd.f32 %v1644_v8, %v1620_v48  ;;  %v1632_v25 = vsel %vm845_vm1, %v1630_v50, %v1631_v5  ;;  %v1639_v35 = vsel %vm845_vm1, %v1631_v5, %v1624_v9  ;;  %v2079_v48 = vld [vmem:[#allocation7 + $0x8e8] sm:$0xff] }
 0x36e   : > { %1705 = vmatmul.f32.gmra.mxu0 %v1662_v43  ;;  %v1788_v43 = vld [vmem:[#allocation7 + $0x658] sm:$0xff]  ;;  %v1646_v58 = vmul.f32 %v7692_v6, %v1632_v25  ;;  %2082 = vmatpush.msra.mxu1 %v2079_v48  ;;  %v2067_v5 = vld [vmem:[#allocation7 + $0x888] sm:$0xff]  ;;  %v2066_v25 = vld [vmem:[#allocation7 + $0x880] sm:$0xff] }
 0x36f   : > { %1919 = vmatpush.msra.mxu0 %v1788_v43  ;;  %v1665_v41 = vadd.f32 %v7605_v10, %v1652_v62  ;;  %v2076_v62 = vld [vmem:[#allocation7 + $0x8d0] sm:$0xff]  ;;  %v2077_v43 = vld [vmem:[#allocation7 + $0x8d8] sm:$0xff] }
 0x370   : > { %1844 = vmatmul.f32.gmra.mxu2 %v7632_v19  ;;  %1885 = vmatmul.f32.gmra.mxu3 %v7632_v19  ;;  %v1545_v42 = vpop.f32.mrf.mxu2 }
 0x371   : > { %1920 = vmatpush.msra.mxu0 %v1785_v0  ;;  %v1622_v61 = vadd.f32 %v1614_v4, %v1545_v42  ;;  %2083 = vmatpush.msra.mxu1 %v2076_v62  ;;  %v2073_v0 = vld [vmem:[#allocation7 + $0x8b8] sm:$0xff]  ;;  %v2050_v62 = vld [vmem:[#allocation7 + $0x800] sm:$0xff] }
 0x372   : > { %2124 = vmatpush.msrb.mxu2 %v2077_v43  ;;  %v2065_v42 = vld [vmem:[#allocation7 + $0x878] sm:$0xff]  ;;  %v2051_v43 = vld [vmem:[#allocation7 + $0x808] sm:$0xff] }
 0x373   : > { %1921 = vmatpush.msra.mxu0 %v1782_v60  ;;  %v1654_v16 = vadd.f32 %v1646_v58, %v1622_v61  ;;  %v2074_v60 = vld [vmem:[#allocation7 + $0x8c0] sm:$0xff]  ;;  %2084 = vmatpush.msra.mxu1 %v2073_v0  ;;  %v2047_v0 = vld [vmem:[#allocation7 + $0x7e8] sm:$0xff] }
 0x374   : > { %2125 = vmatpush.msrb.mxu2 %v2074_v60  ;;  %v2062_v61 = vld [vmem:[#allocation7 + $0x860] sm:$0xff]  ;;  %v2048_v60 = vld [vmem:[#allocation7 + $0x7f0] sm:$0xff] }
 0x375   : > { %1922 = vmatpush.msra.mxu0 %v1779_v55  ;;  %v1667_v29 = vadd.f32 %v7605_v10, %v1654_v16  ;;  %v2072_v55 = vld [vmem:[#allocation7 + $0x8b0] sm:$0xff]  ;;  %2085 = vmatpush.msra.mxu1 %v2070_v40  ;;  %v2058_v16 = vld [vmem:[#allocation7 + $0x840] sm:$0xff] }
 0x376   : > { %1708 = vmatmul.f32.gmra.mxu0 %v1663_v14  ;;  %v7683_v14 = vadd.f32 %v1665_v41, %v7410_v13  ;;  %v1666_v13 = vadd.f32 %v7605_v10, %v1653_v23  ;;  %2167 = vmatpush.msrb.mxu3 %v2072_v55  ;;  %v2064_v23 = vld [vmem:[#allocation7 + $0x870] sm:$0xff] }
 0x377   : > { %v7717_v38 = vadd.f32 %v1667_v29, %v7443_v28  ;;  %2086 = vmatpush.msra.mxu1 %v2067_v5  ;;  %v2044_v40 = vld [vmem:[#allocation7 + $0x7d0] sm:$0xff]  ;;  %v2041_v5 = vld [vmem:[#allocation7 + $0x7b8] sm:$0xff] }
 0x378   : > { %1847 = vmatmul.f32.gmra.mxu2 %v7649_v2  ;;  %1888 = vmatmul.f32.gmra.mxu3 %v7649_v2  ;;  %v7701_v27 = vadd.f32 %v1666_v13, %v7428_v21  ;;  %v1548_v22 = vpop.f32.mrf.mxu2  ;;  %v1647_v21 = vmul.f32 %v7712_v33, %v1639_v35  ;;  %v2059_v35 = vld [vmem:[#allocation7 + $0x848] sm:$0xff]  ;;  %v2040_v55 = vld [vmem:[#allocation7 + $0x7b0] sm:$0xff] }
 0x379   : > { %v1623_v8 = vadd.f32 %v1615_v47, %v1548_v22  ;;  %2168 = vmatpush.msrb.mxu3 %v2069_v57  ;;  %2087 = vmatpush.msra.mxu1 %v2064_v23  ;;  %v2060_v47 = vld [vmem:[#allocation7 + $0x850] sm:$0xff]  ;;  %v2055_v22 = vld [vmem:[#allocation7 + $0x828] sm:$0xff] }
 0x37b   : > { %v1655_v9 = vadd.f32 %v1647_v21, %v1623_v8  ;;  %2169 = vmatpush.msrb.mxu3 %v2066_v25  ;;  %v2056_v21 = vld [vmem:[#allocation7 + $0x830] sm:$0xff]  ;;  %v2038_v25 = vld [vmem:[#allocation7 + $0x7a0] sm:$0xff] }
 0x37c   : > { %v2052_v8 = vld [vmem:[#allocation7 + $0x810] sm:$0xff] }
 0x37d   : > { %2170 = vmatpush.msrb.mxu3 %v2063_v20  ;;  %v2035_v20 = vld [vmem:[#allocation7 + $0x788] sm:$0xff] }
 0x37e   : > { %1711 = vmatmul.f32.gmra.mxu0 %v1664_v51  ;;  %v1668_v51 = vadd.f32 %v7605_v10, %v1655_v9  ;;  %v2053_v9 = vld [vmem:[#allocation7 + $0x818] sm:$0xff] }
 0x37f   : > { %2171 = vmatpush.msrb.mxu3 %v2060_v47 }
 0x380   : > { %1850 = vmatmul.f32.gmra.mxu2 %v7666_v39  ;;  %1891 = vmatmul.f32.gmra.mxu3 %v7666_v39  ;;  %v7723_v49 = vadd.f32 %v1668_v51, %v7453_v12 }
 0x386   : > { %1714 = vmatmul.f32.gmra.mxu0 %v1665_v41  ;;  %v2071_v41 = vld [vmem:[#allocation7 + $0x8a8] sm:$0xff] }
 0x387   : > { %2126 = vmatpush.msrb.mxu2 %v2071_v41  ;;  %v2045_v41 = vld [vmem:[#allocation7 + $0x7d8] sm:$0xff] }
 0x388   : > { %1853 = vmatmul.f32.gmra.mxu2 %v7683_v14  ;;  %1894 = vmatmul.f32.gmra.mxu3 %v7683_v14 }
 0x389   : > { %2127 = vmatpush.msrb.mxu2 %v2068_v1  ;;  %v2042_v1 = vld [vmem:[#allocation7 + $0x7c0] sm:$0xff] }
 0x38b   : > { %2128 = vmatpush.msrb.mxu2 %v2065_v42  ;;  %v2037_v42 = vld [vmem:[#allocation7 + $0x798] sm:$0xff] }
 0x38d   : > { %2129 = vmatpush.msrb.mxu2 %v2062_v61  ;;  %v2034_v61 = vld [vmem:[#allocation7 + $0x780] sm:$0xff] }
 0x38e   : > { %1717 = vmatmul.f32.gmra.mxu0 %v1666_v13  ;;  %v2061_v13 = vld [vmem:[#allocation7 + $0x858] sm:$0xff] }
 0x38f   : > { %2088 = vmatpush.msra.mxu1 %v2061_v13  ;;  %2130 = vmatpush.msrb.mxu2 %v2059_v35  ;;  %v2039_v13 = vld [vmem:[#allocation7 + $0x7a8] sm:$0xff] }
 0x390   : > { %1856 = vmatmul.f32.gmra.mxu2 %v7701_v27  ;;  %1897 = vmatmul.f32.gmra.mxu3 %v7701_v27 }
 0x391   : > { %2089 = vmatpush.msra.mxu1 %v2058_v16  ;;  %2131 = vmatpush.msrb.mxu2 %v2056_v21  ;;  %v2036_v16 = vld [vmem:[#allocation7 + $0x790] sm:$0xff] }
 0x393   : > { %2090 = vmatpush.msra.mxu1 %v2055_v22  ;;  %2132 = vmatpush.msrb.mxu2 %v2053_v9 }
 0x395   : > { %2091 = vmatpush.msra.mxu1 %v2052_v8  ;;  %2133 = vmatpush.msrb.mxu2 %v2050_v62 }
 0x396   : > { %1720 = vmatmul.f32.gmra.mxu0 %v1667_v29  ;;  %v2057_v29 = vld [vmem:[#allocation7 + $0x838] sm:$0xff] }
 0x397   : > { %2172 = vmatpush.msrb.mxu3 %v2057_v29  ;;  %2092 = vmatpush.msra.mxu1 %v2049_v56 }
 0x398   : > { %1859 = vmatmul.f32.gmra.mxu2 %v7717_v38  ;;  %1900 = vmatmul.f32.gmra.mxu3 %v7717_v38 }
 0x399   : > { %2093 = vmatpush.msra.mxu1 %v2046_v63  ;;  %2134 = vmatpush.msrb.mxu2 %v2047_v0 }
 0x39b   : > { %2094 = vmatpush.msra.mxu1 %v2043_v46  ;;  %2135 = vmatpush.msrb.mxu2 %v2044_v40 }
 0x39d   : > { %2095 = vmatpush.msra.mxu1 %v2040_v55  ;;  %2136 = vmatpush.msrb.mxu2 %v2041_v5 }
 0x39e   : > { %1723 = vmatmul.f32.gmra.mxu0 %v1668_v51  ;;  %v2054_v51 = vld [vmem:[#allocation7 + $0x820] sm:$0xff] }
 0x39f   : > { %2173 = vmatpush.msrb.mxu3 %v2054_v51  ;;  %2096 = vmatpush.msra.mxu1 %v2037_v42 }
 0x3a0   : > { %1862 = vmatmul.f32.gmra.mxu2 %v7723_v49  ;;  %1903 = vmatmul.f32.gmra.mxu3 %v7723_v49 }
 0x3a1   : > { %2174 = vmatpush.msrb.mxu3 %v2051_v43  ;;  %2137 = vmatpush.msrb.mxu2 %v2038_v25 }
 0x3a2   : > { %2097 = vmatpush.msra.mxu1 %v2034_v61 }
 0x3a3   : > { %2175 = vmatpush.msrb.mxu3 %v2048_v60  ;;  %2138 = vmatpush.msrb.mxu2 %v2035_v20 }
 0x3a5   : > { %2176 = vmatpush.msrb.mxu3 %v2045_v41  ;;  %v7783_v41 = vld [vmem:[#allocation9 + $0x4] ss:$0 sm:$0xff] }
 0x3a6   : > { %1923 = vmatmul.f32.vlgmr.msra.gmra.mxu0 %v7614_v59 }
 0x3a7   : > { %2177 = vmatpush.msrb.mxu3 %v2042_v1 }
 0x3a9   : > { %2178 = vmatpush.msrb.mxu3 %v2039_v13 }
 0x3ab   : > { %2179 = vmatpush.msrb.mxu3 %v2036_v16 }
 0x3ae   : > { %1926 = vmatmul.f32.gmra.mxu0 %v7632_v19 }
 0x3b6   : > { %1929 = vmatmul.f32.gmra.mxu0 %v7649_v2 }
 0x3be   : > { %1932 = vmatmul.f32.gmra.mxu0 %v7666_v39 }
 0x3c6   : > { %1935 = vmatmul.f32.gmra.mxu0 %v7683_v14 }
 0x3ce   : > { %1938 = vmatmul.f32.gmra.mxu0 %v7701_v27 }
 0x3d6   : > { %1941 = vmatmul.f32.gmra.mxu0 %v7717_v38 }
 0x3de   : > { %1944 = vmatmul.f32.gmra.mxu0 %v7723_v49 }
 0x3e3   : > { %v7735_v28 = vpop.f32.mrf.mxu0 }
 0x3e4   : > { %9521 = vst [vmem:[#allocation25_spill] sm:$0xff] %v7735_v28 }
 0x3eb   : > { %v7737_v12 = vpop.f32.mrf.mxu0  ;;  %v7739_v10 = vpop.f32.mrf.mxu2 }
 0x3ec   : > { %v1883_v22 = vpop.f32.mrf.mxu3  ;;  %v1948_v9 = vrot.slane %v7739_v10, 7 }
 0x3f3   : > { %v7741_v34 = vpop.f32.mrf.mxu0  ;;  %v7743_v50 = vpop.f32.mrf.mxu2 }
 0x3f4   : > { %v1886_v51 = vpop.f32.mrf.mxu3  ;;  %v1949_v63 = vrot.slane %v7743_v50, 7 }
 0x3f6   : > { %v1962_v55 = vsel %vm812_vm0, %v1948_v9, %v1949_v63 }
 0x3f7   : > { %v1965_v50 = vmul.f32 %v7596_v7, %v1962_v55 }
 0x3fb   : > { %v7745_v53 = vpop.f32.mrf.mxu0  ;;  %v7747_v44 = vpop.f32.mrf.mxu2 }
 0x3fc   : > { %v1950_v25 = vrot.slane %v7747_v44, 7 }
 0x403   : > { %v7749_v4 = vpop.f32.mrf.mxu0  ;;  %v7751_v58 = vpop.f32.mrf.mxu2 }
 0x40b   : > { %v7753_v48 = vpop.f32.mrf.mxu0  ;;  %v7755_v11 = vpop.f32.mrf.mxu2 }
 0x413   : > { %v7757_v57 = vpop.f32.mrf.mxu0  ;;  %v7759_v23 = vpop.f32.mrf.mxu2 }
 0x41b   : > { %v7761_v35 = vpop.f32.mrf.mxu0  ;;  %v7763_v47 = vpop.f32.mrf.mxu2 }
 0x423   : > { %v7765_v21 = vpop.f32.mrf.mxu2  ;;  %v7767_v29 = vpop.f32.mrf.mxu0 }
 0x424   : > { %v1955_v8 = vrot.slane %v7765_v21, 7  ;;  %v1980_v0 = vrot.slane %v7767_v29, 1 }
 0x426   : > { %v1963_v56 = vsel %vm812_vm0, %v1955_v8, %v1948_v9 }
 0x427   : > { %v1964_v62 = vmul.f32 %v7591_v37, %v1963_v56  ;;  %v1889_v37 = vpop.f32.mrf.mxu3 }
 0x429   : > { %v1972_v10 = vadd.f32 %v1964_v62, %v1883_v22  ;;  %v1961_v22 = vsel %vm812_vm0, %v1949_v63, %v1950_v25 }
 0x42a   : > { %v1966_v56 = vmul.f32 %v7618_v52, %v1961_v22 }
 0x42b   : > { %v1927_v43 = vpop.f32.mrf.mxu0 }
 0x42c   : > { %v1981_v60 = vrot.slane %v1927_v43, 1  ;;  %v1951_v43 = vrot.slane %v7751_v58, 7 }
 0x42e   : > { %v1994_v46 = vsel %vm845_vm1, %v1980_v0, %v1981_v60  ;;  %v1960_v63 = vsel %vm812_vm0, %v1950_v25, %v1951_v43 }
 0x42f   : > { %v1996_v40 = vmul.f32 %v7599_v17, %v1994_v46  ;;  %v1973_v17 = vadd.f32 %v1965_v50, %v1886_v51  ;;  %v1892_v9 = vpop.f32.mrf.mxu3  ;;  %v1974_v51 = vadd.f32 %v1966_v56, %v1889_v37 }
 0x431   : > { %v2004_v5 = vadd.f32 %v1996_v40, %v1972_v10  ;;  %v1967_v40 = vmul.f32 %v7636_v36, %v1960_v63 }
 0x433   : > { %v2017_v1 = vadd.f32 %v7783_v41, %v2004_v5  ;;  %v1930_v42 = vpop.f32.mrf.mxu0  ;;  %v1952_v5 = vrot.slane %v7755_v11, 7  ;;  %v1975_v37 = vadd.f32 %v1967_v40, %v1892_v9 }
 0x434   : > { %v1982_v13 = vrot.slane %v1930_v42, 1 }
 0x435   : > { %v2025_v61 = vmax.f32 %v2017_v1, 0.0  ;;  %v1959_v25 = vsel %vm812_vm0, %v1951_v43, %v1952_v5 }
 0x436   : > { %v1993_v20 = vsel %vm845_vm1, %v1981_v60, %v1982_v13 }
 0x437   : > { %v1997_v16 = vmul.f32 %v7607_v32, %v1993_v20  ;;  %2098 = vmatmul.f32.vlgmr.msra.gmra.mxu1 %v2025_v61  ;;  %2139 = vmatmul.f32.vlgmr.msrb.gmra.mxu2 %v2025_v61  ;;  %v1895_v50 = vpop.f32.mrf.mxu3 }
 0x438   : > { %2180 = vmatmul.f32.vlgmr.msrb.gmra.mxu3 %v2025_v61  ;;  %v1968_v61 = vmul.f32 %v7653_v26, %v1959_v25 }
 0x439   : > { %v2005_v7 = vadd.f32 %v1997_v16, %v1973_v17  ;;  %v1953_v17 = vrot.slane %v7759_v23, 7 }
 0x43a   : > { %v1976_v9 = vadd.f32 %v1968_v61, %v1895_v50 }
 0x43b   : > { %v1933_v62 = vpop.f32.mrf.mxu0  ;;  %v2018_v44 = vadd.f32 %v7783_v41, %v2005_v7 }
 0x43c   : > { %v1983_v46 = vrot.slane %v1933_v62, 1  ;;  %v1958_v62 = vsel %vm812_vm0, %v1952_v5, %v1953_v17 }
 0x43d   : > { %v2026_v60 = vmax.f32 %v2018_v44, 0.0  ;;  %v1969_v44 = vmul.f32 %v7670_v15, %v1958_v62  ;;  %v2297_v62 = vld [vmem:[#allocation10 + $0x170] sm:$0xff] }
 0x43e   : > { %v1992_v32 = vsel %vm845_vm1, %v1982_v13, %v1983_v46 }
 0x43f   : > { %v1998_v10 = vmul.f32 %v7625_v18, %v1992_v32  ;;  %2101 = vmatmul.f32.gmra.mxu1 %v2026_v60  ;;  %2142 = vmatmul.f32.gmra.mxu2 %v2026_v60  ;;  %v1898_v7 = vpop.f32.mrf.mxu3 }
 0x440   : > { %2183 = vmatmul.f32.gmra.mxu3 %v2026_v60 }
 0x441   : > { %v2006_v52 = vadd.f32 %v1998_v10, %v1974_v51 }
 0x443   : > { %v1936_v55 = vpop.f32.mrf.mxu0  ;;  %v2019_v58 = vadd.f32 %v7783_v41, %v2006_v52 }
 0x444   : > { %v1984_v1 = vrot.slane %v1936_v55, 1 }
 0x445   : > { %v2027_v42 = vmax.f32 %v2019_v58, 0.0 }
 0x446   : > { %v1991_v18 = vsel %vm845_vm1, %v1983_v46, %v1984_v1  ;;  %v1954_v46 = vrot.slane %v7763_v47, 7 }
 0x447   : > { %v1999_v13 = vmul.f32 %v7643_v45, %v1991_v18  ;;  %2104 = vmatmul.f32.gmra.mxu1 %v2027_v42  ;;  %2145 = vmatmul.f32.gmra.mxu2 %v2027_v42  ;;  %v1901_v63 = vpop.f32.mrf.mxu3 }
 0x448   : > { %2186 = vmatmul.f32.gmra.mxu3 %v2027_v42  ;;  %v1957_v52 = vsel %vm812_vm0, %v1953_v17, %v1954_v46  ;;  %v1956_v58 = vsel %vm812_vm0, %v1954_v46, %v1955_v8  ;;  %v2296_v46 = vld [vmem:[#allocation10 + $0x168] sm:$0xff] }
 0x449   : > { %v2007_v36 = vadd.f32 %v1999_v13, %v1975_v37  ;;  %v1970_v40 = vmul.f32 %v7687_v3, %v1957_v52  ;;  %v1971_v18 = vmul.f32 %v7707_v30, %v1956_v58  ;;  %v2398_v52 = vld [vmem:[#allocation7 + $0xa48] sm:$0xff]  ;;  %v2293_v58 = vld [vmem:[#allocation10 + $0x150] sm:$0xff] }
 0x44b   : > { %v1939_v20 = vpop.f32.mrf.mxu0  ;;  %v2020_v11 = vadd.f32 %v7783_v41, %v2007_v36  ;;  %v1978_v42 = vadd.f32 %v1970_v40, %v1901_v63  ;;  %v2397_v63 = vld [vmem:[#allocation7 + $0xa40] sm:$0xff] }
 0x44c   : > { %v1985_v16 = vrot.slane %v1939_v20, 1  ;;  %v7843_v20 = vpop.f32.mrf.mxu1  ;;  %v2393_v40 = vld [vmem:[#allocation7 + $0xa20] sm:$0xff] }
 0x44d   : > { %v2028_v22 = vmax.f32 %v2020_v11, 0.0  ;;  %9522 = vst [vmem:[#allocation26_spill] sm:$0xff] %v7843_v20 }
 0x44e   : > { %v1990_v45 = vsel %vm845_vm1, %v1984_v1, %v1985_v16 }
 0x44f   : > { %v2000_v56 = vmul.f32 %v7659_v24, %v1990_v45  ;;  %2107 = vmatmul.f32.gmra.mxu1 %v2028_v22  ;;  %2148 = vmatmul.f32.gmra.mxu2 %v2028_v22  ;;  %v1977_v24 = vadd.f32 %v1969_v44, %v1898_v7  ;;  %v1904_v13 = vpop.f32.mrf.mxu3  ;;  %v2403_v44 = vld [vmem:[#allocation7 + $0xa70] sm:$0xff] }
 0x450   : > { %2189 = vmatmul.f32.gmra.mxu3 %v2028_v22  ;;  %v1979_v25 = vadd.f32 %v1971_v18, %v1904_v13  ;;  %2446 = vmatpush.msra.mxu2 %v2403_v44  ;;  %v2387_v18 = vld [vmem:[#allocation7 + $0x9f0] sm:$0xff]  ;;  %v2384_v13 = vld [vmem:[#allocation7 + $0x9d8] sm:$0xff] }
 0x451   : > { %v2008_v26 = vadd.f32 %v2000_v56, %v1976_v9 }
 0x453   : > { %v1942_v43 = vpop.f32.mrf.mxu0  ;;  %v2021_v23 = vadd.f32 %v7783_v41, %v2008_v26  ;;  %v2402_v26 = vld [vmem:[#allocation7 + $0xa68] sm:$0xff] }
 0x454   : > { %v1986_v60 = vrot.slane %v1942_v43, 1  ;;  %v7846_v17 = vpop.f32.mrf.mxu1  ;;  %2405 = vmatpush.msrb.mxu1 %v2402_v26  ;;  %v2379_v26 = vld [vmem:[#allocation7 + $0x9b0] sm:$0xff] }
 0x455   : > { %v2029_v32 = vmax.f32 %v2021_v23, 0.0  ;;  %v2404_v23 = vld [vmem:[#allocation7 + $0xa78] sm:$0xff] }
 0x456   : > { %v1989_v51 = vsel %vm845_vm1, %v1985_v16, %v1986_v60  ;;  %2487 = vmatpush.msra.mxu3 %v2404_v23 }
 0x457   : > { %v2001_v10 = vmul.f32 %v7676_v31, %v1989_v51  ;;  %2110 = vmatmul.f32.gmra.mxu1 %v2029_v32  ;;  %2151 = vmatmul.f32.gmra.mxu2 %v2029_v32  ;;  %v2401_v51 = vld [vmem:[#allocation7 + $0xa60] sm:$0xff] }
 0x458   : > { %2192 = vmatmul.f32.gmra.mxu3 %v2029_v32  ;;  %v2400_v32 = vld [vmem:[#allocation7 + $0xa58] sm:$0xff] }
 0x459   : > { %v2009_v15 = vadd.f32 %v2001_v10, %v1977_v24  ;;  %2447 = vmatpush.msra.mxu2 %v2400_v32  ;;  %2488 = vmatpush.msra.mxu3 %v2401_v51  ;;  %v2295_v24 = vld [vmem:[#allocation10 + $0x160] sm:$0xff]  ;;  %v2396_v10 = vld [vmem:[#allocation7 + $0xa38] sm:$0xff] }
 0x45a   : > { %v2375_v32 = vld [vmem:[#allocation7 + $0x990] sm:$0xff]  ;;  %v2376_v51 = vld [vmem:[#allocation7 + $0x998] sm:$0xff] }
 0x45b   : > { %v1945_v55 = vpop.f32.mrf.mxu0  ;;  %v2022_v47 = vadd.f32 %v7783_v41, %v2009_v15  ;;  %v2294_v15 = vld [vmem:[#allocation10 + $0x158] sm:$0xff]  ;;  %2448 = vmatpush.msra.mxu2 %v2397_v63  ;;  %2489 = vmatpush.msra.mxu3 %v2398_v52  ;;  %v2372_v63 = vld [vmem:[#allocation7 + $0x978] sm:$0xff]  ;;  %v2373_v52 = vld [vmem:[#allocation7 + $0x980] sm:$0xff] }
 0x45c   : > { %v1987_v5 = vrot.slane %v1945_v55, 1  ;;  %v2394_v55 = vld [vmem:[#allocation7 + $0xa28] sm:$0xff] }
 0x45d   : > { %v2030_v31 = vmax.f32 %v2022_v47, 0.0  ;;  %v2395_v47 = vld [vmem:[#allocation7 + $0xa30] sm:$0xff]  ;;  %2449 = vmatpush.msra.mxu2 %v2394_v55  ;;  %v2369_v55 = vld [vmem:[#allocation7 + $0x960] sm:$0xff] }
 0x45e   : > { %v1988_v50 = vsel %vm845_vm1, %v1986_v60, %v1987_v5  ;;  %v1995_v1 = vsel %vm845_vm1, %v1987_v5, %v1980_v0  ;;  %v2399_v60 = vld [vmem:[#allocation7 + $0xa50] sm:$0xff]  ;;  %2490 = vmatpush.msra.mxu3 %v2395_v47  ;;  %v2390_v5 = vld [vmem:[#allocation7 + $0xa08] sm:$0xff] }
 0x45f   : > { %v2002_v37 = vmul.f32 %v7692_v6, %v1988_v50  ;;  %2113 = vmatmul.f32.gmra.mxu1 %v2030_v31  ;;  %2154 = vmatmul.f32.gmra.mxu2 %v2030_v31  ;;  %v2003_v21 = vmul.f32 %v7712_v33, %v1995_v1  ;;  %v7848_v33 = vpop.f32.mrf.mxu1  ;;  %v2392_v1 = vld [vmem:[#allocation7 + $0xa18] sm:$0xff]  ;;  %v2370_v47 = vld [vmem:[#allocation7 + $0x968] sm:$0xff] }
 0x460   : > { %2195 = vmatmul.f32.gmra.mxu3 %v2030_v31  ;;  %2406 = vmatpush.msrb.mxu1 %v2399_v60  ;;  %v2391_v31 = vld [vmem:[#allocation7 + $0xa10] sm:$0xff]  ;;  %v2288_v60 = vld [vmem:[#allocation10 + $0x128] sm:$0xff] }
 0x461   : > { %v2010_v8 = vadd.f32 %v2002_v37, %v1978_v42  ;;  %v2011_v29 = vadd.f32 %v2003_v21, %v1979_v25  ;;  %2450 = vmatpush.msra.mxu2 %v2391_v31  ;;  %2491 = vmatpush.msra.mxu3 %v2392_v1  ;;  %v2292_v42 = vld [vmem:[#allocation10 + $0x148] sm:$0xff]  ;;  %v2389_v21 = vld [vmem:[#allocation7 + $0xa00] sm:$0xff]  ;;  %v2366_v31 = vld [vmem:[#allocation7 + $0x948] sm:$0xff] }
 0x462   : > { %2407 = vmatpush.msrb.mxu1 %v2396_v10  ;;  %v2388_v37 = vld [vmem:[#allocation7 + $0x9f8] sm:$0xff]  ;;  %v2385_v25 = vld [vmem:[#allocation7 + $0x9e0] sm:$0xff]  ;;  %v2287_v10 = vld [vmem:[#allocation10 + $0x120] sm:$0xff] }
 0x463   : > { %v2023_v36 = vadd.f32 %v7783_v41, %v2010_v8  ;;  %v2024_v0 = vadd.f32 %v7783_v41, %v2011_v29  ;;  %v2298_v41 = vld [vmem:[#allocation10 + $0x178] sm:$0xff]  ;;  %2451 = vmatpush.msra.mxu2 %v2388_v37  ;;  %2492 = vmatpush.msra.mxu3 %v2389_v21  ;;  %v2291_v8 = vld [vmem:[#allocation10 + $0x140] sm:$0xff]  ;;  %v2381_v29 = vld [vmem:[#allocation7 + $0x9c0] sm:$0xff] }
 0x464   : > { %2299 = vmatpush.msrb.mxu0 %v2298_v41  ;;  %2408 = vmatpush.msrb.mxu1 %v2393_v40  ;;  %v2289_v41 = vld [vmem:[#allocation10 + $0x130] sm:$0xff]  ;;  %v2286_v40 = vld [vmem:[#allocation10 + $0x118] sm:$0xff]  ;;  %v2367_v1 = vld [vmem:[#allocation7 + $0x950] sm:$0xff] }
 0x465   : > { %v2031_v61 = vmax.f32 %v2023_v36, 0.0  ;;  %v2032_v11 = vmax.f32 %v2024_v0, 0.0  ;;  %v2386_v36 = vld [vmem:[#allocation7 + $0x9e8] sm:$0xff]  ;;  %2452 = vmatpush.msra.mxu2 %v2385_v25  ;;  %v2284_v37 = vld [vmem:[#allocation10 + $0x108] sm:$0xff]  ;;  %v2363_v21 = vld [vmem:[#allocation7 + $0x930] sm:$0xff] }
 0x466   : > { %2300 = vmatpush.msrb.mxu0 %v2297_v62  ;;  %2409 = vmatpush.msrb.mxu1 %v2390_v5  ;;  %v2382_v0 = vld [vmem:[#allocation7 + $0x9c8] sm:$0xff]  ;;  %v2285_v5 = vld [vmem:[#allocation10 + $0x110] sm:$0xff] }
 0x467   : > { %2116 = vmatmul.f32.gmra.mxu1 %v2031_v61  ;;  %2157 = vmatmul.f32.gmra.mxu2 %v2031_v61  ;;  %v7850_v16 = vpop.f32.mrf.mxu1  ;;  %v2378_v62 = vld [vmem:[#allocation7 + $0x9a8] sm:$0xff]  ;;  %v2365_v25 = vld [vmem:[#allocation7 + $0x940] sm:$0xff] }
 0x468   : > { %2198 = vmatmul.f32.gmra.mxu3 %v2031_v61  ;;  %2301 = vmatpush.msrb.mxu0 %v2296_v46  ;;  %v2290_v61 = vld [vmem:[#allocation10 + $0x138] sm:$0xff]  ;;  %v2380_v46 = vld [vmem:[#allocation7 + $0x9b8] sm:$0xff] }
 0x469   : > { %2410 = vmatpush.msrb.mxu1 %v2387_v18  ;;  %2493 = vmatpush.msra.mxu3 %v2386_v36  ;;  %v2368_v18 = vld [vmem:[#allocation7 + $0x958] sm:$0xff]  ;;  %v2283_v36 = vld [vmem:[#allocation10 + $0x100] sm:$0xff] }
 0x46a   : > { %2302 = vmatpush.msrb.mxu0 %v2295_v24  ;;  %2453 = vmatpush.msra.mxu2 %v2382_v0  ;;  %v2377_v24 = vld [vmem:[#allocation7 + $0x9a0] sm:$0xff]  ;;  %v2362_v0 = vld [vmem:[#allocation7 + $0x928] sm:$0xff] }
 0x46b   : > { %2411 = vmatpush.msrb.mxu1 %v2384_v13 }
 0x46c   : > { %2303 = vmatpush.msrb.mxu0 %v2294_v15  ;;  %2454 = vmatpush.msra.mxu2 %v2379_v26  ;;  %v2374_v15 = vld [vmem:[#allocation7 + $0x988] sm:$0xff] }
 0x46d   : > { %2412 = vmatpush.msrb.mxu1 %v2381_v29  ;;  %v2361_v29 = vld [vmem:[#allocation7 + $0x920] sm:$0xff] }
 0x46e   : > { %2304 = vmatpush.msrb.mxu0 %v2293_v58  ;;  %2455 = vmatpush.msra.mxu2 %v2376_v51  ;;  %v2371_v58 = vld [vmem:[#allocation7 + $0x970] sm:$0xff] }
 0x46f   : > { %2119 = vmatmul.f32.gmra.mxu1 %v2032_v11  ;;  %2160 = vmatmul.f32.gmra.mxu2 %v2032_v11  ;;  %v7852_v22 = vpop.f32.mrf.mxu1 }
 0x470   : > { %2201 = vmatmul.f32.gmra.mxu3 %v2032_v11  ;;  %2305 = vmatpush.msrb.mxu0 %v2292_v42  ;;  %v2383_v11 = vld [vmem:[#allocation7 + $0x9d0] sm:$0xff] }
 0x471   : > { %2494 = vmatpush.msra.mxu3 %v2383_v11  ;;  %2413 = vmatpush.msrb.mxu1 %v2378_v62  ;;  %v2357_v11 = vld [vmem:[#allocation7 + $0x900] sm:$0xff]  ;;  %v2359_v62 = vld [vmem:[#allocation7 + $0x910] sm:$0xff] }
 0x472   : > { %2306 = vmatpush.msrb.mxu0 %v2291_v8  ;;  %2456 = vmatpush.msra.mxu2 %v2373_v52  ;;  %v2364_v8 = vld [vmem:[#allocation7 + $0x938] sm:$0xff] }
 0x473   : > { %2495 = vmatpush.msra.mxu3 %v2380_v46  ;;  %2414 = vmatpush.msrb.mxu1 %v2375_v32 }
 0x474   : > { %2307 = vmatpush.msrb.mxu0 %v2290_v61  ;;  %2457 = vmatpush.msra.mxu2 %v2370_v47  ;;  %v2360_v61 = vld [vmem:[#allocation7 + $0x918] sm:$0xff] }
 0x475   : > { %2496 = vmatpush.msra.mxu3 %v2377_v24  ;;  %2415 = vmatpush.msrb.mxu1 %v2372_v63 }
 0x476   : > { %2308 = vmatpush.msrb.mxu0 %v2289_v41  ;;  %2458 = vmatpush.msra.mxu2 %v2367_v1  ;;  %v2358_v41 = vld [vmem:[#allocation7 + $0x908] sm:$0xff] }
 0x477   : > { %v7854_v7 = vpop.f32.mrf.mxu1  ;;  %2497 = vmatpush.msra.mxu3 %v2374_v15  ;;  %2416 = vmatpush.msrb.mxu1 %v2369_v55 }
 0x478   : > { %2309 = vmatpush.msrb.mxu0 %v2288_v60  ;;  %2459 = vmatpush.msra.mxu2 %v2364_v8  ;;  %v7900_v8 = vld [vmem:[#allocation4] sm:$0xff] }
 0x479   : > { %2498 = vmatpush.msra.mxu3 %v2371_v58  ;;  %2417 = vmatpush.msrb.mxu1 %v2366_v31  ;;  %v7892_v31 = vld [vmem:[#allocation2] sm:$0xff] }
 0x47a   : > { %2310 = vmatpush.msrb.mxu0 %v2287_v10  ;;  %2460 = vmatpush.msra.mxu2 %v2361_v29 }
 0x47b   : > { %2499 = vmatpush.msra.mxu3 %v2368_v18  ;;  %2418 = vmatpush.msrb.mxu1 %v2363_v21 }
 0x47c   : > { %2311 = vmatpush.msrb.mxu0 %v2286_v40  ;;  %2461 = vmatpush.msra.mxu2 %v2358_v41  ;;  %v7907_v41 = vld [vmem:[#allocation9 + $0x5] ss:$0 sm:$0xff] }
 0x47d   : > { %2500 = vmatpush.msra.mxu3 %v2365_v25  ;;  %2419 = vmatpush.msrb.mxu1 %v2360_v61  ;;  %v7904_v61 = vld [vmem:[#allocation4 + $0x8] sm:$0xff] }
 0x47e   : > { %2312 = vmatpush.msrb.mxu0 %v2285_v5 }
 0x47f   : > { %v7856_v45 = vpop.f32.mrf.mxu1  ;;  %2501 = vmatpush.msra.mxu3 %v2362_v0  ;;  %2420 = vmatpush.msrb.mxu1 %v2357_v11 }
 0x480   : > { %2313 = vmatpush.msrb.mxu0 %v2284_v37  ;;  %v7897_v37 = vld [vmem:[#allocation2 + $0x8] sm:$0xff] }
 0x481   : > { %2502 = vmatpush.msra.mxu3 %v2359_v62 }
 0x482   : > { %2314 = vmatpush.msrb.mxu0 %v2283_v36 }
 0x487   : > { %v7858_v9 = vpop.f32.mrf.mxu1 }
 0x4b4   : > { %v7860_v56 = vpop.f32.mrf.mxu1 }
 0x4b5   : > { %v2205_v15 = vrot.slane %v7860_v56, 7 }
 0x4ba   : > { %v2140_v46 = vpop.f32.mrf.mxu2 }
 0x4bb   : > { %v7866_v44 = vpop.f32.mrf.mxu3 }
 0x4bc   : > { %v7862_v43 = vpop.f32.mrf.mxu1  ;;  %v2237_v40 = vrot.slane %v7866_v44, 1 }
 0x4bd   : > { %v2206_v10 = vrot.slane %v7862_v43, 7 }
 0x4bf   : > { %v2219_v58 = vsel %vm812_vm0, %v2205_v15, %v2206_v10 }
 0x4c0   : > { %v2222_v21 = vmul.f32 %v7897_v37, %v2219_v58 }
 0x4c2   : > { %v2143_v51 = vpop.f32.mrf.mxu2 }
 0x4c3   : > { %v2184_v13 = vpop.f32.mrf.mxu3 }
 0x4c4   : > { %v7864_v50 = vpop.f32.mrf.mxu1  ;;  %v2238_v63 = vrot.slane %v2184_v13, 1 }
 0x4c5   : > { %v2207_v36 = vrot.slane %v7864_v50, 7 }
 0x4c6   : > { %v2251_v5 = vsel %vm845_vm1, %v2237_v40, %v2238_v63 }
 0x4c7   : > { %v2253_v13 = vmul.f32 %v7900_v8, %v2251_v5  ;;  %v7915_v5 = vld [vmem:[#allocation2 + $0x10] sm:$0xff] }
 0x4ca   : > { %v2146_v1 = vpop.f32.mrf.mxu2 }
 0x4cb   : > { %v2187_v60 = vpop.f32.mrf.mxu3 }
 0x4cc   : > { %v7868_v23 = vpop.f32.mrf.mxu1  ;;  %v2239_v55 = vrot.slane %v2187_v60, 1  ;;  %v2230_v60 = vadd.f32 %v2222_v21, %v2143_v51 }
 0x4cd   : > { %v2208_v51 = vrot.slane %v7868_v23, 7 }
 0x4ce   : > { %v2250_v18 = vsel %vm845_vm1, %v2238_v63, %v2239_v55 }
 0x4cf   : > { %v2254_v29 = vmul.f32 %v7904_v61, %v2250_v18 }
 0x4d1   : > { %v2262_v58 = vadd.f32 %v2254_v29, %v2230_v60 }
 0x4d3   : > { %v2190_v24 = vpop.f32.mrf.mxu3 }
 0x4d4   : > { %v7870_v42 = vpop.f32.mrf.mxu1  ;;  %v2240_v62 = vrot.slane %v2190_v24, 1  ;;  %v2149_v24 = vpop.f32.mrf.mxu2 }
 0x4d6   : > { %v2249_v50 = vsel %vm845_vm1, %v2239_v55, %v2240_v62  ;;  %v2217_v55 = vsel %vm812_vm0, %v2207_v36, %v2208_v51 }
 0x4db   : > { %v2193_v0 = vpop.f32.mrf.mxu3 }
 0x4dc   : > { %v7872_v26 = vpop.f32.mrf.mxu1  ;;  %v2241_v18 = vrot.slane %v2193_v0, 1  ;;  %v2209_v0 = vrot.slane %v7870_v42, 7 }
 0x4de   : > { %v2248_v23 = vsel %vm845_vm1, %v2240_v62, %v2241_v18  ;;  %v2216_v62 = vsel %vm812_vm0, %v2208_v51, %v2209_v0 }
 0x4e4   : > { %v7874_v32 = vpop.f32.mrf.mxu1 }
 0x4ec   : > { %v7877_v52 = vpop.f32.mrf.mxu1 }
 0x4ed   : > { %v2212_v47 = vrot.slane %v7877_v52, 7 }
 0x4ef   : > { %v2220_v43 = vsel %vm812_vm0, %v2212_v47, %v2205_v15  ;;  %v2218_v15 = vsel %vm812_vm0, %v2206_v10, %v2207_v36 }
 0x4f0   : > { %v2221_v56 = vmul.f32 %v7892_v31, %v2220_v43  ;;  %v2223_v43 = vmul.f32 %v7915_v5, %v2218_v15 }
 0x4f2   : > { %v2229_v25 = vadd.f32 %v2221_v56, %v2140_v46  ;;  %v7919_v56 = vld [vmem:[#allocation4 + $0x10] sm:$0xff]  ;;  %v2231_v21 = vadd.f32 %v2223_v43, %v2146_v1  ;;  %v7932_v1 = vld [vmem:[#allocation4 + $0x18] sm:$0xff] }
 0x4f3   : > { %v2255_v10 = vmul.f32 %v7919_v56, %v2249_v50  ;;  %v2256_v36 = vmul.f32 %v7932_v1, %v2248_v23 }
 0x4f4   : > { %v2261_v11 = vadd.f32 %v2253_v13, %v2229_v25  ;;  %v2196_v13 = vpop.f32.mrf.mxu3 }
 0x4f5   : > { %v2263_v29 = vadd.f32 %v2255_v10, %v2231_v21  ;;  %v2242_v15 = vrot.slane %v2196_v13, 1  ;;  %v7941_v10 = vld [vmem:[#allocation2 + $0x20] sm:$0xff]  ;;  %v2210_v21 = vrot.slane %v7872_v26, 7 }
 0x4f6   : > { %v2274_v63 = vadd.f32 %v7907_v41, %v2261_v11  ;;  %v7928_v11 = vld [vmem:[#allocation2 + $0x18] sm:$0xff] }
 0x4f7   : > { %v2224_v60 = vmul.f32 %v7928_v11, %v2217_v55  ;;  %v2247_v42 = vsel %vm845_vm1, %v2241_v18, %v2242_v15  ;;  %v2215_v18 = vsel %vm812_vm0, %v2209_v0, %v2210_v21 }
 0x4f8   : > { %2315 = vmatmul.f32.vlgmr.msrb.gmra.mxu0 %v2274_v63  ;;  %v2348_v46 = vadd.f32 %v2274_v63, %v7614_v59  ;;  %v2275_v59 = vadd.f32 %v7907_v41, %v2262_v58  ;;  %v2276_v63 = vadd.f32 %v7907_v41, %v2263_v29 }
 0x4fa   : > { %2421 = vmatmul.f32.vlgmr.msrb.gmra.mxu1 %v2348_v46  ;;  %2462 = vmatmul.f32.vlgmr.msra.gmra.mxu2 %v2348_v46  ;;  %v2349_v25 = vadd.f32 %v2275_v59, %v7632_v19  ;;  %v2152_v19 = vpop.f32.mrf.mxu2  ;;  %v2350_v50 = vadd.f32 %v2276_v63, %v7649_v2 }
 0x4fb   : > { %2503 = vmatmul.f32.vlgmr.msra.gmra.mxu3 %v2348_v46  ;;  %v2232_v46 = vadd.f32 %v2224_v60, %v2149_v24  ;;  %v7945_v24 = vld [vmem:[#allocation4 + $0x20] sm:$0xff]  ;;  %v7954_v60 = vld [vmem:[#allocation2 + $0x28] sm:$0xff] }
 0x4fc   : > { %v2199_v58 = vpop.f32.mrf.mxu3  ;;  %v2257_v51 = vmul.f32 %v7945_v24, %v2247_v42 }
 0x4fd   : > { %v2264_v43 = vadd.f32 %v2256_v36, %v2232_v46  ;;  %v2243_v2 = vrot.slane %v2199_v58, 1  ;;  %v2226_v36 = vmul.f32 %v7954_v60, %v2215_v18  ;;  %v7958_v46 = vld [vmem:[#allocation4 + $0x28] sm:$0xff]  ;;  %v7980_v18 = vld [vmem:[#allocation4 + $0x38] sm:$0xff] }
 0x4ff   : > { %v2277_v13 = vadd.f32 %v7907_v41, %v2264_v43  ;;  %v2246_v26 = vsel %vm845_vm1, %v2242_v15, %v2243_v2 }
 0x500   : > { %2318 = vmatmul.f32.gmra.mxu0 %v2275_v59  ;;  %v2225_v59 = vmul.f32 %v7941_v10, %v2216_v62  ;;  %v2258_v0 = vmul.f32 %v7958_v46, %v2246_v26  ;;  %v2659_v26 = vld [vmem:[#allocation7 + $0xbe8] sm:$0xff] }
 0x501   : > { %v2351_v29 = vadd.f32 %v2277_v13, %v7666_v39  ;;  %2662 = vmatpush.msra.mxu0 %v2659_v26  ;;  %v2634_v26 = vld [vmem:[#allocation7 + $0xb20] sm:$0xff] }
 0x502   : > { %2424 = vmatmul.f32.gmra.mxu1 %v2349_v25  ;;  %2465 = vmatmul.f32.gmra.mxu2 %v2349_v25  ;;  %v2233_v55 = vadd.f32 %v2225_v59, %v2152_v19  ;;  %v2211_v19 = vrot.slane %v7874_v32, 7 }
 0x503   : > { %2506 = vmatmul.f32.gmra.mxu3 %v2349_v25  ;;  %v2155_v25 = vpop.f32.mrf.mxu2 }
 0x504   : > { %v2265_v23 = vadd.f32 %v2257_v51, %v2233_v55  ;;  %v2234_v58 = vadd.f32 %v2226_v36, %v2155_v25  ;;  %v2214_v15 = vsel %vm812_vm0, %v2210_v21, %v2211_v19  ;;  %v2660_v36 = vld [vmem:[#allocation7 + $0xbf0] sm:$0xff] }
 0x505   : > { %v2227_v59 = vmul.f32 %v7687_v3, %v2214_v15  ;;  %2703 = vmatpush.msra.mxu1 %v2660_v36  ;;  %v2651_v15 = vld [vmem:[#allocation7 + $0xba8] sm:$0xff]  ;;  %v2629_v36 = vld [vmem:[#allocation7 + $0xaf8] sm:$0xff] }
 0x506   : > { %v2278_v39 = vadd.f32 %v7907_v41, %v2265_v23  ;;  %v2266_v43 = vadd.f32 %v2258_v0, %v2234_v58  ;;  %v2657_v0 = vld [vmem:[#allocation7 + $0xbd8] sm:$0xff]  ;;  %v2650_v58 = vld [vmem:[#allocation7 + $0xba0] sm:$0xff] }
 0x507   : > { %2704 = vmatpush.msra.mxu1 %v2657_v0  ;;  %v2626_v0 = vld [vmem:[#allocation7 + $0xae0] sm:$0xff] }
 0x508   : > { %2321 = vmatmul.f32.gmra.mxu0 %v2276_v63  ;;  %v2202_v63 = vpop.f32.mrf.mxu3 }
 0x509   : > { %v2244_v62 = vrot.slane %v2202_v63, 1  ;;  %v2661_v63 = vld [vmem:[#allocation7 + $0xbf8] sm:$0xff] }
 0x50a   : > { %2427 = vmatmul.f32.gmra.mxu1 %v2350_v50  ;;  %2468 = vmatmul.f32.gmra.mxu2 %v2350_v50 }
 0x50b   : > { %2509 = vmatmul.f32.gmra.mxu3 %v2350_v50  ;;  %v2352_v50 = vadd.f32 %v2278_v39, %v7683_v14  ;;  %v2158_v42 = vpop.f32.mrf.mxu2  ;;  %v2245_v32 = vsel %vm845_vm1, %v2243_v2, %v2244_v62  ;;  %v2213_v14 = vsel %vm812_vm0, %v2211_v19, %v2212_v47  ;;  %v2252_v3 = vsel %vm845_vm1, %v2244_v62, %v2237_v40  ;;  %v2655_v62 = vld [vmem:[#allocation7 + $0xbc8] sm:$0xff] }
 0x50c   : > { %v2259_v51 = vmul.f32 %v7692_v6, %v2245_v32  ;;  %v2235_v55 = vadd.f32 %v2227_v59, %v2158_v42  ;;  %v2228_v2 = vmul.f32 %v7707_v30, %v2213_v14  ;;  %v2260_v52 = vmul.f32 %v7980_v18, %v2252_v3  ;;  %2744 = vmatpush.msrb.mxu2 %v2661_v63  ;;  %v2648_v42 = vld [vmem:[#allocation7 + $0xb90] sm:$0xff]  ;;  %v2649_v32 = vld [vmem:[#allocation7 + $0xb98] sm:$0xff]  ;;  %v2638_v3 = vld [vmem:[#allocation7 + $0xb40] sm:$0xff] }
 0x50d   : > { %v2641_v14 = vld [vmem:[#allocation7 + $0xb58] sm:$0xff]  ;;  %v2630_v63 = vld [vmem:[#allocation7 + $0xb00] sm:$0xff] }
 0x50e   : > { %v2267_v25 = vadd.f32 %v2259_v51, %v2235_v55  ;;  %v2644_v51 = vld [vmem:[#allocation7 + $0xb70] sm:$0xff]  ;;  %v2646_v55 = vld [vmem:[#allocation7 + $0xb80] sm:$0xff] }
 0x510   : > { %2324 = vmatmul.f32.gmra.mxu0 %v2277_v13  ;;  %v2279_v13 = vadd.f32 %v7907_v41, %v2266_v43  ;;  %v2280_v47 = vadd.f32 %v7907_v41, %v2267_v25  ;;  %v2647_v43 = vld [vmem:[#allocation7 + $0xb88] sm:$0xff] }
 0x511   : > { %v2643_v25 = vld [vmem:[#allocation7 + $0xb68] sm:$0xff] }
 0x512   : > { %2430 = vmatmul.f32.gmra.mxu1 %v2351_v29  ;;  %2471 = vmatmul.f32.gmra.mxu2 %v2351_v29  ;;  %v2353_v21 = vadd.f32 %v2279_v13, %v7701_v27  ;;  %v2354_v27 = vadd.f32 %v2280_v47, %v7717_v38  ;;  %v2656_v38 = vld [vmem:[#allocation7 + $0xbd0] sm:$0xff] }
 0x513   : > { %2512 = vmatmul.f32.gmra.mxu3 %v2351_v29  ;;  %v2161_v6 = vpop.f32.mrf.mxu2  ;;  %2663 = vmatpush.msra.mxu0 %v2656_v38  ;;  %v2631_v38 = vld [vmem:[#allocation7 + $0xb08] sm:$0xff] }
 0x514   : > { %v2236_v29 = vadd.f32 %v2228_v2, %v2161_v6  ;;  %v2639_v2 = vld [vmem:[#allocation7 + $0xb48] sm:$0xff]  ;;  %v2640_v6 = vld [vmem:[#allocation7 + $0xb50] sm:$0xff] }
 0x516   : > { %v2268_v44 = vadd.f32 %v2260_v52, %v2236_v29  ;;  %v2635_v52 = vld [vmem:[#allocation7 + $0xb28] sm:$0xff]  ;;  %v2637_v29 = vld [vmem:[#allocation7 + $0xb38] sm:$0xff] }
 0x518   : > { %2327 = vmatmul.f32.gmra.mxu0 %v2278_v39  ;;  %v2281_v30 = vadd.f32 %v7907_v41, %v2268_v44  ;;  %v2658_v39 = vld [vmem:[#allocation7 + $0xbe0] sm:$0xff] }
 0x519   : > { %2745 = vmatpush.msrb.mxu2 %v2658_v39  ;;  %v2654_v41 = vld [vmem:[#allocation7 + $0xbc0] sm:$0xff]  ;;  %v2627_v39 = vld [vmem:[#allocation7 + $0xae8] sm:$0xff] }
 0x51a   : > { %2433 = vmatmul.f32.gmra.mxu1 %v2352_v50  ;;  %2474 = vmatmul.f32.gmra.mxu2 %v2352_v50  ;;  %v2355_v40 = vadd.f32 %v2281_v30, %v7723_v49  ;;  %v2653_v49 = vld [vmem:[#allocation7 + $0xbb8] sm:$0xff] }
 0x51b   : > { %2515 = vmatmul.f32.gmra.mxu3 %v2352_v50  ;;  %2664 = vmatpush.msra.mxu0 %v2653_v49  ;;  %v2652_v50 = vld [vmem:[#allocation7 + $0xbb0] sm:$0xff] }
 0x51c   : > { %2705 = vmatpush.msra.mxu1 %v2654_v41  ;;  %2746 = vmatpush.msrb.mxu2 %v2655_v62  ;;  %v2628_v49 = vld [vmem:[#allocation7 + $0xaf0] sm:$0xff]  ;;  %v2623_v41 = vld [vmem:[#allocation7 + $0xac8] sm:$0xff] }
 0x51d   : > { %2665 = vmatpush.msra.mxu0 %v2650_v58  ;;  %v2624_v62 = vld [vmem:[#allocation7 + $0xad0] sm:$0xff]  ;;  %v2625_v58 = vld [vmem:[#allocation7 + $0xad8] sm:$0xff] }
 0x51e   : > { %2706 = vmatpush.msra.mxu1 %v2651_v15  ;;  %2747 = vmatpush.msrb.mxu2 %v2652_v50  ;;  %v2620_v50 = vld [vmem:[#allocation7 + $0xab0] sm:$0xff] }
 0x51f   : > { %2666 = vmatpush.msra.mxu0 %v2647_v43  ;;  %v2621_v43 = vld [vmem:[#allocation7 + $0xab8] sm:$0xff] }
 0x520   : > { %2330 = vmatmul.f32.gmra.mxu0 %v2279_v13  ;;  %2707 = vmatpush.msra.mxu1 %v2648_v42  ;;  %v2645_v13 = vld [vmem:[#allocation7 + $0xb78] sm:$0xff]  ;;  %v2622_v42 = vld [vmem:[#allocation7 + $0xac0] sm:$0xff] }
 0x521   : > { %2748 = vmatpush.msrb.mxu2 %v2649_v32  ;;  %2667 = vmatpush.msra.mxu0 %v2644_v51  ;;  %v2617_v51 = vld [vmem:[#allocation7 + $0xa98] sm:$0xff] }
 0x522   : > { %2436 = vmatmul.f32.gmra.mxu1 %v2353_v21  ;;  %2477 = vmatmul.f32.gmra.mxu2 %v2353_v21 }
 0x523   : > { %2518 = vmatmul.f32.gmra.mxu3 %v2353_v21  ;;  %2708 = vmatpush.msra.mxu1 %v2645_v13  ;;  %v2642_v21 = vld [vmem:[#allocation7 + $0xb60] sm:$0xff] }
 0x524   : > { %2749 = vmatpush.msrb.mxu2 %v2646_v55  ;;  %2668 = vmatpush.msra.mxu0 %v2641_v14  ;;  %v2618_v13 = vld [vmem:[#allocation7 + $0xaa0] sm:$0xff]  ;;  %v2619_v55 = vld [vmem:[#allocation7 + $0xaa8] sm:$0xff] }
 0x525   : > { %2709 = vmatpush.msra.mxu1 %v2642_v21  ;;  %v2614_v14 = vld [vmem:[#allocation7 + $0xa80] sm:$0xff]  ;;  %v2615_v21 = vld [vmem:[#allocation7 + $0xa88] sm:$0xff] }
 0x526   : > { %2750 = vmatpush.msrb.mxu2 %v2643_v25  ;;  %2669 = vmatpush.msra.mxu0 %v2638_v3  ;;  %v2616_v25 = vld [vmem:[#allocation7 + $0xa90] sm:$0xff] }
 0x527   : > { %2710 = vmatpush.msra.mxu1 %v2639_v2 }
 0x528   : > { %2333 = vmatmul.f32.gmra.mxu0 %v2280_v47  ;;  %2751 = vmatpush.msrb.mxu2 %v2640_v6  ;;  %v2636_v47 = vld [vmem:[#allocation7 + $0xb30] sm:$0xff] }
 0x529   : > { %2670 = vmatpush.msra.mxu0 %v2635_v52  ;;  %2711 = vmatpush.msra.mxu1 %v2636_v47 }
 0x52a   : > { %2439 = vmatmul.f32.gmra.mxu1 %v2354_v27  ;;  %2480 = vmatmul.f32.gmra.mxu2 %v2354_v27 }
 0x52b   : > { %2521 = vmatmul.f32.gmra.mxu3 %v2354_v27  ;;  %2752 = vmatpush.msrb.mxu2 %v2637_v29 }
 0x52d   : > { %2753 = vmatpush.msrb.mxu2 %v2634_v26 }
 0x52f   : > { %2754 = vmatpush.msrb.mxu2 %v2631_v38 }
 0x530   : > { %2336 = vmatmul.f32.gmra.mxu0 %v2281_v30  ;;  %v2632_v30 = vld [vmem:[#allocation7 + $0xb10] sm:$0xff] }
 0x531   : > { %2671 = vmatpush.msra.mxu0 %v2632_v30  ;;  %2755 = vmatpush.msrb.mxu2 %v2628_v49 }
 0x532   : > { %2442 = vmatmul.f32.gmra.mxu1 %v2355_v40  ;;  %2483 = vmatmul.f32.gmra.mxu2 %v2355_v40 }
 0x533   : > { %2524 = vmatmul.f32.gmra.mxu3 %v2355_v40  ;;  %v2633_v40 = vld [vmem:[#allocation7 + $0xb18] sm:$0xff]  ;;  %2672 = vmatpush.msra.mxu0 %v2629_v36 }
 0x534   : > { %2712 = vmatpush.msra.mxu1 %v2633_v40  ;;  %2756 = vmatpush.msrb.mxu2 %v2625_v58 }
 0x535   : > { %2673 = vmatpush.msra.mxu0 %v2626_v0 }
 0x536   : > { %2713 = vmatpush.msra.mxu1 %v2630_v63  ;;  %2757 = vmatpush.msrb.mxu2 %v2622_v42 }
 0x537   : > { %2674 = vmatpush.msra.mxu0 %v2623_v41 }
 0x538   : > { %2714 = vmatpush.msra.mxu1 %v2627_v39  ;;  %2758 = vmatpush.msrb.mxu2 %v2619_v55  ;;  %v8026_v55 = vld [vmem:[#allocation9 + $0x6] ss:$0 sm:$0xff] }
 0x539   : > { %2675 = vmatpush.msra.mxu0 %v2620_v50 }
 0x53a   : > { %2715 = vmatpush.msra.mxu1 %v2624_v62  ;;  %2759 = vmatpush.msrb.mxu2 %v2616_v25 }
 0x53b   : > { %2676 = vmatpush.msra.mxu0 %v2617_v51 }
 0x53c   : > { %2716 = vmatpush.msra.mxu1 %v2621_v43 }
 0x53d   : > { %2677 = vmatpush.msra.mxu0 %v2614_v14 }
 0x53e   : > { %2717 = vmatpush.msra.mxu1 %v2618_v13 }
 0x540   : > { %2718 = vmatpush.msra.mxu1 %v2615_v21 }
 0x577   : > { %v7987_v23 = vpop.f32.mrf.mxu1 }
 0x578   : > { %v2528_v36 = vrot.slane %v7987_v23, 7 }
 0x57d   : > { %v2463_v2 = vpop.f32.mrf.mxu2 }
 0x57e   : > { %v7993_v27 = vpop.f32.mrf.mxu3 }
 0x57f   : > { %v7989_v19 = vpop.f32.mrf.mxu1  ;;  %v2560_v63 = vrot.slane %v7993_v27, 1 }
 0x580   : > { %v2529_v30 = vrot.slane %v7989_v19, 7 }
 0x582   : > { %v2542_v39 = vsel %vm812_vm0, %v2528_v36, %v2529_v30 }
 0x583   : > { %v2545_v58 = vmul.f32 %v7897_v37, %v2542_v39 }
 0x585   : > { %v2466_v47 = vpop.f32.mrf.mxu2 }
 0x586   : > { %v2507_v32 = vpop.f32.mrf.mxu3  ;;  %v2553_v21 = vadd.f32 %v2545_v58, %v2466_v47 }
 0x587   : > { %v7991_v59 = vpop.f32.mrf.mxu1  ;;  %v2561_v40 = vrot.slane %v2507_v32, 1 }
 0x588   : > { %v2530_v42 = vrot.slane %v7991_v59, 7 }
 0x589   : > { %v2574_v49 = vsel %vm845_vm1, %v2560_v63, %v2561_v40 }
 0x58a   : > { %v2576_v50 = vmul.f32 %v7900_v8, %v2574_v49 }
 0x58d   : > { %v2469_v41 = vpop.f32.mrf.mxu2 }
 0x58e   : > { %v2510_v6 = vpop.f32.mrf.mxu3 }
 0x58f   : > { %v7995_v44 = vpop.f32.mrf.mxu1  ;;  %v2562_v38 = vrot.slane %v2510_v6, 1  ;;  %v2541_v6 = vsel %vm812_vm0, %v2529_v30, %v2530_v42 }
 0x590   : > { %v2546_v59 = vmul.f32 %v7915_v5, %v2541_v6  ;;  %v2531_v39 = vrot.slane %v7995_v44, 7 }
 0x591   : > { %v2573_v62 = vsel %vm845_vm1, %v2561_v40, %v2562_v38 }
 0x592   : > { %v2577_v32 = vmul.f32 %v7904_v61, %v2573_v62  ;;  %v2540_v62 = vsel %vm812_vm0, %v2530_v42, %v2531_v39 }
 0x595   : > { %v2472_v49 = vpop.f32.mrf.mxu2 }
 0x596   : > { %v2513_v29 = vpop.f32.mrf.mxu3 }
 0x597   : > { %v7997_v15 = vpop.f32.mrf.mxu1  ;;  %v2563_v14 = vrot.slane %v2513_v29, 1 }
 0x598   : > { %v2532_v44 = vrot.slane %v7997_v15, 7 }
 0x59a   : > { %v2539_v42 = vsel %vm812_vm0, %v2531_v39, %v2532_v44 }
 0x59e   : > { %v2516_v51 = vpop.f32.mrf.mxu3 }
 0x59f   : > { %v7999_v3 = vpop.f32.mrf.mxu1 }
 0x5a0   : > { %v2533_v15 = vrot.slane %v7999_v3, 7 }
 0x5a6   : > { %v2519_v30 = vpop.f32.mrf.mxu3 }
 0x5a7   : > { %v8001_v52 = vpop.f32.mrf.mxu1 }
 0x5a8   : > { %v2534_v3 = vrot.slane %v8001_v52, 7 }
 0x5af   : > { %v8004_v26 = vpop.f32.mrf.mxu1 }
 0x5b0   : > { %v2535_v0 = vrot.slane %v8004_v26, 7 }
 0x5b2   : > { %v2543_v19 = vsel %vm812_vm0, %v2535_v0, %v2528_v36  ;;  %v2585_v36 = vadd.f32 %v2577_v32, %v2553_v21 }
 0x5b3   : > { %v2544_v23 = vmul.f32 %v7892_v31, %v2543_v19  ;;  %v2564_v19 = vrot.slane %v2516_v51, 1  ;;  %v2475_v51 = vpop.f32.mrf.mxu2 }
 0x5b4   : > { %v2598_v29 = vadd.f32 %v8026_v55, %v2585_v36  ;;  %v2548_v36 = vmul.f32 %v7941_v10, %v2539_v42  ;;  %v8065_v42 = vld [vmem:[#allocation2 + $0x30] sm:$0xff] }
 0x5b5   : > { %v2552_v43 = vadd.f32 %v2544_v23, %v2463_v2  ;;  %v2572_v2 = vsel %vm845_vm1, %v2562_v38, %v2563_v14  ;;  %v2554_v23 = vadd.f32 %v2546_v59, %v2469_v41 }
 0x5b6   : > { %v2578_v47 = vmul.f32 %v7919_v56, %v2572_v2  ;;  %v2606_v58 = vmax.f32 %v2598_v29, 0.0  ;;  %v2538_v29 = vsel %vm812_vm0, %v2532_v44, %v2533_v15  ;;  %v2537_v44 = vsel %vm812_vm0, %v2533_v15, %v2534_v3 }
 0x5b7   : > { %v2584_v13 = vadd.f32 %v2576_v50, %v2552_v43  ;;  %v2571_v50 = vsel %vm845_vm1, %v2563_v14, %v2564_v19  ;;  %v2547_v43 = vmul.f32 %v7928_v11, %v2540_v62  ;;  %v2549_v62 = vmul.f32 %v7954_v60, %v2538_v29 }
 0x5b8   : > { %v2586_v38 = vadd.f32 %v2578_v47, %v2554_v23  ;;  %v2579_v32 = vmul.f32 %v7932_v1, %v2571_v50  ;;  %v2556_v47 = vadd.f32 %v2548_v36, %v2475_v51  ;;  %v2550_v52 = vmul.f32 %v8065_v42, %v2537_v44 }
 0x5b9   : > { %v2597_v25 = vadd.f32 %v8026_v55, %v2584_v13  ;;  %v2565_v13 = vrot.slane %v2519_v30, 1  ;;  %v2555_v21 = vadd.f32 %v2547_v43, %v2472_v49  ;;  %v2536_v36 = vsel %vm812_vm0, %v2534_v3, %v2535_v0 }
 0x5ba   : > { %v2599_v41 = vadd.f32 %v8026_v55, %v2586_v38 }
 0x5bb   : > { %v2605_v40 = vmax.f32 %v2597_v25, 0.0  ;;  %v2522_v25 = vpop.f32.mrf.mxu3  ;;  %v2587_v14 = vadd.f32 %v2579_v32, %v2555_v21  ;;  %v2478_v39 = vpop.f32.mrf.mxu2 }
 0x5bc   : > { %v2607_v6 = vmax.f32 %v2599_v41, 0.0  ;;  %v2566_v49 = vrot.slane %v2522_v25, 1  ;;  %v2557_v32 = vadd.f32 %v2549_v62, %v2478_v39  ;;  %v8068_v25 = vld [vmem:[#allocation4 + $0x30] sm:$0xff] }
 0x5bd   : > { %2678 = vmatmul.f32.vlgmr.msra.gmra.mxu0 %v2605_v40  ;;  %2719 = vmatmul.f32.vlgmr.msra.gmra.mxu1 %v2605_v40  ;;  %v2600_v59 = vadd.f32 %v8026_v55, %v2587_v14 }
 0x5be   : > { %2760 = vmatmul.f32.vlgmr.msrb.gmra.mxu2 %v2605_v40  ;;  %v2570_v40 = vsel %vm845_vm1, %v2564_v19, %v2565_v13  ;;  %v2569_v19 = vsel %vm845_vm1, %v2565_v13, %v2566_v49 }
 0x5bf   : > { %v2580_v2 = vmul.f32 %v7945_v24, %v2570_v40  ;;  %v2608_v23 = vmax.f32 %v2600_v59, 0.0  ;;  %v2581_v38 = vmul.f32 %v7958_v46, %v2569_v19  ;;  %v8085_v19 = vpop.f32.mrf.mxu0 }
 0x5c0   : > { %9523 = vst [vmem:[#allocation27_spill] sm:$0xff] %v8085_v19 }
 0x5c1   : > { %v2588_v30 = vadd.f32 %v2580_v2, %v2556_v47  ;;  %v2589_v51 = vadd.f32 %v2581_v38, %v2557_v32 }
 0x5c3   : > { %v2601_v50 = vadd.f32 %v8026_v55, %v2588_v30  ;;  %v2481_v13 = vpop.f32.mrf.mxu2  ;;  %v2602_v14 = vadd.f32 %v8026_v55, %v2589_v51 }
 0x5c4   : > { %v2558_v40 = vadd.f32 %v2550_v52, %v2481_v13  ;;  %v2876_v13 = vld [vmem:[#allocation10 + $0x1e8] sm:$0xff]  ;;  %v2874_v52 = vld [vmem:[#allocation10 + $0x1d8] sm:$0xff] }
 0x5c5   : > { %2681 = vmatmul.f32.gmra.mxu0 %v2606_v58  ;;  %2722 = vmatmul.f32.gmra.mxu1 %v2606_v58  ;;  %v2609_v41 = vmax.f32 %v2601_v50, 0.0  ;;  %v2610_v15 = vmax.f32 %v2602_v14, 0.0 }
 0x5c6   : > { %2763 = vmatmul.f32.gmra.mxu2 %v2606_v58  ;;  %v2525_v58 = vpop.f32.mrf.mxu3 }
 0x5c7   : > { %v2567_v43 = vrot.slane %v2525_v58, 1  ;;  %v8088_v62 = vpop.f32.mrf.mxu0 }
 0x5c8   : > { %9524 = vst [vmem:[#allocation28_spill] sm:$0xff] %v8088_v62 }
 0x5c9   : > { %v2568_v21 = vsel %vm845_vm1, %v2566_v49, %v2567_v43  ;;  %v2575_v59 = vsel %vm845_vm1, %v2567_v43, %v2560_v63  ;;  %v8080_v49 = vld [vmem:[#allocation2 + $0x38] sm:$0xff] }
 0x5ca   : > { %v2551_v47 = vmul.f32 %v8080_v49, %v2536_v36  ;;  %v2583_v26 = vmul.f32 %v7980_v18, %v2575_v59  ;;  %v2871_v36 = vld [vmem:[#allocation10 + $0x1c0] sm:$0xff] }
 0x5cb   : > { %v2484_v39 = vpop.f32.mrf.mxu2 }
 0x5cc   : > { %v2559_v0 = vadd.f32 %v2551_v47, %v2484_v39  ;;  %v2868_v47 = vld [vmem:[#allocation10 + $0x1a8] sm:$0xff] }
 0x5cd   : > { %2684 = vmatmul.f32.gmra.mxu0 %v2607_v6  ;;  %2725 = vmatmul.f32.gmra.mxu1 %v2607_v6 }
 0x5ce   : > { %2766 = vmatmul.f32.gmra.mxu2 %v2607_v6  ;;  %v2582_v6 = vmul.f32 %v8068_v25, %v2568_v21  ;;  %v2591_v30 = vadd.f32 %v2583_v26, %v2559_v0  ;;  %v2875_v21 = vld [vmem:[#allocation10 + $0x1e0] sm:$0xff]  ;;  %v2865_v0 = vld [vmem:[#allocation10 + $0x190] sm:$0xff] }
 0x5cf   : > { %v8090_v58 = vpop.f32.mrf.mxu0  ;;  %v2867_v26 = vld [vmem:[#allocation10 + $0x1a0] sm:$0xff] }
 0x5d0   : > { %v2590_v2 = vadd.f32 %v2582_v6, %v2558_v40  ;;  %v2604_v27 = vadd.f32 %v8026_v55, %v2591_v30  ;;  %9525 = vst [vmem:[#allocation29_spill] sm:$0xff] %v8090_v58  ;;  %v2873_v6 = vld [vmem:[#allocation10 + $0x1d0] sm:$0xff]  ;;  %v2872_v40 = vld [vmem:[#allocation10 + $0x1c8] sm:$0xff] }
 0x5d1   : > { %v2864_v30 = vld [vmem:[#allocation10 + $0x188] sm:$0xff] }
 0x5d2   : > { %v2603_v29 = vadd.f32 %v8026_v55, %v2590_v2  ;;  %v2612_v63 = vmax.f32 %v2604_v27, 0.0  ;;  %v2878_v55 = vld [vmem:[#allocation10 + $0x1f8] sm:$0xff]  ;;  %v2869_v2 = vld [vmem:[#allocation10 + $0x1b0] sm:$0xff]  ;;  %v2863_v27 = vld [vmem:[#allocation10 + $0x180] sm:$0xff] }
 0x5d3   : > { %2879 = vmatpush.msrb.mxu3 %v2878_v55 }
 0x5d5   : > { %2687 = vmatmul.f32.gmra.mxu0 %v2608_v23  ;;  %2728 = vmatmul.f32.gmra.mxu1 %v2608_v23 }
 0x5d6   : > { %2769 = vmatmul.f32.gmra.mxu2 %v2608_v23  ;;  %v2611_v23 = vmax.f32 %v2603_v29, 0.0  ;;  %v2866_v29 = vld [vmem:[#allocation10 + $0x198] sm:$0xff] }
 0x5d7   : > { %v8092_v3 = vpop.f32.mrf.mxu0 }
 0x5dd   : > { %2690 = vmatmul.f32.gmra.mxu0 %v2609_v41  ;;  %2731 = vmatmul.f32.gmra.mxu1 %v2609_v41 }
 0x5de   : > { %2772 = vmatmul.f32.gmra.mxu2 %v2609_v41  ;;  %v2877_v41 = vld [vmem:[#allocation10 + $0x1f0] sm:$0xff] }
 0x5df   : > { %v8094_v38 = vpop.f32.mrf.mxu0  ;;  %2880 = vmatpush.msrb.mxu3 %v2877_v41 }
 0x5e1   : > { %2881 = vmatpush.msrb.mxu3 %v2876_v13 }
 0x5e3   : > { %2882 = vmatpush.msrb.mxu3 %v2875_v21 }
 0x5e5   : > { %2693 = vmatmul.f32.gmra.mxu0 %v2610_v15  ;;  %2734 = vmatmul.f32.gmra.mxu1 %v2610_v15 }
 0x5e6   : > { %2775 = vmatmul.f32.gmra.mxu2 %v2610_v15  ;;  %2883 = vmatpush.msrb.mxu3 %v2874_v52  ;;  %v2870_v15 = vld [vmem:[#allocation10 + $0x1b8] sm:$0xff] }
 0x5e7   : > { %v8096_v50 = vpop.f32.mrf.mxu0 }
 0x5e8   : > { %2884 = vmatpush.msrb.mxu3 %v2873_v6 }
 0x5ea   : > { %2885 = vmatpush.msrb.mxu3 %v2872_v40 }
 0x5ec   : > { %2886 = vmatpush.msrb.mxu3 %v2871_v36 }
 0x5ed   : > { %2696 = vmatmul.f32.gmra.mxu0 %v2611_v23  ;;  %2737 = vmatmul.f32.gmra.mxu1 %v2611_v23 }
 0x5ee   : > { %2778 = vmatmul.f32.gmra.mxu2 %v2611_v23  ;;  %2887 = vmatpush.msrb.mxu3 %v2870_v15 }
 0x5ef   : > { %v8098_v43 = vpop.f32.mrf.mxu0 }
 0x5f0   : > { %2888 = vmatpush.msrb.mxu3 %v2869_v2 }
 0x5f2   : > { %2889 = vmatpush.msrb.mxu3 %v2868_v47 }
 0x5f4   : > { %2890 = vmatpush.msrb.mxu3 %v2867_v26 }
 0x5f5   : > { %2699 = vmatmul.f32.gmra.mxu0 %v2612_v63  ;;  %2740 = vmatmul.f32.gmra.mxu1 %v2612_v63 }
 0x5f6   : > { %2781 = vmatmul.f32.gmra.mxu2 %v2612_v63  ;;  %2891 = vmatpush.msrb.mxu3 %v2866_v29 }
 0x5f7   : > { %v8100_v32 = vpop.f32.mrf.mxu0 }
 0x5f8   : > { %2892 = vmatpush.msrb.mxu3 %v2865_v0 }
 0x5fa   : > { %2893 = vmatpush.msrb.mxu3 %v2864_v30 }
 0x5fc   : > { %2894 = vmatpush.msrb.mxu3 %v2863_v27 }
 0x63a   : > { %v2679_v44 = vpop.f32.mrf.mxu0  ;;  %v2720_v41 = vpop.f32.mrf.mxu1 }
 0x63b   : > { %v2785_v15 = vrot.slane %v2679_v44, 7 }
 0x641   : > { %v8108_v39 = vpop.f32.mrf.mxu2 }
 0x642   : > { %v8102_v51 = vpop.f32.mrf.mxu0  ;;  %v2723_v52 = vpop.f32.mrf.mxu1  ;;  %v9492_v2 = vrot.slane %v8108_v39, 1 }
 0x643   : > { %v2786_v47 = vrot.slane %v8102_v51, 7 }
 0x645   : > { %v2799_v44 = vsel %vm812_vm0, %v2785_v15, %v2786_v47 }
 0x646   : > { %v2802_v62 = vmul.f32 %v7897_v37, %v2799_v44 }
 0x648   : > { %v2810_v58 = vadd.f32 %v2802_v62, %v2723_v52 }
 0x649   : > { %v2764_v63 = vpop.f32.mrf.mxu2 }
 0x64a   : > { %v8104_v14 = vpop.f32.mrf.mxu0  ;;  %v2818_v6 = vrot.slane %v2764_v63, 1  ;;  %v2726_v28 = vpop.f32.mrf.mxu1 }
 0x64b   : > { %v2787_v20 = vrot.slane %v8104_v14, 7 }
 0x64c   : > { %v2831_v29 = vsel %vm845_vm1, %v9492_v2, %v2818_v6 }
 0x64d   : > { %v2833_v51 = vmul.f32 %v7900_v8, %v2831_v29  ;;  %v2798_v8 = vsel %vm812_vm0, %v2786_v47, %v2787_v20 }
 0x651   : > { %v2767_v13 = vpop.f32.mrf.mxu2 }
 0x652   : > { %v8106_v59 = vpop.f32.mrf.mxu0  ;;  %v2819_v0 = vrot.slane %v2767_v13, 1  ;;  %v8136_v13 = vld [vmem:[#allocation9 + $0x7] ss:$0 sm:$0xff] }
 0x653   : > { %v2788_v14 = vrot.slane %v8106_v59, 7 }
 0x654   : > { %v2830_v19 = vsel %vm845_vm1, %v2818_v6, %v2819_v0  ;;  %v2803_v6 = vmul.f32 %v7915_v5, %v2798_v8 }
 0x655   : > { %v2797_v52 = vsel %vm812_vm0, %v2787_v20, %v2788_v14 }
 0x656   : > { %v2804_v5 = vmul.f32 %v7928_v11, %v2797_v52 }
 0x659   : > { %v2770_v40 = vpop.f32.mrf.mxu2 }
 0x65a   : > { %v8110_v23 = vpop.f32.mrf.mxu0 }
 0x65b   : > { %v2789_v59 = vrot.slane %v8110_v23, 7 }
 0x65d   : > { %v2796_v44 = vsel %vm812_vm0, %v2788_v14, %v2789_v59 }
 0x65e   : > { %v2805_v11 = vmul.f32 %v7941_v10, %v2796_v44 }
 0x662   : > { %v8112_v55 = vpop.f32.mrf.mxu0 }
 0x663   : > { %v2790_v23 = vrot.slane %v8112_v55, 7 }
 0x665   : > { %v2795_v8 = vsel %vm812_vm0, %v2789_v59, %v2790_v23 }
 0x666   : > { %v2806_v14 = vmul.f32 %v7954_v60, %v2795_v8 }
 0x66a   : > { %v8114_v21 = vpop.f32.mrf.mxu0 }
 0x66b   : > { %v2791_v55 = vrot.slane %v8114_v21, 7 }
 0x672   : > { %v8116_v36 = vpop.f32.mrf.mxu0 }
 0x673   : > { %v9493_v26 = vrot.slane %v8116_v36, 7 }
 0x675   : > { %v2800_v30 = vsel %vm812_vm0, %v9493_v26, %v2785_v15  ;;  %v2834_v26 = vmul.f32 %v7904_v61, %v2830_v19  ;;  %v2820_v15 = vrot.slane %v2770_v40, 1  ;;  %v2729_v19 = vpop.f32.mrf.mxu1  ;;  %v2811_v40 = vadd.f32 %v2803_v6, %v2726_v28 }
 0x676   : > { %v2801_v27 = vmul.f32 %v7892_v31, %v2800_v30  ;;  %v2773_v31 = vpop.f32.mrf.mxu2 }
 0x677   : > { %v2829_v37 = vsel %vm845_vm1, %v2819_v0, %v2820_v15 }
 0x678   : > { %v2809_v63 = vadd.f32 %v2801_v27, %v2720_v41  ;;  %v2842_v41 = vadd.f32 %v2834_v26, %v2810_v58  ;;  %v2835_v29 = vmul.f32 %v7919_v56, %v2829_v37  ;;  %v2812_v27 = vadd.f32 %v2804_v5, %v2729_v19 }
 0x67a   : > { %v2841_v2 = vadd.f32 %v2833_v51, %v2809_v63  ;;  %v2855_v61 = vadd.f32 %v8136_v13, %v2842_v41  ;;  %v2843_v58 = vadd.f32 %v2835_v29, %v2811_v40 }
 0x67c   : > { %v2854_v30 = vadd.f32 %v8136_v13, %v2841_v2  ;;  %v2821_v2 = vrot.slane %v2773_v31, 1  ;;  %v2856_v26 = vadd.f32 %v8136_v13, %v2843_v58 }
 0x67d   : > { %v2732_v28 = vpop.f32.mrf.mxu1 }
 0x67e   : > { %2895 = vmatmul.f32.vlgmr.msrb.gmra.mxu3 %v2854_v30  ;;  %v2776_v62 = vpop.f32.mrf.mxu2  ;;  %v2828_v47 = vsel %vm845_vm1, %v2820_v15, %v2821_v2  ;;  %v2813_v15 = vadd.f32 %v2805_v11, %v2732_v28 }
 0x67f   : > { %v2836_v56 = vmul.f32 %v7932_v1, %v2828_v47  ;;  %v2822_v0 = vrot.slane %v2776_v62, 1  ;;  %v9526_v47 = vrot.slane %v8116_v36, 7 }
 0x681   : > { %v2844_v51 = vadd.f32 %v2836_v56, %v2812_v27  ;;  %v2827_v63 = vsel %vm845_vm1, %v2821_v2, %v2822_v0  ;;  %v2794_v2 = vsel %vm812_vm0, %v2790_v23, %v2791_v55  ;;  %v2793_v5 = vsel %vm812_vm0, %v2791_v55, %v9526_v47  ;;  %v9530_v55 = vld [vmem:[#allocation26_spill] sm:$0xff]  ;;  %v8245_v47 = vld [vmem:[%s7126_s13 + $0x10] sm:$0xff] }
 0x682   : > { %v2837_v1 = vmul.f32 %v7945_v24, %v2827_v63  ;;  %v2807_v52 = vmul.f32 %v8065_v42, %v2794_v2  ;;  %v9527_v56 = vrot.slane %v8108_v39, 1  ;;  %v2808_v42 = vmul.f32 %v8080_v49, %v2793_v5  ;;  %v8230_v2 = vld [vmem:[%s7126_s13 + $0x20] sm:$0xff] }
 0x683   : > { %v2857_v31 = vadd.f32 %v8136_v13, %v2844_v51  ;;  %v1763_v49 = vadd.f32 %v7856_v45, %v7757_v57  ;;  %v1754_v57 = vadd.f32 %v7850_v16, %v7745_v53  ;;  %v1751_v45 = vadd.f32 %v7848_v33, %v7741_v34  ;;  %v6373_v53 = vld [vmem:[#allocation12] ss:$0 sm:$0xff]  ;;  %v8221_v33 = vld [vmem:[%s7126_s13 + $0x28] sm:$0xff] }
 0x684   : > { %v2845_v41 = vadd.f32 %v2837_v1, %v2813_v15  ;;  %v1748_v16 = vadd.f32 %v7846_v17, %v7737_v12 }
 0x685   : > { %v2735_v37 = vpop.f32.mrf.mxu1 }
 0x686   : > { %2898 = vmatmul.f32.gmra.mxu3 %v2855_v61  ;;  %v2779_v20 = vpop.f32.mrf.mxu2  ;;  %v2858_v29 = vadd.f32 %v8136_v13, %v2845_v41  ;;  %v2814_v19 = vadd.f32 %v2806_v14, %v2735_v37 }
 0x687   : > { %v2823_v30 = vrot.slane %v2779_v20, 1 }
 0x689   : > { %v2826_v6 = vsel %vm845_vm1, %v2822_v0, %v2823_v30 }
 0x68a   : > { %v2838_v24 = vmul.f32 %v7958_v46, %v2826_v6 }
 0x68c   : > { %v2846_v40 = vadd.f32 %v2838_v24, %v2814_v19 }
 0x68d   : > { %v2738_v60 = vpop.f32.mrf.mxu1 }
 0x68e   : > { %2901 = vmatmul.f32.gmra.mxu3 %v2856_v26  ;;  %v2782_v10 = vpop.f32.mrf.mxu2  ;;  %v2859_v21 = vadd.f32 %v8136_v13, %v2846_v40  ;;  %v2815_v46 = vadd.f32 %v2807_v52, %v2738_v60  ;;  %v9532_v40 = vld [vmem:[#allocation27_spill] sm:$0xff]  ;;  %v8238_v60 = vld [vmem:[%s7126_s13 + $0x18] sm:$0xff] }
 0x68f   : > { %v2824_v61 = vrot.slane %v2782_v10, 1  ;;  %v9529_v10 = vld [vmem:[#allocation25_spill] sm:$0xff] }
 0x690   : > { %v1745_v24 = vadd.f32 %v9530_v55, %v9529_v10  ;;  %v3094_v10 = vld [vmem:[#allocation16 + $0x58] sm:$0xff] }
 0x691   : > { %v2825_v62 = vsel %vm845_vm1, %v2823_v30, %v2824_v61  ;;  %v2832_v26 = vsel %vm845_vm1, %v2824_v61, %v9527_v56  ;;  %v1757_v30 = vadd.f32 %v7852_v22, %v7749_v4  ;;  %v8210_v22 = vld [vmem:[%s7126_s13 + $0x30] sm:$0xff]  ;;  %v8252_v56 = vld [vmem:[%s7126_s13 + $0x8] sm:$0xff] }
 0x692   : > { %v2839_v58 = vmul.f32 %v8068_v25, %v2825_v62  ;;  %v2840_v0 = vmul.f32 %v7980_v18, %v2832_v26  ;;  %v1760_v18 = vadd.f32 %v7854_v7, %v7753_v48  ;;  %v2340_v62 = vadd.f32 %v9532_v40, %v1745_v24  ;;  %v3093_v24 = vld [vmem:[#allocation16 + $0x50] sm:$0xff] }
 0x693   : > { %v2344_v48 = vadd.f32 %v8094_v38, %v1757_v30  ;;  %v9528_v38 = vld [vmem:[#allocation29_spill] sm:$0xff]  ;;  %v3089_v40 = vld [vmem:[#allocation16 + $0x30] sm:$0xff] }
 0x694   : > { %v2847_v59 = vadd.f32 %v2839_v58, %v2815_v46  ;;  %v2345_v15 = vadd.f32 %v8096_v50, %v1760_v18  ;;  %v2342_v6 = vadd.f32 %v9528_v38, %v1751_v45  ;;  %v3025_v18 = vld [vmem:[#allocation13 + $0x58] sm:$0xff]  ;;  %v3022_v30 = vld [vmem:[#allocation13 + $0x40] sm:$0xff]  ;;  %v3015_v45 = vld [vmem:[#allocation13 + $0x8] sm:$0xff] }
 0x695   : > { %v2741_v27 = vpop.f32.mrf.mxu1  ;;  %v3098_v38 = vld [vmem:[#allocation16 + $0x78] sm:$0xff] }
 0x696   : > { %2904 = vmatmul.f32.gmra.mxu3 %v2857_v31  ;;  %v2860_v25 = vadd.f32 %v8136_v13, %v2847_v59  ;;  %v2816_v28 = vadd.f32 %v2808_v42, %v2741_v27  ;;  %v1766_v31 = vadd.f32 %v7858_v9, %v7761_v35  ;;  %v2343_v9 = vadd.f32 %v8092_v3, %v1754_v57  ;;  %v3018_v57 = vld [vmem:[#allocation13 + $0x20] sm:$0xff] }
 0x697   : > { %3103 = vmatpush.msra.mxu2 %v3098_v38  ;;  %v3360_v38 = vld [vmem:[#allocation7 + $0xd78] sm:$0xff] }
 0x698   : > { %v2848_v44 = vadd.f32 %v2840_v0, %v2816_v28  ;;  %v2347_v8 = vadd.f32 %v8100_v32, %v1766_v31  ;;  %v8259_v0 = vld [vmem:[%s7126_s13] sm:$0xff] }
 0x699   : > { %v3024_v31 = vld [vmem:[#allocation13 + $0x50] sm:$0xff] }
 0x69a   : > { %v2861_v36 = vadd.f32 %v8136_v13, %v2848_v44  ;;  %v2346_v13 = vadd.f32 %v8098_v43, %v1763_v49  ;;  %v8214_v43 = vld [vmem:[%s7126_s13 + $0x38] sm:$0xff]  ;;  %v627_v49 = vld [vmem:[#allocation6 + $0x20] sm:$0xff] }
 0x69e   : > { %2907 = vmatmul.f32.gmra.mxu3 %v2858_v29  ;;  %v9531_v29 = vld [vmem:[#allocation28_spill] sm:$0xff] }
 0x69f   : > { %v2341_v61 = vadd.f32 %v9531_v29, %v1748_v16  ;;  %v3092_v29 = vld [vmem:[#allocation16 + $0x48] sm:$0xff] }
 0x6a6   : > { %2910 = vmatmul.f32.gmra.mxu3 %v2859_v21 }
 0x6ae   : > { %2913 = vmatmul.f32.gmra.mxu3 %v2860_v25 }
 0x6b6   : > { %2916 = vmatmul.f32.gmra.mxu3 %v2861_v36  ;;  %v623_v36 = vld [vmem:[#allocation6] sm:$0xff] }
 0x701   : > { %v2896_v20 = vpop.f32.mrf.mxu3 }
 0x702   : > { %v2920_v46 = vadd.f32 %v2896_v20, %v2340_v62  ;;  %v624_v20 = vld [vmem:[#allocation6 + $0x8] sm:$0xff]  ;;  %v3088_v62 = vld [vmem:[#allocation16 + $0x28] sm:$0xff] }
 0x704   : > { %v2928_v25 = vadd.f32 %v8259_v0, %v2920_v46 }
 0x706   : > { %v8269_v44 = vadd.f32 %v6373_v53, %v2928_v25  ;;  %v3084_v25 = vld [vmem:[#allocation16 + $0x8] sm:$0xff] }
 0x709   : > { %v2899_v51 = vpop.f32.mrf.mxu3 }
 0x70a   : > { %v2921_v52 = vadd.f32 %v2899_v51, %v2341_v61  ;;  %v625_v51 = vld [vmem:[#allocation6 + $0x10] sm:$0xff] }
 0x70b   : > { %v3091_v61 = vld [vmem:[#allocation16 + $0x40] sm:$0xff] }
 0x70c   : > { %v2929_v26 = vadd.f32 %v8252_v56, %v2921_v52  ;;  %v3087_v52 = vld [vmem:[#allocation16 + $0x20] sm:$0xff] }
 0x70e   : > { %v8266_v28 = vadd.f32 %v6373_v53, %v2929_v26  ;;  %v3085_v26 = vld [vmem:[#allocation16 + $0x10] sm:$0xff] }
 0x711   : > { %v2902_v63 = vpop.f32.mrf.mxu3 }
 0x712   : > { %v2922_v19 = vadd.f32 %v2902_v63, %v2342_v6  ;;  %v626_v63 = vld [vmem:[#allocation6 + $0x18] sm:$0xff]  ;;  %v3097_v6 = vld [vmem:[#allocation16 + $0x70] sm:$0xff] }
 0x713   : > { %3104 = vmatpush.msra.mxu2 %v3097_v6  ;;  %v3355_v6 = vld [vmem:[#allocation7 + $0xd50] sm:$0xff] }
 0x714   : > { %v2930_v5 = vadd.f32 %v8245_v47, %v2922_v19  ;;  %v3090_v19 = vld [vmem:[#allocation16 + $0x38] sm:$0xff] }
 0x716   : > { %v8263_v27 = vadd.f32 %v6373_v53, %v2930_v5 }
 0x719   : > { %v2905_v39 = vpop.f32.mrf.mxu3 }
 0x71a   : > { %v2923_v34 = vadd.f32 %v2905_v39, %v2343_v9  ;;  %v3029_v39 = vld [vmem:[#allocation13 + $0x78] sm:$0xff]  ;;  %v630_v9 = vld [vmem:[#allocation6 + $0x38] sm:$0xff] }
 0x71b   : > { %3034 = vmatpush.msrb.mxu1 %v3029_v39 }
 0x71c   : > { %v2931_v58 = vadd.f32 %v8238_v60, %v2923_v34  ;;  %v3096_v34 = vld [vmem:[#allocation16 + $0x68] sm:$0xff] }
 0x71d   : > { %3105 = vmatpush.msra.mxu2 %v3096_v34  ;;  %v3356_v34 = vld [vmem:[#allocation7 + $0xd58] sm:$0xff] }
 0x71e   : > { %v8256_v42 = vadd.f32 %v6373_v53, %v2931_v58  ;;  %v3086_v58 = vld [vmem:[#allocation16 + $0x18] sm:$0xff] }
 0x721   : > { %v2908_v11 = vpop.f32.mrf.mxu3 }
 0x722   : > { %v2924_v4 = vadd.f32 %v2908_v11, %v2344_v48  ;;  %v3028_v11 = vld [vmem:[#allocation13 + $0x70] sm:$0xff]  ;;  %v629_v48 = vld [vmem:[#allocation6 + $0x30] sm:$0xff] }
 0x723   : > { %3035 = vmatpush.msrb.mxu1 %v3028_v11 }
 0x724   : > { %v2932_v12 = vadd.f32 %v8230_v2, %v2924_v4  ;;  %v3014_v4 = vld [vmem:[#allocation13] sm:$0xff] }
 0x726   : > { %v8249_v59 = vadd.f32 %v6373_v53, %v2932_v12 }
 0x729   : > { %v2911_v23 = vpop.f32.mrf.mxu3 }
 0x72a   : > { %v2925_v7 = vadd.f32 %v2911_v23, %v2345_v15  ;;  %v3027_v23 = vld [vmem:[#allocation13 + $0x68] sm:$0xff]  ;;  %v628_v15 = vld [vmem:[#allocation6 + $0x28] sm:$0xff] }
 0x72b   : > { %3036 = vmatpush.msrb.mxu1 %v3027_v23 }
 0x72c   : > { %v2933_v3 = vadd.f32 %v8221_v33, %v2925_v7  ;;  %v3017_v7 = vld [vmem:[#allocation13 + $0x18] sm:$0xff] }
 0x72e   : > { %v8242_v21 = vadd.f32 %v6373_v53, %v2933_v3  ;;  %v3095_v3 = vld [vmem:[#allocation16 + $0x60] sm:$0xff] }
 0x72f   : > { %3106 = vmatpush.msra.mxu2 %v3095_v3  ;;  %v3357_v3 = vld [vmem:[#allocation7 + $0xd60] sm:$0xff] }
 0x731   : > { %v2914_v1 = vpop.f32.mrf.mxu3  ;;  %3107 = vmatpush.msra.mxu2 %v3094_v10  ;;  %v3352_v10 = vld [vmem:[#allocation7 + $0xd38] sm:$0xff] }
 0x732   : > { %v2926_v41 = vadd.f32 %v2914_v1, %v2346_v13  ;;  %v3026_v1 = vld [vmem:[#allocation13 + $0x60] sm:$0xff]  ;;  %v3023_v13 = vld [vmem:[#allocation13 + $0x48] sm:$0xff] }
 0x733   : > { %3037 = vmatpush.msrb.mxu1 %v3026_v1  ;;  %3108 = vmatpush.msra.mxu2 %v3093_v24  ;;  %v3354_v24 = vld [vmem:[#allocation7 + $0xd48] sm:$0xff] }
 0x734   : > { %v2934_v50 = vadd.f32 %v8210_v22, %v2926_v41  ;;  %v3020_v41 = vld [vmem:[#allocation13 + $0x30] sm:$0xff] }
 0x735   : > { %3038 = vmatpush.msrb.mxu1 %v3025_v18  ;;  %3109 = vmatpush.msra.mxu2 %v3092_v29  ;;  %v3349_v29 = vld [vmem:[#allocation7 + $0xd20] sm:$0xff] }
 0x736   : > { %v8234_v17 = vadd.f32 %v6373_v53, %v2934_v50 }
 0x737   : > { %3039 = vmatpush.msrb.mxu1 %v3024_v31  ;;  %3110 = vmatpush.msra.mxu2 %v3091_v61  ;;  %v3350_v61 = vld [vmem:[#allocation7 + $0xd28] sm:$0xff] }
 0x739   : > { %v2917_v37 = vpop.f32.mrf.mxu3  ;;  %3040 = vmatpush.msrb.mxu1 %v3023_v13  ;;  %3111 = vmatpush.msra.mxu2 %v3090_v19  ;;  %v3351_v19 = vld [vmem:[#allocation7 + $0xd30] sm:$0xff] }
 0x73a   : > { %v2927_v35 = vadd.f32 %v2917_v37, %v2347_v8  ;;  %v3021_v8 = vld [vmem:[#allocation13 + $0x38] sm:$0xff]  ;;  %v3019_v37 = vld [vmem:[#allocation13 + $0x28] sm:$0xff] }
 0x73b   : > { %3041 = vmatpush.msrb.mxu1 %v3022_v30  ;;  %3112 = vmatpush.msra.mxu2 %v3089_v40  ;;  %v3347_v40 = vld [vmem:[#allocation7 + $0xd10] sm:$0xff] }
 0x73c   : > { %v2935_v32 = vadd.f32 %v8214_v43, %v2927_v35  ;;  %v3016_v35 = vld [vmem:[#allocation13 + $0x10] sm:$0xff] }
 0x73d   : > { %3042 = vmatpush.msrb.mxu1 %v3021_v8  ;;  %3113 = vmatpush.msra.mxu2 %v3088_v62  ;;  %v3348_v62 = vld [vmem:[#allocation7 + $0xd18] sm:$0xff] }
 0x73e   : > { %v8224_v14 = vadd.f32 %v6373_v53, %v2935_v32 }
 0x73f   : > { %3043 = vmatpush.msrb.mxu1 %v3020_v41  ;;  %3114 = vmatpush.msra.mxu2 %v3087_v52  ;;  %v3343_v52 = vld [vmem:[#allocation7 + $0xcf0] sm:$0xff] }
 0x740   : > { %2981 = vmatpush.msrb.mxu0 %v8224_v14 }
 0x741   : > { %3044 = vmatpush.msrb.mxu1 %v3019_v37  ;;  %3115 = vmatpush.msra.mxu2 %v3086_v58  ;;  %v3344_v58 = vld [vmem:[#allocation7 + $0xcf8] sm:$0xff] }
 0x742   : > { %2982 = vmatpush.msrb.mxu0 %v8234_v17 }
 0x743   : > { %3045 = vmatpush.msrb.mxu1 %v3018_v57  ;;  %3116 = vmatpush.msra.mxu2 %v3085_v26  ;;  %v3341_v26 = vld [vmem:[#allocation7 + $0xce0] sm:$0xff] }
 0x744   : > { %2983 = vmatpush.msrb.mxu0 %v8242_v21 }
 0x745   : > { %3046 = vmatpush.msrb.mxu1 %v3017_v7  ;;  %3117 = vmatpush.msra.mxu2 %v3084_v25  ;;  %v3342_v25 = vld [vmem:[#allocation7 + $0xce8] sm:$0xff] }
 0x746   : > { %2984 = vmatpush.msrb.mxu0 %v8249_v59 }
 0x747   : > { %3047 = vmatpush.msrb.mxu1 %v3016_v35 }
 0x748   : > { %2985 = vmatpush.msrb.mxu0 %v8256_v42 }
 0x749   : > { %3048 = vmatpush.msrb.mxu1 %v3015_v45 }
 0x74a   : > { %2986 = vmatpush.msrb.mxu0 %v8263_v27 }
 0x74b   : > { %3049 = vmatpush.msrb.mxu1 %v3014_v4 }
 0x74c   : > { %2987 = vmatpush.msrb.mxu0 %v8266_v28 }
 0x74d   : > { %3443 = vmatpush.msra.mxu1 %v3360_v38  ;;  %v3314_v38 = vld [vmem:[#allocation7 + $0xc08] sm:$0xff] }
 0x74e   : > { %2988 = vmatpush.msrb.mxu0 %v8269_v44 }
 0x74f   : > { %6174 = vmatmul.msk.f32.vlgmr.msrb.gmra.mxu0 %vm2948_vm2, %v623_v36  ;;  %v3083_v36 = vld [vmem:[#allocation16] sm:$0xff]  ;;  %3444 = vmatpush.msra.mxu1 %v3357_v3 }
 0x750   : > { %3118 = vmatpush.msra.mxu2 %v3083_v36  ;;  %v3337_v36 = vld [vmem:[#allocation7 + $0xcc0] sm:$0xff] }
 0x751   : > { %3445 = vmatpush.msra.mxu1 %v3354_v24 }
 0x753   : > { %3446 = vmatpush.msra.mxu1 %v3351_v19 }
 0x755   : > { %3447 = vmatpush.msra.mxu1 %v3348_v62 }
 0x757   : > { %6175 = vmatmul.msk.f32.gmra.mxu0 %vm2948_vm2, %v624_v20  ;;  %v6374_v20 = vld [vmem:[#allocation15] ss:$0 sm:$0xff] }
 0x75f   : > { %6176 = vmatmul.msk.f32.gmra.mxu0 %vm2948_vm2, %v625_v51 }
 0x767   : > { %6177 = vmatmul.msk.f32.gmra.mxu0 %vm2948_vm2, %v626_v63 }
 0x76f   : > { %6178 = vmatmul.msk.f32.gmra.mxu0 %vm2948_vm2, %v627_v49 }
 0x777   : > { %6179 = vmatmul.msk.f32.gmra.mxu0 %vm2948_vm2, %v628_v15 }
 0x77f   : > { %6180 = vmatmul.msk.f32.gmra.mxu0 %vm2948_vm2, %v629_v48 }
 0x787   : > { %6181 = vmatmul.msk.f32.gmra.mxu0 %vm2948_vm2, %v630_v9 }
 0x7cc   : > { %v2990_v50 = vpop.f32.mrf.mxu0 }
 0x7cd   : > { %3050 = vmatmul.f32.vlgmr.msrb.gmra.mxu1 %v2990_v50 }
 0x7d4   : > { %v2993_v32 = vpop.f32.mrf.mxu0 }
 0x7d5   : > { %3053 = vmatmul.f32.gmra.mxu1 %v2993_v32 }
 0x7dc   : > { %v2996_v53 = vpop.f32.mrf.mxu0 }
 0x7dd   : > { %3056 = vmatmul.f32.gmra.mxu1 %v2996_v53  ;;  %v3358_v53 = vld [vmem:[#allocation7 + $0xd68] sm:$0xff] }
 0x7de   : > { %3361 = vmatpush.msra.mxu3 %v3358_v53 }
 0x7e0   : > { %3362 = vmatpush.msra.mxu3 %v3355_v6  ;;  %v3315_v6 = vld [vmem:[#allocation7 + $0xc10] sm:$0xff] }
 0x7e2   : > { %3363 = vmatpush.msra.mxu3 %v3352_v10 }
 0x7e4   : > { %v2999_v16 = vpop.f32.mrf.mxu0  ;;  %3364 = vmatpush.msra.mxu3 %v3349_v29 }
 0x7e5   : > { %3059 = vmatmul.f32.gmra.mxu1 %v2999_v16  ;;  %v3359_v16 = vld [vmem:[#allocation7 + $0xd70] sm:$0xff] }
 0x7e6   : > { %3402 = vmatpush.msra.mxu0 %v3359_v16  ;;  %v3313_v16 = vld [vmem:[#allocation7 + $0xc00] sm:$0xff] }
 0x7e8   : > { %3403 = vmatpush.msra.mxu0 %v3356_v34 }
 0x7ec   : > { %v3002_v55 = vpop.f32.mrf.mxu0 }
 0x7ed   : > { %3062 = vmatmul.f32.gmra.mxu1 %v3002_v55  ;;  %v3353_v55 = vld [vmem:[#allocation7 + $0xd40] sm:$0xff] }
 0x7ee   : > { %3404 = vmatpush.msra.mxu0 %v3353_v55 }
 0x7f0   : > { %3405 = vmatpush.msra.mxu0 %v3350_v61 }
 0x7f2   : > { %3406 = vmatpush.msra.mxu0 %v3347_v40 }
 0x7f4   : > { %v3005_v12 = vpop.f32.mrf.mxu0  ;;  %3407 = vmatpush.msra.mxu0 %v3344_v58 }
 0x7f5   : > { %3065 = vmatmul.f32.gmra.mxu1 %v3005_v12  ;;  %v3346_v12 = vld [vmem:[#allocation7 + $0xd08] sm:$0xff] }
 0x7f6   : > { %3365 = vmatpush.msra.mxu3 %v3346_v12  ;;  %3408 = vmatpush.msra.mxu0 %v3341_v26 }
 0x7f8   : > { %3366 = vmatpush.msra.mxu3 %v3343_v52 }
 0x7fc   : > { %v3008_v46 = vpop.f32.mrf.mxu0 }
 0x7fd   : > { %3068 = vmatmul.f32.gmra.mxu1 %v3008_v46  ;;  %v3345_v46 = vld [vmem:[#allocation7 + $0xd00] sm:$0xff] }
 0x7fe   : > { %3448 = vmatpush.msra.mxu1 %v3345_v46 }
 0x800   : > { %3449 = vmatpush.msra.mxu1 %v3342_v25 }
 0x804   : > { %v3011_v5 = vpop.f32.mrf.mxu0 }
 0x805   : > { %3071 = vmatmul.f32.gmra.mxu1 %v3011_v5  ;;  %v3340_v5 = vld [vmem:[#allocation7 + $0xcd8] sm:$0xff] }
 0x806   : > { %3367 = vmatpush.msra.mxu3 %v3340_v5 }
 0x808   : > { %3368 = vmatpush.msra.mxu3 %v3337_v36 }
 0x84a   : > { %v3051_v51 = vpop.f32.mrf.mxu1 }
 0x84b   : > { %v3052_v63 = vadd.f32 %v6374_v20, %v3051_v51  ;;  %v3339_v51 = vld [vmem:[#allocation7 + $0xcd0] sm:$0xff] }
 0x84c   : > { %3450 = vmatpush.msra.mxu1 %v3339_v51 }
 0x84d   : > { %v3075_v39 = vmax.f32 %v3052_v63, 0.0  ;;  %v3334_v63 = vld [vmem:[#allocation7 + $0xca8] sm:$0xff] }
 0x84e   : > { %3369 = vmatpush.msra.mxu3 %v3334_v63 }
 0x84f   : > { %3119 = vmatmul.f32.vlgmr.msra.gmra.mxu2 %v3075_v39  ;;  %v3335_v39 = vld [vmem:[#allocation7 + $0xcb0] sm:$0xff] }
 0x852   : > { %v3054_v11 = vpop.f32.mrf.mxu1 }
 0x853   : > { %v3055_v23 = vadd.f32 %v6374_v20, %v3054_v11  ;;  %v3336_v11 = vld [vmem:[#allocation7 + $0xcb8] sm:$0xff] }
 0x854   : > { %3451 = vmatpush.msra.mxu1 %v3336_v11 }
 0x855   : > { %v3076_v1 = vmax.f32 %v3055_v23, 0.0  ;;  %v3331_v23 = vld [vmem:[#allocation7 + $0xc90] sm:$0xff] }
 0x856   : > { %3370 = vmatpush.msra.mxu3 %v3331_v23 }
 0x857   : > { %3122 = vmatmul.f32.gmra.mxu2 %v3076_v1  ;;  %v3332_v1 = vld [vmem:[#allocation7 + $0xc98] sm:$0xff] }
 0x85a   : > { %v3057_v49 = vpop.f32.mrf.mxu1 }
 0x85b   : > { %v3058_v18 = vadd.f32 %v6374_v20, %v3057_v49  ;;  %v3333_v49 = vld [vmem:[#allocation7 + $0xca0] sm:$0xff] }
 0x85c   : > { %3452 = vmatpush.msra.mxu1 %v3333_v49 }
 0x85d   : > { %v3077_v31 = vmax.f32 %v3058_v18, 0.0  ;;  %v3328_v18 = vld [vmem:[#allocation7 + $0xc78] sm:$0xff] }
 0x85e   : > { %3371 = vmatpush.msra.mxu3 %v3328_v18 }
 0x85f   : > { %3125 = vmatmul.f32.gmra.mxu2 %v3077_v31  ;;  %v3329_v31 = vld [vmem:[#allocation7 + $0xc80] sm:$0xff] }
 0x862   : > { %v3060_v13 = vpop.f32.mrf.mxu1 }
 0x863   : > { %v3061_v30 = vadd.f32 %v6374_v20, %v3060_v13  ;;  %v3330_v13 = vld [vmem:[#allocation7 + $0xc88] sm:$0xff] }
 0x864   : > { %3453 = vmatpush.msra.mxu1 %v3330_v13 }
 0x865   : > { %v3078_v15 = vmax.f32 %v3061_v30, 0.0  ;;  %v3325_v30 = vld [vmem:[#allocation7 + $0xc60] sm:$0xff] }
 0x866   : > { %3372 = vmatpush.msra.mxu3 %v3325_v30 }
 0x867   : > { %3128 = vmatmul.f32.gmra.mxu2 %v3078_v15  ;;  %v3326_v15 = vld [vmem:[#allocation7 + $0xc68] sm:$0xff] }
 0x86a   : > { %v3063_v8 = vpop.f32.mrf.mxu1 }
 0x86b   : > { %v3064_v41 = vadd.f32 %v6374_v20, %v3063_v8  ;;  %v3327_v8 = vld [vmem:[#allocation7 + $0xc70] sm:$0xff] }
 0x86c   : > { %3454 = vmatpush.msra.mxu1 %v3327_v8 }
 0x86d   : > { %v3079_v37 = vmax.f32 %v3064_v41, 0.0  ;;  %v3322_v41 = vld [vmem:[#allocation7 + $0xc48] sm:$0xff] }
 0x86e   : > { %3373 = vmatpush.msra.mxu3 %v3322_v41 }
 0x86f   : > { %3131 = vmatmul.f32.gmra.mxu2 %v3079_v37  ;;  %v3323_v37 = vld [vmem:[#allocation7 + $0xc50] sm:$0xff] }
 0x872   : > { %v3066_v57 = vpop.f32.mrf.mxu1 }
 0x873   : > { %v3067_v48 = vadd.f32 %v6374_v20, %v3066_v57  ;;  %v3324_v57 = vld [vmem:[#allocation7 + $0xc58] sm:$0xff] }
 0x874   : > { %3455 = vmatpush.msra.mxu1 %v3324_v57 }
 0x875   : > { %v3080_v7 = vmax.f32 %v3067_v48, 0.0  ;;  %v8280_v48 = vld [vmem:[#allocation18] ss:$0 sm:$0xff] }
 0x877   : > { %3134 = vmatmul.f32.gmra.mxu2 %v3080_v7  ;;  %v3319_v7 = vld [vmem:[#allocation7 + $0xc30] sm:$0xff] }
 0x878   : > { %3374 = vmatpush.msra.mxu3 %v3319_v7 }
 0x87a   : > { %v3069_v35 = vpop.f32.mrf.mxu1 }
 0x87b   : > { %v3070_v45 = vadd.f32 %v6374_v20, %v3069_v35  ;;  %v3320_v35 = vld [vmem:[#allocation7 + $0xc38] sm:$0xff] }
 0x87d   : > { %v3081_v9 = vmax.f32 %v3070_v45, 0.0  ;;  %v3321_v45 = vld [vmem:[#allocation7 + $0xc40] sm:$0xff] }
 0x87e   : > { %3456 = vmatpush.msra.mxu1 %v3321_v45 }
 0x87f   : > { %3137 = vmatmul.f32.gmra.mxu2 %v3081_v9 }
 0x882   : > { %v3072_v4 = vpop.f32.mrf.mxu1 }
 0x883   : > { %v3073_v50 = vadd.f32 %v6374_v20, %v3072_v4  ;;  %v3338_v20 = vld [vmem:[#allocation7 + $0xcc8] sm:$0xff]  ;;  %v3316_v4 = vld [vmem:[#allocation7 + $0xc18] sm:$0xff] }
 0x884   : > { %3409 = vmatpush.msra.mxu0 %v3338_v20  ;;  %3375 = vmatpush.msra.mxu3 %v3316_v4 }
 0x885   : > { %v3082_v32 = vmax.f32 %v3073_v50, 0.0  ;;  %v3317_v50 = vld [vmem:[#allocation7 + $0xc20] sm:$0xff] }
 0x886   : > { %3410 = vmatpush.msra.mxu0 %v3335_v39  ;;  %3376 = vmatpush.msra.mxu3 %v3313_v16 }
 0x887   : > { %3140 = vmatmul.f32.gmra.mxu2 %v3082_v32  ;;  %v3318_v32 = vld [vmem:[#allocation7 + $0xc28] sm:$0xff] }
 0x888   : > { %3411 = vmatpush.msra.mxu0 %v3332_v1  ;;  %3457 = vmatpush.msra.mxu1 %v3318_v32 }
 0x88a   : > { %3412 = vmatpush.msra.mxu0 %v3329_v31  ;;  %3458 = vmatpush.msra.mxu1 %v3315_v6 }
 0x88c   : > { %3413 = vmatpush.msra.mxu0 %v3326_v15 }
 0x88e   : > { %3414 = vmatpush.msra.mxu0 %v3323_v37 }
 0x890   : > { %3415 = vmatpush.msra.mxu0 %v3320_v35 }
 0x892   : > { %3416 = vmatpush.msra.mxu0 %v3317_v50 }
 0x894   : > { %3417 = vmatpush.msra.mxu0 %v3314_v38 }
 0x8d2   : > { %v3120_v9 = vpop.f32.mrf.mxu2 }
 0x8d3   : > { %v3121_v53 = vadd.f32 %v8280_v48, %v3120_v9 }
 0x8d5   : > { %v6182_v34 = vmul.f32 -1.442695, %v3121_v53 }
 0x8d7   : > { %6387 = vpow2.f32 %v6182_v34 }
 0x8da   : > { %v3123_v3 = vpop.f32.mrf.mxu2 }
 0x8db   : > { %v3124_v10 = vadd.f32 %v8280_v48, %v3123_v3 }
 0x8dd   : > { %v6388_v55 = vpop.eup %6387  ;;  %v6183_v24 = vmul.f32 -1.442695, %v3124_v10 }
 0x8de   : > { %v3168_v29 = vadd.f32 1.0, %v6388_v55 }
 0x8df   : > { %6389 = vpow2.f32 %v6183_v24 }
 0x8e0   : > { %6391 = vrcp.f32 %v3168_v29  ;;  %v3187_v5 = vand.u32 2147483648, %v3168_v29  ;;  %v3185_v36 = vand.u32 2147483647, %v3168_v29  ;;  %vm3181_vm4 = vweird.f32 %v3168_v29 }
 0x8e2   : > { %v3126_v61 = vpop.f32.mrf.mxu2  ;;  %v3188_v23 = vor.u32 1.1754944e-38, %v3187_v5  ;;  %vm3186_vm6 = vcmp.eq.f32.partialorder %v3185_v36, 8.507059e+37 }
 0x8e3   : > { %v3127_v19 = vadd.f32 %v8280_v48, %v3126_v61 }
 0x8e5   : > { %v6390_v12 = vpop.eup %6389  ;;  %v6184_v40 = vmul.f32 -1.442695, %v3127_v19 }
 0x8e6   : > { %v6392_v62 = vpop.eup %6391  ;;  %v3169_v52 = vadd.f32 1.0, %v6390_v12 }
 0x8e7   : > { %v3177_v58 = vmul.f32 %v6392_v62, %v3168_v29  ;;  %6393 = vpow2.f32 %v6184_v40  ;;  %vm3182_vm3 = vweird.f32 %v6392_v62 }
 0x8e8   : > { %6395 = vrcp.f32 %v3169_v52  ;;  %vm3183_vm5 = vmor %vm3181_vm4, %vm3182_vm3  ;;  %v3200_v15 = vand.u32 2147483647, %v3169_v52  ;;  %v3202_v8 = vand.u32 2147483648, %v3169_v52  ;;  %vm3196_vm8 = vweird.f32 %v3169_v52 }
 0x8e9   : > { %v3178_v46 = vsub.f32 1.0, %v3177_v58 }
 0x8ea   : > { %v3129_v26 = vpop.f32.mrf.mxu2  ;;  %vm3201_vm10 = vcmp.eq.f32.partialorder %v3200_v15, 8.507059e+37 }
 0x8eb   : > { %v3179_v25 = vmul.f32 %v6392_v62, %v3178_v46  ;;  %v3130_v20 = vadd.f32 %v8280_v48, %v3129_v26 }
 0x8ed   : > { %v6394_v51 = vpop.eup %6393  ;;  %v3180_v63 = vadd.f32 %v6392_v62, %v3179_v25  ;;  %v6185_v39 = vmul.f32 -1.442695, %v3130_v20 }
 0x8ee   : > { %v6396_v11 = vpop.eup %6395  ;;  %v3170_v1 = vadd.f32 1.0, %v6394_v51 }
 0x8ef   : > { %v3184_v49 = vsel %vm3183_vm5, %v6392_v62, %v3180_v63  ;;  %v3192_v18 = vmul.f32 %v6396_v11, %v3169_v52  ;;  %6397 = vpow2.f32 %v6185_v39  ;;  %vm3197_vm7 = vweird.f32 %v6396_v11 }
 0x8f0   : > { %v3189_v31 = vsel %vm3186_vm6, %v3188_v23, %v3184_v49  ;;  %6399 = vrcp.f32 %v3170_v1  ;;  %vm3198_vm9 = vmor %vm3196_vm8, %vm3197_vm7  ;;  %v3215_v6 = vand.u32 2147483647, %v3170_v1  ;;  %v3217_v34 = vand.u32 2147483648, %v3170_v1 }
 0x8f1   : > { %v3193_v13 = vsub.f32 1.0, %v3192_v18  ;;  %v3296_v30 = vmul.f32 %v3189_v31, %v8269_v44  ;;  %v3203_v44 = vor.u32 1.1754944e-38, %v3202_v8  ;;  %vm3211_vm12 = vweird.f32 %v3170_v1 }
 0x8f2   : > { %v3132_v41 = vpop.f32.mrf.mxu2  ;;  %vm3216_vm14 = vcmp.eq.f32.partialorder %v3215_v6, 8.507059e+37 }
 0x8f3   : > { %v3194_v37 = vmul.f32 %v6396_v11, %v3193_v13  ;;  %v3133_v57 = vadd.f32 %v8280_v48, %v3132_v41  ;;  %v8289_v7 = vadd.f32 %v8259_v0, %v3296_v30 }
 0x8f5   : > { %9533 = vst [vmem:[#allocation29_spill] sm:$0xff] %v8289_v7  ;;  %v6398_v35 = vpop.eup %6397  ;;  %v3195_v45 = vadd.f32 %v6396_v11, %v3194_v37  ;;  %v6186_v9 = vmul.f32 -1.442695, %v3133_v57  ;;  %3377 = vmatmul.f32.vlgmr.msra.gmra.mxu3 %v8289_v7  ;;  %3418 = vmatmul.f32.vlgmr.msra.gmra.mxu0 %v8289_v7 }
 0x8f6   : > { %v6400_v4 = vpop.eup %6399  ;;  %v3171_v50 = vadd.f32 1.0, %v6398_v35  ;;  %3459 = vmatmul.f32.vlgmr.msra.gmra.mxu1 %v8289_v7 }
 0x8f7   : > { %v3199_v32 = vsel %vm3198_vm9, %v6396_v11, %v3195_v45  ;;  %v3207_v53 = vmul.f32 %v6400_v4, %v3170_v1  ;;  %6401 = vpow2.f32 %v6186_v9  ;;  %vm3212_vm11 = vweird.f32 %v6400_v4 }
 0x8f8   : > { %v3204_v0 = vsel %vm3201_vm10, %v3203_v44, %v3199_v32  ;;  %6403 = vrcp.f32 %v3171_v50  ;;  %vm3213_vm13 = vmor %vm3211_vm12, %vm3212_vm11  ;;  %v3230_v5 = vand.u32 2147483647, %v3171_v50  ;;  %v3232_v26 = vand.u32 2147483648, %v3171_v50 }
 0x8f9   : > { %v3208_v16 = vsub.f32 1.0, %v3207_v53  ;;  %v3297_v38 = vmul.f32 %v3204_v0, %v8266_v28  ;;  %v3218_v28 = vor.u32 1.1754944e-38, %v3217_v34  ;;  %vm3226_vm3 = vweird.f32 %v3171_v50 }
 0x8fa   : > { %v3135_v3 = vpop.f32.mrf.mxu2  ;;  %vm3231_vm5 = vcmp.eq.f32.partialorder %v3230_v5, 8.507059e+37 }
 0x8fb   : > { %v3209_v10 = vmul.f32 %v6400_v4, %v3208_v16  ;;  %v3136_v55 = vadd.f32 %v8280_v48, %v3135_v3  ;;  %v8297_v24 = vadd.f32 %v8252_v56, %v3297_v38 }
 0x8fd   : > { %9534 = vst [vmem:[#allocation25_spill] sm:$0xff] %v8297_v24  ;;  %v6402_v29 = vpop.eup %6401  ;;  %v3210_v61 = vadd.f32 %v6400_v4, %v3209_v10  ;;  %v6187_v19 = vmul.f32 -1.442695, %v3136_v55  ;;  %3380 = vmatmul.f32.gmra.mxu3 %v8297_v24  ;;  %3421 = vmatmul.f32.gmra.mxu0 %v8297_v24 }
 0x8fe   : > { %v6404_v12 = vpop.eup %6403  ;;  %v3172_v40 = vadd.f32 1.0, %v6402_v29  ;;  %3462 = vmatmul.f32.gmra.mxu1 %v8297_v24 }
 0x8ff   : > { %v3214_v62 = vsel %vm3213_vm13, %v6400_v4, %v3210_v61  ;;  %v3222_v52 = vmul.f32 %v6404_v12, %v3171_v50  ;;  %6405 = vpow2.f32 %v6187_v19  ;;  %vm3227_vm15 = vweird.f32 %v6404_v12 }
 0x900   : > { %v3219_v56 = vsel %vm3216_vm14, %v3218_v28, %v3214_v62  ;;  %6407 = vrcp.f32 %v3172_v40  ;;  %vm3228_vm4 = vmor %vm3226_vm3, %vm3227_vm15  ;;  %v3245_v30 = vand.u32 2147483647, %v3172_v40  ;;  %v3247_v15 = vand.u32 2147483648, %v3172_v40 }
 0x901   : > { %v3223_v58 = vsub.f32 1.0, %v3222_v52  ;;  %v3298_v46 = vmul.f32 %v3219_v56, %v8263_v27  ;;  %v3233_v27 = vor.u32 1.1754944e-38, %v3232_v26  ;;  %vm3241_vm7 = vweird.f32 %v3172_v40 }
 0x902   : > { %v3138_v25 = vpop.f32.mrf.mxu2  ;;  %vm3246_vm9 = vcmp.eq.f32.partialorder %v3245_v30, 8.507059e+37  ;;  %v3613_v30 = vld [vmem:[#allocation7 + $0xed8] sm:$0xff] }
 0x903   : > { %v3224_v36 = vmul.f32 %v6404_v12, %v3223_v58  ;;  %v3139_v20 = vadd.f32 %v8280_v48, %v3138_v25  ;;  %v8305_v51 = vadd.f32 %v8245_v47, %v3298_v46 }
 0x905   : > { %9535 = vst [vmem:[#allocation26_spill] sm:$0xff] %v8305_v51  ;;  %v6406_v63 = vpop.eup %6405  ;;  %v3225_v39 = vadd.f32 %v6404_v12, %v3224_v36  ;;  %v6188_v11 = vmul.f32 -1.442695, %v3139_v20  ;;  %3383 = vmatmul.f32.gmra.mxu3 %v8305_v51  ;;  %3424 = vmatmul.f32.gmra.mxu0 %v8305_v51 }
 0x906   : > { %v6408_v23 = vpop.eup %6407  ;;  %v3173_v1 = vadd.f32 1.0, %v6406_v63  ;;  %3465 = vmatmul.f32.gmra.mxu1 %v8305_v51 }
 0x907   : > { %v3229_v49 = vsel %vm3228_vm4, %v6404_v12, %v3225_v39  ;;  %v3237_v18 = vmul.f32 %v6408_v23, %v3172_v40  ;;  %6409 = vpow2.f32 %v6188_v11  ;;  %vm3242_vm6 = vweird.f32 %v6408_v23 }
 0x908   : > { %v3234_v47 = vsel %vm3231_vm5, %v3233_v27, %v3229_v49  ;;  %6411 = vrcp.f32 %v3173_v1  ;;  %vm3243_vm8 = vmor %vm3241_vm7, %vm3242_vm6  ;;  %v3262_v0 = vand.u32 2147483648, %v3173_v1  ;;  %v3260_v38 = vand.u32 2147483647, %v3173_v1 }
 0x909   : > { %v3238_v31 = vsub.f32 1.0, %v3237_v18  ;;  %v3299_v13 = vmul.f32 %v3234_v47, %v8256_v42  ;;  %v3248_v42 = vor.u32 1.1754944e-38, %v3247_v15  ;;  %vm3256_vm11 = vweird.f32 %v3173_v1  ;;  %v3615_v18 = vld [vmem:[#allocation7 + $0xee8] sm:$0xff]  ;;  %v3616_v47 = vld [vmem:[#allocation7 + $0xef0] sm:$0xff]  ;;  %v3609_v15 = vld [vmem:[#allocation7 + $0xeb8] sm:$0xff] }
 0x90a   : > { %v3141_v8 = vpop.f32.mrf.mxu2  ;;  %v3263_v55 = vor.u32 1.1754944e-38, %v3262_v0  ;;  %vm3261_vm13 = vcmp.eq.f32.partialorder %v3260_v38, 8.507059e+37  ;;  %3618 = vmatpush.msrb.mxu2 %v3615_v18  ;;  %3659 = vmatpush.msrb.mxu3 %v3616_v47  ;;  %v3599_v0 = vld [vmem:[#allocation7 + $0xe68] sm:$0xff] }
 0x90b   : > { %v3239_v41 = vmul.f32 %v6408_v23, %v3238_v31  ;;  %v3142_v37 = vadd.f32 %v8280_v48, %v3141_v8  ;;  %v8313_v57 = vadd.f32 %v8238_v60, %v3299_v13  ;;  %v3617_v31 = vld [vmem:[#allocation7 + $0xef8] sm:$0xff]  ;;  %v3610_v8 = vld [vmem:[#allocation7 + $0xec0] sm:$0xff]  ;;  %v3595_v38 = vld [vmem:[#allocation7 + $0xe48] sm:$0xff] }
 0x90c   : > { %3700 = vmatpush.msrb.mxu0 %v3617_v31  ;;  %3660 = vmatpush.msrb.mxu3 %v3613_v30 }
 0x90d   : > { %9536 = vst [vmem:[#allocation28_spill] sm:$0xff] %v8313_v57  ;;  %v6410_v35 = vpop.eup %6409  ;;  %v3240_v45 = vadd.f32 %v6408_v23, %v3239_v41  ;;  %v6189_v9 = vmul.f32 -1.442695, %v3142_v37  ;;  %3386 = vmatmul.f32.gmra.mxu3 %v8313_v57  ;;  %3427 = vmatmul.f32.gmra.mxu0 %v8313_v57  ;;  %v3611_v41 = vld [vmem:[#allocation7 + $0xec8] sm:$0xff]  ;;  %v3606_v37 = vld [vmem:[#allocation7 + $0xea0] sm:$0xff] }
 0x90e   : > { %v6412_v4 = vpop.eup %6411  ;;  %v3174_v44 = vadd.f32 1.0, %v6410_v35  ;;  %3468 = vmatmul.f32.gmra.mxu1 %v8313_v57  ;;  %3661 = vmatpush.msrb.mxu3 %v3610_v8  ;;  %v3607_v35 = vld [vmem:[#allocation7 + $0xea8] sm:$0xff] }
 0x90f   : > { %v3244_v50 = vsel %vm3243_vm8, %v6408_v23, %v3240_v45  ;;  %v3252_v48 = vmul.f32 %v6412_v4, %v3173_v1  ;;  %6413 = vpow2.f32 %v6189_v9  ;;  %vm3257_vm10 = vweird.f32 %v6412_v4  ;;  %v3608_v45 = vld [vmem:[#allocation7 + $0xeb0] sm:$0xff]  ;;  %v3603_v9 = vld [vmem:[#allocation7 + $0xe88] sm:$0xff] }
 0x910   : > { %v3249_v60 = vsel %vm3246_vm9, %v3248_v42, %v3244_v50  ;;  %6415 = vrcp.f32 %v3174_v44  ;;  %vm3258_vm12 = vmor %vm3256_vm11, %vm3257_vm10  ;;  %v3277_v28 = vand.u32 2147483648, %v3174_v44  ;;  %v3275_v62 = vand.u32 2147483647, %v3174_v44  ;;  %3662 = vmatpush.msrb.mxu3 %v3607_v35  ;;  %v3605_v42 = vld [vmem:[#allocation7 + $0xe98] sm:$0xff]  ;;  %v3600_v50 = vld [vmem:[#allocation7 + $0xe70] sm:$0xff] }
 0x911   : > { %v3253_v32 = vsub.f32 1.0, %v3252_v48  ;;  %v3300_v53 = vmul.f32 %v3249_v60, %v8249_v59  ;;  %vm3271_vm15 = vweird.f32 %v3174_v44  ;;  %v3601_v48 = vld [vmem:[#allocation7 + $0xe78] sm:$0xff]  ;;  %v3602_v60 = vld [vmem:[#allocation7 + $0xe80] sm:$0xff] }
 0x912   : > { %v3278_v46 = vor.u32 1.1754944e-38, %v3277_v28  ;;  %vm3276_vm4 = vcmp.eq.f32.partialorder %v3275_v62, 8.507059e+37  ;;  %v3586_v28 = vld [vmem:[#allocation7 + $0xe00] sm:$0xff] }
 0x913   : > { %v3254_v16 = vmul.f32 %v6412_v4, %v3253_v32  ;;  %v8320_v6 = vadd.f32 %v8230_v2, %v3300_v53  ;;  %v3597_v32 = vld [vmem:[#allocation7 + $0xe58] sm:$0xff]  ;;  %v3598_v53 = vld [vmem:[#allocation7 + $0xe60] sm:$0xff] }
 0x914   : > { %v3582_v62 = vld [vmem:[#allocation7 + $0xde0] sm:$0xff] }
 0x915   : > { %9537 = vst [vmem:[#allocation27_spill] sm:$0xff] %v8320_v6  ;;  %v6414_v34 = vpop.eup %6413  ;;  %v3255_v3 = vadd.f32 %v6412_v4, %v3254_v16  ;;  %3389 = vmatmul.f32.gmra.mxu3 %v8320_v6  ;;  %3430 = vmatmul.f32.gmra.mxu0 %v8320_v6  ;;  %v3594_v16 = vld [vmem:[#allocation7 + $0xe40] sm:$0xff] }
 0x916   : > { %v6416_v10 = vpop.eup %6415  ;;  %v3175_v29 = vadd.f32 1.0, %v6414_v34  ;;  %3471 = vmatmul.f32.gmra.mxu1 %v8320_v6  ;;  %v3596_v34 = vld [vmem:[#allocation7 + $0xe50] sm:$0xff] }
 0x917   : > { %v3259_v59 = vsel %vm3258_vm12, %v6412_v4, %v3255_v3  ;;  %v3267_v61 = vmul.f32 %v6416_v10, %v3174_v44  ;;  %vm3272_vm14 = vweird.f32 %v6416_v10  ;;  %v3604_v4 = vld [vmem:[#allocation7 + $0xe90] sm:$0xff]  ;;  %v3591_v3 = vld [vmem:[#allocation7 + $0xe28] sm:$0xff] }
 0x918   : > { %v3264_v19 = vsel %vm3261_vm13, %v3263_v55, %v3259_v59  ;;  %6417 = vrcp.f32 %v3175_v29  ;;  %vm3273_vm3 = vmor %vm3271_vm15, %vm3272_vm14  ;;  %v3290_v63 = vand.u32 2147483647, %v3175_v29  ;;  %vm3286_vm6 = vweird.f32 %v3175_v29  ;;  %3663 = vmatpush.msrb.mxu3 %v3604_v4  ;;  %v3593_v55 = vld [vmem:[#allocation7 + $0xe38] sm:$0xff] }
 0x919   : > { %v3268_v2 = vsub.f32 1.0, %v3267_v61  ;;  %v3301_v12 = vmul.f32 %v3264_v19, %v8242_v21  ;;  %v3588_v61 = vld [vmem:[#allocation7 + $0xe10] sm:$0xff]  ;;  %v3589_v19 = vld [vmem:[#allocation7 + $0xe18] sm:$0xff] }
 0x91a   : > { %vm3291_vm8 = vcmp.eq.f32.partialorder %v3290_v63, 8.507059e+37  ;;  %3664 = vmatpush.msrb.mxu3 %v3601_v48  ;;  %v3574_v63 = vld [vmem:[#allocation7 + $0xda0] sm:$0xff] }
 0x91b   : > { %v3269_v40 = vmul.f32 %v6416_v10, %v3268_v2  ;;  %v8327_v52 = vadd.f32 %v8221_v33, %v3301_v12  ;;  %v3292_v33 = vand.u32 2147483648, %v3175_v29  ;;  %v3590_v2 = vld [vmem:[#allocation7 + $0xe20] sm:$0xff]  ;;  %v3585_v12 = vld [vmem:[#allocation7 + $0xdf8] sm:$0xff] }
 0x91c   : > { %3665 = vmatpush.msrb.mxu3 %v3598_v53  ;;  %v8381_v48 = vld [vmem:[#allocation2] sm:$0xff] }
 0x91d   : > { %9538 = vst [vmem:[#allocation30_spill] sm:$0xff] %v8327_v52  ;;  %v3270_v56 = vadd.f32 %v6416_v10, %v3269_v40  ;;  %3392 = vmatmul.f32.gmra.mxu3 %v8327_v52  ;;  %3433 = vmatmul.f32.gmra.mxu0 %v8327_v52  ;;  %v3293_v23 = vor.u32 1.1754944e-38, %v3292_v33  ;;  %v3587_v40 = vld [vmem:[#allocation7 + $0xe08] sm:$0xff]  ;;  %v3578_v33 = vld [vmem:[#allocation7 + $0xdc0] sm:$0xff] }
 0x91e   : > { %v6418_v58 = vpop.eup %6417  ;;  %3474 = vmatmul.f32.gmra.mxu1 %v8327_v52  ;;  %3666 = vmatpush.msrb.mxu3 %v3595_v38 }
 0x91f   : > { %v3274_v5 = vsel %vm3273_vm3, %v6416_v10, %v3270_v56  ;;  %v3282_v21 = vmul.f32 %v6418_v58, %v3175_v29  ;;  %vm3287_vm5 = vweird.f32 %v6418_v58  ;;  %v3592_v10 = vld [vmem:[#allocation7 + $0xe30] sm:$0xff]  ;;  %v3583_v56 = vld [vmem:[#allocation7 + $0xde8] sm:$0xff] }
 0x920   : > { %v3279_v26 = vsel %vm3276_vm4, %v3278_v46, %v3274_v5  ;;  %vm3288_vm7 = vmor %vm3286_vm6, %vm3287_vm5  ;;  %3667 = vmatpush.msrb.mxu3 %v3592_v10  ;;  %v3579_v46 = vld [vmem:[#allocation7 + $0xdc8] sm:$0xff]  ;;  %v3580_v5 = vld [vmem:[#allocation7 + $0xdd0] sm:$0xff] }
 0x921   : > { %v3283_v25 = vsub.f32 1.0, %v3282_v21  ;;  %v3302_v36 = vmul.f32 %v3279_v26, %v8234_v17  ;;  %v3581_v21 = vld [vmem:[#allocation7 + $0xdd8] sm:$0xff] }
 0x922   : > { %3668 = vmatpush.msrb.mxu3 %v3589_v19  ;;  %v8393_v19 = vld [vmem:[#allocation9 + $0x8] ss:$0 sm:$0xff] }
 0x923   : > { %v3284_v20 = vmul.f32 %v6418_v58, %v3283_v25  ;;  %v8334_v39 = vadd.f32 %v8210_v22, %v3302_v36  ;;  %v3576_v25 = vld [vmem:[#allocation7 + $0xdb0] sm:$0xff]  ;;  %v3577_v36 = vld [vmem:[#allocation7 + $0xdb8] sm:$0xff] }
 0x924   : > { %3669 = vmatpush.msrb.mxu3 %v3586_v28 }
 0x925   : > { %9539 = vst [vmem:[#allocation31_spill] sm:$0xff] %v8334_v39  ;;  %v3285_v11 = vadd.f32 %v6418_v58, %v3284_v20  ;;  %3395 = vmatmul.f32.gmra.mxu3 %v8334_v39  ;;  %3436 = vmatmul.f32.gmra.mxu0 %v8334_v39  ;;  %v3573_v20 = vld [vmem:[#allocation7 + $0xd98] sm:$0xff] }
 0x926   : > { %3477 = vmatmul.f32.gmra.mxu1 %v8334_v39  ;;  %3670 = vmatpush.msrb.mxu3 %v3583_v56 }
 0x927   : > { %v3289_v27 = vsel %vm3288_vm7, %v6418_v58, %v3285_v11  ;;  %v3584_v58 = vld [vmem:[#allocation7 + $0xdf0] sm:$0xff] }
 0x928   : > { %v3294_v17 = vsel %vm3291_vm8, %v3293_v23, %v3289_v27  ;;  %3671 = vmatpush.msrb.mxu3 %v3580_v5  ;;  %v3575_v23 = vld [vmem:[#allocation7 + $0xda8] sm:$0xff]  ;;  %v3570_v27 = vld [vmem:[#allocation7 + $0xd80] sm:$0xff] }
 0x929   : > { %v3303_v1 = vmul.f32 %v3294_v17, %v8224_v14  ;;  %v3612_v14 = vld [vmem:[#allocation7 + $0xed0] sm:$0xff]  ;;  %v3571_v17 = vld [vmem:[#allocation7 + $0xd88] sm:$0xff] }
 0x92a   : > { %3619 = vmatpush.msrb.mxu2 %v3612_v14  ;;  %3672 = vmatpush.msrb.mxu3 %v3577_v36 }
 0x92b   : > { %v8341_v49 = vadd.f32 %v8214_v43, %v3303_v1  ;;  %v3614_v43 = vld [vmem:[#allocation7 + $0xee0] sm:$0xff]  ;;  %v3572_v1 = vld [vmem:[#allocation7 + $0xd90] sm:$0xff] }
 0x92c   : > { %3701 = vmatpush.msrb.mxu0 %v3614_v43  ;;  %3620 = vmatpush.msrb.mxu2 %v3609_v15 }
 0x92d   : > { %9540 = vst [vmem:[#allocation32_spill] sm:$0xff] %v8341_v49  ;;  %3398 = vmatmul.f32.gmra.mxu3 %v8341_v49  ;;  %3439 = vmatmul.f32.gmra.mxu0 %v8341_v49 }
 0x92e   : > { %3480 = vmatmul.f32.gmra.mxu1 %v8341_v49  ;;  %3702 = vmatpush.msrb.mxu0 %v3611_v41 }
 0x92f   : > { %3621 = vmatpush.msrb.mxu2 %v3606_v37  ;;  %3673 = vmatpush.msrb.mxu3 %v3574_v63 }
 0x930   : > { %3703 = vmatpush.msrb.mxu0 %v3608_v45 }
 0x931   : > { %3622 = vmatpush.msrb.mxu2 %v3603_v9  ;;  %3674 = vmatpush.msrb.mxu3 %v3571_v17 }
 0x932   : > { %3704 = vmatpush.msrb.mxu0 %v3605_v42 }
 0x933   : > { %3623 = vmatpush.msrb.mxu2 %v3600_v50 }
 0x934   : > { %3705 = vmatpush.msrb.mxu0 %v3602_v60 }
 0x935   : > { %3624 = vmatpush.msrb.mxu2 %v3597_v32 }
 0x936   : > { %3706 = vmatpush.msrb.mxu0 %v3599_v0 }
 0x937   : > { %3625 = vmatpush.msrb.mxu2 %v3594_v16  ;;  %v8387_v16 = vld [vmem:[#allocation4] sm:$0xff] }
 0x938   : > { %3707 = vmatpush.msrb.mxu0 %v3596_v34 }
 0x939   : > { %3626 = vmatpush.msrb.mxu2 %v3591_v3  ;;  %v8390_v3 = vld [vmem:[#allocation4 + $0x8] sm:$0xff] }
 0x93a   : > { %3708 = vmatpush.msrb.mxu0 %v3593_v55 }
 0x93b   : > { %3627 = vmatpush.msrb.mxu2 %v3588_v61 }
 0x93c   : > { %3709 = vmatpush.msrb.mxu0 %v3590_v2 }
 0x93d   : > { %3628 = vmatpush.msrb.mxu2 %v3585_v12 }
 0x93e   : > { %3710 = vmatpush.msrb.mxu0 %v3587_v40  ;;  %v8398_v40 = vld [vmem:[#allocation2 + $0x10] sm:$0xff] }
 0x93f   : > { %3629 = vmatpush.msrb.mxu2 %v3582_v62 }
 0x940   : > { %3711 = vmatpush.msrb.mxu0 %v3584_v58 }
 0x941   : > { %3630 = vmatpush.msrb.mxu2 %v3579_v46 }
 0x942   : > { %3712 = vmatpush.msrb.mxu0 %v3581_v21 }
 0x943   : > { %3631 = vmatpush.msrb.mxu2 %v3576_v25  ;;  %v8404_v25 = vld [vmem:[#allocation4 + $0x10] sm:$0xff] }
 0x944   : > { %3713 = vmatpush.msrb.mxu0 %v3578_v33 }
 0x945   : > { %3632 = vmatpush.msrb.mxu2 %v3573_v20 }
 0x946   : > { %3714 = vmatpush.msrb.mxu0 %v3575_v23 }
 0x947   : > { %3633 = vmatpush.msrb.mxu2 %v3570_v27  ;;  %v8410_v27 = vld [vmem:[#allocation2 + $0x18] sm:$0xff] }
 0x948   : > { %3715 = vmatpush.msrb.mxu0 %v3572_v1 }
 0x972   : > { %v3419_v47 = vpop.f32.mrf.mxu0 }
 0x973   : > { %v8352_v29 = vpop.f32.mrf.mxu1 }
 0x974   : > { %v3516_v35 = vrot.slane %v8352_v29, 1 }
 0x978   : > { %v8346_v22 = vpop.f32.mrf.mxu3 }
 0x979   : > { %v3484_v8 = vrot.slane %v8346_v22, 7 }
 0x97a   : > { %v3422_v30 = vpop.f32.mrf.mxu0 }
 0x97b   : > { %v3463_v11 = vpop.f32.mrf.mxu1 }
 0x97c   : > { %v3517_v41 = vrot.slane %v3463_v11, 1 }
 0x97e   : > { %v3530_v42 = vsel %vm845_vm1, %v3516_v35, %v3517_v41 }
 0x97f   : > { %v3532_v38 = vmul.f32 %v8387_v16, %v3530_v42  ;;  %v8422_v42 = vld [vmem:[#allocation2 + $0x20] sm:$0xff] }
 0x980   : > { %v8348_v13 = vpop.f32.mrf.mxu3 }
 0x981   : > { %v3485_v43 = vrot.slane %v8348_v13, 7  ;;  %v8378_v13 = vld [vmem:[#allocation2 + $0x8] sm:$0xff] }
 0x982   : > { %v3425_v32 = vpop.f32.mrf.mxu0 }
 0x983   : > { %v3466_v31 = vpop.f32.mrf.mxu1  ;;  %v3498_v45 = vsel %vm812_vm0, %v3484_v8, %v3485_v43 }
 0x984   : > { %v3518_v9 = vrot.slane %v3466_v31, 1  ;;  %v3501_v50 = vmul.f32 %v8378_v13, %v3498_v45 }
 0x986   : > { %v3529_v53 = vsel %vm845_vm1, %v3517_v41, %v3518_v9  ;;  %v3509_v2 = vadd.f32 %v3501_v50, %v3422_v30  ;;  %v8416_v30 = vld [vmem:[#allocation4 + $0x18] sm:$0xff] }
 0x987   : > { %v3533_v10 = vmul.f32 %v8390_v3, %v3529_v53 }
 0x988   : > { %v8350_v44 = vpop.f32.mrf.mxu3 }
 0x989   : > { %v3486_v0 = vrot.slane %v8350_v44, 7  ;;  %v3541_v58 = vadd.f32 %v3533_v10, %v3509_v2 }
 0x98a   : > { %v3428_v21 = vpop.f32.mrf.mxu0 }
 0x98b   : > { %v3469_v15 = vpop.f32.mrf.mxu1  ;;  %v3497_v12 = vsel %vm812_vm0, %v3485_v43, %v3486_v0  ;;  %v3554_v33 = vadd.f32 %v8393_v19, %v3541_v58 }
 0x98c   : > { %v3519_v28 = vrot.slane %v3469_v15, 1  ;;  %v3502_v62 = vmul.f32 %v8398_v40, %v3497_v12  ;;  %v8434_v12 = vld [vmem:[#allocation2 + $0x28] sm:$0xff] }
 0x98d   : > { %v3562_v17 = vmax.f32 %v3554_v33, 0.0 }
 0x98e   : > { %v3528_v46 = vsel %vm845_vm1, %v3518_v9, %v3519_v28  ;;  %v3510_v20 = vadd.f32 %v3502_v62, %v3425_v32 }
 0x98f   : > { %v3534_v36 = vmul.f32 %v8404_v25, %v3528_v46  ;;  %v8440_v46 = vld [vmem:[#allocation4 + $0x28] sm:$0xff] }
 0x990   : > { %v8354_v59 = vpop.f32.mrf.mxu3 }
 0x991   : > { %v3487_v5 = vrot.slane %v8354_v59, 7  ;;  %v3542_v1 = vadd.f32 %v3534_v36, %v3510_v20 }
 0x992   : > { %v3431_v41 = vpop.f32.mrf.mxu0 }
 0x993   : > { %v3472_v55 = vpop.f32.mrf.mxu1  ;;  %v3496_v63 = vsel %vm812_vm0, %v3486_v0, %v3487_v5  ;;  %v3555_v15 = vadd.f32 %v8393_v19, %v3542_v1  ;;  %v8428_v0 = vld [vmem:[#allocation4 + $0x20] sm:$0xff]  ;;  %v8451_v1 = vld [vmem:[#allocation4 + $0x30] sm:$0xff] }
 0x994   : > { %v3520_v11 = vrot.slane %v3472_v55, 1  ;;  %v3503_v59 = vmul.f32 %v8410_v27, %v3496_v63  ;;  %v8446_v63 = vld [vmem:[#allocation2 + $0x30] sm:$0xff] }
 0x995   : > { %v3563_v50 = vmax.f32 %v3555_v15, 0.0 }
 0x998   : > { %v8356_v26 = vpop.f32.mrf.mxu3 }
 0x999   : > { %v3488_v31 = vrot.slane %v8356_v26, 7 }
 0x99a   : > { %v3434_v2 = vpop.f32.mrf.mxu0 }
 0x99b   : > { %v3475_v23 = vpop.f32.mrf.mxu1  ;;  %v3495_v45 = vsel %vm812_vm0, %v3487_v5, %v3488_v31 }
 0x99c   : > { %v3521_v9 = vrot.slane %v3475_v23, 1 }
 0x99e   : > { %v3526_v32 = vsel %vm845_vm1, %v3520_v11, %v3521_v9 }
 0x9a0   : > { %v8358_v18 = vpop.f32.mrf.mxu3 }
 0x9a1   : > { %v3489_v53 = vrot.slane %v8358_v18, 7 }
 0x9a3   : > { %v3478_v26 = vpop.f32.mrf.mxu1  ;;  %v3494_v55 = vsel %vm812_vm0, %v3488_v31, %v3489_v53 }
 0x9a8   : > { %v8360_v14 = vpop.f32.mrf.mxu3 }
 0x9ab   : > { %v3481_v58 = vpop.f32.mrf.mxu1 }
 0x9ac   : > { %v3523_v20 = vrot.slane %v3481_v58, 1  ;;  %v3881_v58 = vld [vmem:[#allocation7 + $0x1028] sm:$0xff] }
 0x9b0   : > { %v8364_v37 = vpop.f32.mrf.mxu3 }
 0x9b1   : > { %v3491_v4 = vrot.slane %v8364_v37, 7 }
 0x9b3   : > { %v3499_v22 = vsel %vm812_vm0, %v3491_v4, %v3484_v8  ;;  %v3511_v8 = vadd.f32 %v3503_v59, %v3428_v21  ;;  %v3437_v59 = vpop.f32.mrf.mxu0 }
 0x9b4   : > { %v3500_v60 = vmul.f32 %v8381_v48, %v3499_v22  ;;  %v3504_v22 = vmul.f32 %v8422_v42, %v3495_v45 }
 0x9b6   : > { %v3508_v34 = vadd.f32 %v3500_v60, %v3419_v47  ;;  %v3527_v47 = vsel %vm845_vm1, %v3519_v28, %v3520_v11  ;;  %v3512_v10 = vadd.f32 %v3504_v22, %v3431_v41  ;;  %v3505_v28 = vmul.f32 %v8434_v12, %v3494_v55  ;;  %v3891_v55 = vld [vmem:[#allocation7 + $0x1078] sm:$0xff] }
 0x9b7   : > { %v3535_v43 = vmul.f32 %v8416_v30, %v3527_v47  ;;  %3974 = vmatpush.msra.mxu3 %v3891_v55  ;;  %v3853_v55 = vld [vmem:[#allocation7 + $0xf48] sm:$0xff] }
 0x9b8   : > { %v3540_v61 = vadd.f32 %v3532_v38, %v3508_v34  ;;  %v3536_v38 = vmul.f32 %v8428_v0, %v3526_v32  ;;  %v3513_v36 = vadd.f32 %v3505_v28, %v3434_v2  ;;  %v3886_v2 = vld [vmem:[#allocation7 + $0x1050] sm:$0xff]  ;;  %v3887_v28 = vld [vmem:[#allocation7 + $0x1058] sm:$0xff] }
 0x9b9   : > { %v3543_v60 = vadd.f32 %v3535_v43, %v3511_v8  ;;  %v8459_v8 = vld [vmem:[#allocation2 + $0x38] sm:$0xff] }
 0x9ba   : > { %v3553_v44 = vadd.f32 %v8393_v19, %v3540_v61  ;;  %v3522_v61 = vrot.slane %v3478_v26, 1  ;;  %v3531_v26 = vsel %vm845_vm1, %v3523_v20, %v3516_v35  ;;  %v3889_v35 = vld [vmem:[#allocation7 + $0x1068] sm:$0xff] }
 0x9bb   : > { %v3556_v34 = vadd.f32 %v8393_v19, %v3543_v60  ;;  %v3440_v22 = vpop.f32.mrf.mxu0  ;;  %v8467_v60 = vld [vmem:[#allocation4 + $0x38] sm:$0xff]  ;;  %3892 = vmatpush.msrb.mxu1 %v3889_v35  ;;  %v3857_v35 = vld [vmem:[#allocation7 + $0xf68] sm:$0xff] }
 0x9bc   : > { %v3561_v56 = vmax.f32 %v3553_v44, 0.0  ;;  %v3544_v44 = vadd.f32 %v3536_v38, %v3512_v10  ;;  %v3525_v62 = vsel %vm845_vm1, %v3521_v9, %v3522_v61  ;;  %v3890_v10 = vld [vmem:[#allocation7 + $0x1070] sm:$0xff] }
 0x9bd   : > { %v3564_v18 = vmax.f32 %v3556_v34, 0.0  ;;  %v3537_v5 = vmul.f32 %v8440_v46, %v3525_v62  ;;  %3933 = vmatpush.msra.mxu2 %v3890_v10  ;;  %3893 = vmatpush.msrb.mxu1 %v3886_v2  ;;  %v3885_v62 = vld [vmem:[#allocation7 + $0x1048] sm:$0xff]  ;;  %v3858_v10 = vld [vmem:[#allocation7 + $0xf70] sm:$0xff] }
 0x9be   : > { %3634 = vmatmul.f32.vlgmr.msrb.gmra.mxu2 %v3561_v56  ;;  %3675 = vmatmul.f32.vlgmr.msrb.gmra.mxu3 %v3561_v56  ;;  %v3557_v21 = vadd.f32 %v8393_v19, %v3544_v44  ;;  %v3884_v44 = vld [vmem:[#allocation7 + $0x1040] sm:$0xff]  ;;  %v3854_v2 = vld [vmem:[#allocation7 + $0xf50] sm:$0xff] }
 0x9bf   : > { %3716 = vmatmul.f32.vlgmr.msrb.gmra.mxu0 %v3561_v56  ;;  %v3490_v56 = vrot.slane %v8360_v14, 7  ;;  %v3545_v23 = vadd.f32 %v3537_v5, %v3513_v36  ;;  %3934 = vmatpush.msra.mxu2 %v3887_v28  ;;  %v3882_v5 = vld [vmem:[#allocation7 + $0x1030] sm:$0xff]  ;;  %v3855_v28 = vld [vmem:[#allocation7 + $0xf58] sm:$0xff] }
 0x9c0   : > { %v3565_v14 = vmax.f32 %v3557_v21, 0.0  ;;  %v3877_v21 = vld [vmem:[#allocation7 + $0x1008] sm:$0xff]  ;;  %v3878_v36 = vld [vmem:[#allocation7 + $0x1010] sm:$0xff] }
 0x9c1   : > { %v3493_v33 = vsel %vm812_vm0, %v3489_v53, %v3490_v56  ;;  %v3558_v31 = vadd.f32 %v8393_v19, %v3545_v23  ;;  %v3492_v15 = vsel %vm812_vm0, %v3490_v56, %v3491_v4  ;;  %v3539_v4 = vmul.f32 %v8467_v60, %v3531_v26  ;;  %3935 = vmatpush.msra.mxu2 %v3884_v44  ;;  %v3880_v56 = vld [vmem:[#allocation7 + $0x1020] sm:$0xff]  ;;  %v3851_v44 = vld [vmem:[#allocation7 + $0xf38] sm:$0xff] }
 0x9c2   : > { %v3506_v11 = vmul.f32 %v8446_v63, %v3493_v33  ;;  %v3507_v41 = vmul.f32 %v8459_v8, %v3492_v15  ;;  %v3879_v33 = vld [vmem:[#allocation7 + $0x1018] sm:$0xff]  ;;  %v3876_v23 = vld [vmem:[#allocation7 + $0x1000] sm:$0xff]  ;;  %v3870_v15 = vld [vmem:[#allocation7 + $0xfd0] sm:$0xff] }
 0x9c3   : > { %v3566_v45 = vmax.f32 %v3558_v31, 0.0  ;;  %3936 = vmatpush.msra.mxu2 %v3881_v58  ;;  %v3868_v31 = vld [vmem:[#allocation7 + $0xfc0] sm:$0xff]  ;;  %v3847_v58 = vld [vmem:[#allocation7 + $0xf18] sm:$0xff] }
 0x9c4   : > { %v3514_v43 = vadd.f32 %v3506_v11, %v3437_v59  ;;  %v3874_v11 = vld [vmem:[#allocation7 + $0xff0] sm:$0xff]  ;;  %v3871_v59 = vld [vmem:[#allocation7 + $0xfd8] sm:$0xff] }
 0x9c5   : > { %3937 = vmatpush.msra.mxu2 %v3878_v36  ;;  %v3844_v36 = vld [vmem:[#allocation7 + $0xf00] sm:$0xff] }
 0x9c6   : > { %3637 = vmatmul.f32.gmra.mxu2 %v3562_v17  ;;  %3678 = vmatmul.f32.gmra.mxu3 %v3562_v17 }
 0x9c7   : > { %3719 = vmatmul.f32.gmra.mxu0 %v3562_v17  ;;  %v3524_v17 = vsel %vm845_vm1, %v3522_v61, %v3523_v20 }
 0x9c8   : > { %v3538_v47 = vmul.f32 %v8451_v1, %v3524_v17  ;;  %v3872_v17 = vld [vmem:[#allocation7 + $0xfe0] sm:$0xff] }
 0x9ca   : > { %v3546_v9 = vadd.f32 %v3538_v47, %v3514_v43  ;;  %v3873_v47 = vld [vmem:[#allocation7 + $0xfe8] sm:$0xff] }
 0x9cb   : > { %v3869_v43 = vld [vmem:[#allocation7 + $0xfc8] sm:$0xff] }
 0x9cc   : > { %v3559_v37 = vadd.f32 %v8393_v19, %v3546_v9  ;;  %v3867_v9 = vld [vmem:[#allocation7 + $0xfb8] sm:$0xff] }
 0x9ce   : > { %3640 = vmatmul.f32.gmra.mxu2 %v3563_v50  ;;  %3681 = vmatmul.f32.gmra.mxu3 %v3563_v50  ;;  %v3567_v32 = vmax.f32 %v3559_v37, 0.0  ;;  %v3862_v37 = vld [vmem:[#allocation7 + $0xf90] sm:$0xff] }
 0x9cf   : > { %3722 = vmatmul.f32.gmra.mxu0 %v3563_v50  ;;  %v3515_v50 = vadd.f32 %v3507_v41, %v3440_v22  ;;  %v3865_v41 = vld [vmem:[#allocation7 + $0xfa8] sm:$0xff] }
 0x9d1   : > { %v3547_v53 = vadd.f32 %v3539_v4, %v3515_v50  ;;  %v3863_v50 = vld [vmem:[#allocation7 + $0xf98] sm:$0xff]  ;;  %v3864_v4 = vld [vmem:[#allocation7 + $0xfa0] sm:$0xff] }
 0x9d3   : > { %v3560_v38 = vadd.f32 %v8393_v19, %v3547_v53  ;;  %v3883_v19 = vld [vmem:[#allocation7 + $0x1038] sm:$0xff]  ;;  %v3860_v53 = vld [vmem:[#allocation7 + $0xf80] sm:$0xff] }
 0x9d4   : > { %3894 = vmatpush.msrb.mxu1 %v3883_v19  ;;  %v3850_v19 = vld [vmem:[#allocation7 + $0xf30] sm:$0xff] }
 0x9d5   : > { %v3568_v34 = vmax.f32 %v3560_v38, 0.0  ;;  %v3861_v38 = vld [vmem:[#allocation7 + $0xf88] sm:$0xff] }
 0x9d6   : > { %3643 = vmatmul.f32.gmra.mxu2 %v3564_v18  ;;  %3684 = vmatmul.f32.gmra.mxu3 %v3564_v18 }
 0x9d7   : > { %3725 = vmatmul.f32.gmra.mxu0 %v3564_v18  ;;  %v3888_v18 = vld [vmem:[#allocation7 + $0x1060] sm:$0xff]  ;;  %3895 = vmatpush.msrb.mxu1 %v3880_v56 }
 0x9d8   : > { %3975 = vmatpush.msra.mxu3 %v3888_v18 }
 0x9d9   : > { %3896 = vmatpush.msrb.mxu1 %v3877_v21  ;;  %v3849_v21 = vld [vmem:[#allocation7 + $0xf28] sm:$0xff] }
 0x9da   : > { %3976 = vmatpush.msra.mxu3 %v3885_v62  ;;  %v3852_v62 = vld [vmem:[#allocation7 + $0xf40] sm:$0xff] }
 0x9db   : > { %3897 = vmatpush.msrb.mxu1 %v3874_v11  ;;  %v3846_v11 = vld [vmem:[#allocation7 + $0xf10] sm:$0xff] }
 0x9dc   : > { %3977 = vmatpush.msra.mxu3 %v3882_v5  ;;  %v3848_v5 = vld [vmem:[#allocation7 + $0xf20] sm:$0xff] }
 0x9dd   : > { %3898 = vmatpush.msrb.mxu1 %v3871_v59 }
 0x9de   : > { %3646 = vmatmul.f32.gmra.mxu2 %v3565_v14  ;;  %3687 = vmatmul.f32.gmra.mxu3 %v3565_v14 }
 0x9df   : > { %3728 = vmatmul.f32.gmra.mxu0 %v3565_v14  ;;  %3978 = vmatpush.msra.mxu3 %v3879_v33  ;;  %v3875_v14 = vld [vmem:[#allocation7 + $0xff8] sm:$0xff]  ;;  %v3845_v33 = vld [vmem:[#allocation7 + $0xf08] sm:$0xff] }
 0x9e0   : > { %3938 = vmatpush.msra.mxu2 %v3875_v14  ;;  %3899 = vmatpush.msrb.mxu1 %v3868_v31 }
 0x9e1   : > { %3979 = vmatpush.msra.mxu3 %v3876_v23 }
 0x9e2   : > { %3939 = vmatpush.msra.mxu2 %v3872_v17  ;;  %3900 = vmatpush.msrb.mxu1 %v3865_v41 }
 0x9e3   : > { %3980 = vmatpush.msra.mxu3 %v3873_v47 }
 0x9e4   : > { %3940 = vmatpush.msra.mxu2 %v3869_v43  ;;  %3901 = vmatpush.msrb.mxu1 %v3862_v37 }
 0x9e5   : > { %3981 = vmatpush.msra.mxu3 %v3870_v15 }
 0x9e6   : > { %3649 = vmatmul.f32.gmra.mxu2 %v3566_v45  ;;  %3690 = vmatmul.f32.gmra.mxu3 %v3566_v45 }
 0x9e7   : > { %3731 = vmatmul.f32.gmra.mxu0 %v3566_v45  ;;  %v3866_v45 = vld [vmem:[#allocation7 + $0xfb0] sm:$0xff]  ;;  %3982 = vmatpush.msra.mxu3 %v3867_v9 }
 0x9e8   : > { %3941 = vmatpush.msra.mxu2 %v3866_v45 }
 0x9e9   : > { %3983 = vmatpush.msra.mxu3 %v3864_v4 }
 0x9ea   : > { %3942 = vmatpush.msra.mxu2 %v3863_v50 }
 0x9eb   : > { %3984 = vmatpush.msra.mxu3 %v3861_v38 }
 0x9ec   : > { %3943 = vmatpush.msra.mxu2 %v3860_v53 }
 0x9ed   : > { %3985 = vmatpush.msra.mxu3 %v3858_v10 }
 0x9ee   : > { %3652 = vmatmul.f32.gmra.mxu2 %v3567_v32  ;;  %3693 = vmatmul.f32.gmra.mxu3 %v3567_v32 }
 0x9ef   : > { %3734 = vmatmul.f32.gmra.mxu0 %v3567_v32  ;;  %v3859_v32 = vld [vmem:[#allocation7 + $0xf78] sm:$0xff]  ;;  %3944 = vmatpush.msra.mxu2 %v3857_v35 }
 0x9f0   : > { %3902 = vmatpush.msrb.mxu1 %v3859_v32  ;;  %3986 = vmatpush.msra.mxu3 %v3855_v28 }
 0x9f1   : > { %3945 = vmatpush.msra.mxu2 %v3854_v2 }
 0x9f2   : > { %3987 = vmatpush.msra.mxu3 %v3852_v62  ;;  %v8510_v62 = vld [vmem:[#allocation9 + $0x9] ss:$0 sm:$0xff] }
 0x9f3   : > { %3946 = vmatpush.msra.mxu2 %v3851_v44 }
 0x9f4   : > { %3988 = vmatpush.msra.mxu3 %v3849_v21 }
 0x9f5   : > { %3947 = vmatpush.msra.mxu2 %v3848_v5 }
 0x9f6   : > { %3655 = vmatmul.f32.gmra.mxu2 %v3568_v34  ;;  %3696 = vmatmul.f32.gmra.mxu3 %v3568_v34 }
 0x9f7   : > { %3737 = vmatmul.f32.gmra.mxu0 %v3568_v34  ;;  %v3856_v34 = vld [vmem:[#allocation7 + $0xf60] sm:$0xff]  ;;  %3948 = vmatpush.msra.mxu2 %v3845_v33 }
 0x9f8   : > { %3903 = vmatpush.msrb.mxu1 %v3856_v34  ;;  %3989 = vmatpush.msra.mxu3 %v3846_v11 }
 0x9fa   : > { %3904 = vmatpush.msrb.mxu1 %v3853_v55 }
 0x9fc   : > { %3905 = vmatpush.msrb.mxu1 %v3850_v19 }
 0x9fe   : > { %3906 = vmatpush.msrb.mxu1 %v3847_v58 }
 0xa00   : > { %3907 = vmatpush.msrb.mxu1 %v3844_v36 }
 0xa3c   : > { %v8477_v22 = vpop.f32.mrf.mxu0 }
 0xa3d   : > { %v3773_v9 = vrot.slane %v8477_v22, 1 }
 0xa41   : > { %v8471_v29 = vpop.f32.mrf.mxu2  ;;  %v3676_v23 = vpop.f32.mrf.mxu3 }
 0xa42   : > { %v3741_v15 = vrot.slane %v8471_v29, 7 }
 0xa44   : > { %v3720_v56 = vpop.f32.mrf.mxu0 }
 0xa45   : > { %v3774_v41 = vrot.slane %v3720_v56, 1 }
 0xa47   : > { %v3787_v32 = vsel %vm845_vm1, %v3773_v9, %v3774_v41 }
 0xa48   : > { %v3789_v10 = vmul.f32 %v8387_v16, %v3787_v32 }
 0xa49   : > { %v8473_v61 = vpop.f32.mrf.mxu2  ;;  %v3679_v47 = vpop.f32.mrf.mxu3 }
 0xa4a   : > { %v3742_v31 = vrot.slane %v8473_v61, 7 }
 0xa4c   : > { %v3723_v59 = vpop.f32.mrf.mxu0  ;;  %v3755_v37 = vsel %vm812_vm0, %v3741_v15, %v3742_v31 }
 0xa4d   : > { %v3775_v50 = vrot.slane %v3723_v59, 1  ;;  %v3758_v61 = vmul.f32 %v8378_v13, %v3755_v37 }
 0xa4f   : > { %v3786_v38 = vsel %vm845_vm1, %v3774_v41, %v3775_v50  ;;  %v3766_v2 = vadd.f32 %v3758_v61, %v3679_v47 }
 0xa50   : > { %v3790_v28 = vmul.f32 %v8390_v3, %v3786_v38 }
 0xa51   : > { %v8475_v20 = vpop.f32.mrf.mxu2  ;;  %v3682_v35 = vpop.f32.mrf.mxu3 }
 0xa52   : > { %v3743_v34 = vrot.slane %v8475_v20, 7  ;;  %v3798_v21 = vadd.f32 %v3790_v28, %v3766_v2 }
 0xa54   : > { %v3726_v43 = vpop.f32.mrf.mxu0  ;;  %v3754_v56 = vsel %vm812_vm0, %v3742_v31, %v3743_v34  ;;  %v8530_v31 = vadd.f32 %v8510_v62, %v3798_v21 }
 0xa55   : > { %v3776_v58 = vrot.slane %v3726_v43, 1  ;;  %v3759_v20 = vmul.f32 %v8398_v40, %v3754_v56 }
 0xa57   : > { %v3785_v33 = vsel %vm845_vm1, %v3775_v50, %v3776_v58  ;;  %v3767_v59 = vadd.f32 %v3759_v20, %v3682_v35  ;;  %v8537_v50 = vadd.f32 %v8530_v31, %v8297_v24 }
 0xa58   : > { %v3791_v47 = vmul.f32 %v8404_v25, %v3785_v33 }
 0xa59   : > { %v8479_v26 = vpop.f32.mrf.mxu2 }
 0xa5a   : > { %v3744_v11 = vrot.slane %v8479_v26, 7  ;;  %v3799_v37 = vadd.f32 %v3791_v47, %v3767_v59 }
 0xa5c   : > { %v3729_v19 = vpop.f32.mrf.mxu0  ;;  %v3753_v43 = vsel %vm812_vm0, %v3743_v34, %v3744_v11  ;;  %v8547_v38 = vadd.f32 %v8510_v62, %v3799_v37 }
 0xa5d   : > { %v3760_v26 = vmul.f32 %v8410_v27, %v3753_v43 }
 0xa5e   : > { %v8554_v28 = vadd.f32 %v8547_v38, %v8305_v51 }
 0xa61   : > { %v8481_v18 = vpop.f32.mrf.mxu2 }
 0xa64   : > { %v3732_v41 = vpop.f32.mrf.mxu0 }
 0xa69   : > { %v8483_v14 = vpop.f32.mrf.mxu2 }
 0xa6c   : > { %v3735_v2 = vpop.f32.mrf.mxu0 }
 0xa6d   : > { %v3779_v33 = vrot.slane %v3735_v2, 1 }
 0xa71   : > { %v8485_v17 = vpop.f32.mrf.mxu2 }
 0xa72   : > { %v3747_v43 = vrot.slane %v8485_v17, 7 }
 0xa79   : > { %v8489_v45 = vpop.f32.mrf.mxu2 }
 0xa7a   : > { %v3748_v4 = vrot.slane %v8489_v45, 7 }
 0xa7c   : > { %v3756_v29 = vsel %vm812_vm0, %v3748_v4, %v3741_v15  ;;  %v3777_v15 = vrot.slane %v3729_v19, 1  ;;  %v3749_v2 = vsel %vm812_vm0, %v3747_v43, %v3748_v4 }
 0xa7d   : > { %v3757_v53 = vmul.f32 %v8381_v48, %v3756_v29  ;;  %v3745_v29 = vrot.slane %v8481_v18, 7 }
 0xa7e   : > { %v3784_v32 = vsel %vm845_vm1, %v3776_v58, %v3777_v15 }
 0xa7f   : > { %v3765_v55 = vadd.f32 %v3757_v53, %v3676_v23  ;;  %v3685_v23 = vpop.f32.mrf.mxu3  ;;  %v3792_v53 = vmul.f32 %v8416_v30, %v3784_v32  ;;  %v3752_v35 = vsel %vm812_vm0, %v3744_v11, %v3745_v29 }
 0xa80   : > { %v3768_v61 = vadd.f32 %v3760_v26, %v3685_v23  ;;  %v3761_v18 = vmul.f32 %v8422_v42, %v3752_v35 }
 0xa81   : > { %v3797_v44 = vadd.f32 %v3789_v10, %v3765_v55  ;;  %v3778_v10 = vrot.slane %v3732_v41, 1 }
 0xa82   : > { %v3800_v55 = vadd.f32 %v3792_v53, %v3768_v61 }
 0xa83   : > { %v8515_v5 = vadd.f32 %v8510_v62, %v3797_v44  ;;  %v3783_v19 = vsel %vm845_vm1, %v3777_v15, %v3778_v10  ;;  %v3746_v44 = vrot.slane %v8483_v14, 7  ;;  %v3782_v47 = vsel %vm845_vm1, %v3778_v10, %v3779_v33  ;;  %v3738_v15 = vpop.f32.mrf.mxu0 }
 0xa84   : > { %v3793_v58 = vmul.f32 %v8428_v0, %v3783_v19  ;;  %v8564_v21 = vadd.f32 %v8510_v62, %v3800_v55  ;;  %v3794_v37 = vmul.f32 %v8440_v46, %v3782_v47  ;;  %v4146_v47 = vld [vmem:[#allocation7 + $0x11e8] sm:$0xff] }
 0xa85   : > { %v8520_v36 = vadd.f32 %v8515_v5, %v8289_v7  ;;  %v3751_v20 = vsel %vm812_vm0, %v3745_v29, %v3746_v44  ;;  %v3750_v32 = vsel %vm812_vm0, %v3746_v44, %v3747_v43  ;;  %v3780_v29 = vrot.slane %v3738_v15, 1  ;;  %v4147_v43 = vld [vmem:[#allocation7 + $0x11f0] sm:$0xff]  ;;  %v4148_v15 = vld [vmem:[#allocation7 + $0x11f8] sm:$0xff]  ;;  %4149 = vmatpush.msra.mxu0 %v4146_v47  ;;  %v4130_v47 = vld [vmem:[#allocation7 + $0x1168] sm:$0xff] }
 0xa86   : > { %v3762_v14 = vmul.f32 %v8434_v12, %v3751_v20  ;;  %v8571_v59 = vadd.f32 %v8564_v21, %v8313_v57  ;;  %v3763_v17 = vmul.f32 %v8446_v63, %v3750_v32  ;;  %v3764_v44 = vmul.f32 %v8459_v8, %v3749_v2  ;;  %4190 = vmatpush.msra.mxu1 %v4147_v43  ;;  %v4145_v32 = vld [vmem:[#allocation7 + $0x11e0] sm:$0xff]  ;;  %v4135_v2 = vld [vmem:[#allocation7 + $0x1190] sm:$0xff] }
 0xa87   : > { %3908 = vmatmul.f32.vlgmr.msrb.gmra.mxu1 %v8520_v36  ;;  %3949 = vmatmul.f32.vlgmr.msra.gmra.mxu2 %v8520_v36  ;;  %v3688_v34 = vpop.f32.mrf.mxu3  ;;  %v3781_v35 = vsel %vm845_vm1, %v3779_v33, %v3780_v29  ;;  %v4125_v43 = vld [vmem:[#allocation7 + $0x1140] sm:$0xff] }
 0xa88   : > { %3990 = vmatmul.f32.vlgmr.msra.gmra.mxu3 %v8520_v36  ;;  %v3769_v56 = vadd.f32 %v3761_v18, %v3688_v34  ;;  %v3795_v55 = vmul.f32 %v8451_v1, %v3781_v35  ;;  %4231 = vmatpush.msrb.mxu2 %v4148_v15  ;;  %v4138_v35 = vld [vmem:[#allocation7 + $0x11a8] sm:$0xff] }
 0xa89   : > { %v4126_v15 = vld [vmem:[#allocation7 + $0x1148] sm:$0xff] }
 0xa8a   : > { %v3801_v23 = vadd.f32 %v3793_v58, %v3769_v56  ;;  %v3788_v58 = vsel %vm845_vm1, %v3780_v29, %v3773_v9  ;;  %4232 = vmatpush.msrb.mxu2 %v4145_v32  ;;  %v4140_v29 = vld [vmem:[#allocation7 + $0x11b8] sm:$0xff]  ;;  %v4123_v32 = vld [vmem:[#allocation7 + $0x1130] sm:$0xff] }
 0xa8b   : > { %v3796_v33 = vmul.f32 %v8467_v60, %v3788_v58  ;;  %v4131_v58 = vld [vmem:[#allocation7 + $0x1170] sm:$0xff] }
 0xa8c   : > { %v8581_v26 = vadd.f32 %v8510_v62, %v3801_v23 }
 0xa8e   : > { %v8588_v53 = vadd.f32 %v8581_v26, %v8320_v6 }
 0xa8f   : > { %3911 = vmatmul.f32.gmra.mxu1 %v8537_v50  ;;  %3952 = vmatmul.f32.gmra.mxu2 %v8537_v50  ;;  %v3691_v11 = vpop.f32.mrf.mxu3 }
 0xa90   : > { %3993 = vmatmul.f32.gmra.mxu3 %v8537_v50  ;;  %v3770_v41 = vadd.f32 %v3762_v14, %v3691_v11 }
 0xa92   : > { %v3802_v61 = vadd.f32 %v3794_v37, %v3770_v41  ;;  %v4144_v37 = vld [vmem:[#allocation7 + $0x11d8] sm:$0xff] }
 0xa93   : > { %4191 = vmatpush.msra.mxu1 %v4144_v37  ;;  %v4122_v37 = vld [vmem:[#allocation7 + $0x1128] sm:$0xff] }
 0xa94   : > { %v8597_v18 = vadd.f32 %v8510_v62, %v3802_v61  ;;  %v4141_v61 = vld [vmem:[#allocation7 + $0x11c0] sm:$0xff] }
 0xa95   : > { %4192 = vmatpush.msra.mxu1 %v4141_v61 }
 0xa96   : > { %v8606_v56 = vadd.f32 %v8597_v18, %v8327_v52  ;;  %v8675_v52 = vld [vmem:[#allocation9 + $0xa] ss:$0 sm:$0xff] }
 0xa97   : > { %3914 = vmatmul.f32.gmra.mxu1 %v8554_v28  ;;  %3955 = vmatmul.f32.gmra.mxu2 %v8554_v28  ;;  %v3694_v34 = vpop.f32.mrf.mxu3 }
 0xa98   : > { %3996 = vmatmul.f32.gmra.mxu3 %v8554_v28  ;;  %v3771_v10 = vadd.f32 %v3763_v17, %v3694_v34  ;;  %v4142_v17 = vld [vmem:[#allocation7 + $0x11c8] sm:$0xff]  ;;  %v4137_v34 = vld [vmem:[#allocation7 + $0x11a0] sm:$0xff]  ;;  %4193 = vmatpush.msra.mxu1 %v4138_v35  ;;  %v4120_v35 = vld [vmem:[#allocation7 + $0x1118] sm:$0xff] }
 0xa99   : > { %4233 = vmatpush.msrb.mxu2 %v4142_v17 }
 0xa9a   : > { %v3803_v19 = vadd.f32 %v3795_v55, %v3771_v10  ;;  %v4139_v10 = vld [vmem:[#allocation7 + $0x11b0] sm:$0xff]  ;;  %v4134_v55 = vld [vmem:[#allocation7 + $0x1188] sm:$0xff]  ;;  %4194 = vmatpush.msra.mxu1 %v4135_v2  ;;  %v4117_v2 = vld [vmem:[#allocation7 + $0x1100] sm:$0xff] }
 0xa9b   : > { %4234 = vmatpush.msrb.mxu2 %v4139_v10  ;;  %v4121_v10 = vld [vmem:[#allocation7 + $0x1120] sm:$0xff] }
 0xa9c   : > { %v8616_v20 = vadd.f32 %v8510_v62, %v3803_v19  ;;  %v4136_v19 = vld [vmem:[#allocation7 + $0x1198] sm:$0xff] }
 0xa9d   : > { %4235 = vmatpush.msrb.mxu2 %v4136_v19  ;;  %v4118_v19 = vld [vmem:[#allocation7 + $0x1108] sm:$0xff] }
 0xa9e   : > { %v8621_v23 = vadd.f32 %v8616_v20, %v8334_v39 }
 0xa9f   : > { %3917 = vmatmul.f32.gmra.mxu1 %v8571_v59  ;;  %3958 = vmatmul.f32.gmra.mxu2 %v8571_v59  ;;  %v3697_v45 = vpop.f32.mrf.mxu3 }
 0xaa0   : > { %3999 = vmatmul.f32.gmra.mxu3 %v8571_v59  ;;  %v3772_v4 = vadd.f32 %v3764_v44, %v3697_v45  ;;  %v4132_v45 = vld [vmem:[#allocation7 + $0x1178] sm:$0xff] }
 0xaa1   : > { %4195 = vmatpush.msra.mxu1 %v4132_v45  ;;  %v4114_v45 = vld [vmem:[#allocation7 + $0x10e8] sm:$0xff] }
 0xaa2   : > { %v3804_v11 = vadd.f32 %v3796_v33, %v3772_v4  ;;  %v4133_v4 = vld [vmem:[#allocation7 + $0x1180] sm:$0xff]  ;;  %v4128_v33 = vld [vmem:[#allocation7 + $0x1158] sm:$0xff] }
 0xaa3   : > { %4236 = vmatpush.msrb.mxu2 %v4133_v4  ;;  %v4115_v4 = vld [vmem:[#allocation7 + $0x10f0] sm:$0xff] }
 0xaa4   : > { %v8627_v22 = vadd.f32 %v8510_v62, %v3804_v11  ;;  %v4143_v62 = vld [vmem:[#allocation7 + $0x11d0] sm:$0xff]  ;;  %v4129_v11 = vld [vmem:[#allocation7 + $0x1160] sm:$0xff] }
 0xaa5   : > { %4150 = vmatpush.msra.mxu0 %v4143_v62  ;;  %4196 = vmatpush.msra.mxu1 %v4129_v11  ;;  %v4127_v62 = vld [vmem:[#allocation7 + $0x1150] sm:$0xff] }
 0xaa6   : > { %v8631_v9 = vadd.f32 %v8627_v22, %v8341_v49  ;;  %4237 = vmatpush.msrb.mxu2 %v4130_v47  ;;  %v4111_v11 = vld [vmem:[#allocation7 + $0x10d0] sm:$0xff]  ;;  %v4112_v47 = vld [vmem:[#allocation7 + $0x10d8] sm:$0xff] }
 0xaa7   : > { %3920 = vmatmul.f32.gmra.mxu1 %v8588_v53  ;;  %3961 = vmatmul.f32.gmra.mxu2 %v8588_v53 }
 0xaa8   : > { %4002 = vmatmul.f32.gmra.mxu3 %v8588_v53  ;;  %4151 = vmatpush.msra.mxu0 %v4140_v29  ;;  %v4124_v29 = vld [vmem:[#allocation7 + $0x1138] sm:$0xff] }
 0xaa9   : > { %4197 = vmatpush.msra.mxu1 %v4126_v15  ;;  %4238 = vmatpush.msrb.mxu2 %v4127_v62  ;;  %v4107_v15 = vld [vmem:[#allocation7 + $0x10b0] sm:$0xff]  ;;  %v4108_v62 = vld [vmem:[#allocation7 + $0x10b8] sm:$0xff] }
 0xaaa   : > { %4152 = vmatpush.msra.mxu0 %v4137_v34  ;;  %v4119_v34 = vld [vmem:[#allocation7 + $0x1110] sm:$0xff] }
 0xaab   : > { %4198 = vmatpush.msra.mxu1 %v4123_v32  ;;  %4239 = vmatpush.msrb.mxu2 %v4124_v29  ;;  %v4104_v29 = vld [vmem:[#allocation7 + $0x1098] sm:$0xff] }
 0xaac   : > { %4153 = vmatpush.msra.mxu0 %v4134_v55  ;;  %v4116_v55 = vld [vmem:[#allocation7 + $0x10f8] sm:$0xff] }
 0xaad   : > { %4199 = vmatpush.msra.mxu1 %v4120_v35  ;;  %4240 = vmatpush.msrb.mxu2 %v4121_v10  ;;  %v4106_v35 = vld [vmem:[#allocation7 + $0x10a8] sm:$0xff]  ;;  %v4101_v10 = vld [vmem:[#allocation7 + $0x1080] sm:$0xff] }
 0xaae   : > { %4154 = vmatpush.msra.mxu0 %v4131_v58  ;;  %v4113_v58 = vld [vmem:[#allocation7 + $0x10e0] sm:$0xff] }
 0xaaf   : > { %3923 = vmatmul.f32.gmra.mxu1 %v8606_v56  ;;  %3964 = vmatmul.f32.gmra.mxu2 %v8606_v56 }
 0xab0   : > { %4005 = vmatmul.f32.gmra.mxu3 %v8606_v56  ;;  %4155 = vmatpush.msra.mxu0 %v4128_v33  ;;  %v4110_v33 = vld [vmem:[#allocation7 + $0x10c8] sm:$0xff] }
 0xab1   : > { %4200 = vmatpush.msra.mxu1 %v4117_v2  ;;  %4241 = vmatpush.msrb.mxu2 %v4118_v19  ;;  %v4103_v2 = vld [vmem:[#allocation7 + $0x1090] sm:$0xff] }
 0xab2   : > { %4156 = vmatpush.msra.mxu0 %v4125_v43 }
 0xab3   : > { %4201 = vmatpush.msra.mxu1 %v4114_v45  ;;  %4242 = vmatpush.msrb.mxu2 %v4115_v4 }
 0xab4   : > { %4157 = vmatpush.msra.mxu0 %v4122_v37  ;;  %v4109_v37 = vld [vmem:[#allocation7 + $0x10c0] sm:$0xff] }
 0xab5   : > { %4202 = vmatpush.msra.mxu1 %v4111_v11  ;;  %4243 = vmatpush.msrb.mxu2 %v4112_v47 }
 0xab6   : > { %4158 = vmatpush.msra.mxu0 %v4119_v34  ;;  %v4105_v34 = vld [vmem:[#allocation7 + $0x10a0] sm:$0xff] }
 0xab7   : > { %3926 = vmatmul.f32.gmra.mxu1 %v8621_v23  ;;  %3967 = vmatmul.f32.gmra.mxu2 %v8621_v23 }
 0xab8   : > { %4008 = vmatmul.f32.gmra.mxu3 %v8621_v23  ;;  %4159 = vmatpush.msra.mxu0 %v4116_v55  ;;  %v4102_v55 = vld [vmem:[#allocation7 + $0x1088] sm:$0xff] }
 0xab9   : > { %4203 = vmatpush.msra.mxu1 %v4108_v62  ;;  %4244 = vmatpush.msrb.mxu2 %v4109_v37 }
 0xaba   : > { %4160 = vmatpush.msra.mxu0 %v4113_v58 }
 0xabb   : > { %4204 = vmatpush.msra.mxu1 %v4105_v34  ;;  %4245 = vmatpush.msrb.mxu2 %v4106_v35 }
 0xabc   : > { %4161 = vmatpush.msra.mxu0 %v4110_v33 }
 0xabd   : > { %4205 = vmatpush.msra.mxu1 %v4102_v55  ;;  %4246 = vmatpush.msrb.mxu2 %v4103_v2 }
 0xabe   : > { %4162 = vmatpush.msra.mxu0 %v4107_v15 }
 0xabf   : > { %3929 = vmatmul.f32.gmra.mxu1 %v8631_v9  ;;  %3970 = vmatmul.f32.gmra.mxu2 %v8631_v9 }
 0xac0   : > { %4011 = vmatmul.f32.gmra.mxu3 %v8631_v9  ;;  %4163 = vmatpush.msra.mxu0 %v4104_v29 }
 0xac2   : > { %4164 = vmatpush.msra.mxu0 %v4101_v10 }
 0xb04   : > { %v8636_v14 = vpop.f32.mrf.mxu1 }
 0xb05   : > { %v4015_v37 = vrot.slane %v8636_v14, 7 }
 0xb0a   : > { %v3950_v58 = vpop.f32.mrf.mxu2 }
 0xb0b   : > { %v8642_v61 = vpop.f32.mrf.mxu3 }
 0xb0c   : > { %v8638_v41 = vpop.f32.mrf.mxu1  ;;  %v9500_v29 = vrot.slane %v8642_v61, 1 }
 0xb0d   : > { %v4016_v47 = vrot.slane %v8638_v41, 7 }
 0xb0f   : > { %v4029_v10 = vsel %vm812_vm0, %v4015_v37, %v4016_v47 }
 0xb12   : > { %v3953_v33 = vpop.f32.mrf.mxu2 }
 0xb13   : > { %v3994_v32 = vpop.f32.mrf.mxu3 }
 0xb14   : > { %v8640_v44 = vpop.f32.mrf.mxu1  ;;  %v4048_v15 = vrot.slane %v3994_v32, 1 }
 0xb15   : > { %v4017_v51 = vrot.slane %v8640_v44, 7 }
 0xb16   : > { %v4061_v55 = vsel %vm845_vm1, %v9500_v29, %v4048_v15 }
 0xb17   : > { %v4063_v7 = vmul.f32 %v8387_v16, %v4061_v55 }
 0xb1a   : > { %v3956_v32 = vpop.f32.mrf.mxu2 }
 0xb1b   : > { %v3997_v45 = vpop.f32.mrf.mxu3 }
 0xb1c   : > { %v8644_v17 = vpop.f32.mrf.mxu1  ;;  %v4049_v34 = vrot.slane %v3997_v45, 1  ;;  %v4032_v45 = vmul.f32 %v8378_v13, %v4029_v10 }
 0xb1e   : > { %v4060_v2 = vsel %vm845_vm1, %v4048_v15, %v4049_v34  ;;  %v4028_v15 = vsel %vm812_vm0, %v4016_v47, %v4017_v51  ;;  %v3832_v47 = vld [vmem:[#allocation10 + $0x268] sm:$0xff] }
 0xb1f   : > { %v4064_v29 = vmul.f32 %v8390_v3, %v4060_v2  ;;  %v4033_v44 = vmul.f32 %v8398_v40, %v4028_v15  ;;  %v3834_v3 = vld [vmem:[#allocation10 + $0x278] sm:$0xff]  ;;  %v3829_v2 = vld [vmem:[#allocation10 + $0x250] sm:$0xff] }
 0xb20   : > { %4407 = vmatpush.msrb.mxu0 %v3834_v3 }
 0xb23   : > { %v4000_v11 = vpop.f32.mrf.mxu3 }
 0xb24   : > { %v8646_v43 = vpop.f32.mrf.mxu1 }
 0xb2b   : > { %v4003_v57 = vpop.f32.mrf.mxu3 }
 0xb2c   : > { %v8648_v19 = vpop.f32.mrf.mxu1 }
 0xb2d   : > { %v4020_v3 = vrot.slane %v8648_v19, 7  ;;  %v3823_v19 = vld [vmem:[#allocation10 + $0x220] sm:$0xff] }
 0xb34   : > { %v8650_v4 = vpop.f32.mrf.mxu1 }
 0xb3c   : > { %v8653_v62 = vpop.f32.mrf.mxu1 }
 0xb3d   : > { %v9507_v35 = vrot.slane %v8653_v62, 7 }
 0xb3f   : > { %v4030_v41 = vsel %vm812_vm0, %v9507_v35, %v4015_v37  ;;  %v4050_v37 = vrot.slane %v4000_v11, 1  ;;  %v4040_v35 = vadd.f32 %v4032_v45, %v3953_v33  ;;  %v4051_v11 = vrot.slane %v4003_v57, 1 }
 0xb40   : > { %v4031_v14 = vmul.f32 %v8381_v48, %v4030_v41  ;;  %v4019_v57 = vrot.slane %v8646_v43, 7 }
 0xb41   : > { %v4072_v13 = vadd.f32 %v4064_v29, %v4040_v35  ;;  %v4059_v16 = vsel %vm845_vm1, %v4049_v34, %v4050_v37  ;;  %v4041_v29 = vadd.f32 %v4033_v44, %v3956_v32  ;;  %v4006_v35 = vpop.f32.mrf.mxu3  ;;  %v4058_v55 = vsel %vm845_vm1, %v4050_v37, %v4051_v11 }
 0xb42   : > { %v4039_v24 = vadd.f32 %v4031_v14, %v3950_v58  ;;  %v3833_v58 = vld [vmem:[#allocation10 + $0x270] sm:$0xff]  ;;  %v3830_v14 = vld [vmem:[#allocation10 + $0x258] sm:$0xff]  ;;  %v4066_v32 = vmul.f32 %v8416_v30, %v4058_v55 }
 0xb43   : > { %v4085_v33 = vadd.f32 %v8675_v52, %v4072_v13  ;;  %4408 = vmatpush.msrb.mxu0 %v3833_v58  ;;  %v3822_v55 = vld [vmem:[#allocation10 + $0x218] sm:$0xff] }
 0xb44   : > { %v4071_v6 = vadd.f32 %v4063_v7, %v4039_v24  ;;  %v4018_v7 = vrot.slane %v8644_v17, 7  ;;  %v3959_v24 = vpop.f32.mrf.mxu2  ;;  %v3831_v17 = vld [vmem:[#allocation10 + $0x260] sm:$0xff] }
 0xb45   : > { %v4093_v34 = vmax.f32 %v4085_v33, 0.0  ;;  %4409 = vmatpush.msrb.mxu0 %v3832_v47 }
 0xb46   : > { %v4084_v48 = vadd.f32 %v8675_v52, %v4071_v6  ;;  %v4065_v6 = vmul.f32 %v8404_v25, %v4059_v16  ;;  %v4027_v40 = vsel %vm812_vm0, %v4017_v51, %v4018_v7  ;;  %v3827_v16 = vld [vmem:[#allocation10 + $0x240] sm:$0xff] }
 0xb47   : > { %v4034_v25 = vmul.f32 %v8410_v27, %v4027_v40  ;;  %4410 = vmatpush.msrb.mxu0 %v3831_v17  ;;  %v4026_v27 = vsel %vm812_vm0, %v4018_v7, %v4019_v57  ;;  %v4021_v17 = vrot.slane %v8650_v4, 7 }
 0xb48   : > { %v4092_v41 = vmax.f32 %v4084_v48, 0.0  ;;  %v4073_v10 = vadd.f32 %v4065_v6, %v4041_v29  ;;  %v4052_v48 = vrot.slane %v4006_v35, 1  ;;  %v4035_v30 = vmul.f32 %v8422_v42, %v4026_v27  ;;  %v3825_v6 = vld [vmem:[#allocation10 + $0x230] sm:$0xff]  ;;  %v3824_v29 = vld [vmem:[#allocation10 + $0x228] sm:$0xff] }
 0xb49   : > { %4411 = vmatpush.msrb.mxu0 %v3830_v14  ;;  %v4042_v15 = vadd.f32 %v4034_v25, %v3959_v24  ;;  %v4009_v37 = vpop.f32.mrf.mxu3  ;;  %v3826_v24 = vld [vmem:[#allocation10 + $0x238] sm:$0xff]  ;;  %v4025_v42 = vsel %vm812_vm0, %v4019_v57, %v4020_v3  ;;  %v3821_v14 = vld [vmem:[#allocation10 + $0x210] sm:$0xff] }
 0xb4a   : > { %4165 = vmatmul.f32.vlgmr.msra.gmra.mxu0 %v4092_v41  ;;  %4206 = vmatmul.f32.vlgmr.msra.gmra.mxu1 %v4092_v41  ;;  %v4086_v51 = vadd.f32 %v8675_v52, %v4073_v10  ;;  %v4057_v44 = vsel %vm845_vm1, %v4051_v11, %v4052_v48  ;;  %v4053_v33 = vrot.slane %v4009_v37, 1 }
 0xb4b   : > { %4247 = vmatmul.f32.vlgmr.msrb.gmra.mxu2 %v4092_v41  ;;  %v3828_v41 = vld [vmem:[#allocation10 + $0x248] sm:$0xff]  ;;  %4412 = vmatpush.msrb.mxu0 %v3829_v2  ;;  %v4074_v43 = vadd.f32 %v4066_v32, %v4042_v15  ;;  %v4067_v7 = vmul.f32 %v8428_v0, %v4057_v44  ;;  %v4036_v0 = vmul.f32 %v8434_v12, %v4025_v42  ;;  %v3819_v15 = vld [vmem:[#allocation10 + $0x200] sm:$0xff]  ;;  %v4493_v42 = vld [vmem:[#allocation7 + $0x1320] sm:$0xff] }
 0xb4c   : > { %v3962_v45 = vpop.f32.mrf.mxu2  ;;  %v4094_v13 = vmax.f32 %v4086_v51, 0.0  ;;  %v3820_v2 = vld [vmem:[#allocation10 + $0x208] sm:$0xff]  ;;  %v4024_v12 = vsel %vm812_vm0, %v4020_v3, %v4021_v17  ;;  %v9542_v3 = vrot.slane %v8642_v61, 1 }
 0xb4d   : > { %4413 = vmatpush.msrb.mxu0 %v3828_v41  ;;  %v4087_v58 = vadd.f32 %v8675_v52, %v4074_v43  ;;  %v4043_v47 = vadd.f32 %v4035_v30, %v3962_v45  ;;  %v9541_v43 = vrot.slane %v8653_v62, 7 }
 0xb4f   : > { %4414 = vmatpush.msrb.mxu0 %v3827_v16  ;;  %v4095_v35 = vmax.f32 %v4087_v58, 0.0  ;;  %v4075_v40 = vadd.f32 %v4067_v7, %v4043_v47  ;;  %v4023_v16 = vsel %vm812_vm0, %v4021_v17, %v9541_v43  ;;  %v4487_v17 = vld [vmem:[#allocation7 + $0x12f0] sm:$0xff]  ;;  %v4473_v43 = vld [vmem:[#allocation7 + $0x1280] sm:$0xff] }
 0xb51   : > { %4415 = vmatpush.msrb.mxu0 %v3826_v24  ;;  %v4012_v10 = vpop.f32.mrf.mxu3  ;;  %v4088_v57 = vadd.f32 %v8675_v52, %v4075_v40  ;;  %v4038_v24 = vmul.f32 %v8459_v8, %v4023_v16  ;;  %v4365_v8 = vld [vmem:[#allocation10 + $0x2f8] sm:$0xff]  ;;  %v4360_v40 = vld [vmem:[#allocation10 + $0x2d0] sm:$0xff] }
 0xb52   : > { %4168 = vmatmul.f32.gmra.mxu0 %v4093_v34  ;;  %4209 = vmatmul.f32.gmra.mxu1 %v4093_v34  ;;  %v4054_v32 = vrot.slane %v4012_v10, 1  ;;  %v4359_v10 = vld [vmem:[#allocation10 + $0x2c8] sm:$0xff]  ;;  %v4353_v16 = vld [vmem:[#allocation10 + $0x298] sm:$0xff] }
 0xb53   : > { %4250 = vmatmul.f32.gmra.mxu2 %v4093_v34  ;;  %4416 = vmatpush.msrb.mxu0 %v3825_v6  ;;  %v4056_v34 = vsel %vm845_vm1, %v4052_v48, %v4053_v33  ;;  %v4096_v45 = vmax.f32 %v4088_v57, 0.0  ;;  %v4484_v57 = vld [vmem:[#allocation7 + $0x12d8] sm:$0xff] }
 0xb54   : > { %v3965_v11 = vpop.f32.mrf.mxu2  ;;  %v4068_v25 = vmul.f32 %v8440_v46, %v4056_v34  ;;  %v4055_v41 = vsel %vm845_vm1, %v4053_v33, %v4054_v32  ;;  %v4037_v46 = vmul.f32 %v8446_v63, %v4024_v12  ;;  %v4062_v63 = vsel %vm845_vm1, %v4054_v32, %v9542_v3  ;;  %4366 = vmatpush.msrb.mxu3 %v4365_v8  ;;  %v4491_v34 = vld [vmem:[#allocation7 + $0x1310] sm:$0xff]  ;;  %v4357_v32 = vld [vmem:[#allocation10 + $0x2b8] sm:$0xff]  ;;  %v4356_v12 = vld [vmem:[#allocation10 + $0x2b0] sm:$0xff] }
 0xb55   : > { %4417 = vmatpush.msrb.mxu0 %v3824_v29  ;;  %v4044_v51 = vadd.f32 %v4036_v0, %v3965_v11  ;;  %v4069_v27 = vmul.f32 %v8451_v1, %v4055_v41  ;;  %v4070_v7 = vmul.f32 %v8467_v60, %v4062_v63  ;;  %v4364_v60 = vld [vmem:[#allocation10 + $0x2f0] sm:$0xff]  ;;  %v4503_v29 = vld [vmem:[#allocation7 + $0x1370] sm:$0xff]  ;;  %v4361_v11 = vld [vmem:[#allocation10 + $0x2d8] sm:$0xff] }
 0xb56   : > { %4367 = vmatpush.msrb.mxu3 %v4364_v60  ;;  %4546 = vmatpush.msra.mxu2 %v4503_v29  ;;  %v4355_v41 = vld [vmem:[#allocation10 + $0x2a8] sm:$0xff]  ;;  %v4352_v3 = vld [vmem:[#allocation10 + $0x290] sm:$0xff]  ;;  %v4466_v63 = vld [vmem:[#allocation7 + $0x1248] sm:$0xff] }
 0xb57   : > { %4418 = vmatpush.msrb.mxu0 %v3823_v19  ;;  %v4076_v48 = vadd.f32 %v4068_v25, %v4044_v51  ;;  %v4490_v19 = vld [vmem:[#allocation7 + $0x1308] sm:$0xff]  ;;  %v4358_v25 = vld [vmem:[#allocation10 + $0x2c0] sm:$0xff]  ;;  %v4481_v51 = vld [vmem:[#allocation7 + $0x12c0] sm:$0xff] }
 0xb58   : > { %v4457_v8 = vld [vmem:[#allocation7 + $0x1200] sm:$0xff]  ;;  %v4458_v60 = vld [vmem:[#allocation7 + $0x1208] sm:$0xff] }
 0xb59   : > { %4419 = vmatpush.msrb.mxu0 %v3822_v55  ;;  %v4089_v37 = vadd.f32 %v8675_v52, %v4076_v48  ;;  %v4488_v55 = vld [vmem:[#allocation7 + $0x12f8] sm:$0xff]  ;;  %v4479_v48 = vld [vmem:[#allocation7 + $0x12b0] sm:$0xff] }
 0xb5a   : > { %4171 = vmatmul.f32.gmra.mxu0 %v4094_v13  ;;  %4212 = vmatmul.f32.gmra.mxu1 %v4094_v13 }
 0xb5b   : > { %4253 = vmatmul.f32.gmra.mxu2 %v4094_v13  ;;  %4420 = vmatpush.msrb.mxu0 %v3821_v14  ;;  %v4097_v44 = vmax.f32 %v4089_v37, 0.0  ;;  %v4485_v14 = vld [vmem:[#allocation7 + $0x12e0] sm:$0xff]  ;;  %v4354_v37 = vld [vmem:[#allocation10 + $0x2a0] sm:$0xff] }
 0xb5c   : > { %v3968_v4 = vpop.f32.mrf.mxu2 }
 0xb5d   : > { %4421 = vmatpush.msrb.mxu0 %v3820_v2  ;;  %v4045_v13 = vadd.f32 %v4037_v46, %v3968_v4  ;;  %v4482_v2 = vld [vmem:[#allocation7 + $0x12c8] sm:$0xff]  ;;  %v4475_v46 = vld [vmem:[#allocation7 + $0x1290] sm:$0xff] }
 0xb5f   : > { %4422 = vmatpush.msrb.mxu0 %v3819_v15  ;;  %v4077_v30 = vadd.f32 %v4069_v27, %v4045_v13  ;;  %v4476_v27 = vld [vmem:[#allocation7 + $0x1298] sm:$0xff] }
 0xb60   : > { %v4472_v13 = vld [vmem:[#allocation7 + $0x1278] sm:$0xff] }
 0xb61   : > { %v4090_v62 = vadd.f32 %v8675_v52, %v4077_v30  ;;  %v4470_v30 = vld [vmem:[#allocation7 + $0x1268] sm:$0xff] }
 0xb62   : > { %4174 = vmatmul.f32.gmra.mxu0 %v4095_v35  ;;  %4215 = vmatmul.f32.gmra.mxu1 %v4095_v35 }
 0xb63   : > { %4256 = vmatmul.f32.gmra.mxu2 %v4095_v35  ;;  %v4098_v6 = vmax.f32 %v4090_v62, 0.0  ;;  %v4494_v35 = vld [vmem:[#allocation7 + $0x1328] sm:$0xff]  ;;  %v4463_v62 = vld [vmem:[#allocation7 + $0x1230] sm:$0xff] }
 0xb64   : > { %v3971_v1 = vpop.f32.mrf.mxu2 }
 0xb65   : > { %v4046_v58 = vadd.f32 %v4038_v24, %v3971_v1  ;;  %v4467_v24 = vld [vmem:[#allocation7 + $0x1250] sm:$0xff] }
 0xb67   : > { %v4078_v33 = vadd.f32 %v4070_v7, %v4046_v58  ;;  %v4351_v7 = vld [vmem:[#allocation10 + $0x288] sm:$0xff] }
 0xb68   : > { %v4464_v58 = vld [vmem:[#allocation7 + $0x1238] sm:$0xff] }
 0xb69   : > { %v4091_v61 = vadd.f32 %v8675_v52, %v4078_v33  ;;  %v4350_v33 = vld [vmem:[#allocation10 + $0x280] sm:$0xff] }
 0xb6a   : > { %4177 = vmatmul.f32.gmra.mxu0 %v4096_v45  ;;  %4218 = vmatmul.f32.gmra.mxu1 %v4096_v45 }
 0xb6b   : > { %4259 = vmatmul.f32.gmra.mxu2 %v4096_v45  ;;  %v4099_v47 = vmax.f32 %v4091_v61, 0.0  ;;  %v4478_v45 = vld [vmem:[#allocation7 + $0x12a8] sm:$0xff]  ;;  %v4460_v61 = vld [vmem:[#allocation7 + $0x1218] sm:$0xff] }
 0xb72   : > { %4180 = vmatmul.f32.gmra.mxu0 %v4097_v44  ;;  %4221 = vmatmul.f32.gmra.mxu1 %v4097_v44 }
 0xb73   : > { %4262 = vmatmul.f32.gmra.mxu2 %v4097_v44  ;;  %v4469_v44 = vld [vmem:[#allocation7 + $0x1260] sm:$0xff] }
 0xb7a   : > { %4183 = vmatmul.f32.gmra.mxu0 %v4098_v6  ;;  %4224 = vmatmul.f32.gmra.mxu1 %v4098_v6 }
 0xb7b   : > { %4265 = vmatmul.f32.gmra.mxu2 %v4098_v6 }
 0xb82   : > { %4186 = vmatmul.f32.gmra.mxu0 %v4099_v47  ;;  %4227 = vmatmul.f32.gmra.mxu1 %v4099_v47 }
 0xb83   : > { %4268 = vmatmul.f32.gmra.mxu2 %v4099_v47  ;;  %v4461_v47 = vld [vmem:[#allocation7 + $0x1220] sm:$0xff] }
 0xb8a   : > { %4423 = vmatmul.f32.vlgmr.msrb.gmra.mxu0 %v8515_v5  ;;  %v4502_v5 = vld [vmem:[#allocation7 + $0x1368] sm:$0xff] }
 0xb8b   : > { %4505 = vmatpush.msrb.mxu1 %v4502_v5 }
 0xb92   : > { %4426 = vmatmul.f32.gmra.mxu0 %v8530_v31 }
 0xb9a   : > { %4429 = vmatmul.f32.gmra.mxu0 %v8547_v38  ;;  %v4363_v38 = vld [vmem:[#allocation10 + $0x2e8] sm:$0xff] }
 0xb9b   : > { %4368 = vmatpush.msrb.mxu3 %v4363_v38 }
 0xba2   : > { %4432 = vmatmul.f32.gmra.mxu0 %v8564_v21  ;;  %v4499_v21 = vld [vmem:[#allocation7 + $0x1350] sm:$0xff] }
 0xba3   : > { %4506 = vmatpush.msrb.mxu1 %v4499_v21 }
 0xbaa   : > { %4435 = vmatmul.f32.gmra.mxu0 %v8581_v26  ;;  %v4500_v26 = vld [vmem:[#allocation7 + $0x1358] sm:$0xff] }
 0xbab   : > { %4547 = vmatpush.msra.mxu2 %v4500_v26 }
 0xbb2   : > { %4438 = vmatmul.f32.gmra.mxu0 %v8597_v18  ;;  %v4362_v18 = vld [vmem:[#allocation10 + $0x2e0] sm:$0xff] }
 0xbb3   : > { %4369 = vmatpush.msrb.mxu3 %v4362_v18 }
 0xbb5   : > { %4370 = vmatpush.msrb.mxu3 %v4361_v11 }
 0xbb7   : > { %4371 = vmatpush.msrb.mxu3 %v4360_v40 }
 0xbb9   : > { %4372 = vmatpush.msrb.mxu3 %v4359_v10 }
 0xbba   : > { %4441 = vmatmul.f32.gmra.mxu0 %v8616_v20  ;;  %v4496_v20 = vld [vmem:[#allocation7 + $0x1338] sm:$0xff] }
 0xbbb   : > { %4507 = vmatpush.msrb.mxu1 %v4496_v20  ;;  %4373 = vmatpush.msrb.mxu3 %v4358_v25  ;;  %v8774_v25 = vld [vmem:[#allocation2 + $0x8] sm:$0xff] }
 0xbbd   : > { %4508 = vmatpush.msrb.mxu1 %v4493_v42  ;;  %4374 = vmatpush.msrb.mxu3 %v4357_v32 }
 0xbbf   : > { %4509 = vmatpush.msrb.mxu1 %v4490_v19  ;;  %4375 = vmatpush.msrb.mxu3 %v4356_v12 }
 0xbc1   : > { %4510 = vmatpush.msrb.mxu1 %v4487_v17  ;;  %4376 = vmatpush.msrb.mxu3 %v4355_v41  ;;  %v8769_v17 = vld [vmem:[#allocation2] sm:$0xff] }
 0xbc2   : > { %4444 = vmatmul.f32.gmra.mxu0 %v8627_v22  ;;  %v4497_v22 = vld [vmem:[#allocation7 + $0x1340] sm:$0xff] }
 0xbc3   : > { %4548 = vmatpush.msra.mxu2 %v4497_v22  ;;  %4511 = vmatpush.msrb.mxu1 %v4484_v57 }
 0xbc4   : > { %4377 = vmatpush.msrb.mxu3 %v4354_v37 }
 0xbc5   : > { %4549 = vmatpush.msra.mxu2 %v4494_v35  ;;  %4512 = vmatpush.msrb.mxu1 %v4481_v51 }
 0xbc6   : > { %4378 = vmatpush.msrb.mxu3 %v4353_v16 }
 0xbc7   : > { %v8737_v52 = vpop.f32.mrf.mxu0  ;;  %4550 = vmatpush.msra.mxu2 %v4491_v34  ;;  %4513 = vmatpush.msrb.mxu1 %v4478_v45  ;;  %v4207_v29 = vpop.f32.mrf.mxu1  ;;  %v8781_v45 = vld [vmem:[#allocation4 + $0x8] sm:$0xff] }
 0xbc8   : > { %4379 = vmatpush.msrb.mxu3 %v4352_v3  ;;  %v4272_v42 = vrot.slane %v8737_v52, 7 }
 0xbc9   : > { %4551 = vmatpush.msra.mxu2 %v4488_v55  ;;  %4514 = vmatpush.msrb.mxu1 %v4475_v46 }
 0xbca   : > { %4380 = vmatpush.msrb.mxu3 %v4351_v7  ;;  %v4501_v7 = vld [vmem:[#allocation7 + $0x1360] sm:$0xff] }
 0xbcb   : > { %4552 = vmatpush.msra.mxu2 %v4485_v14  ;;  %4515 = vmatpush.msrb.mxu1 %v4472_v13  ;;  %v8777_v14 = vld [vmem:[#allocation4] sm:$0xff] }
 0xbcc   : > { %4381 = vmatpush.msrb.mxu3 %v4350_v33  ;;  %v4498_v33 = vld [vmem:[#allocation7 + $0x1348] sm:$0xff] }
 0xbcd   : > { %4553 = vmatpush.msra.mxu2 %v4482_v2  ;;  %4516 = vmatpush.msrb.mxu1 %v4469_v44 }
 0xbce   : > { %v8743_v15 = vpop.f32.mrf.mxu2 }
 0xbcf   : > { %v8739_v31 = vpop.f32.mrf.mxu0  ;;  %4554 = vmatpush.msra.mxu2 %v4479_v48  ;;  %4517 = vmatpush.msrb.mxu1 %v4466_v63  ;;  %v4210_v26 = vpop.f32.mrf.mxu1  ;;  %v4304_v35 = vrot.slane %v8743_v15, 1  ;;  %v8796_v63 = vld [vmem:[#allocation2 + $0x10] sm:$0xff] }
 0xbd0   : > { %v4273_v20 = vrot.slane %v8739_v31, 7 }
 0xbd1   : > { %4555 = vmatpush.msra.mxu2 %v4476_v27  ;;  %4518 = vmatpush.msrb.mxu1 %v4463_v62  ;;  %v8786_v27 = vld [vmem:[#allocation9 + $0xb] ss:$0 sm:$0xff] }
 0xbd2   : > { %v4286_v34 = vsel %vm812_vm0, %v4272_v42, %v4273_v20 }
 0xbd3   : > { %4556 = vmatpush.msra.mxu2 %v4473_v43  ;;  %4519 = vmatpush.msrb.mxu1 %v4460_v61  ;;  %v4289_v57 = vmul.f32 %v8774_v25, %v4286_v34  ;;  %v4495_v61 = vld [vmem:[#allocation7 + $0x1330] sm:$0xff] }
 0xbd5   : > { %4557 = vmatpush.msra.mxu2 %v4470_v30  ;;  %4520 = vmatpush.msrb.mxu1 %v4457_v8  ;;  %v4297_v13 = vadd.f32 %v4289_v57, %v4210_v26  ;;  %v4504_v30 = vld [vmem:[#allocation7 + $0x1378] sm:$0xff] }
 0xbd6   : > { %v4251_v6 = vpop.f32.mrf.mxu2  ;;  %4587 = vmatpush.msra.mxu3 %v4504_v30 }
 0xbd7   : > { %v8741_v0 = vpop.f32.mrf.mxu0  ;;  %4558 = vmatpush.msra.mxu2 %v4467_v24  ;;  %v4305_v22 = vrot.slane %v4251_v6, 1  ;;  %v4213_v12 = vpop.f32.mrf.mxu1 }
 0xbd8   : > { %v4274_v2 = vrot.slane %v8741_v0, 7  ;;  %4588 = vmatpush.msra.mxu3 %v4501_v7 }
 0xbd9   : > { %4559 = vmatpush.msra.mxu2 %v4464_v58  ;;  %v4318_v10 = vsel %vm845_vm1, %v4304_v35, %v4305_v22 }
 0xbda   : > { %v4320_v32 = vmul.f32 %v8777_v14, %v4318_v10  ;;  %v4285_v16 = vsel %vm812_vm0, %v4273_v20, %v4274_v2  ;;  %4589 = vmatpush.msra.mxu3 %v4498_v33  ;;  %v4468_v33 = vld [vmem:[#allocation7 + $0x1258] sm:$0xff] }
 0xbdb   : > { %4560 = vmatpush.msra.mxu2 %v4461_v47  ;;  %v4290_v24 = vmul.f32 %v8796_v63, %v4285_v16 }
 0xbdc   : > { %4590 = vmatpush.msra.mxu3 %v4495_v61 }
 0xbdd   : > { %4561 = vmatpush.msra.mxu2 %v4458_v60  ;;  %v4298_v60 = vadd.f32 %v4290_v24, %v4213_v12  ;;  %v4471_v24 = vld [vmem:[#allocation7 + $0x1270] sm:$0xff] }
 0xbde   : > { %v4254_v38 = vpop.f32.mrf.mxu2 }
 0xbdf   : > { %v8745_v4 = vpop.f32.mrf.mxu0  ;;  %v4306_v40 = vrot.slane %v4254_v38, 1  ;;  %v4216_v47 = vpop.f32.mrf.mxu1 }
 0xbe0   : > { %v4275_v62 = vrot.slane %v8745_v4, 7 }
 0xbe1   : > { %v4317_v55 = vsel %vm845_vm1, %v4305_v22, %v4306_v40  ;;  %v8814_v22 = vld [vmem:[#allocation2 + $0x18] sm:$0xff] }
 0xbe2   : > { %v4321_v48 = vmul.f32 %v8781_v45, %v4317_v55  ;;  %v4284_v38 = vsel %vm812_vm0, %v4274_v2, %v4275_v62  ;;  %v4483_v55 = vld [vmem:[#allocation7 + $0x12d0] sm:$0xff] }
 0xbe4   : > { %v4329_v44 = vadd.f32 %v4321_v48, %v4297_v13 }
 0xbe6   : > { %v4257_v18 = vpop.f32.mrf.mxu2  ;;  %v4342_v6 = vadd.f32 %v8786_v27, %v4329_v44 }
 0xbe7   : > { %v8747_v1 = vpop.f32.mrf.mxu0  ;;  %v4307_v37 = vrot.slane %v4257_v18, 1  ;;  %v4492_v18 = vld [vmem:[#allocation7 + $0x1318] sm:$0xff] }
 0xbe8   : > { %v8810_v4 = vadd.f32 %v4342_v6, %v8537_v50  ;;  %4591 = vmatpush.msra.mxu3 %v4492_v18  ;;  %v4276_v34 = vrot.slane %v8747_v1, 7  ;;  %v8820_v50 = vld [vmem:[#allocation4 + $0x18] sm:$0xff]  ;;  %v8854_v18 = vld [vmem:[#allocation4 + $0x28] sm:$0xff] }
 0xbe9   : > { %v4316_v3 = vsel %vm845_vm1, %v4306_v40, %v4307_v37  ;;  %v4489_v40 = vld [vmem:[#allocation7 + $0x1300] sm:$0xff] }
 0xbea   : > { %4592 = vmatpush.msra.mxu3 %v4489_v40  ;;  %v4283_v2 = vsel %vm812_vm0, %v4275_v62, %v4276_v34  ;;  %v4459_v40 = vld [vmem:[#allocation7 + $0x1210] sm:$0xff] }
 0xbee   : > { %v8784_v41 = vpop.f32.mrf.mxu2 }
 0xbef   : > { %v8749_v5 = vpop.f32.mrf.mxu0  ;;  %v4308_v8 = vrot.slane %v8784_v41, 1  ;;  %v4480_v41 = vld [vmem:[#allocation7 + $0x12b8] sm:$0xff] }
 0xbf0   : > { %v4277_v16 = vrot.slane %v8749_v5, 7 }
 0xbf1   : > { %v4315_v20 = vsel %vm845_vm1, %v4307_v37, %v4308_v8  ;;  %v8831_v37 = vld [vmem:[#allocation2 + $0x20] sm:$0xff] }
 0xbf2   : > { %v4323_v10 = vmul.f32 %v8820_v50, %v4315_v20  ;;  %v4292_v13 = vmul.f32 %v8831_v37, %v4283_v2  ;;  %v8870_v2 = vld [vmem:[#allocation4 + $0x30] sm:$0xff] }
 0xbf7   : > { %v8751_v21 = vpop.f32.mrf.mxu0 }
 0xbff   : > { %v8754_v11 = vpop.f32.mrf.mxu0 }
 0xc00   : > { %v4279_v19 = vrot.slane %v8754_v11, 7  ;;  %v8890_v11 = vld [vmem:[#allocation4 + $0x38] sm:$0xff] }
 0xc02   : > { %v4287_v31 = vsel %vm812_vm0, %v4279_v19, %v4272_v42  ;;  %v4291_v42 = vmul.f32 %v8814_v22, %v4284_v38  ;;  %v4465_v38 = vld [vmem:[#allocation7 + $0x1240] sm:$0xff] }
 0xc03   : > { %v4288_v52 = vmul.f32 %v8769_v17, %v4287_v31 }
 0xc05   : > { %v4296_v51 = vadd.f32 %v4288_v52, %v4207_v29  ;;  %v4263_v29 = vpop.f32.mrf.mxu2  ;;  %v4486_v52 = vld [vmem:[#allocation7 + $0x12e8] sm:$0xff] }
 0xc06   : > { %v4309_v57 = vrot.slane %v4263_v29, 1  ;;  %4593 = vmatpush.msra.mxu3 %v4486_v52 }
 0xc07   : > { %v4328_v46 = vadd.f32 %v4320_v32, %v4296_v51  ;;  %v4299_v32 = vadd.f32 %v4291_v42, %v4216_v47  ;;  %v4219_v51 = vpop.f32.mrf.mxu1 }
 0xc08   : > { %4594 = vmatpush.msra.mxu3 %v4483_v55  ;;  %v4300_v62 = vadd.f32 %v4292_v13, %v4219_v51 }
 0xc09   : > { %v4341_v43 = vadd.f32 %v8786_v27, %v4328_v46  ;;  %v4331_v48 = vadd.f32 %v4323_v10, %v4299_v32  ;;  %v4314_v46 = vsel %vm845_vm1, %v4308_v8, %v4309_v57  ;;  %v8848_v8 = vld [vmem:[#allocation2 + $0x28] sm:$0xff] }
 0xc0a   : > { %4595 = vmatpush.msra.mxu3 %v4480_v41 }
 0xc0b   : > { %4382 = vmatmul.f32.vlgmr.msrb.gmra.mxu3 %v4341_v43  ;;  %v8792_v0 = vadd.f32 %v4341_v43, %v8520_v36  ;;  %v8802_v36 = vld [vmem:[#allocation4 + $0x10] sm:$0xff]  ;;  %v4477_v43 = vld [vmem:[#allocation7 + $0x12a0] sm:$0xff]  ;;  %v4344_v30 = vadd.f32 %v8786_v27, %v4331_v48 }
 0xc0c   : > { %v4322_v58 = vmul.f32 %v8802_v36, %v4316_v3  ;;  %4596 = vmatpush.msra.mxu3 %v4477_v43  ;;  %v4474_v3 = vld [vmem:[#allocation7 + $0x1288] sm:$0xff] }
 0xc0d   : > { %4521 = vmatmul.f32.vlgmr.msrb.gmra.mxu1 %v8792_v0  ;;  %4562 = vmatmul.f32.vlgmr.msra.gmra.mxu2 %v8792_v0  ;;  %v4266_v12 = vpop.f32.mrf.mxu2 }
 0xc0e   : > { %v4330_v26 = vadd.f32 %v4322_v58, %v4298_v60  ;;  %v4310_v7 = vrot.slane %v4266_v12, 1  ;;  %4597 = vmatpush.msra.mxu3 %v4474_v3  ;;  %v4282_v58 = vsel %vm812_vm0, %v4276_v34, %v4277_v16 }
 0xc0f   : > { %v4222_v61 = vpop.f32.mrf.mxu1  ;;  %v4293_v60 = vmul.f32 %v8848_v8, %v4282_v58 }
 0xc10   : > { %v4343_v31 = vadd.f32 %v8786_v27, %v4330_v26  ;;  %4598 = vmatpush.msra.mxu3 %v4471_v24  ;;  %v4313_v47 = vsel %vm845_vm1, %v4309_v57, %v4310_v7  ;;  %v4462_v26 = vld [vmem:[#allocation7 + $0x1228] sm:$0xff]  ;;  %v8865_v57 = vld [vmem:[#allocation2 + $0x30] sm:$0xff] }
 0xc11   : > { %v4325_v20 = vmul.f32 %v8854_v18, %v4313_v47  ;;  %v4301_v10 = vadd.f32 %v4293_v60, %v4222_v61  ;;  %v4760_v61 = vld [vmem:[#allocation7 + $0x14f0] sm:$0xff]  ;;  %v4761_v47 = vld [vmem:[#allocation7 + $0x14f8] sm:$0xff] }
 0xc12   : > { %v8827_v1 = vadd.f32 %v4343_v31, %v8554_v28  ;;  %v8837_v28 = vld [vmem:[#allocation4 + $0x20] sm:$0xff]  ;;  %4599 = vmatpush.msra.mxu3 %v4468_v33  ;;  %v4759_v33 = vld [vmem:[#allocation7 + $0x14e8] sm:$0xff]  ;;  %4803 = vmatpush.msra.mxu1 %v4760_v61  ;;  %v4733_v61 = vld [vmem:[#allocation7 + $0x1418] sm:$0xff] }
 0xc13   : > { %4385 = vmatmul.f32.gmra.mxu3 %v4342_v6  ;;  %v4324_v44 = vmul.f32 %v8837_v28, %v4314_v46  ;;  %v8844_v6 = vadd.f32 %v4344_v30, %v8571_v59  ;;  %v4278_v59 = vrot.slane %v8751_v21, 7  ;;  %v4333_v21 = vadd.f32 %v4325_v20, %v4301_v10  ;;  %4762 = vmatpush.msra.mxu0 %v4759_v33  ;;  %v4753_v20 = vld [vmem:[#allocation7 + $0x14b8] sm:$0xff]  ;;  %v4751_v10 = vld [vmem:[#allocation7 + $0x14a8] sm:$0xff]  ;;  %v4732_v33 = vld [vmem:[#allocation7 + $0x1410] sm:$0xff] }
 0xc14   : > { %4600 = vmatpush.msra.mxu3 %v4465_v38  ;;  %4844 = vmatpush.msrb.mxu2 %v4761_v47  ;;  %v4757_v38 = vld [vmem:[#allocation7 + $0x14d8] sm:$0xff]  ;;  %v4734_v47 = vld [vmem:[#allocation7 + $0x1420] sm:$0xff] }
 0xc15   : > { %4524 = vmatmul.f32.gmra.mxu1 %v8810_v4  ;;  %4565 = vmatmul.f32.gmra.mxu2 %v8810_v4  ;;  %v4332_v5 = vadd.f32 %v4324_v44, %v4300_v62  ;;  %v4269_v29 = vpop.f32.mrf.mxu2  ;;  %v4280_v41 = vsel %vm812_vm0, %v4278_v59, %v4279_v19 }
 0xc16   : > { %v4311_v34 = vrot.slane %v4269_v29, 1  ;;  %4601 = vmatpush.msra.mxu3 %v4462_v26  ;;  %v4756_v29 = vld [vmem:[#allocation7 + $0x14d0] sm:$0xff]  ;;  %v4758_v26 = vld [vmem:[#allocation7 + $0x14e0] sm:$0xff]  ;;  %4804 = vmatpush.msra.mxu1 %v4757_v38  ;;  %v4729_v38 = vld [vmem:[#allocation7 + $0x13f8] sm:$0xff] }
 0xc17   : > { %v4345_v42 = vadd.f32 %v8786_v27, %v4332_v5  ;;  %v4225_v51 = vpop.f32.mrf.mxu1  ;;  %4763 = vmatpush.msra.mxu0 %v4756_v29  ;;  %4845 = vmatpush.msrb.mxu2 %v4758_v26  ;;  %v4730_v26 = vld [vmem:[#allocation7 + $0x1400] sm:$0xff] }
 0xc18   : > { %4602 = vmatpush.msra.mxu3 %v4459_v40  ;;  %v4312_v55 = vsel %vm845_vm1, %v4310_v7, %v4311_v34  ;;  %v4319_v43 = vsel %vm845_vm1, %v4311_v34, %v4304_v35  ;;  %v4755_v40 = vld [vmem:[#allocation7 + $0x14c8] sm:$0xff]  ;;  %v4750_v34 = vld [vmem:[#allocation7 + $0x14a0] sm:$0xff] }
 0xc19   : > { %v8861_v52 = vadd.f32 %v4345_v42, %v8588_v53  ;;  %v4326_v12 = vmul.f32 %v8870_v2, %v4312_v55  ;;  %v4346_v53 = vadd.f32 %v8786_v27, %v4333_v21  ;;  %v4327_v19 = vmul.f32 %v8890_v11, %v4319_v43  ;;  %4764 = vmatpush.msra.mxu0 %v4753_v20  ;;  %v4747_v21 = vld [vmem:[#allocation7 + $0x1488] sm:$0xff]  ;;  %v4748_v55 = vld [vmem:[#allocation7 + $0x1490] sm:$0xff]  ;;  %v4742_v43 = vld [vmem:[#allocation7 + $0x1460] sm:$0xff] }
 0xc1a   : > { %4846 = vmatpush.msrb.mxu2 %v4755_v40  ;;  %v4731_v20 = vld [vmem:[#allocation7 + $0x1408] sm:$0xff]  ;;  %v4726_v40 = vld [vmem:[#allocation7 + $0x13e0] sm:$0xff] }
 0xc1b   : > { %4388 = vmatmul.f32.gmra.mxu3 %v4343_v31  ;;  %v4281_v31 = vsel %vm812_vm0, %v4277_v16, %v4278_v59  ;;  %v8879_v46 = vadd.f32 %v4346_v53, %v8606_v56  ;;  %v8885_v16 = vld [vmem:[#allocation2 + $0x38] sm:$0xff]  ;;  %4765 = vmatpush.msra.mxu0 %v4750_v34  ;;  %v4727_v34 = vld [vmem:[#allocation7 + $0x13e8] sm:$0xff] }
 0xc1c   : > { %v4294_v32 = vmul.f32 %v8865_v57, %v4281_v31  ;;  %v4295_v44 = vmul.f32 %v8885_v16, %v4280_v41  ;;  %v4752_v31 = vld [vmem:[#allocation7 + $0x14b0] sm:$0xff] }
 0xc1d   : > { %4527 = vmatmul.f32.gmra.mxu1 %v8827_v1  ;;  %4568 = vmatmul.f32.gmra.mxu2 %v8827_v1 }
 0xc1e   : > { %v4302_v48 = vadd.f32 %v4294_v32, %v4225_v51  ;;  %v4749_v32 = vld [vmem:[#allocation7 + $0x1498] sm:$0xff]  ;;  %4847 = vmatpush.msrb.mxu2 %v4752_v31  ;;  %v4744_v51 = vld [vmem:[#allocation7 + $0x1470] sm:$0xff]  ;;  %4766 = vmatpush.msra.mxu0 %v4747_v21  ;;  %v4723_v31 = vld [vmem:[#allocation7 + $0x13c8] sm:$0xff] }
 0xc1f   : > { %v4724_v21 = vld [vmem:[#allocation7 + $0x13d0] sm:$0xff] }
 0xc20   : > { %v4334_v13 = vadd.f32 %v4326_v12, %v4302_v48  ;;  %v4745_v12 = vld [vmem:[#allocation7 + $0x1478] sm:$0xff]  ;;  %4848 = vmatpush.msrb.mxu2 %v4749_v32  ;;  %4767 = vmatpush.msra.mxu0 %v4744_v51  ;;  %v4720_v32 = vld [vmem:[#allocation7 + $0x13b0] sm:$0xff] }
 0xc21   : > { %v4721_v51 = vld [vmem:[#allocation7 + $0x13b8] sm:$0xff] }
 0xc22   : > { %v4347_v56 = vadd.f32 %v8786_v27, %v4334_v13  ;;  %v4741_v13 = vld [vmem:[#allocation7 + $0x1458] sm:$0xff] }
 0xc23   : > { %4391 = vmatmul.f32.gmra.mxu3 %v4344_v30  ;;  %v4228_v30 = vpop.f32.mrf.mxu1  ;;  %4768 = vmatpush.msra.mxu0 %v4741_v13  ;;  %v4717_v13 = vld [vmem:[#allocation7 + $0x1398] sm:$0xff] }
 0xc24   : > { %v4303_v3 = vadd.f32 %v4295_v44, %v4228_v30  ;;  %v8895_v15 = vadd.f32 %v4347_v56, %v8621_v23  ;;  %v4743_v44 = vld [vmem:[#allocation7 + $0x1468] sm:$0xff]  ;;  %v4740_v30 = vld [vmem:[#allocation7 + $0x1450] sm:$0xff] }
 0xc25   : > { %4530 = vmatmul.f32.gmra.mxu1 %v8844_v6  ;;  %4571 = vmatmul.f32.gmra.mxu2 %v8844_v6 }
 0xc26   : > { %v4335_v35 = vadd.f32 %v4327_v19, %v4303_v3  ;;  %v4738_v19 = vld [vmem:[#allocation7 + $0x1440] sm:$0xff]  ;;  %v4735_v3 = vld [vmem:[#allocation7 + $0x1428] sm:$0xff] }
 0xc27   : > { %4769 = vmatpush.msra.mxu0 %v4738_v19  ;;  %v4714_v19 = vld [vmem:[#allocation7 + $0x1380] sm:$0xff] }
 0xc28   : > { %v4348_v24 = vadd.f32 %v8786_v27, %v4335_v35  ;;  %v4736_v35 = vld [vmem:[#allocation7 + $0x1430] sm:$0xff] }
 0xc29   : > { %4770 = vmatpush.msra.mxu0 %v4735_v3 }
 0xc2a   : > { %v8901_v7 = vadd.f32 %v4348_v24, %v8631_v9 }
 0xc2b   : > { %4394 = vmatmul.f32.gmra.mxu3 %v4345_v42  ;;  %v4754_v42 = vld [vmem:[#allocation7 + $0x14c0] sm:$0xff]  ;;  %4771 = vmatpush.msra.mxu0 %v4732_v33 }
 0xc2c   : > { %4805 = vmatpush.msra.mxu1 %v4754_v42 }
 0xc2d   : > { %4533 = vmatmul.f32.gmra.mxu1 %v8861_v52  ;;  %4574 = vmatmul.f32.gmra.mxu2 %v8861_v52 }
 0xc2e   : > { %4806 = vmatpush.msra.mxu1 %v4751_v10  ;;  %4772 = vmatpush.msra.mxu0 %v4729_v38  ;;  %v4728_v10 = vld [vmem:[#allocation7 + $0x13f0] sm:$0xff] }
 0xc30   : > { %4807 = vmatpush.msra.mxu1 %v4748_v55  ;;  %4773 = vmatpush.msra.mxu0 %v4726_v40  ;;  %v4725_v55 = vld [vmem:[#allocation7 + $0x13d8] sm:$0xff] }
 0xc32   : > { %4808 = vmatpush.msra.mxu1 %v4745_v12  ;;  %4774 = vmatpush.msra.mxu0 %v4723_v31  ;;  %v4722_v12 = vld [vmem:[#allocation7 + $0x13c0] sm:$0xff] }
 0xc33   : > { %4397 = vmatmul.f32.gmra.mxu3 %v4346_v53  ;;  %v4746_v53 = vld [vmem:[#allocation7 + $0x1480] sm:$0xff] }
 0xc34   : > { %4849 = vmatpush.msrb.mxu2 %v4746_v53  ;;  %4809 = vmatpush.msra.mxu1 %v4742_v43  ;;  %v4718_v43 = vld [vmem:[#allocation7 + $0x13a0] sm:$0xff] }
 0xc35   : > { %4536 = vmatmul.f32.gmra.mxu1 %v8879_v46  ;;  %4577 = vmatmul.f32.gmra.mxu2 %v8879_v46 }
 0xc36   : > { %4850 = vmatpush.msrb.mxu2 %v4743_v44  ;;  %4775 = vmatpush.msra.mxu0 %v4720_v32  ;;  %v4719_v44 = vld [vmem:[#allocation7 + $0x13a8] sm:$0xff] }
 0xc38   : > { %4851 = vmatpush.msrb.mxu2 %v4740_v30  ;;  %4776 = vmatpush.msra.mxu0 %v4717_v13  ;;  %v4716_v30 = vld [vmem:[#allocation7 + $0x1390] sm:$0xff] }
 0xc3a   : > { %4777 = vmatpush.msra.mxu0 %v4714_v19 }
 0xc3b   : > { %4400 = vmatmul.f32.gmra.mxu3 %v4347_v56  ;;  %v4739_v56 = vld [vmem:[#allocation7 + $0x1448] sm:$0xff] }
 0xc3c   : > { %4810 = vmatpush.msra.mxu1 %v4739_v56  ;;  %v4715_v56 = vld [vmem:[#allocation7 + $0x1388] sm:$0xff] }
 0xc3d   : > { %4539 = vmatmul.f32.gmra.mxu1 %v8895_v15  ;;  %4580 = vmatmul.f32.gmra.mxu2 %v8895_v15 }
 0xc3e   : > { %4811 = vmatpush.msra.mxu1 %v4736_v35 }
 0xc40   : > { %4812 = vmatpush.msra.mxu1 %v4733_v61 }
 0xc42   : > { %4813 = vmatpush.msra.mxu1 %v4730_v26 }
 0xc43   : > { %4403 = vmatmul.f32.gmra.mxu3 %v4348_v24  ;;  %v4737_v24 = vld [vmem:[#allocation7 + $0x1438] sm:$0xff] }
 0xc44   : > { %4852 = vmatpush.msrb.mxu2 %v4737_v24  ;;  %4814 = vmatpush.msra.mxu1 %v4727_v34 }
 0xc45   : > { %4542 = vmatmul.f32.gmra.mxu1 %v8901_v7  ;;  %4583 = vmatmul.f32.gmra.mxu2 %v8901_v7 }
 0xc46   : > { %4853 = vmatpush.msrb.mxu2 %v4734_v47  ;;  %4815 = vmatpush.msra.mxu1 %v4724_v21 }
 0xc48   : > { %4854 = vmatpush.msrb.mxu2 %v4731_v20  ;;  %4816 = vmatpush.msra.mxu1 %v4721_v51 }
 0xc4a   : > { %4855 = vmatpush.msrb.mxu2 %v4728_v10  ;;  %4817 = vmatpush.msra.mxu1 %v4718_v43 }
 0xc4b   : > { %4603 = vmatmul.f32.vlgmr.msra.gmra.mxu3 %v8792_v0 }
 0xc4c   : > { %4856 = vmatpush.msrb.mxu2 %v4725_v55  ;;  %4818 = vmatpush.msra.mxu1 %v4715_v56 }
 0xc4e   : > { %4857 = vmatpush.msrb.mxu2 %v4722_v12  ;;  %v8961_v12 = vld [vmem:[#allocation9 + $0xc] ss:$0 sm:$0xff] }
 0xc50   : > { %4858 = vmatpush.msrb.mxu2 %v4719_v44 }
 0xc52   : > { %4859 = vmatpush.msrb.mxu2 %v4716_v30 }
 0xc53   : > { %4606 = vmatmul.f32.gmra.mxu3 %v8810_v4 }
 0xc5b   : > { %4609 = vmatmul.f32.gmra.mxu3 %v8827_v1 }
 0xc63   : > { %4612 = vmatmul.f32.gmra.mxu3 %v8844_v6 }
 0xc6b   : > { %4615 = vmatmul.f32.gmra.mxu3 %v8861_v52 }
 0xc73   : > { %4618 = vmatmul.f32.gmra.mxu3 %v8879_v46 }
 0xc7b   : > { %4621 = vmatmul.f32.gmra.mxu3 %v8895_v15 }
 0xc83   : > { %4624 = vmatmul.f32.gmra.mxu3 %v8901_v7 }
 0xc8a   : > { %v8913_v23 = vpop.f32.mrf.mxu1 }
 0xc8b   : > { %v4628_v26 = vrot.slane %v8913_v23, 7 }
 0xc8e   : > { %v8915_v9 = vpop.f32.mrf.mxu3 }
 0xc90   : > { %v4563_v35 = vpop.f32.mrf.mxu2 }
 0xc92   : > { %v8917_v27 = vpop.f32.mrf.mxu1 }
 0xc93   : > { %v4629_v10 = vrot.slane %v8917_v27, 7 }
 0xc96   : > { %v8919_v62 = vpop.f32.mrf.mxu3 }
 0xc97   : > { %9543 = vst [vmem:[#allocation33_spill] sm:$0xff] %v8919_v62 }
 0xc98   : > { %v4566_v47 = vpop.f32.mrf.mxu2 }
 0xc9a   : > { %v8921_v58 = vpop.f32.mrf.mxu1 }
 0xc9b   : > { %v4630_v19 = vrot.slane %v8921_v58, 7 }
 0xc9e   : > { %v8923_v5 = vpop.f32.mrf.mxu3 }
 0xca0   : > { %v4569_v55 = vpop.f32.mrf.mxu2 }
 0xca2   : > { %v8925_v60 = vpop.f32.mrf.mxu1 }
 0xca6   : > { %v8927_v59 = vpop.f32.mrf.mxu3 }
 0xcaa   : > { %v8929_v48 = vpop.f32.mrf.mxu1 }
 0xcae   : > { %v8931_v41 = vpop.f32.mrf.mxu3 }
 0xcb2   : > { %v8935_v42 = vpop.f32.mrf.mxu1 }
 0xcb6   : > { %v8933_v29 = vpop.f32.mrf.mxu3 }
 0xcba   : > { %v8939_v3 = vpop.f32.mrf.mxu1 }
 0xcbe   : > { %v8937_v53 = vpop.f32.mrf.mxu3 }
 0xcc2   : > { %v8943_v33 = vpop.f32.mrf.mxu1 }
 0xcc3   : > { %v4635_v38 = vrot.slane %v8943_v33, 7 }
 0xcc5   : > { %v4643_v20 = vsel %vm812_vm0, %v4635_v38, %v4628_v26 }
 0xcc6   : > { %v8941_v24 = vpop.f32.mrf.mxu3  ;;  %v4644_v40 = vmul.f32 %v8769_v17, %v4643_v20  ;;  %v4642_v17 = vsel %vm812_vm0, %v4628_v26, %v4629_v10  ;;  %v4641_v26 = vsel %vm812_vm0, %v4629_v10, %v4630_v19 }
 0xcc7   : > { %v4645_v27 = vmul.f32 %v8774_v25, %v4642_v17 }
 0xcc8   : > { %v4652_v23 = vadd.f32 %v4644_v40, %v4563_v35  ;;  %v4572_v40 = vpop.f32.mrf.mxu2 }
 0xcc9   : > { %v4653_v20 = vadd.f32 %v4645_v27, %v4566_v47 }
 0xcce   : > { %v8945_v61 = vpop.f32.mrf.mxu3 }
 0xccf   : > { %v4660_v31 = vrot.slane %v8945_v61, 1 }
 0xcd6   : > { %v4607_v34 = vpop.f32.mrf.mxu3 }
 0xcd7   : > { %v4661_v21 = vrot.slane %v4607_v34, 1  ;;  %v4646_v34 = vmul.f32 %v8796_v63, %v4641_v26  ;;  %v4633_v26 = vrot.slane %v8935_v42, 7 }
 0xcd9   : > { %v4674_v32 = vsel %vm845_vm1, %v4660_v31, %v4661_v21  ;;  %v4654_v47 = vadd.f32 %v4646_v34, %v4569_v55 }
 0xcda   : > { %v4676_v51 = vmul.f32 %v8777_v14, %v4674_v32 }
 0xcdc   : > { %v4684_v13 = vadd.f32 %v4676_v51, %v4652_v23  ;;  %v4631_v23 = vrot.slane %v8925_v60, 7 }
 0xcde   : > { %v4697_v43 = vadd.f32 %v8961_v12, %v4684_v13  ;;  %v4610_v44 = vpop.f32.mrf.mxu3  ;;  %v4640_v10 = vsel %vm812_vm0, %v4630_v19, %v4631_v23  ;;  %v4575_v13 = vpop.f32.mrf.mxu2 }
 0xcdf   : > { %v4662_v56 = vrot.slane %v4610_v44, 1  ;;  %v4647_v27 = vmul.f32 %v8814_v22, %v4640_v10  ;;  %v4632_v44 = vrot.slane %v8929_v48, 7 }
 0xce0   : > { %v4705_v30 = vmax.f32 %v4697_v43, 0.0 }
 0xce1   : > { %v4673_v35 = vsel %vm845_vm1, %v4661_v21, %v4662_v56  ;;  %v4655_v55 = vadd.f32 %v4647_v27, %v4572_v40  ;;  %v4639_v19 = vsel %vm812_vm0, %v4631_v23, %v4632_v44  ;;  %v4638_v23 = vsel %vm812_vm0, %v4632_v44, %v4633_v26 }
 0xce2   : > { %v4677_v14 = vmul.f32 %v8781_v45, %v4673_v35  ;;  %4778 = vmatmul.f32.vlgmr.msra.gmra.mxu0 %v4705_v30  ;;  %4819 = vmatmul.f32.vlgmr.msra.gmra.mxu1 %v4705_v30 }
 0xce3   : > { %4860 = vmatmul.f32.vlgmr.msrb.gmra.mxu2 %v4705_v30 }
 0xce4   : > { %v4685_v25 = vadd.f32 %v4677_v14, %v4653_v20  ;;  %v4648_v20 = vmul.f32 %v8831_v37, %v4639_v19 }
 0xce6   : > { %v4613_v32 = vpop.f32.mrf.mxu3  ;;  %v4698_v58 = vadd.f32 %v8961_v12, %v4685_v25  ;;  %v4578_v25 = vpop.f32.mrf.mxu2  ;;  %v4656_v40 = vadd.f32 %v4648_v20, %v4575_v13 }
 0xce7   : > { %v4663_v51 = vrot.slane %v4613_v32, 1 }
 0xce8   : > { %v4706_v21 = vmax.f32 %v4698_v58, 0.0 }
 0xce9   : > { %v4672_v45 = vsel %vm845_vm1, %v4662_v56, %v4663_v51 }
 0xcea   : > { %v4678_v17 = vmul.f32 %v8802_v36, %v4672_v45  ;;  %4781 = vmatmul.f32.gmra.mxu0 %v4706_v21  ;;  %4822 = vmatmul.f32.gmra.mxu1 %v4706_v21  ;;  %v4634_v45 = vrot.slane %v8939_v3, 7 }
 0xceb   : > { %4863 = vmatmul.f32.gmra.mxu2 %v4706_v21 }
 0xcec   : > { %v4686_v63 = vadd.f32 %v4678_v17, %v4654_v47  ;;  %v4637_v27 = vsel %vm812_vm0, %v4633_v26, %v4634_v45  ;;  %v4636_v44 = vsel %vm812_vm0, %v4634_v45, %v4635_v38  ;;  %v9021_v26 = vpop.f32.mrf.mxu0 }
 0xcee   : > { %v4616_v43 = vpop.f32.mrf.mxu3  ;;  %v4699_v60 = vadd.f32 %v8961_v12, %v4686_v63  ;;  %v4581_v10 = vpop.f32.mrf.mxu2 }
 0xcef   : > { %v4664_v30 = vrot.slane %v4616_v43, 1  ;;  %v4650_v43 = vmul.f32 %v8865_v57, %v4637_v27  ;;  %v5076_v27 = vld [vmem:[#allocation7 + $0x1638] sm:$0xff] }
 0xcf0   : > { %v4707_v56 = vmax.f32 %v4699_v60, 0.0 }
 0xcf1   : > { %v4671_v36 = vsel %vm845_vm1, %v4663_v51, %v4664_v30  ;;  %v4649_v51 = vmul.f32 %v8848_v8, %v4638_v23 }
 0xcf2   : > { %v4679_v35 = vmul.f32 %v8820_v50, %v4671_v36  ;;  %4784 = vmatmul.f32.gmra.mxu0 %v4707_v56  ;;  %4825 = vmatmul.f32.gmra.mxu1 %v4707_v56 }
 0xcf3   : > { %4866 = vmatmul.f32.gmra.mxu2 %v4707_v56  ;;  %v4657_v63 = vadd.f32 %v4649_v51, %v4578_v25  ;;  %v4977_v51 = vld [vmem:[#allocation10 + $0x370] sm:$0xff] }
 0xcf4   : > { %v4687_v22 = vadd.f32 %v4679_v35, %v4655_v55  ;;  %v4658_v55 = vadd.f32 %v4650_v43, %v4581_v10  ;;  %v4651_v35 = vmul.f32 %v8885_v16, %v4636_v44  ;;  %v5079_v10 = vld [vmem:[#allocation7 + $0x1650] sm:$0xff]  ;;  %v5078_v43 = vld [vmem:[#allocation7 + $0x1648] sm:$0xff] }
 0xcf5   : > { %v5074_v44 = vld [vmem:[#allocation7 + $0x1628] sm:$0xff] }
 0xcf6   : > { %v4619_v14 = vpop.f32.mrf.mxu3  ;;  %v4700_v48 = vadd.f32 %v8961_v12, %v4687_v22  ;;  %v4584_v33 = vpop.f32.mrf.mxu2 }
 0xcf7   : > { %v4665_v34 = vrot.slane %v4619_v14, 1  ;;  %v4659_v20 = vadd.f32 %v4651_v35, %v4584_v33  ;;  %v5072_v35 = vld [vmem:[#allocation7 + $0x1618] sm:$0xff]  ;;  %v5067_v33 = vld [vmem:[#allocation7 + $0x15f0] sm:$0xff] }
 0xcf8   : > { %v4708_v32 = vmax.f32 %v4700_v48, 0.0 }
 0xcf9   : > { %v4670_v50 = vsel %vm845_vm1, %v4664_v30, %v4665_v34 }
 0xcfa   : > { %v4680_v58 = vmul.f32 %v8837_v28, %v4670_v50  ;;  %4787 = vmatmul.f32.gmra.mxu0 %v4708_v32  ;;  %4828 = vmatmul.f32.gmra.mxu1 %v4708_v32 }
 0xcfb   : > { %4869 = vmatmul.f32.gmra.mxu2 %v4708_v32 }
 0xcfc   : > { %v4688_v37 = vadd.f32 %v4680_v58, %v4656_v40 }
 0xcfe   : > { %v4622_v21 = vpop.f32.mrf.mxu3  ;;  %v4701_v42 = vadd.f32 %v8961_v12, %v4688_v37 }
 0xcff   : > { %v4666_v47 = vrot.slane %v4622_v21, 1  ;;  %v5082_v21 = vld [vmem:[#allocation7 + $0x1668] sm:$0xff] }
 0xd00   : > { %v4709_v17 = vmax.f32 %v4701_v42, 0.0  ;;  %v5083_v42 = vld [vmem:[#allocation7 + $0x1670] sm:$0xff]  ;;  %5085 = vmatpush.msrb.mxu0 %v5082_v21  ;;  %v4969_v21 = vld [vmem:[#allocation10 + $0x330] sm:$0xff] }
 0xd01   : > { %v4669_v28 = vsel %vm845_vm1, %v4665_v34, %v4666_v47  ;;  %v9024_v34 = vpop.f32.mrf.mxu0  ;;  %5126 = vmatpush.msrb.mxu1 %v5083_v42  ;;  %v5058_v42 = vld [vmem:[#allocation7 + $0x15a8] sm:$0xff] }
 0xd02   : > { %v4681_v13 = vmul.f32 %v8854_v18, %v4669_v28  ;;  %4790 = vmatmul.f32.gmra.mxu0 %v4709_v17  ;;  %4831 = vmatmul.f32.gmra.mxu1 %v4709_v17  ;;  %9544 = vst [vmem:[#allocation34_spill] sm:$0xff] %v9024_v34  ;;  %v5080_v28 = vld [vmem:[#allocation7 + $0x1658] sm:$0xff] }
 0xd03   : > { %4872 = vmatmul.f32.gmra.mxu2 %v4709_v17  ;;  %v4976_v17 = vld [vmem:[#allocation10 + $0x368] sm:$0xff]  ;;  %5086 = vmatpush.msrb.mxu0 %v5079_v10 }
 0xd04   : > { %v4689_v8 = vadd.f32 %v4681_v13, %v4657_v63  ;;  %v5081_v63 = vld [vmem:[#allocation7 + $0x1660] sm:$0xff]  ;;  %5127 = vmatpush.msrb.mxu1 %v5080_v28  ;;  %v4975_v13 = vld [vmem:[#allocation10 + $0x360] sm:$0xff]  ;;  %v5060_v28 = vld [vmem:[#allocation7 + $0x15b8] sm:$0xff] }
 0xd05   : > { %5087 = vmatpush.msrb.mxu0 %v5076_v27  ;;  %v5056_v27 = vld [vmem:[#allocation7 + $0x1598] sm:$0xff] }
 0xd06   : > { %v4625_v60 = vpop.f32.mrf.mxu3  ;;  %v4702_v3 = vadd.f32 %v8961_v12, %v4689_v8  ;;  %v5077_v8 = vld [vmem:[#allocation7 + $0x1640] sm:$0xff] }
 0xd07   : > { %v4667_v30 = vrot.slane %v4625_v60, 1  ;;  %5128 = vmatpush.msrb.mxu1 %v5077_v8  ;;  %v4974_v60 = vld [vmem:[#allocation10 + $0x358] sm:$0xff]  ;;  %v5057_v8 = vld [vmem:[#allocation7 + $0x15a0] sm:$0xff] }
 0xd08   : > { %v4710_v56 = vmax.f32 %v4702_v3, 0.0  ;;  %v5073_v3 = vld [vmem:[#allocation7 + $0x1620] sm:$0xff] }
 0xd09   : > { %v4668_v18 = vsel %vm845_vm1, %v4666_v47, %v4667_v30  ;;  %v4675_v36 = vsel %vm845_vm1, %v4667_v30, %v4660_v31  ;;  %v5084_v47 = vld [vmem:[#allocation7 + $0x1678] sm:$0xff]  ;;  %5088 = vmatpush.msrb.mxu0 %v5073_v3  ;;  %v5075_v30 = vld [vmem:[#allocation7 + $0x1630] sm:$0xff]  ;;  %5129 = vmatpush.msrb.mxu1 %v5074_v44  ;;  %v5053_v3 = vld [vmem:[#allocation7 + $0x1580] sm:$0xff] }
 0xd0a   : > { %v4682_v19 = vmul.f32 %v8870_v2, %v4668_v18  ;;  %4793 = vmatmul.f32.gmra.mxu0 %v4710_v56  ;;  %4834 = vmatmul.f32.gmra.mxu1 %v4710_v56  ;;  %v4683_v38 = vmul.f32 %v8890_v11, %v4675_v36  ;;  %v9026_v11 = vpop.f32.mrf.mxu0  ;;  %v5070_v18 = vld [vmem:[#allocation7 + $0x1608] sm:$0xff]  ;;  %v5071_v36 = vld [vmem:[#allocation7 + $0x1610] sm:$0xff] }
 0xd0b   : > { %4875 = vmatmul.f32.gmra.mxu2 %v4710_v56  ;;  %9545 = vst [vmem:[#allocation35_spill] sm:$0xff] %v9026_v11  ;;  %v4973_v56 = vld [vmem:[#allocation10 + $0x350] sm:$0xff]  ;;  %5089 = vmatpush.msrb.mxu0 %v5070_v18  ;;  %v5054_v44 = vld [vmem:[#allocation7 + $0x1588] sm:$0xff] }
 0xd0c   : > { %v4690_v22 = vadd.f32 %v4682_v19, %v4658_v55  ;;  %v4691_v61 = vadd.f32 %v4683_v38, %v4659_v20  ;;  %5167 = vmatpush.msra.mxu2 %v5084_v47  ;;  %5130 = vmatpush.msrb.mxu1 %v5071_v36  ;;  %v4972_v19 = vld [vmem:[#allocation10 + $0x348] sm:$0xff]  ;;  %v4971_v20 = vld [vmem:[#allocation10 + $0x340] sm:$0xff]  ;;  %v5050_v18 = vld [vmem:[#allocation7 + $0x1568] sm:$0xff] }
 0xd0d   : > { %v5068_v38 = vld [vmem:[#allocation7 + $0x15f8] sm:$0xff]  ;;  %5090 = vmatpush.msrb.mxu0 %v5067_v33  ;;  %v5059_v47 = vld [vmem:[#allocation7 + $0x15b0] sm:$0xff] }
 0xd0e   : > { %v4703_v14 = vadd.f32 %v8961_v12, %v4690_v22  ;;  %v4704_v31 = vadd.f32 %v8961_v12, %v4691_v61  ;;  %v4978_v12 = vld [vmem:[#allocation10 + $0x378] sm:$0xff]  ;;  %5168 = vmatpush.msra.mxu2 %v5081_v63  ;;  %v5069_v22 = vld [vmem:[#allocation7 + $0x1600] sm:$0xff]  ;;  %5131 = vmatpush.msrb.mxu1 %v5068_v38  ;;  %v4968_v63 = vld [vmem:[#allocation10 + $0x328] sm:$0xff] }
 0xd0f   : > { %4979 = vmatpush.msrb.mxu3 %v4978_v12  ;;  %v5066_v61 = vld [vmem:[#allocation7 + $0x15e8] sm:$0xff]  ;;  %v5051_v36 = vld [vmem:[#allocation7 + $0x1570] sm:$0xff] }
 0xd10   : > { %v4711_v48 = vmax.f32 %v4703_v14, 0.0  ;;  %v4712_v25 = vmax.f32 %v4704_v31, 0.0  ;;  %5169 = vmatpush.msra.mxu2 %v5078_v43  ;;  %v5064_v14 = vld [vmem:[#allocation7 + $0x15d8] sm:$0xff]  ;;  %v4970_v31 = vld [vmem:[#allocation10 + $0x338] sm:$0xff]  ;;  %v4967_v43 = vld [vmem:[#allocation10 + $0x320] sm:$0xff] }
 0xd11   : > { %4980 = vmatpush.msrb.mxu3 %v4977_v51  ;;  %5091 = vmatpush.msrb.mxu0 %v5064_v14  ;;  %v5062_v12 = vld [vmem:[#allocation7 + $0x15c8] sm:$0xff]  ;;  %v5063_v51 = vld [vmem:[#allocation7 + $0x15d0] sm:$0xff] }
 0xd12   : > { %4796 = vmatmul.f32.gmra.mxu0 %v4711_v48  ;;  %4837 = vmatmul.f32.gmra.mxu1 %v4711_v48  ;;  %v9028_v32 = vpop.f32.mrf.mxu0  ;;  %v5047_v33 = vld [vmem:[#allocation7 + $0x1550] sm:$0xff] }
 0xd13   : > { %4878 = vmatmul.f32.gmra.mxu2 %v4711_v48  ;;  %4981 = vmatpush.msrb.mxu3 %v4976_v17  ;;  %v5065_v48 = vld [vmem:[#allocation7 + $0x15e0] sm:$0xff]  ;;  %v5043_v14 = vld [vmem:[#allocation7 + $0x1530] sm:$0xff] }
 0xd14   : > { %5170 = vmatpush.msra.mxu2 %v5075_v30  ;;  %5132 = vmatpush.msrb.mxu1 %v5065_v48  ;;  %v4966_v30 = vld [vmem:[#allocation10 + $0x318] sm:$0xff]  ;;  %v5044_v48 = vld [vmem:[#allocation7 + $0x1538] sm:$0xff] }
 0xd15   : > { %4982 = vmatpush.msrb.mxu3 %v4975_v13  ;;  %v5055_v13 = vld [vmem:[#allocation7 + $0x1590] sm:$0xff] }
 0xd16   : > { %5171 = vmatpush.msra.mxu2 %v5072_v35  ;;  %5133 = vmatpush.msrb.mxu1 %v5062_v12  ;;  %v4965_v35 = vld [vmem:[#allocation10 + $0x310] sm:$0xff]  ;;  %v5040_v12 = vld [vmem:[#allocation7 + $0x1518] sm:$0xff] }
 0xd17   : > { %4983 = vmatpush.msrb.mxu3 %v4974_v60  ;;  %v5052_v60 = vld [vmem:[#allocation7 + $0x1578] sm:$0xff] }
 0xd18   : > { %5172 = vmatpush.msra.mxu2 %v5069_v22  ;;  %5134 = vmatpush.msrb.mxu1 %v5059_v47  ;;  %v5048_v22 = vld [vmem:[#allocation7 + $0x1558] sm:$0xff]  ;;  %v5038_v47 = vld [vmem:[#allocation7 + $0x1508] sm:$0xff] }
 0xd19   : > { %4984 = vmatpush.msrb.mxu3 %v4973_v56  ;;  %v5049_v56 = vld [vmem:[#allocation7 + $0x1560] sm:$0xff] }
 0xd1a   : > { %4799 = vmatmul.f32.gmra.mxu0 %v4712_v25  ;;  %4840 = vmatmul.f32.gmra.mxu1 %v4712_v25  ;;  %v9030_v50 = vpop.f32.mrf.mxu0 }
 0xd1b   : > { %4881 = vmatmul.f32.gmra.mxu2 %v4712_v25  ;;  %4985 = vmatpush.msrb.mxu3 %v4972_v19  ;;  %v5061_v25 = vld [vmem:[#allocation7 + $0x15c0] sm:$0xff]  ;;  %v5046_v19 = vld [vmem:[#allocation7 + $0x1548] sm:$0xff] }
 0xd1c   : > { %5173 = vmatpush.msra.mxu2 %v5066_v61  ;;  %5092 = vmatpush.msrb.mxu0 %v5061_v25  ;;  %v4963_v25 = vld [vmem:[#allocation10 + $0x300] sm:$0xff] }
 0xd1d   : > { %4986 = vmatpush.msrb.mxu3 %v4971_v20  ;;  %5135 = vmatpush.msrb.mxu1 %v5056_v27  ;;  %v4964_v20 = vld [vmem:[#allocation10 + $0x308] sm:$0xff] }
 0xd1e   : > { %5174 = vmatpush.msra.mxu2 %v5063_v51  ;;  %5093 = vmatpush.msrb.mxu0 %v5058_v42  ;;  %v5041_v51 = vld [vmem:[#allocation7 + $0x1520] sm:$0xff] }
 0xd1f   : > { %4987 = vmatpush.msrb.mxu3 %v4970_v31  ;;  %5136 = vmatpush.msrb.mxu1 %v5053_v3  ;;  %v5045_v31 = vld [vmem:[#allocation7 + $0x1540] sm:$0xff] }
 0xd20   : > { %5175 = vmatpush.msra.mxu2 %v5060_v28  ;;  %5094 = vmatpush.msrb.mxu0 %v5055_v13  ;;  %v5037_v42 = vld [vmem:[#allocation7 + $0x1500] sm:$0xff]  ;;  %v5039_v28 = vld [vmem:[#allocation7 + $0x1510] sm:$0xff] }
 0xd21   : > { %4988 = vmatpush.msrb.mxu3 %v4969_v21  ;;  %5137 = vmatpush.msrb.mxu1 %v5050_v18  ;;  %v5042_v21 = vld [vmem:[#allocation7 + $0x1528] sm:$0xff] }
 0xd22   : > { %v9032_v40 = vpop.f32.mrf.mxu0  ;;  %5176 = vmatpush.msra.mxu2 %v5057_v8  ;;  %5095 = vmatpush.msrb.mxu0 %v5052_v60 }
 0xd23   : > { %4989 = vmatpush.msrb.mxu3 %v4968_v63  ;;  %5138 = vmatpush.msrb.mxu1 %v5047_v33 }
 0xd24   : > { %5177 = vmatpush.msra.mxu2 %v5054_v44  ;;  %5096 = vmatpush.msrb.mxu0 %v5049_v56 }
 0xd25   : > { %4990 = vmatpush.msrb.mxu3 %v4967_v43  ;;  %5139 = vmatpush.msrb.mxu1 %v5044_v48 }
 0xd26   : > { %5178 = vmatpush.msra.mxu2 %v5051_v36  ;;  %5097 = vmatpush.msrb.mxu0 %v5046_v19 }
 0xd27   : > { %4991 = vmatpush.msrb.mxu3 %v4966_v30  ;;  %5140 = vmatpush.msrb.mxu1 %v5041_v51 }
 0xd28   : > { %5179 = vmatpush.msra.mxu2 %v5048_v22  ;;  %5098 = vmatpush.msrb.mxu0 %v5043_v14  ;;  %v9070_v22 = vld [vmem:[#allocation2] sm:$0xff]  ;;  %v9075_v14 = vld [vmem:[#allocation2 + $0x8] sm:$0xff] }
 0xd29   : > { %4992 = vmatpush.msrb.mxu3 %v4965_v35  ;;  %5141 = vmatpush.msrb.mxu1 %v5038_v47 }
 0xd2a   : > { %v9034_v58 = vpop.f32.mrf.mxu0  ;;  %5180 = vmatpush.msra.mxu2 %v5045_v31  ;;  %5099 = vmatpush.msrb.mxu0 %v5040_v12 }
 0xd2b   : > { %4993 = vmatpush.msrb.mxu3 %v4964_v20 }
 0xd2c   : > { %5181 = vmatpush.msra.mxu2 %v5042_v21  ;;  %5100 = vmatpush.msrb.mxu0 %v5037_v42  ;;  %v9082_v21 = vld [vmem:[#allocation4 + $0x8] sm:$0xff] }
 0xd2d   : > { %4994 = vmatpush.msrb.mxu3 %v4963_v25 }
 0xd2e   : > { %5182 = vmatpush.msra.mxu2 %v5039_v28 }
 0xd32   : > { %v9036_v23 = vpop.f32.mrf.mxu0 }
 0xd5f   : > { %v9038_v37 = vpop.f32.mrf.mxu0  ;;  %v4820_v13 = vpop.f32.mrf.mxu1 }
 0xd60   : > { %v4885_v56 = vrot.slane %v9038_v37, 7 }
 0xd66   : > { %v9044_v17 = vpop.f32.mrf.mxu2 }
 0xd67   : > { %v9040_v45 = vpop.f32.mrf.mxu0  ;;  %v4823_v43 = vpop.f32.mrf.mxu1  ;;  %v4917_v18 = vrot.slane %v9044_v17, 1 }
 0xd68   : > { %v4886_v3 = vrot.slane %v9040_v45, 7 }
 0xd6a   : > { %v4899_v19 = vsel %vm812_vm0, %v4885_v56, %v4886_v3 }
 0xd6b   : > { %v4902_v48 = vmul.f32 %v9075_v14, %v4899_v19 }
 0xd6e   : > { %v4864_v61 = vpop.f32.mrf.mxu2 }
 0xd6f   : > { %v9042_v55 = vpop.f32.mrf.mxu0  ;;  %v4918_v44 = vrot.slane %v4864_v61, 1  ;;  %v9078_v61 = vld [vmem:[#allocation4] sm:$0xff]  ;;  %v4826_v51 = vpop.f32.mrf.mxu1 }
 0xd70   : > { %v4887_v12 = vrot.slane %v9042_v55, 7 }
 0xd71   : > { %v4931_v33 = vsel %vm845_vm1, %v4917_v18, %v4918_v44 }
 0xd72   : > { %v4933_v31 = vmul.f32 %v9078_v61, %v4931_v33 }
 0xd76   : > { %v4867_v27 = vpop.f32.mrf.mxu2 }
 0xd77   : > { %v9046_v10 = vpop.f32.mrf.mxu0  ;;  %v4919_v36 = vrot.slane %v4867_v27, 1  ;;  %v9085_v27 = vld [vmem:[#allocation9 + $0xd] ss:$0 sm:$0xff] }
 0xd79   : > { %v4930_v20 = vsel %vm845_vm1, %v4918_v44, %v4919_v36 }
 0xd7a   : > { %v4934_v42 = vmul.f32 %v9082_v21, %v4930_v20 }
 0xd7e   : > { %v4870_v60 = vpop.f32.mrf.mxu2 }
 0xd7f   : > { %v9048_v38 = vpop.f32.mrf.mxu0  ;;  %v4920_v44 = vrot.slane %v4870_v60, 1  ;;  %v9097_v60 = vld [vmem:[#allocation4 + $0x10] sm:$0xff] }
 0xd81   : > { %v4929_v33 = vsel %vm845_vm1, %v4919_v36, %v4920_v44 }
 0xd86   : > { %v4873_v47 = vpop.f32.mrf.mxu2 }
 0xd87   : > { %v9050_v63 = vpop.f32.mrf.mxu0 }
 0xd8f   : > { %v9052_v8 = vpop.f32.mrf.mxu0 }
 0xd97   : > { %v9055_v30 = vpop.f32.mrf.mxu0 }
 0xd98   : > { %v4892_v35 = vrot.slane %v9055_v30, 7 }
 0xd9a   : > { %v4900_v45 = vsel %vm812_vm0, %v4892_v35, %v4885_v56  ;;  %v4910_v56 = vadd.f32 %v4902_v48, %v4823_v43  ;;  %v4888_v43 = vrot.slane %v9046_v10, 7 }
 0xd9b   : > { %v4901_v37 = vmul.f32 %v9070_v22, %v4900_v45  ;;  %v4898_v45 = vsel %vm812_vm0, %v4886_v3, %v4887_v12  ;;  %v4935_v3 = vmul.f32 %v9097_v60, %v4929_v33 }
 0xd9c   : > { %v4942_v55 = vadd.f32 %v4934_v42, %v4910_v56  ;;  %v4876_v42 = vpop.f32.mrf.mxu2  ;;  %v4897_v36 = vsel %vm812_vm0, %v4887_v12, %v4888_v43 }
 0xd9d   : > { %v4909_v25 = vadd.f32 %v4901_v37, %v4820_v13  ;;  %v9093_v37 = vld [vmem:[#allocation2 + $0x10] sm:$0xff] }
 0xd9e   : > { %v4903_v20 = vmul.f32 %v9093_v37, %v4898_v45  ;;  %v4955_v48 = vadd.f32 %v9085_v27, %v4942_v55 }
 0xd9f   : > { %v4941_v28 = vadd.f32 %v4933_v31, %v4909_v25  ;;  %v4921_v31 = vrot.slane %v4873_v47, 1  ;;  %v4889_v47 = vrot.slane %v9048_v38, 7 }
 0xda0   : > { %v4911_v25 = vadd.f32 %v4903_v20, %v4826_v51  ;;  %v9110_v51 = vld [vmem:[#allocation4 + $0x18] sm:$0xff] }
 0xda1   : > { %v4954_v19 = vadd.f32 %v9085_v27, %v4941_v28  ;;  %v5029_v28 = vadd.f32 %v4955_v48, %v8810_v4  ;;  %v4928_v10 = vsel %vm845_vm1, %v4920_v44, %v4921_v31  ;;  %v4922_v4 = vrot.slane %v4876_v42, 1  ;;  %v9123_v42 = vld [vmem:[#allocation4 + $0x20] sm:$0xff] }
 0xda2   : > { %v4943_v56 = vadd.f32 %v4935_v3, %v4911_v25  ;;  %v4936_v12 = vmul.f32 %v9110_v51, %v4928_v10  ;;  %v4896_v44 = vsel %vm812_vm0, %v4888_v43, %v4889_v47  ;;  %v9119_v25 = vld [vmem:[#allocation2 + $0x20] sm:$0xff] }
 0xda3   : > { %4995 = vmatmul.f32.vlgmr.msrb.gmra.mxu3 %v4954_v19  ;;  %v5028_v13 = vadd.f32 %v4954_v19, %v8792_v0  ;;  %v4829_v0 = vpop.f32.mrf.mxu1  ;;  %v9106_v19 = vld [vmem:[#allocation2 + $0x18] sm:$0xff]  ;;  %v4927_v38 = vsel %vm845_vm1, %v4921_v31, %v4922_v4 }
 0xda4   : > { %v4904_v45 = vmul.f32 %v9106_v19, %v4897_v36  ;;  %v4879_v20 = vpop.f32.mrf.mxu2  ;;  %v4905_v36 = vmul.f32 %v9119_v25, %v4896_v44  ;;  %v4937_v43 = vmul.f32 %v9123_v42, %v4927_v38 }
 0xda5   : > { %5101 = vmatmul.f32.vlgmr.msrb.gmra.mxu0 %v5028_v13  ;;  %5142 = vmatmul.f32.vlgmr.msrb.gmra.mxu1 %v5028_v13 }
 0xda6   : > { %5183 = vmatmul.f32.vlgmr.msra.gmra.mxu2 %v5028_v13  ;;  %v4956_v13 = vadd.f32 %v9085_v27, %v4943_v56  ;;  %v4912_v55 = vadd.f32 %v4904_v45, %v4829_v0  ;;  %v4890_v0 = vrot.slane %v9050_v63, 7 }
 0xda8   : > { %v5030_v3 = vadd.f32 %v4956_v13, %v8827_v1  ;;  %v4923_v1 = vrot.slane %v4879_v20, 1  ;;  %v4895_v31 = vsel %vm812_vm0, %v4889_v47, %v4890_v0  ;;  %v9136_v20 = vld [vmem:[#allocation4 + $0x28] sm:$0xff] }
 0xdaa   : > { %v4926_v63 = vsel %vm845_vm1, %v4922_v4, %v4923_v1 }
 0xdab   : > { %4998 = vmatmul.f32.gmra.mxu3 %v4955_v48  ;;  %v4832_v33 = vpop.f32.mrf.mxu1  ;;  %v4944_v48 = vadd.f32 %v4936_v12, %v4912_v55  ;;  %v4938_v47 = vmul.f32 %v9136_v20, %v4926_v63 }
 0xdac   : > { %v4913_v56 = vadd.f32 %v4905_v36, %v4832_v33  ;;  %v4882_v44 = vpop.f32.mrf.mxu2  ;;  %v4891_v33 = vrot.slane %v9052_v8, 7 }
 0xdad   : > { %5104 = vmatmul.f32.gmra.mxu0 %v5029_v28  ;;  %5145 = vmatmul.f32.gmra.mxu1 %v5029_v28 }
 0xdae   : > { %5186 = vmatmul.f32.gmra.mxu2 %v5029_v28  ;;  %v4957_v28 = vadd.f32 %v9085_v27, %v4944_v48  ;;  %v4945_v45 = vadd.f32 %v4937_v43, %v4913_v56  ;;  %v4894_v4 = vsel %vm812_vm0, %v4890_v0, %v4891_v33 }
 0xdaf   : > { %v4907_v8 = vmul.f32 %v8865_v57, %v4894_v4  ;;  %v5335_v4 = vld [vmem:[#allocation7 + $0x17c8] sm:$0xff] }
 0xdb0   : > { %v5031_v10 = vadd.f32 %v4957_v28, %v8844_v6  ;;  %v4958_v6 = vadd.f32 %v9085_v27, %v4945_v45 }
 0xdb2   : > { %v5032_v38 = vadd.f32 %v4958_v6, %v8861_v52  ;;  %v4893_v52 = vsel %vm812_vm0, %v4891_v33, %v4892_v35  ;;  %v5340_v33 = vld [vmem:[#allocation7 + $0x17f0] sm:$0xff] }
 0xdb3   : > { %5001 = vmatmul.f32.gmra.mxu3 %v4956_v13  ;;  %v4835_v12 = vpop.f32.mrf.mxu1  ;;  %v9132_v13 = vld [vmem:[#allocation2 + $0x28] sm:$0xff]  ;;  %v4908_v45 = vmul.f32 %v8885_v16, %v4893_v52  ;;  %5383 = vmatpush.msra.mxu0 %v5340_v33  ;;  %v5325_v52 = vld [vmem:[#allocation7 + $0x1778] sm:$0xff] }
 0xdb4   : > { %v4906_v55 = vmul.f32 %v9132_v13, %v4895_v31  ;;  %v5313_v33 = vld [vmem:[#allocation7 + $0x1718] sm:$0xff] }
 0xdb5   : > { %5107 = vmatmul.f32.gmra.mxu0 %v5030_v3  ;;  %5148 = vmatmul.f32.gmra.mxu1 %v5030_v3 }
 0xdb6   : > { %5189 = vmatmul.f32.gmra.mxu2 %v5030_v3  ;;  %v4924_v3 = vrot.slane %v4882_v44, 1  ;;  %v4914_v48 = vadd.f32 %v4906_v55, %v4835_v12  ;;  %v5339_v44 = vld [vmem:[#allocation7 + $0x17e8] sm:$0xff] }
 0xdb7   : > { %5342 = vmatpush.msra.mxu3 %v5339_v44  ;;  %v5312_v44 = vld [vmem:[#allocation7 + $0x1710] sm:$0xff] }
 0xdb8   : > { %v4946_v36 = vadd.f32 %v4938_v47, %v4914_v48  ;;  %v4925_v43 = vsel %vm845_vm1, %v4923_v1, %v4924_v3  ;;  %v4932_v57 = vsel %vm845_vm1, %v4924_v3, %v4917_v18  ;;  %v5341_v47 = vld [vmem:[#allocation7 + $0x17f8] sm:$0xff]  ;;  %v5338_v48 = vld [vmem:[#allocation7 + $0x17e0] sm:$0xff] }
 0xdb9   : > { %v4939_v56 = vmul.f32 %v8870_v2, %v4925_v43  ;;  %v9158_v2 = vld [vmem:[#allocation4 + $0x38] sm:$0xff]  ;;  %5424 = vmatpush.msra.mxu1 %v5341_v47  ;;  %v5332_v43 = vld [vmem:[#allocation7 + $0x17b0] sm:$0xff]  ;;  %v5314_v47 = vld [vmem:[#allocation7 + $0x1720] sm:$0xff] }
 0xdba   : > { %v4959_v31 = vadd.f32 %v9085_v27, %v4946_v36  ;;  %v4940_v30 = vmul.f32 %v9158_v2, %v4932_v57  ;;  %v5337_v3 = vld [vmem:[#allocation7 + $0x17d8] sm:$0xff]  ;;  %v5331_v36 = vld [vmem:[#allocation7 + $0x17a8] sm:$0xff]  ;;  %v5322_v57 = vld [vmem:[#allocation7 + $0x1760] sm:$0xff] }
 0xdbb   : > { %5004 = vmatmul.f32.gmra.mxu3 %v4957_v28  ;;  %v4838_v28 = vpop.f32.mrf.mxu1  ;;  %5384 = vmatpush.msra.mxu0 %v5337_v3  ;;  %v5310_v3 = vld [vmem:[#allocation7 + $0x1700] sm:$0xff] }
 0xdbc   : > { %v5033_v0 = vadd.f32 %v4959_v31, %v8879_v46  ;;  %5425 = vmatpush.msra.mxu1 %v5338_v48  ;;  %v5311_v48 = vld [vmem:[#allocation7 + $0x1708] sm:$0xff] }
 0xdbd   : > { %5110 = vmatmul.f32.gmra.mxu0 %v5031_v10  ;;  %5151 = vmatmul.f32.gmra.mxu1 %v5031_v10 }
 0xdbe   : > { %5192 = vmatmul.f32.gmra.mxu2 %v5031_v10  ;;  %v4915_v10 = vadd.f32 %v4907_v8, %v4838_v28  ;;  %5426 = vmatpush.msra.mxu1 %v5335_v4  ;;  %v5327_v8 = vld [vmem:[#allocation7 + $0x1788] sm:$0xff]  ;;  %v5328_v28 = vld [vmem:[#allocation7 + $0x1790] sm:$0xff] }
 0xdbf   : > { %v5308_v4 = vld [vmem:[#allocation7 + $0x16f0] sm:$0xff] }
 0xdc0   : > { %v4947_v1 = vadd.f32 %v4939_v56, %v4915_v10  ;;  %5427 = vmatpush.msra.mxu1 %v5332_v43  ;;  %v5329_v56 = vld [vmem:[#allocation7 + $0x1798] sm:$0xff]  ;;  %v5324_v10 = vld [vmem:[#allocation7 + $0x1770] sm:$0xff] }
 0xdc1   : > { %v5305_v43 = vld [vmem:[#allocation7 + $0x16d8] sm:$0xff] }
 0xdc2   : > { %v4960_v35 = vadd.f32 %v9085_v27, %v4947_v1  ;;  %5428 = vmatpush.msra.mxu1 %v5329_v56  ;;  %v5321_v1 = vld [vmem:[#allocation7 + $0x1758] sm:$0xff] }
 0xdc3   : > { %5007 = vmatmul.f32.gmra.mxu3 %v4958_v6  ;;  %v4841_v12 = vpop.f32.mrf.mxu1  ;;  %v5301_v56 = vld [vmem:[#allocation7 + $0x16b8] sm:$0xff] }
 0xdc4   : > { %v4916_v63 = vadd.f32 %v4908_v45, %v4841_v12  ;;  %v5034_v46 = vadd.f32 %v4960_v35, %v8895_v15  ;;  %v5336_v15 = vld [vmem:[#allocation7 + $0x17d0] sm:$0xff]  ;;  %v5323_v45 = vld [vmem:[#allocation7 + $0x1768] sm:$0xff] }
 0xdc5   : > { %5113 = vmatmul.f32.gmra.mxu0 %v5032_v38  ;;  %5154 = vmatmul.f32.gmra.mxu1 %v5032_v38  ;;  %v5320_v12 = vld [vmem:[#allocation7 + $0x1750] sm:$0xff] }
 0xdc6   : > { %5195 = vmatmul.f32.gmra.mxu2 %v5032_v38  ;;  %v4948_v17 = vadd.f32 %v4940_v30, %v4916_v63  ;;  %5343 = vmatpush.msra.mxu3 %v5336_v15  ;;  %v5330_v38 = vld [vmem:[#allocation7 + $0x17a0] sm:$0xff]  ;;  %v5315_v63 = vld [vmem:[#allocation7 + $0x1728] sm:$0xff]  ;;  %v5309_v15 = vld [vmem:[#allocation7 + $0x16f8] sm:$0xff] }
 0xdc7   : > { %v5318_v30 = vld [vmem:[#allocation7 + $0x1740] sm:$0xff] }
 0xdc8   : > { %v4961_v16 = vadd.f32 %v9085_v27, %v4948_v17  ;;  %v5334_v27 = vld [vmem:[#allocation7 + $0x17c0] sm:$0xff]  ;;  %v5317_v17 = vld [vmem:[#allocation7 + $0x1738] sm:$0xff] }
 0xdc9   : > { %5385 = vmatpush.msra.mxu0 %v5334_v27  ;;  %v5307_v27 = vld [vmem:[#allocation7 + $0x16e8] sm:$0xff] }
 0xdca   : > { %v5035_v18 = vadd.f32 %v4961_v16, %v8901_v7  ;;  %v5333_v7 = vld [vmem:[#allocation7 + $0x17b8] sm:$0xff] }
 0xdcb   : > { %5010 = vmatmul.f32.gmra.mxu3 %v4959_v31  ;;  %5386 = vmatpush.msra.mxu0 %v5331_v36  ;;  %v5304_v36 = vld [vmem:[#allocation7 + $0x16d0] sm:$0xff] }
 0xdcc   : > { %5344 = vmatpush.msra.mxu3 %v5333_v7  ;;  %v5306_v7 = vld [vmem:[#allocation7 + $0x16e0] sm:$0xff] }
 0xdcd   : > { %5116 = vmatmul.f32.gmra.mxu0 %v5033_v0  ;;  %5157 = vmatmul.f32.gmra.mxu1 %v5033_v0 }
 0xdce   : > { %5198 = vmatmul.f32.gmra.mxu2 %v5033_v0  ;;  %5345 = vmatpush.msra.mxu3 %v5330_v38  ;;  %v5326_v0 = vld [vmem:[#allocation7 + $0x1780] sm:$0xff]  ;;  %v5303_v38 = vld [vmem:[#allocation7 + $0x16c8] sm:$0xff] }
 0xdcf   : > { %5387 = vmatpush.msra.mxu0 %v5328_v28  ;;  %5429 = vmatpush.msra.mxu1 %v5326_v0  ;;  %v5300_v28 = vld [vmem:[#allocation7 + $0x16b0] sm:$0xff]  ;;  %v5297_v0 = vld [vmem:[#allocation7 + $0x1698] sm:$0xff] }
 0xdd0   : > { %5346 = vmatpush.msra.mxu3 %v5327_v8 }
 0xdd1   : > { %5388 = vmatpush.msra.mxu0 %v5325_v52  ;;  %5430 = vmatpush.msra.mxu1 %v5323_v45  ;;  %v5294_v45 = vld [vmem:[#allocation7 + $0x1680] sm:$0xff] }
 0xdd2   : > { %5347 = vmatpush.msra.mxu3 %v5324_v10  ;;  %v5302_v10 = vld [vmem:[#allocation7 + $0x16c0] sm:$0xff] }
 0xdd3   : > { %5013 = vmatmul.f32.gmra.mxu3 %v4960_v35  ;;  %5389 = vmatpush.msra.mxu0 %v5322_v57  ;;  %v5319_v35 = vld [vmem:[#allocation7 + $0x1748] sm:$0xff] }
 0xdd4   : > { %5348 = vmatpush.msra.mxu3 %v5321_v1  ;;  %5431 = vmatpush.msra.mxu1 %v5320_v12  ;;  %v5298_v1 = vld [vmem:[#allocation7 + $0x16a0] sm:$0xff]  ;;  %v5299_v57 = vld [vmem:[#allocation7 + $0x16a8] sm:$0xff] }
 0xdd5   : > { %5119 = vmatmul.f32.gmra.mxu0 %v5034_v46  ;;  %5160 = vmatmul.f32.gmra.mxu1 %v5034_v46 }
 0xdd6   : > { %5201 = vmatmul.f32.gmra.mxu2 %v5034_v46  ;;  %5349 = vmatpush.msra.mxu3 %v5318_v30  ;;  %v5316_v46 = vld [vmem:[#allocation7 + $0x1730] sm:$0xff]  ;;  %v5295_v30 = vld [vmem:[#allocation7 + $0x1688] sm:$0xff] }
 0xdd7   : > { %5390 = vmatpush.msra.mxu0 %v5319_v35  ;;  %5432 = vmatpush.msra.mxu1 %v5317_v17  ;;  %v5296_v35 = vld [vmem:[#allocation7 + $0x1690] sm:$0xff] }
 0xdd8   : > { %5350 = vmatpush.msra.mxu3 %v5315_v63 }
 0xdd9   : > { %5391 = vmatpush.msra.mxu0 %v5316_v46  ;;  %5433 = vmatpush.msra.mxu1 %v5314_v47 }
 0xdda   : > { %5351 = vmatpush.msra.mxu3 %v5312_v44 }
 0xddb   : > { %5016 = vmatmul.f32.gmra.mxu3 %v4961_v16  ;;  %5392 = vmatpush.msra.mxu0 %v5313_v33 }
 0xddc   : > { %5352 = vmatpush.msra.mxu3 %v5309_v15  ;;  %5434 = vmatpush.msra.mxu1 %v5311_v48 }
 0xddd   : > { %5122 = vmatmul.f32.gmra.mxu0 %v5035_v18  ;;  %5163 = vmatmul.f32.gmra.mxu1 %v5035_v18 }
 0xdde   : > { %5204 = vmatmul.f32.gmra.mxu2 %v5035_v18  ;;  %5393 = vmatpush.msra.mxu0 %v5310_v3 }
 0xddf   : > { %5353 = vmatpush.msra.mxu3 %v5306_v7  ;;  %5435 = vmatpush.msra.mxu1 %v5308_v4 }
 0xde0   : > { %5394 = vmatpush.msra.mxu0 %v5307_v27 }
 0xde1   : > { %5354 = vmatpush.msra.mxu3 %v5303_v38  ;;  %5436 = vmatpush.msra.mxu1 %v5305_v43 }
 0xde2   : > { %5395 = vmatpush.msra.mxu0 %v5304_v36 }
 0xde3   : > { %5355 = vmatpush.msra.mxu3 %v5300_v28  ;;  %5437 = vmatpush.msra.mxu1 %v5302_v10 }
 0xde4   : > { %5396 = vmatpush.msra.mxu0 %v5301_v56 }
 0xde5   : > { %5356 = vmatpush.msra.mxu3 %v5297_v0  ;;  %5438 = vmatpush.msra.mxu1 %v5299_v57 }
 0xde6   : > { %5397 = vmatpush.msra.mxu0 %v5298_v1 }
 0xde7   : > { %5357 = vmatpush.msra.mxu3 %v5294_v45  ;;  %5439 = vmatpush.msra.mxu1 %v5296_v35 }
 0xde8   : > { %5398 = vmatpush.msra.mxu0 %v5295_v30  ;;  %v9204_v30 = vld [vmem:[#allocation9 + $0xe] ss:$0 sm:$0xff] }
 0xe22   : > { %v9165_v55 = vpop.f32.mrf.mxu0  ;;  %v5143_v63 = vpop.f32.mrf.mxu1 }
 0xe23   : > { %v5208_v48 = vrot.slane %v9165_v55, 7 }
 0xe29   : > { %v9171_v16 = vpop.f32.mrf.mxu2 }
 0xe2a   : > { %v9167_v6 = vpop.f32.mrf.mxu0  ;;  %v5146_v44 = vpop.f32.mrf.mxu1  ;;  %v5240_v7 = vrot.slane %v9171_v16, 1 }
 0xe2b   : > { %v5209_v47 = vrot.slane %v9167_v6, 7 }
 0xe2d   : > { %v5222_v38 = vsel %vm812_vm0, %v5208_v48, %v5209_v47 }
 0xe2e   : > { %v5225_v28 = vmul.f32 %v9075_v14, %v5222_v38 }
 0xe31   : > { %v5187_v52 = vpop.f32.mrf.mxu2 }
 0xe32   : > { %v9169_v31 = vpop.f32.mrf.mxu0  ;;  %v5241_v15 = vrot.slane %v5187_v52, 1  ;;  %v5149_v0 = vpop.f32.mrf.mxu1 }
 0xe33   : > { %v5210_v52 = vrot.slane %v9169_v31, 7 }
 0xe34   : > { %v5254_v36 = vsel %vm845_vm1, %v5240_v7, %v5241_v15 }
 0xe35   : > { %v5256_v56 = vmul.f32 %v9078_v61, %v5254_v36 }
 0xe39   : > { %v5190_v46 = vpop.f32.mrf.mxu2 }
 0xe3a   : > { %v9173_v18 = vpop.f32.mrf.mxu0  ;;  %v5242_v27 = vrot.slane %v5190_v46, 1  ;;  %v5233_v46 = vadd.f32 %v5225_v28, %v5146_v44 }
 0xe3b   : > { %v5211_v36 = vrot.slane %v9173_v18, 7 }
 0xe3c   : > { %v5253_v43 = vsel %vm845_vm1, %v5241_v15, %v5242_v27  ;;  %v5221_v15 = vsel %vm812_vm0, %v5209_v47, %v5210_v52 }
 0xe3d   : > { %v5257_v1 = vmul.f32 %v9082_v21, %v5253_v43  ;;  %v5226_v31 = vmul.f32 %v9093_v37, %v5221_v15 }
 0xe3f   : > { %v5234_v28 = vadd.f32 %v5226_v31, %v5149_v0 }
 0xe41   : > { %v5193_v33 = vpop.f32.mrf.mxu2 }
 0xe42   : > { %v9175_v8 = vpop.f32.mrf.mxu0  ;;  %v5243_v35 = vrot.slane %v5193_v33, 1 }
 0xe43   : > { %v5212_v18 = vrot.slane %v9175_v8, 7 }
 0xe49   : > { %v5196_v57 = vpop.f32.mrf.mxu2 }
 0xe4a   : > { %v9177_v12 = vpop.f32.mrf.mxu0  ;;  %v5244_v43 = vrot.slane %v5196_v57, 1 }
 0xe4b   : > { %v5213_v8 = vrot.slane %v9177_v12, 7 }
 0xe51   : > { %v5199_v47 = vpop.f32.mrf.mxu2 }
 0xe52   : > { %v9179_v17 = vpop.f32.mrf.mxu0  ;;  %v5245_v57 = vrot.slane %v5199_v47, 1 }
 0xe53   : > { %v5214_v12 = vrot.slane %v9179_v17, 7 }
 0xe5a   : > { %v9182_v3 = vpop.f32.mrf.mxu0 }
 0xe5b   : > { %v5215_v4 = vrot.slane %v9182_v3, 7 }
 0xe5d   : > { %v5223_v6 = vsel %vm812_vm0, %v5215_v4, %v5208_v48 }
 0xe5e   : > { %v5224_v55 = vmul.f32 %v9070_v22, %v5223_v6  ;;  %v5265_v6 = vadd.f32 %v5257_v1, %v5233_v46  ;;  %v5251_v1 = vsel %vm845_vm1, %v5243_v35, %v5244_v43 }
 0xe5f   : > { %v5259_v46 = vmul.f32 %v9110_v51, %v5251_v1 }
 0xe60   : > { %v5232_v10 = vadd.f32 %v5224_v55, %v5143_v63  ;;  %v5252_v63 = vsel %vm845_vm1, %v5242_v27, %v5243_v35  ;;  %v5278_v44 = vadd.f32 %v9204_v30, %v5265_v6  ;;  %v5152_v55 = vpop.f32.mrf.mxu1 }
 0xe61   : > { %v5258_v33 = vmul.f32 %v9097_v60, %v5252_v63  ;;  %v5250_v63 = vsel %vm845_vm1, %v5244_v43, %v5245_v57 }
 0xe62   : > { %v5264_v45 = vadd.f32 %v5256_v56, %v5232_v10  ;;  %v5220_v56 = vsel %vm812_vm0, %v5210_v52, %v5211_v36  ;;  %v5286_v10 = vmax.f32 %v5278_v44, 0.0  ;;  %v5219_v52 = vsel %vm812_vm0, %v5211_v36, %v5212_v18 }
 0xe63   : > { %v5266_v27 = vadd.f32 %v5258_v33, %v5234_v28  ;;  %v5228_v31 = vmul.f32 %v9119_v25, %v5219_v52  ;;  %v5260_v33 = vmul.f32 %v9123_v42, %v5250_v63  ;;  %v5218_v36 = vsel %vm812_vm0, %v5212_v18, %v5213_v8 }
 0xe64   : > { %v5277_v48 = vadd.f32 %v9204_v30, %v5264_v45  ;;  %v5227_v45 = vmul.f32 %v9106_v19, %v5220_v56 }
 0xe65   : > { %v5279_v0 = vadd.f32 %v9204_v30, %v5266_v27  ;;  %v5229_v27 = vmul.f32 %v9132_v13, %v5218_v36  ;;  %v9258_v36 = vld [vmem:[#allocation2 + $0x38] sm:$0xff] }
 0xe66   : > { %v5285_v38 = vmax.f32 %v5277_v48, 0.0  ;;  %v5235_v48 = vadd.f32 %v5227_v45, %v5152_v55 }
 0xe67   : > { %v5287_v6 = vmax.f32 %v5279_v0, 0.0 }
 0xe68   : > { %5358 = vmatmul.f32.vlgmr.msra.gmra.mxu3 %v5285_v38  ;;  %5399 = vmatmul.f32.vlgmr.msra.gmra.mxu0 %v5285_v38  ;;  %v5155_v15 = vpop.f32.mrf.mxu1  ;;  %v5267_v35 = vadd.f32 %v5259_v46, %v5235_v48  ;;  %v5217_v48 = vsel %vm812_vm0, %v5213_v8, %v5214_v12 }
 0xe69   : > { %5440 = vmatmul.f32.vlgmr.msra.gmra.mxu1 %v5285_v38  ;;  %v5202_v38 = vpop.f32.mrf.mxu2  ;;  %v5236_v28 = vadd.f32 %v5228_v31, %v5155_v15 }
 0xe6a   : > { %v5280_v44 = vadd.f32 %v9204_v30, %v5267_v35  ;;  %v5246_v55 = vrot.slane %v5202_v38, 1  ;;  %v9243_v38 = vld [vmem:[#allocation2 + $0x30] sm:$0xff] }
 0xe6b   : > { %v5268_v56 = vadd.f32 %v5260_v33, %v5236_v28  ;;  %v9246_v35 = vld [vmem:[#allocation4 + $0x30] sm:$0xff]  ;;  %v5216_v33 = vsel %vm812_vm0, %v5214_v12, %v5215_v4 }
 0xe6c   : > { %v5288_v47 = vmax.f32 %v5280_v44, 0.0  ;;  %v5249_v43 = vsel %vm845_vm1, %v5245_v57, %v5246_v55 }
 0xe6d   : > { %v5261_v45 = vmul.f32 %v9136_v20, %v5249_v43  ;;  %v5281_v46 = vadd.f32 %v9204_v30, %v5268_v56 }
 0xe6f   : > { %v5289_v15 = vmax.f32 %v5281_v46, 0.0 }
 0xe70   : > { %5361 = vmatmul.f32.gmra.mxu3 %v5286_v10  ;;  %5402 = vmatmul.f32.gmra.mxu0 %v5286_v10 }
 0xe71   : > { %5443 = vmatmul.f32.gmra.mxu1 %v5286_v10  ;;  %v5158_v10 = vpop.f32.mrf.mxu1  ;;  %v5205_v1 = vpop.f32.mrf.mxu2 }
 0xe72   : > { %v5247_v0 = vrot.slane %v5205_v1, 1  ;;  %v5237_v18 = vadd.f32 %v5229_v27, %v5158_v10 }
 0xe74   : > { %v5269_v52 = vadd.f32 %v5261_v45, %v5237_v18  ;;  %v5248_v57 = vsel %vm845_vm1, %v5246_v55, %v5247_v0  ;;  %v5255_v28 = vsel %vm845_vm1, %v5247_v0, %v5240_v7  ;;  %v9264_v7 = vpop.f32.mrf.mxu3 }
 0xe75   : > { %v5262_v63 = vmul.f32 %v9246_v35, %v5248_v57  ;;  %v5263_v56 = vmul.f32 %v9158_v2, %v5255_v28  ;;  %v5557_v57 = vld [vmem:[#allocation10 + $0x3f0] sm:$0xff]  ;;  %v5550_v28 = vld [vmem:[#allocation10 + $0x3b8] sm:$0xff] }
 0xe76   : > { %v5282_v31 = vadd.f32 %v9204_v30, %v5269_v52  ;;  %v5558_v52 = vld [vmem:[#allocation10 + $0x3f8] sm:$0xff] }
 0xe77   : > { %5559 = vmatpush.msrb.mxu2 %v5558_v52  ;;  %v5543_v52 = vld [vmem:[#allocation10 + $0x380] sm:$0xff] }
 0xe78   : > { %5364 = vmatmul.f32.gmra.mxu3 %v5287_v6  ;;  %5405 = vmatmul.f32.gmra.mxu0 %v5287_v6  ;;  %v5290_v44 = vmax.f32 %v5282_v31, 0.0  ;;  %v5554_v31 = vld [vmem:[#allocation10 + $0x3d8] sm:$0xff] }
 0xe79   : > { %5446 = vmatmul.f32.gmra.mxu1 %v5287_v6  ;;  %v5230_v6 = vmul.f32 %v9243_v38, %v5217_v48  ;;  %v5161_v17 = vpop.f32.mrf.mxu1  ;;  %5560 = vmatpush.msrb.mxu2 %v5557_v57 }
 0xe7b   : > { %v5238_v8 = vadd.f32 %v5230_v6, %v5161_v17  ;;  %v5556_v17 = vld [vmem:[#allocation10 + $0x3e8] sm:$0xff] }
 0xe7c   : > { %v9266_v12 = vpop.f32.mrf.mxu3  ;;  %5561 = vmatpush.msrb.mxu2 %v5556_v17 }
 0xe7d   : > { %v5270_v55 = vadd.f32 %v5262_v63, %v5238_v8  ;;  %9546 = vst [vmem:[#allocation36_spill] sm:$0xff] %v9266_v12  ;;  %v5555_v63 = vld [vmem:[#allocation10 + $0x3e0] sm:$0xff]  ;;  %v5553_v8 = vld [vmem:[#allocation10 + $0x3d0] sm:$0xff] }
 0xe7e   : > { %5562 = vmatpush.msrb.mxu2 %v5555_v63 }
 0xe7f   : > { %v5283_v3 = vadd.f32 %v9204_v30, %v5270_v55  ;;  %v5551_v55 = vld [vmem:[#allocation10 + $0x3c0] sm:$0xff] }
 0xe80   : > { %5367 = vmatmul.f32.gmra.mxu3 %v5288_v47  ;;  %5408 = vmatmul.f32.gmra.mxu0 %v5288_v47 }
 0xe81   : > { %5449 = vmatmul.f32.gmra.mxu1 %v5288_v47  ;;  %v5231_v47 = vmul.f32 %v9258_v36, %v5216_v33  ;;  %v5164_v10 = vpop.f32.mrf.mxu1  ;;  %v5291_v43 = vmax.f32 %v5283_v3, 0.0  ;;  %5563 = vmatpush.msrb.mxu2 %v5554_v31  ;;  %v5548_v3 = vld [vmem:[#allocation10 + $0x3a8] sm:$0xff] }
 0xe83   : > { %v5239_v4 = vadd.f32 %v5231_v47, %v5164_v10  ;;  %5564 = vmatpush.msrb.mxu2 %v5553_v8  ;;  %v5549_v47 = vld [vmem:[#allocation10 + $0x3b0] sm:$0xff] }
 0xe84   : > { %v9268_v45 = vpop.f32.mrf.mxu3 }
 0xe85   : > { %v5271_v27 = vadd.f32 %v5263_v56, %v5239_v4  ;;  %9547 = vst [vmem:[#allocation37_spill] sm:$0xff] %v9268_v45  ;;  %v5547_v4 = vld [vmem:[#allocation10 + $0x3a0] sm:$0xff] }
 0xe87   : > { %v5284_v16 = vadd.f32 %v9204_v30, %v5271_v27  ;;  %v5545_v27 = vld [vmem:[#allocation10 + $0x390] sm:$0xff] }
 0xe88   : > { %5370 = vmatmul.f32.gmra.mxu3 %v5289_v15  ;;  %5411 = vmatmul.f32.gmra.mxu0 %v5289_v15 }
 0xe89   : > { %5452 = vmatmul.f32.gmra.mxu1 %v5289_v15  ;;  %v5292_v1 = vmax.f32 %v5284_v16, 0.0 }
 0xe8c   : > { %v9270_v46 = vpop.f32.mrf.mxu3 }
 0xe8d   : > { %9548 = vst [vmem:[#allocation38_spill] sm:$0xff] %v9270_v46 }
 0xe90   : > { %5373 = vmatmul.f32.gmra.mxu3 %v5290_v44  ;;  %5414 = vmatmul.f32.gmra.mxu0 %v5290_v44 }
 0xe91   : > { %5455 = vmatmul.f32.gmra.mxu1 %v5290_v44  ;;  %v5552_v44 = vld [vmem:[#allocation10 + $0x3c8] sm:$0xff] }
 0xe92   : > { %5565 = vmatpush.msrb.mxu2 %v5552_v44 }
 0xe94   : > { %v9272_v0 = vpop.f32.mrf.mxu3  ;;  %5566 = vmatpush.msrb.mxu2 %v5551_v55 }
 0xe96   : > { %5567 = vmatpush.msrb.mxu2 %v5550_v28 }
 0xe98   : > { %5376 = vmatmul.f32.gmra.mxu3 %v5291_v43  ;;  %5417 = vmatmul.f32.gmra.mxu0 %v5291_v43 }
 0xe99   : > { %5458 = vmatmul.f32.gmra.mxu1 %v5291_v43  ;;  %5568 = vmatpush.msrb.mxu2 %v5549_v47  ;;  %v5546_v43 = vld [vmem:[#allocation10 + $0x398] sm:$0xff] }
 0xe9b   : > { %5569 = vmatpush.msrb.mxu2 %v5548_v3 }
 0xe9c   : > { %v9274_v18 = vpop.f32.mrf.mxu3 }
 0xe9d   : > { %5570 = vmatpush.msrb.mxu2 %v5547_v4 }
 0xe9f   : > { %5571 = vmatpush.msrb.mxu2 %v5546_v43 }
 0xea0   : > { %5379 = vmatmul.f32.gmra.mxu3 %v5292_v1  ;;  %5420 = vmatmul.f32.gmra.mxu0 %v5292_v1 }
 0xea1   : > { %5461 = vmatmul.f32.gmra.mxu1 %v5292_v1  ;;  %5572 = vmatpush.msrb.mxu2 %v5545_v27  ;;  %v5544_v1 = vld [vmem:[#allocation10 + $0x388] sm:$0xff] }
 0xea3   : > { %5573 = vmatpush.msrb.mxu2 %v5544_v1 }
 0xea4   : > { %v9276_v48 = vpop.f32.mrf.mxu3 }
 0xea5   : > { %5574 = vmatpush.msrb.mxu2 %v5543_v52 }
 0xeac   : > { %v9278_v15 = vpop.f32.mrf.mxu3 }
 0xee5   : > { %v5400_v63 = vpop.f32.mrf.mxu0 }
 0xee6   : > { %v9286_v10 = vpop.f32.mrf.mxu1 }
 0xee7   : > { %v9508_v4 = vrot.slane %v9286_v10, 1 }
 0xeeb   : > { %v5359_v30 = vpop.f32.mrf.mxu3 }
 0xeec   : > { %v5465_v43 = vrot.slane %v5359_v30, 7 }
 0xeed   : > { %v5403_v44 = vpop.f32.mrf.mxu0 }
 0xeee   : > { %v5444_v57 = vpop.f32.mrf.mxu1 }
 0xeef   : > { %v5498_v55 = vrot.slane %v5444_v57, 1 }
 0xef1   : > { %v5511_v1 = vsel %vm845_vm1, %v9508_v4, %v5498_v55 }
 0xef2   : > { %v5513_v30 = vmul.f32 %v9078_v61, %v5511_v1 }
 0xef3   : > { %v9280_v6 = vpop.f32.mrf.mxu3 }
 0xef4   : > { %v5466_v28 = vrot.slane %v9280_v6, 7 }
 0xef5   : > { %v5406_v62 = vpop.f32.mrf.mxu0 }
 0xef6   : > { %v5447_v31 = vpop.f32.mrf.mxu1  ;;  %v5479_v52 = vsel %vm812_vm0, %v5465_v43, %v5466_v28 }
 0xef7   : > { %v5499_v12 = vrot.slane %v5447_v31, 1  ;;  %v5482_v45 = vmul.f32 %v9075_v14, %v5479_v52  ;;  %v9315_v31 = vld [vmem:[#allocation9 + $0xf] ss:$0 sm:$0xff] }
 0xef9   : > { %v5510_v4 = vsel %vm845_vm1, %v5498_v55, %v5499_v12 }
 0xefa   : > { %v5514_v46 = vmul.f32 %v9082_v21, %v5510_v4 }
 0xefb   : > { %v9282_v33 = vpop.f32.mrf.mxu3 }
 0xefc   : > { %v5467_v49 = vrot.slane %v9282_v33, 7 }
 0xefd   : > { %v5409_v55 = vpop.f32.mrf.mxu0 }
 0xefe   : > { %v5450_v47 = vpop.f32.mrf.mxu1  ;;  %v5478_v61 = vsel %vm812_vm0, %v5466_v28, %v5467_v49 }
 0xeff   : > { %v5500_v14 = vrot.slane %v5450_v47, 1 }
 0xf01   : > { %v5509_v33 = vsel %vm845_vm1, %v5499_v12, %v5500_v14 }
 0xf02   : > { %v5515_v21 = vmul.f32 %v9097_v60, %v5509_v33 }
 0xf03   : > { %v9284_v56 = vpop.f32.mrf.mxu3 }
 0xf06   : > { %v5453_v11 = vpop.f32.mrf.mxu1 }
 0xf0b   : > { %v9288_v16 = vpop.f32.mrf.mxu3 }
 0xf0e   : > { %v5456_v28 = vpop.f32.mrf.mxu1 }
 0xf13   : > { %v9290_v17 = vpop.f32.mrf.mxu3 }
 0xf1b   : > { %v9292_v8 = vpop.f32.mrf.mxu3 }
 0xf23   : > { %v9295_v3 = vpop.f32.mrf.mxu3 }
 0xf24   : > { %v5472_v27 = vrot.slane %v9295_v3, 7 }
 0xf26   : > { %v5480_v6 = vsel %vm812_vm0, %v5472_v27, %v5465_v43 }
 0xf27   : > { %v5481_v57 = vmul.f32 %v9070_v22, %v5480_v6  ;;  %v5490_v22 = vadd.f32 %v5482_v45, %v5403_v44  ;;  %v5501_v44 = vrot.slane %v5453_v11, 1  ;;  %v5502_v11 = vrot.slane %v5456_v28, 1 }
 0xf29   : > { %v5489_v34 = vadd.f32 %v5481_v57, %v5400_v63  ;;  %v5483_v63 = vmul.f32 %v9093_v37, %v5478_v61  ;;  %v5522_v1 = vadd.f32 %v5514_v46, %v5490_v22  ;;  %v5508_v12 = vsel %vm845_vm1, %v5500_v14, %v5501_v44 }
 0xf2a   : > { %v5516_v47 = vmul.f32 %v9110_v51, %v5508_v12 }
 0xf2b   : > { %v5521_v39 = vadd.f32 %v5513_v30, %v5489_v34  ;;  %v5468_v34 = vrot.slane %v9284_v56, 7  ;;  %v5535_v4 = vadd.f32 %v9315_v31, %v5522_v1  ;;  %v5469_v56 = vrot.slane %v9288_v16, 7 }
 0xf2c   : > { %v5507_v30 = vsel %vm845_vm1, %v5501_v44, %v5502_v11  ;;  %v5470_v16 = vrot.slane %v9290_v17, 7 }
 0xf2d   : > { %v5534_v43 = vadd.f32 %v9315_v31, %v5521_v39  ;;  %v5491_v39 = vadd.f32 %v5483_v63, %v5406_v62  ;;  %v5477_v45 = vsel %vm812_vm0, %v5467_v49, %v5468_v34  ;;  %v5412_v62 = vpop.f32.mrf.mxu0  ;;  %v5476_v49 = vsel %vm812_vm0, %v5468_v34, %v5469_v56 }
 0xf2e   : > { %v5484_v37 = vmul.f32 %v9106_v19, %v5477_v45  ;;  %v5485_v6 = vmul.f32 %v9119_v25, %v5476_v49  ;;  %v5459_v19 = vpop.f32.mrf.mxu1  ;;  %v5517_v51 = vmul.f32 %v9123_v42, %v5507_v30  ;;  %v5475_v61 = vsel %vm812_vm0, %v5469_v56, %v5470_v16 }
 0xf2f   : > { %5575 = vmatmul.f32.vlgmr.msrb.gmra.mxu2 %v5534_v43  ;;  %v5523_v46 = vadd.f32 %v5515_v21, %v5491_v39  ;;  %v5503_v14 = vrot.slane %v5459_v19, 1  ;;  %v5486_v25 = vmul.f32 %v9132_v13, %v5475_v61  ;;  %v5471_v34 = vrot.slane %v9292_v8, 7 }
 0xf30   : > { %v5492_v52 = vadd.f32 %v5484_v37, %v5409_v55  ;;  %v5493_v22 = vadd.f32 %v5485_v6, %v5412_v62 }
 0xf31   : > { %v5536_v60 = vadd.f32 %v9315_v31, %v5523_v46  ;;  %v5506_v33 = vsel %vm845_vm1, %v5502_v11, %v5503_v14  ;;  %v5473_v46 = vsel %vm812_vm0, %v5471_v34, %v5472_v27 }
 0xf32   : > { %v5524_v57 = vadd.f32 %v5516_v47, %v5492_v52  ;;  %v5525_v1 = vadd.f32 %v5517_v51, %v5493_v22  ;;  %v5518_v42 = vmul.f32 %v9136_v20, %v5506_v33  ;;  %v5488_v12 = vmul.f32 %v9258_v36, %v5473_v46  ;;  %v9555_v33 = vld [vmem:[#allocation34_spill] sm:$0xff] }
 0xf33   : > { %v9549_v47 = vrot.slane %v9286_v10, 1  ;;  %v4425_v36 = vadd.f32 %v9021_v26, %v8915_v9  ;;  %v4446_v51 = vadd.f32 %v9036_v23, %v8941_v24  ;;  %v4437_v26 = vadd.f32 %v9030_v50, %v8931_v41  ;;  %v9550_v24 = vld [vmem:[#allocation35_spill] sm:$0xff] }
 0xf34   : > { %v5537_v43 = vadd.f32 %v9315_v31, %v5524_v57  ;;  %v5538_v55 = vadd.f32 %v9315_v31, %v5525_v1  ;;  %v4431_v23 = vadd.f32 %v9550_v24, %v8923_v5  ;;  %v9552_v41 = vld [vmem:[#allocation31_spill] sm:$0xff]  ;;  %v9554_v1 = vld [vmem:[#allocation33_spill] sm:$0xff] }
 0xf35   : > { %v5415_v63 = vpop.f32.mrf.mxu0  ;;  %v5020_v27 = vadd.f32 %v9264_v7, %v4425_v36  ;;  %v6540_v36 = vld [vmem:[#allocation6 + $0x8] sm:$0xff] }
 0xf36   : > { %v5462_v17 = vpop.f32.mrf.mxu1  ;;  %v5494_v21 = vadd.f32 %v5486_v25, %v5415_v63 }
 0xf37   : > { %5578 = vmatmul.f32.gmra.mxu2 %v5535_v4  ;;  %v5474_v4 = vsel %vm812_vm0, %v5470_v16, %v5471_v34  ;;  %v5504_v39 = vrot.slane %v5462_v17, 1  ;;  %v4428_v34 = vadd.f32 %v9555_v33, %v9554_v1  ;;  %v9556_v17 = vld [vmem:[#allocation37_spill] sm:$0xff]  ;;  %v5753_v1 = vld [vmem:[#allocation16 + $0xd8] sm:$0xff] }
 0xf38   : > { %v5487_v45 = vmul.f32 %v9243_v38, %v5474_v4  ;;  %v5526_v13 = vadd.f32 %v5518_v42, %v5494_v21  ;;  %v9558_v21 = vld [vmem:[#allocation36_spill] sm:$0xff] }
 0xf39   : > { %v5505_v28 = vsel %vm845_vm1, %v5503_v14, %v5504_v39  ;;  %v5021_v5 = vadd.f32 %v9558_v21, %v4428_v34  ;;  %v5752_v34 = vld [vmem:[#allocation16 + $0xd0] sm:$0xff] }
 0xf3a   : > { %v5519_v8 = vmul.f32 %v9246_v35, %v5505_v28  ;;  %v5539_v37 = vadd.f32 %v9315_v31, %v5526_v13  ;;  %v9560_v28 = vld [vmem:[#allocation28_spill] sm:$0xff]  ;;  %v5748_v21 = vld [vmem:[#allocation16 + $0xb0] sm:$0xff] }
 0xf3d   : > { %v5418_v44 = vpop.f32.mrf.mxu0 }
 0xf3e   : > { %v5495_v20 = vadd.f32 %v5487_v45, %v5418_v44 }
 0xf3f   : > { %5581 = vmatmul.f32.gmra.mxu2 %v5536_v60  ;;  %v5512_v60 = vsel %vm845_vm1, %v5504_v39, %v9549_v47  ;;  %v9559_v39 = vld [vmem:[#allocation27_spill] sm:$0xff] }
 0xf40   : > { %v5527_v56 = vadd.f32 %v5519_v8, %v5495_v20  ;;  %v5520_v62 = vmul.f32 %v9158_v2, %v5512_v60  ;;  %v4443_v2 = vadd.f32 %v9034_v58, %v8937_v53  ;;  %v4434_v53 = vadd.f32 %v9028_v32, %v8927_v59  ;;  %v9561_v20 = vld [vmem:[#allocation26_spill] sm:$0xff]  ;;  %v9563_v60 = vld [vmem:[#allocation29_spill] sm:$0xff] }
 0xf41   : > { %v5024_v58 = vadd.f32 %v9272_v0, %v4437_v26  ;;  %v5022_v59 = vadd.f32 %v9556_v17, %v4431_v23  ;;  %v9557_v0 = vld [vmem:[#allocation30_spill] sm:$0xff] }
 0xf42   : > { %v5540_v35 = vadd.f32 %v9315_v31, %v5527_v56  ;;  %v5026_v9 = vadd.f32 %v9276_v48, %v4443_v2  ;;  %v9551_v48 = vld [vmem:[#allocation38_spill] sm:$0xff]  ;;  %v9562_v56 = vld [vmem:[#allocation25_spill] sm:$0xff] }
 0xf43   : > { %v5023_v14 = vadd.f32 %v9551_v48, %v4434_v53  ;;  %v5680_v2 = vld [vmem:[#allocation13 + $0xc8] sm:$0xff]  ;;  %v5677_v26 = vld [vmem:[#allocation13 + $0xb0] sm:$0xff] }
 0xf44   : > { %v5673_v53 = vld [vmem:[#allocation13 + $0x90] sm:$0xff] }
 0xf45   : > { %v5421_v38 = vpop.f32.mrf.mxu0  ;;  %v5751_v17 = vld [vmem:[#allocation16 + $0xc8] sm:$0xff] }
 0xf46   : > { %v5496_v52 = vadd.f32 %v5488_v12, %v5421_v38 }
 0xf47   : > { %5584 = vmatmul.f32.gmra.mxu2 %v5537_v43  ;;  %v5027_v43 = vadd.f32 %v9278_v15, %v4446_v51  ;;  %v6384_v15 = vld [vmem:[#allocation12 + $0x1] ss:$0 sm:$0xff] }
 0xf48   : > { %v5528_v3 = vadd.f32 %v5520_v62, %v5496_v52  ;;  %v5678_v51 = vld [vmem:[#allocation13 + $0xb8] sm:$0xff] }
 0xf4a   : > { %v5541_v49 = vadd.f32 %v9315_v31, %v5528_v3  ;;  %v4440_v31 = vadd.f32 %v9032_v40, %v8933_v29 }
 0xf4c   : > { %v5025_v7 = vadd.f32 %v9274_v18, %v4440_v31  ;;  %v9553_v18 = vld [vmem:[#allocation32_spill] sm:$0xff] }
 0xf4d   : > { %v5679_v31 = vld [vmem:[#allocation13 + $0xc0] sm:$0xff] }
 0xf4f   : > { %5587 = vmatmul.f32.gmra.mxu2 %v5538_v55 }
 0xf57   : > { %5590 = vmatmul.f32.gmra.mxu2 %v5539_v37 }
 0xf5f   : > { %5593 = vmatmul.f32.gmra.mxu2 %v5540_v35 }
 0xf67   : > { %5596 = vmatmul.f32.gmra.mxu2 %v5541_v49  ;;  %v6539_v49 = vld [vmem:[#allocation6] sm:$0xff] }
 0xfb2   : > { %v5576_v11 = vpop.f32.mrf.mxu2 }
 0xfb3   : > { %v5600_v10 = vadd.f32 %v5576_v11, %v5020_v27  ;;  %v6541_v27 = vld [vmem:[#allocation6 + $0x10] sm:$0xff]  ;;  %v6542_v11 = vld [vmem:[#allocation6 + $0x18] sm:$0xff] }
 0xfb5   : > { %v5608_v35 = vadd.f32 %v5600_v10, %v9563_v60  ;;  %v5686_v10 = vld [vmem:[#allocation13 + $0xf8] sm:$0xff] }
 0xfb6   : > { %5692 = vmatpush.msrb.mxu0 %v5686_v10 }
 0xfb7   : > { %v9423_v3 = vadd.f32 %v6384_v15, %v5608_v35  ;;  %v5742_v35 = vld [vmem:[#allocation16 + $0x80] sm:$0xff] }
 0xfba   : > { %v5579_v6 = vpop.f32.mrf.mxu2 }
 0xfbb   : > { %v5601_v44 = vadd.f32 %v5579_v6, %v5021_v5  ;;  %v5685_v6 = vld [vmem:[#allocation13 + $0xf0] sm:$0xff] }
 0xfbc   : > { %5693 = vmatpush.msrb.mxu0 %v5685_v6  ;;  %v5747_v5 = vld [vmem:[#allocation16 + $0xa8] sm:$0xff] }
 0xfbd   : > { %v5609_v38 = vadd.f32 %v5601_v44, %v9562_v56 }
 0xfbf   : > { %v9420_v62 = vadd.f32 %v6384_v15, %v5609_v38  ;;  %v5743_v38 = vld [vmem:[#allocation16 + $0x88] sm:$0xff] }
 0xfc2   : > { %v5582_v54 = vpop.f32.mrf.mxu2 }
 0xfc3   : > { %v5602_v4 = vadd.f32 %v5582_v54, %v5022_v59  ;;  %v5684_v54 = vld [vmem:[#allocation13 + $0xe8] sm:$0xff] }
 0xfc4   : > { %5694 = vmatpush.msrb.mxu0 %v5684_v54  ;;  %v5750_v59 = vld [vmem:[#allocation16 + $0xc0] sm:$0xff] }
 0xfc5   : > { %v5610_v46 = vadd.f32 %v5602_v4, %v9561_v20  ;;  %v5746_v4 = vld [vmem:[#allocation16 + $0xa0] sm:$0xff] }
 0xfc7   : > { %v9417_v52 = vadd.f32 %v6384_v15, %v5610_v46  ;;  %v5744_v46 = vld [vmem:[#allocation16 + $0x90] sm:$0xff] }
 0xfca   : > { %v5585_v19 = vpop.f32.mrf.mxu2 }
 0xfcb   : > { %v5603_v32 = vadd.f32 %v5585_v19, %v5023_v14  ;;  %v5683_v19 = vld [vmem:[#allocation13 + $0xe0] sm:$0xff] }
 0xfcc   : > { %5695 = vmatpush.msrb.mxu0 %v5683_v19 }
 0xfcd   : > { %v5611_v8 = vadd.f32 %v5603_v32, %v9560_v28  ;;  %v5749_v32 = vld [vmem:[#allocation16 + $0xb8] sm:$0xff] }
 0xfcf   : > { %v9413_v47 = vadd.f32 %v6384_v15, %v5611_v8 }
 0xfd2   : > { %v5588_v57 = vpop.f32.mrf.mxu2 }
 0xfd3   : > { %v5604_v63 = vadd.f32 %v5588_v57, %v5024_v58  ;;  %v5682_v57 = vld [vmem:[#allocation13 + $0xd8] sm:$0xff]  ;;  %v5672_v58 = vld [vmem:[#allocation13 + $0x88] sm:$0xff] }
 0xfd4   : > { %5696 = vmatpush.msrb.mxu0 %v5682_v57 }
 0xfd5   : > { %v5612_v45 = vadd.f32 %v5604_v63, %v9559_v39  ;;  %v5757_v63 = vld [vmem:[#allocation16 + $0xf8] sm:$0xff] }
 0xfd6   : > { %5763 = vmatpush.msrb.mxu1 %v5757_v63 }
 0xfd7   : > { %v9409_v12 = vadd.f32 %v6384_v15, %v5612_v45  ;;  %v5745_v45 = vld [vmem:[#allocation16 + $0x98] sm:$0xff] }
 0xfda   : > { %v5591_v30 = vpop.f32.mrf.mxu2 }
 0xfdb   : > { %v5605_v29 = vadd.f32 %v5591_v30, %v5025_v7  ;;  %v6543_v30 = vld [vmem:[#allocation6 + $0x20] sm:$0xff] }
 0xfdc   : > { %v5676_v7 = vld [vmem:[#allocation13 + $0xa8] sm:$0xff] }
 0xfdd   : > { %v5613_v42 = vadd.f32 %v5605_v29, %v9557_v0  ;;  %v6546_v29 = vld [vmem:[#allocation6 + $0x38] sm:$0xff] }
 0xfdf   : > { %v9405_v37 = vadd.f32 %v6384_v15, %v5613_v42 }
 0xfe2   : > { %v5594_v16 = vpop.f32.mrf.mxu2 }
 0xfe3   : > { %v5606_v22 = vadd.f32 %v5594_v16, %v5026_v9  ;;  %v5681_v16 = vld [vmem:[#allocation13 + $0xd0] sm:$0xff] }
 0xfe4   : > { %5697 = vmatpush.msrb.mxu0 %v5681_v16  ;;  %v6544_v9 = vld [vmem:[#allocation6 + $0x28] sm:$0xff] }
 0xfe5   : > { %v5614_v50 = vadd.f32 %v5606_v22, %v9552_v41  ;;  %v5674_v22 = vld [vmem:[#allocation13 + $0x98] sm:$0xff] }
 0xfe6   : > { %5698 = vmatpush.msrb.mxu0 %v5680_v2 }
 0xfe7   : > { %v9401_v13 = vadd.f32 %v6384_v15, %v5614_v50  ;;  %v5756_v50 = vld [vmem:[#allocation16 + $0xf0] sm:$0xff] }
 0xfe8   : > { %5699 = vmatpush.msrb.mxu0 %v5679_v31  ;;  %5764 = vmatpush.msrb.mxu1 %v5756_v50 }
 0xfea   : > { %v5597_v61 = vpop.f32.mrf.mxu2  ;;  %5700 = vmatpush.msrb.mxu0 %v5678_v51 }
 0xfeb   : > { %v5607_v40 = vadd.f32 %v5597_v61, %v5027_v43  ;;  %v5675_v43 = vld [vmem:[#allocation13 + $0xa0] sm:$0xff] }
 0xfec   : > { %5701 = vmatpush.msrb.mxu0 %v5677_v26  ;;  %v6545_v61 = vld [vmem:[#allocation6 + $0x30] sm:$0xff] }
 0xfed   : > { %v5615_v25 = vadd.f32 %v5607_v40, %v9553_v18  ;;  %v5671_v40 = vld [vmem:[#allocation13 + $0x80] sm:$0xff] }
 0xfee   : > { %5702 = vmatpush.msrb.mxu0 %v5676_v7 }
 0xfef   : > { %v9396_v55 = vadd.f32 %v6384_v15, %v5615_v25  ;;  %v5755_v25 = vld [vmem:[#allocation16 + $0xe8] sm:$0xff]  ;;  %v5754_v15 = vld [vmem:[#allocation16 + $0xe0] sm:$0xff] }
 0xff0   : > { %5703 = vmatpush.msrb.mxu0 %v5675_v43  ;;  %5765 = vmatpush.msrb.mxu1 %v5755_v25 }
 0xff1   : > { %5637 = vmatpush.msrb.mxu3 %v9396_v55 }
 0xff2   : > { %5704 = vmatpush.msrb.mxu0 %v5674_v22  ;;  %5766 = vmatpush.msrb.mxu1 %v5754_v15 }
 0xff3   : > { %5638 = vmatpush.msrb.mxu3 %v9401_v13 }
 0xff4   : > { %5705 = vmatpush.msrb.mxu0 %v5673_v53  ;;  %5767 = vmatpush.msrb.mxu1 %v5753_v1 }
 0xff5   : > { %5639 = vmatpush.msrb.mxu3 %v9405_v37 }
 0xff6   : > { %5706 = vmatpush.msrb.mxu0 %v5672_v58  ;;  %5768 = vmatpush.msrb.mxu1 %v5752_v34 }
 0xff7   : > { %5640 = vmatpush.msrb.mxu3 %v9409_v12 }
 0xff8   : > { %5707 = vmatpush.msrb.mxu0 %v5671_v40  ;;  %5769 = vmatpush.msrb.mxu1 %v5751_v17 }
 0xff9   : > { %5641 = vmatpush.msrb.mxu3 %v9413_v47 }
 0xffa   : > { %5770 = vmatpush.msrb.mxu1 %v5750_v59 }
 0xffb   : > { %5642 = vmatpush.msrb.mxu3 %v9417_v52 }
 0xffc   : > { %5771 = vmatpush.msrb.mxu1 %v5749_v32 }
 0xffd   : > { %5643 = vmatpush.msrb.mxu3 %v9420_v62 }
 0xffe   : > { %5772 = vmatpush.msrb.mxu1 %v5748_v21 }
 0xfff   : > { %5644 = vmatpush.msrb.mxu3 %v9423_v3 }
0x1000   : > { %6190 = vmatmul.msk.f32.vlgmr.msrb.gmra.mxu3 %vm2948_vm2, %v6539_v49  ;;  %5773 = vmatpush.msrb.mxu1 %v5747_v5  ;;  %v6385_v49 = vld [vmem:[#allocation15 + $0x1] ss:$0 sm:$0xff] }
0x1002   : > { %5774 = vmatpush.msrb.mxu1 %v5746_v4 }
0x1004   : > { %5775 = vmatpush.msrb.mxu1 %v5745_v45 }
0x1006   : > { %5776 = vmatpush.msrb.mxu1 %v5744_v46 }
0x1008   : > { %6191 = vmatmul.msk.f32.gmra.mxu3 %vm2948_vm2, %v6540_v36  ;;  %5777 = vmatpush.msrb.mxu1 %v5743_v38 }
0x100a   : > { %5778 = vmatpush.msrb.mxu1 %v5742_v35 }
0x1010   : > { %6192 = vmatmul.msk.f32.gmra.mxu3 %vm2948_vm2, %v6541_v27 }
0x1018   : > { %6193 = vmatmul.msk.f32.gmra.mxu3 %vm2948_vm2, %v6542_v11 }
0x1020   : > { %6194 = vmatmul.msk.f32.gmra.mxu3 %vm2948_vm2, %v6543_v30 }
0x1028   : > { %6195 = vmatmul.msk.f32.gmra.mxu3 %vm2948_vm2, %v6544_v9 }
0x1030   : > { %6196 = vmatmul.msk.f32.gmra.mxu3 %vm2948_vm2, %v6545_v61 }
0x1038   : > { %6197 = vmatmul.msk.f32.gmra.mxu3 %vm2948_vm2, %v6546_v29 }
0x1083   : > { %v5646_v24 = vpop.f32.mrf.mxu3 }
0x1084   : > { %5708 = vmatmul.f32.vlgmr.msrb.gmra.mxu0 %v5646_v24 }
0x108b   : > { %v5649_v23 = vpop.f32.mrf.mxu3 }
0x108c   : > { %5711 = vmatmul.f32.gmra.mxu0 %v5649_v23  ;;  %v9434_v23 = vld [vmem:[#allocation18 + $0x1] ss:$0 sm:$0xff] }
0x1093   : > { %v5652_v48 = vpop.f32.mrf.mxu3 }
0x1094   : > { %5714 = vmatmul.f32.gmra.mxu0 %v5652_v48 }
0x109b   : > { %v5655_v14 = vpop.f32.mrf.mxu3 }
0x109c   : > { %5717 = vmatmul.f32.gmra.mxu0 %v5655_v14 }
0x10a3   : > { %v5658_v33 = vpop.f32.mrf.mxu3 }
0x10a4   : > { %5720 = vmatmul.f32.gmra.mxu0 %v5658_v33 }
0x10ab   : > { %v5661_v42 = vpop.f32.mrf.mxu3 }
0x10ac   : > { %5723 = vmatmul.f32.gmra.mxu0 %v5661_v42 }
0x10b3   : > { %v5664_v44 = vpop.f32.mrf.mxu3 }
0x10b4   : > { %5726 = vmatmul.f32.gmra.mxu0 %v5664_v44 }
0x10bb   : > { %v5667_v8 = vpop.f32.mrf.mxu3 }
0x10bc   : > { %5729 = vmatmul.f32.gmra.mxu0 %v5667_v8 }
0x1101   : > { %v5709_v36 = vpop.f32.mrf.mxu0 }
0x1102   : > { %v5710_v27 = vadd.f32 %v6385_v49, %v5709_v36 }
0x1104   : > { %v5733_v11 = vmax.f32 %v5710_v27, 0.0 }
0x1106   : > { %5779 = vmatmul.f32.vlgmr.msrb.gmra.mxu1 %v5733_v11 }
0x1109   : > { %v5712_v10 = vpop.f32.mrf.mxu0 }
0x110a   : > { %v5713_v6 = vadd.f32 %v6385_v49, %v5712_v10 }
0x110c   : > { %v5734_v54 = vmax.f32 %v5713_v6, 0.0 }
0x110e   : > { %5782 = vmatmul.f32.gmra.mxu1 %v5734_v54 }
0x1111   : > { %v5715_v19 = vpop.f32.mrf.mxu0 }
0x1112   : > { %v5716_v57 = vadd.f32 %v6385_v49, %v5715_v19 }
0x1114   : > { %v5735_v30 = vmax.f32 %v5716_v57, 0.0 }
0x1116   : > { %5785 = vmatmul.f32.gmra.mxu1 %v5735_v30 }
0x1119   : > { %v5718_v16 = vpop.f32.mrf.mxu0 }
0x111a   : > { %v5719_v2 = vadd.f32 %v6385_v49, %v5718_v16 }
0x111c   : > { %v5736_v31 = vmax.f32 %v5719_v2, 0.0 }
0x111e   : > { %5788 = vmatmul.f32.gmra.mxu1 %v5736_v31 }
0x1121   : > { %v5721_v51 = vpop.f32.mrf.mxu0 }
0x1122   : > { %v5722_v9 = vadd.f32 %v6385_v49, %v5721_v51 }
0x1124   : > { %v5737_v26 = vmax.f32 %v5722_v9, 0.0 }
0x1126   : > { %5791 = vmatmul.f32.gmra.mxu1 %v5737_v26 }
0x1129   : > { %v5724_v7 = vpop.f32.mrf.mxu0 }
0x112a   : > { %v5725_v43 = vadd.f32 %v6385_v49, %v5724_v7 }
0x112c   : > { %v5738_v22 = vmax.f32 %v5725_v43, 0.0 }
0x112e   : > { %5794 = vmatmul.f32.gmra.mxu1 %v5738_v22 }
0x1131   : > { %v5727_v61 = vpop.f32.mrf.mxu0 }
0x1132   : > { %v5728_v53 = vadd.f32 %v6385_v49, %v5727_v61 }
0x1134   : > { %v5739_v58 = vmax.f32 %v5728_v53, 0.0 }
0x1136   : > { %5797 = vmatmul.f32.gmra.mxu1 %v5739_v58 }
0x1139   : > { %v5730_v29 = vpop.f32.mrf.mxu0 }
0x113a   : > { %v5731_v40 = vadd.f32 %v6385_v49, %v5730_v29 }
0x113c   : > { %v5740_v24 = vmax.f32 %v5731_v40, 0.0 }
0x113e   : > { %5800 = vmatmul.f32.gmra.mxu1 %v5740_v24 }
0x1183   : > { %v5780_v48 = vpop.f32.mrf.mxu1 }
0x1184   : > { %v5781_v14 = vadd.f32 %v9434_v23, %v5780_v48 }
0x1186   : > { %v6198_v63 = vmul.f32 -1.442695, %v5781_v14 }
0x1188   : > { %6419 = vpow2.f32 %v6198_v63 }
0x118b   : > { %v5783_v50 = vpop.f32.mrf.mxu1 }
0x118c   : > { %v5784_v25 = vadd.f32 %v9434_v23, %v5783_v50 }
0x118e   : > { %v6420_v15 = vpop.eup %6419  ;;  %v6199_v1 = vmul.f32 -1.442695, %v5784_v25 }
0x118f   : > { %v5828_v33 = vadd.f32 1.0, %v6420_v15 }
0x1190   : > { %6421 = vpow2.f32 %v6199_v1 }
0x1191   : > { %6423 = vrcp.f32 %v5828_v33  ;;  %v5847_v45 = vand.u32 2147483648, %v5828_v33  ;;  %v5845_v46 = vand.u32 2147483647, %v5828_v33  ;;  %vm5841_vm1 = vweird.f32 %v5828_v33 }
0x1193   : > { %v5786_v34 = vpop.f32.mrf.mxu1  ;;  %v5848_v11 = vor.u32 1.1754944e-38, %v5847_v45  ;;  %vm5846_vm9 = vcmp.eq.f32.partialorder %v5845_v46, 8.507059e+37 }
0x1194   : > { %v5787_v17 = vadd.f32 %v9434_v23, %v5786_v34 }
0x1196   : > { %v6422_v59 = vpop.eup %6421  ;;  %v6200_v32 = vmul.f32 -1.442695, %v5787_v17 }
0x1197   : > { %v6424_v42 = vpop.eup %6423  ;;  %v5829_v21 = vadd.f32 1.0, %v6422_v59 }
0x1198   : > { %v5837_v5 = vmul.f32 %v6424_v42, %v5828_v33  ;;  %6425 = vpow2.f32 %v6200_v32  ;;  %vm5842_vm0 = vweird.f32 %v6424_v42 }
0x1199   : > { %6427 = vrcp.f32 %v5829_v21  ;;  %vm5843_vm2 = vmor %vm5841_vm1, %vm5842_vm0  ;;  %v5860_v16 = vand.u32 2147483647, %v5829_v21  ;;  %v5862_v2 = vand.u32 2147483648, %v5829_v21  ;;  %vm5856_vm11 = vweird.f32 %v5829_v21 }
0x119a   : > { %v5838_v4 = vsub.f32 1.0, %v5837_v5 }
0x119b   : > { %v5789_v44 = vpop.f32.mrf.mxu1  ;;  %v5863_v61 = vor.u32 1.1754944e-38, %v5862_v2  ;;  %vm5861_vm13 = vcmp.eq.f32.partialorder %v5860_v16, 8.507059e+37 }
0x119c   : > { %v5839_v8 = vmul.f32 %v6424_v42, %v5838_v4  ;;  %v5790_v38 = vadd.f32 %v9434_v23, %v5789_v44 }
0x119e   : > { %v6426_v35 = vpop.eup %6425  ;;  %v5840_v49 = vadd.f32 %v6424_v42, %v5839_v8  ;;  %v6201_v36 = vmul.f32 -1.442695, %v5790_v38 }
0x119f   : > { %v6428_v27 = vpop.eup %6427  ;;  %v5830_v10 = vadd.f32 1.0, %v6426_v35 }
0x11a0   : > { %v5844_v6 = vsel %vm5843_vm2, %v6424_v42, %v5840_v49  ;;  %v5852_v54 = vmul.f32 %v6428_v27, %v5829_v21  ;;  %6429 = vpow2.f32 %v6201_v36  ;;  %vm5857_vm10 = vweird.f32 %v6428_v27 }
0x11a1   : > { %v5849_v19 = vsel %vm5846_vm9, %v5848_v11, %v5844_v6  ;;  %6431 = vrcp.f32 %v5830_v10  ;;  %vm5858_vm12 = vmor %vm5856_vm11, %vm5857_vm10  ;;  %v5875_v48 = vand.u32 2147483647, %v5830_v10  ;;  %v5877_v14 = vand.u32 2147483648, %v5830_v10 }
0x11a2   : > { %v5956_v57 = vmul.f32 %v5849_v19, %v9423_v3  ;;  %v5853_v30 = vsub.f32 1.0, %v5852_v54  ;;  %vm5871_vm15 = vweird.f32 %v5830_v10 }
0x11a3   : > { %v5792_v31 = vpop.f32.mrf.mxu1  ;;  %v5878_v59 = vor.u32 1.1754944e-38, %v5877_v14  ;;  %vm5876_vm4 = vcmp.eq.f32.partialorder %v5875_v48, 8.507059e+37 }
0x11a4   : > { %v5964_v51 = vadd.f32 %v5956_v57, %v9563_v60  ;;  %v5854_v9 = vmul.f32 %v6428_v27, %v5853_v30  ;;  %v5793_v26 = vadd.f32 %v9434_v23, %v5792_v31 }
0x11a6   : > { %v6430_v7 = vpop.eup %6429  ;;  %5972 = vst [vmem:[%s9446_s14] sm:$0xff] %v5964_v51  ;;  %v5855_v3 = vadd.f32 %v6428_v27, %v5854_v9  ;;  %v6202_v43 = vmul.f32 -1.442695, %v5793_v26 }
0x11a7   : > { %v6432_v22 = vpop.eup %6431  ;;  %v5831_v53 = vadd.f32 1.0, %v6430_v7 }
0x11a8   : > { %v5859_v58 = vsel %vm5858_vm12, %v6428_v27, %v5855_v3  ;;  %v5867_v29 = vmul.f32 %v6432_v22, %v5830_v10  ;;  %6433 = vpow2.f32 %v6202_v43  ;;  %vm5872_vm14 = vweird.f32 %v6432_v22 }
0x11a9   : > { %v5864_v40 = vsel %vm5861_vm13, %v5863_v61, %v5859_v58  ;;  %6435 = vrcp.f32 %v5831_v53  ;;  %vm5873_vm3 = vmor %vm5871_vm15, %vm5872_vm14  ;;  %v5890_v4 = vand.u32 2147483647, %v5831_v53  ;;  %v5892_v45 = vand.u32 2147483648, %v5831_v53 }
0x11aa   : > { %v5957_v60 = vmul.f32 %v5864_v40, %v9420_v62  ;;  %v5868_v24 = vsub.f32 1.0, %v5867_v29  ;;  %vm5886_vm6 = vweird.f32 %v5831_v53 }
0x11ab   : > { %v5795_v63 = vpop.f32.mrf.mxu1  ;;  %v5893_v11 = vor.u32 1.1754944e-38, %v5892_v45  ;;  %vm5891_vm8 = vcmp.eq.f32.partialorder %v5890_v4, 8.507059e+37 }
0x11ac   : > { %v5965_v50 = vadd.f32 %v5957_v60, %v9562_v56  ;;  %v5869_v25 = vmul.f32 %v6432_v22, %v5868_v24  ;;  %v5796_v15 = vadd.f32 %v9434_v23, %v5795_v63 }
0x11ae   : > { %v6434_v1 = vpop.eup %6433  ;;  %5973 = vst [vmem:[%s9446_s14 + $0x8] sm:$0xff] %v5965_v50  ;;  %v5870_v33 = vadd.f32 %v6432_v22, %v5869_v25  ;;  %v6203_v34 = vmul.f32 -1.442695, %v5796_v15 }
0x11af   : > { %v6436_v17 = vpop.eup %6435  ;;  %v5832_v32 = vadd.f32 1.0, %v6434_v1 }
0x11b0   : > { %v5874_v62 = vsel %vm5873_vm3, %v6432_v22, %v5870_v33  ;;  %v5882_v42 = vmul.f32 %v6436_v17, %v5831_v53  ;;  %6437 = vpow2.f32 %v6203_v34  ;;  %vm5887_vm5 = vweird.f32 %v6436_v17 }
0x11b1   : > { %v5879_v21 = vsel %vm5876_vm4, %v5878_v59, %v5874_v62  ;;  %6439 = vrcp.f32 %v5832_v32  ;;  %vm5888_vm7 = vmor %vm5886_vm6, %vm5887_vm5  ;;  %v5905_v57 = vand.u32 2147483647, %v5832_v32  ;;  %v5907_v30 = vand.u32 2147483648, %v5832_v32 }
0x11b2   : > { %v5958_v56 = vmul.f32 %v5879_v21, %v9417_v52  ;;  %v5883_v5 = vsub.f32 1.0, %v5882_v42  ;;  %vm5901_vm1 = vweird.f32 %v5832_v32 }
0x11b3   : > { %v5798_v44 = vpop.f32.mrf.mxu1  ;;  %v5908_v43 = vor.u32 1.1754944e-38, %v5907_v30  ;;  %vm5906_vm9 = vcmp.eq.f32.partialorder %v5905_v57, 8.507059e+37 }
0x11b4   : > { %v5966_v8 = vadd.f32 %v5958_v56, %v9561_v20  ;;  %v5884_v46 = vmul.f32 %v6436_v17, %v5883_v5  ;;  %v5799_v38 = vadd.f32 %v9434_v23, %v5798_v44 }
0x11b6   : > { %v6438_v35 = vpop.eup %6437  ;;  %5974 = vst [vmem:[%s9446_s14 + $0x10] sm:$0xff] %v5966_v8  ;;  %v5885_v49 = vadd.f32 %v6436_v17, %v5884_v46  ;;  %v6204_v36 = vmul.f32 -1.442695, %v5799_v38 }
0x11b7   : > { %v6440_v27 = vpop.eup %6439  ;;  %v5833_v10 = vadd.f32 1.0, %v6438_v35 }
0x11b8   : > { %v5889_v52 = vsel %vm5888_vm7, %v6436_v17, %v5885_v49  ;;  %v5897_v6 = vmul.f32 %v6440_v27, %v5832_v32  ;;  %6441 = vpow2.f32 %v6204_v36  ;;  %vm5902_vm0 = vweird.f32 %v6440_v27 }
0x11b9   : > { %v5894_v54 = vsel %vm5891_vm8, %v5893_v11, %v5889_v52  ;;  %6443 = vrcp.f32 %v5833_v10  ;;  %vm5903_vm2 = vmor %vm5901_vm1, %vm5902_vm0  ;;  %v5920_v60 = vand.u32 2147483647, %v5833_v10  ;;  %vm5916_vm11 = vweird.f32 %v5833_v10 }
0x11ba   : > { %v5959_v20 = vmul.f32 %v5894_v54, %v9413_v47  ;;  %v5898_v19 = vsub.f32 1.0, %v5897_v6 }
0x11bb   : > { %v5801_v16 = vpop.f32.mrf.mxu1  ;;  %vm5921_vm13 = vcmp.eq.f32.partialorder %v5920_v60, 8.507059e+37 }
0x11bc   : > { %v5967_v2 = vadd.f32 %v5959_v20, %v9560_v28  ;;  %v5899_v31 = vmul.f32 %v6440_v27, %v5898_v19  ;;  %v5802_v51 = vadd.f32 %v9434_v23, %v5801_v16  ;;  %v5922_v23 = vand.u32 2147483648, %v5833_v10 }
0x11be   : > { %v6442_v9 = vpop.eup %6441  ;;  %5975 = vst [vmem:[%s9446_s14 + $0x18] sm:$0xff] %v5967_v2  ;;  %v5900_v26 = vadd.f32 %v6440_v27, %v5899_v31  ;;  %v6205_v7 = vmul.f32 -1.442695, %v5802_v51  ;;  %v5923_v63 = vor.u32 1.1754944e-38, %v5922_v23 }
0x11bf   : > { %v6444_v3 = vpop.eup %6443  ;;  %v5834_v47 = vadd.f32 1.0, %v6442_v9 }
0x11c0   : > { %v5904_v22 = vsel %vm5903_vm2, %v6440_v27, %v5900_v26  ;;  %v5912_v61 = vmul.f32 %v6444_v3, %v5833_v10  ;;  %6445 = vpow2.f32 %v6205_v7  ;;  %vm5917_vm10 = vweird.f32 %v6444_v3 }
0x11c1   : > { %v5909_v53 = vsel %vm5906_vm9, %v5908_v43, %v5904_v22  ;;  %6447 = vrcp.f32 %v5834_v47  ;;  %vm5918_vm12 = vmor %vm5916_vm11, %vm5917_vm10  ;;  %v5937_v33 = vand.u32 2147483648, %v5834_v47  ;;  %v5935_v59 = vand.u32 2147483647, %v5834_v47 }
0x11c2   : > { %v5960_v28 = vmul.f32 %v5909_v53, %v9409_v12  ;;  %v5913_v58 = vsub.f32 1.0, %v5912_v61  ;;  %vm5931_vm15 = vweird.f32 %v5834_v47 }
0x11c3   : > { %v5938_v42 = vor.u32 1.1754944e-38, %v5937_v33  ;;  %vm5936_vm4 = vcmp.eq.f32.partialorder %v5935_v59, 8.507059e+37 }
0x11c4   : > { %v5968_v29 = vadd.f32 %v5960_v28, %v9559_v39  ;;  %v5914_v40 = vmul.f32 %v6444_v3, %v5913_v58 }
0x11c6   : > { %v6446_v24 = vpop.eup %6445  ;;  %5976 = vst [vmem:[%s9446_s14 + $0x20] sm:$0xff] %v5968_v29  ;;  %v5915_v48 = vadd.f32 %v6444_v3, %v5914_v40 }
0x11c7   : > { %v6448_v14 = vpop.eup %6447  ;;  %v5835_v50 = vadd.f32 1.0, %v6446_v24 }
0x11c8   : > { %v5919_v25 = vsel %vm5918_vm12, %v6444_v3, %v5915_v48  ;;  %v5927_v15 = vmul.f32 %v6448_v14, %v5834_v47  ;;  %vm5932_vm14 = vweird.f32 %v6448_v14 }
0x11c9   : > { %v5924_v12 = vsel %vm5921_vm13, %v5923_v63, %v5919_v25  ;;  %6449 = vrcp.f32 %v5835_v50  ;;  %vm5933_vm3 = vmor %vm5931_vm15, %vm5932_vm14  ;;  %v5952_v45 = vand.u32 2147483648, %v5835_v50  ;;  %v5950_v8 = vand.u32 2147483647, %v5835_v50 }
0x11ca   : > { %v5961_v1 = vmul.f32 %v5924_v12, %v9405_v37  ;;  %v5928_v39 = vsub.f32 1.0, %v5927_v15  ;;  %vm5946_vm6 = vweird.f32 %v5835_v50 }
0x11cb   : > { %v5953_v38 = vor.u32 1.1754944e-38, %v5952_v45  ;;  %vm5951_vm8 = vcmp.eq.f32.partialorder %v5950_v8, 8.507059e+37 }
0x11cc   : > { %v5969_v34 = vadd.f32 %v5961_v1, %v9557_v0  ;;  %v5929_v17 = vmul.f32 %v6448_v14, %v5928_v39 }
0x11ce   : > { %5977 = vst [vmem:[%s9446_s14 + $0x28] sm:$0xff] %v5969_v34  ;;  %v5930_v32 = vadd.f32 %v6448_v14, %v5929_v17 }
0x11cf   : > { %v6450_v62 = vpop.eup %6449 }
0x11d0   : > { %v5934_v21 = vsel %vm5933_vm3, %v6448_v14, %v5930_v32  ;;  %v5942_v56 = vmul.f32 %v6450_v62, %v5835_v50  ;;  %vm5947_vm5 = vweird.f32 %v6450_v62 }
0x11d1   : > { %v5939_v5 = vsel %vm5936_vm4, %v5938_v42, %v5934_v21  ;;  %vm5948_vm7 = vmor %vm5946_vm6, %vm5947_vm5 }
0x11d2   : > { %v5962_v37 = vmul.f32 %v5939_v5, %v9401_v13  ;;  %v5943_v4 = vsub.f32 1.0, %v5942_v56 }
0x11d4   : > { %v5970_v0 = vadd.f32 %v5962_v37, %v9552_v41  ;;  %v5944_v44 = vmul.f32 %v6450_v62, %v5943_v4 }
0x11d6   : > { %5978 = vst [vmem:[%s9446_s14 + $0x30] sm:$0xff] %v5970_v0  ;;  %v5945_v46 = vadd.f32 %v6450_v62, %v5944_v44 }
0x11d8   : > { %v5949_v35 = vsel %vm5948_vm7, %v6450_v62, %v5945_v46 }
0x11d9   : > { %v5954_v49 = vsel %vm5951_vm8, %v5953_v38, %v5949_v35 }
0x11da   : > { %v5963_v36 = vmul.f32 %v5954_v49, %v9396_v55 }
0x11dc   : > { %v5971_v13 = vadd.f32 %v5963_v36, %v9553_v18 }
0x11de   : > { %5979 = vst [vmem:[%s9446_s14 + $0x38] sm:$0xff] %v5971_v13 }
0x11df PF: > { %s28_s21 = sadd.s32 1, %s6907_s21  }
0x11e0   : > { %p25_p7 = scmp.ge.s32.totalorder %s28_s21, 4  }
0x11e2   :  { %27 = sbr.rel (!%p25_p7) target bundleno = 9 (0x9), region = 185 }
0x11e7   :  { %6002 = vsyncpa [#allocation3], 1 }
0x11e8   :  { %6004 = vsyncpa [#allocation3 + $0x1], 1 }
0x11e9   :  { %6005 = vsyncpa [#allocation5], 1 }
0x11ea   :  { %6006 = vsyncpa [#allocation8], 1 }
0x11eb   :  { %6007 = vsyncpa [#allocation11], 1 }
0x11ec   :  { %6008 = vsyncpa [#allocation14], 1 }
0x11ed   :  { %6009 = vsyncpa [#allocation17], 1 }

</bundles_post_ra>
